<compile_context>
chip_gen: v6e
topology: v6e:2x2x1
jax: 0.10.0
libtpu: 0.0.40
codegen_flags: <defaults>
</compile_context>

<pallas_src>
import functools

import jax
import jax.numpy as jnp
from jax.experimental import pallas as pl
from jax.experimental.pallas import tpu as pltpu


def _round_up(v, m):
    return ((v + m - 1) // m) * m


# ----------------------------- Pallas kernels ------------------------------


def _cond_linear_kernel(x_ref, w_ref, b_ref, o_ref):
    # Fused conditioning projection: [t_feat | pooled_text] @ W + b  (tiny, f32)
    o_ref[...] = (
        jnp.dot(x_ref[...], w_ref[...], preferred_element_type=jnp.float32)
        + b_ref[...]
    )


def _conv3x3_cond_silu_kernel(W, x_ref, w_ref, b_ref, c_ref, m_ref, o_ref):
    """3x3 conv + bias + per-batch cond + SiLU for one batch element.

    x_ref : [ROWS + 2*(Wp+1), Cp] bf16  row-extended, flattened zero-padded frame
    w_ref : [9, Cp, N]            bf16  tap-major weights
    b_ref : [1, N]                f32   bias
    c_ref : [1, N]                f32   per-batch cond row (broadcast in-kernel)
    m_ref : [ROWS, 1]             f32   interior mask (1 inside, 0 on border)
    o_ref : [ROWS, N]             bf16  padded-frame output, border rows zeroed
    """
    Wp = W + 2
    rows = o_ref.shape[0]
    # 3x3 conv == 9 accumulated matmuls over row-shifted views (no im2col).
    acc = jnp.dot(x_ref[pl.ds(0, rows), :], w_ref[0],
                  preferred_element_type=jnp.float32)
    for t in range(1, 9):
        dh, dw = t // 3, t % 3
        start = dh * Wp + dw
        acc = acc + jnp.dot(x_ref[pl.ds(start, rows), :], w_ref[t],
                            preferred_element_type=jnp.float32)
    acc = acc + b_ref[...] + c_ref[...]
    act = acc * jax.nn.sigmoid(acc)
    # Zero the padded-frame border rows so this output doubles as the next
    # conv's zero-padded input frame (no interior re-pad in the wrapper).
    # The mask is precomputed on host -> no in-kernel integer division.
    o_ref[...] = (act * m_ref[...]).astype(o_ref.dtype)


def _conv3x3_bias_kernel(W, x_ref, w_ref, b_ref, o_ref):
    """3x3 conv + bias for one batch element (padded-frame layout, no im2col)."""
    Wp = W + 2
    rows = o_ref.shape[0]
    acc = jnp.dot(x_ref[pl.ds(0, rows), :], w_ref[0],
                  preferred_element_type=jnp.float32)
    for t in range(1, 9):
        dh, dw = t // 3, t % 3
        start = dh * Wp + dw
        acc = acc + jnp.dot(x_ref[pl.ds(start, rows), :], w_ref[t],
                            preferred_element_type=jnp.float32)
    o_ref[...] = (acc + b_ref[...]).astype(o_ref.dtype)


def _cfg_kernel(scale, logits_ref, null_ref, o_ref):
    # out = null + (logits - null) * cond_scale   (scale is a static float)
    n = null_ref[...]
    o_ref[...] = n + (logits_ref[...] - n) * scale


# ----------------------------- Pallas wrappers ------------------------------


def pallas_cond_linear(x, w, b):
    """x:[B,K] @ w:[K,N] + b:[1,N] -> [B,N].  One launch, whole arrays in VMEM."""
    B = x.shape[0]
    N = w.shape[1]
    return pl.pallas_call(
        _cond_linear_kernel,
        out_shape=jax.ShapeDtypeStruct((B, N), jnp.float32),
        in_specs=[pl.BlockSpec(memory_space=pltpu.MemorySpace.VMEM)] * 3,
        out_specs=pl.BlockSpec(memory_space=pltpu.MemorySpace.VMEM),
    )(x, w, b)


def _interior_mask(H, W):
    """[Hp*Wp, 1] f32: 1.0 for interior rows of the padded frame, else 0.0."""
    Hp, Wp = H + 2, W + 2
    hp = jnp.arange(Hp)
    wp = jnp.arange(Wp)
    m = ((hp >= 1) & (hp <= H))[:, None] & ((wp >= 1) & (wp <= W))[None, :]
    return m.astype(jnp.float32).reshape(Hp * Wp, 1)


def pallas_conv3x3(x_ext, w, b, H, W, cond=None, out_dtype=jnp.float32):
    """Fused 3x3 conv over a flattened zero-padded frame.

    x_ext : [B, ROWS + 2*(Wp+1), Cp] bf16  row-extended padded frame
    w     : [9, Cp, N]               bf16  tap-major weights
    b     : [1, N]                   f32
    cond  : [B, 1, N] f32 or None          per-batch cond (fused add + SiLU)

    Returns [B, ROWS, N] with ROWS = (H+2)*(W+2).  Grid over batch (parallel ->
    shards across v7x's 2 TensorCores); K and N are 128-multiples so all loads
    and stores are lane-dense and unmasked.
    """
    B, rows_ext, Cp = x_ext.shape
    Hp, Wp = H + 2, W + 2
    rows = Hp * Wp
    assert rows_ext == rows + 2 * (Wp + 1)
    N = w.shape[-1]

    in_specs = [
        pl.BlockSpec((None, rows_ext, Cp), lambda bb: (bb, 0, 0)),
        # Weights are grid-invariant (constant index_map -> fetched once).
        pl.BlockSpec((9, Cp, N), lambda bb: (0, 0, 0)),
        pl.BlockSpec((1, N), lambda bb: (0, 0)),
    ]
    args = [x_ext, w, b]
    if cond is not None:
        in_specs.append(pl.BlockSpec((None, 1, N), lambda bb: (bb, 0, 0)))
        in_specs.append(pl.BlockSpec((rows, 1), lambda bb: (0, 0)))
        args.append(cond)
        args.append(_interior_mask(H, W))
        kernel = functools.partial(_conv3x3_cond_silu_kernel, W)
    else:
        kernel = functools.partial(_conv3x3_bias_kernel, W)

    return pl.pallas_call(
        kernel,
        grid=(B,),
        out_shape=jax.ShapeDtypeStruct((B, rows, N), out_dtype),
        in_specs=in_specs,
        out_specs=pl.BlockSpec((None, rows, N), lambda bb: (bb, 0, 0)),
        compiler_params=pltpu.CompilerParams(dimension_semantics=("parallel",)),
    )(*args)


def pallas_cfg_combine(logits, null_logits, cond_scale, tile_rows=512):
    """null + (logits - null) * cond_scale, tiled lane-dense (x, 128) blocks.

    `logits` is aliased to the output (input_output_aliases) so under jit no
    extra HBM output allocation is made; blocks stay in VMEM at any size.
    """
    shape = logits.shape
    out_dtype = logits.dtype
    n = logits.size
    lanes = 128
    rows = pl.cdiv(n, lanes)
    tile_r = rows if rows <= tile_rows else tile_rows
    rows_p = _round_up(rows, tile_r)
    pad = rows_p * lanes - n

    def to2d(a):
        flat = a.reshape(-1).astype(jnp.float32)
        if pad:
            flat = jnp.pad(flat, (0, pad))
        return flat.reshape(rows_p, lanes)

    out = pl.pallas_call(
        functools.partial(_cfg_kernel, float(cond_scale)),
        grid=(rows_p // tile_r,),
        out_shape=jax.ShapeDtypeStruct((rows_p, lanes), jnp.float32),
        in_specs=[pl.BlockSpec((tile_r, lanes), lambda i: (i, 0)),
                  pl.BlockSpec((tile_r, lanes), lambda i: (i, 0))],
        out_specs=pl.BlockSpec((tile_r, lanes), lambda i: (i, 0)),
        input_output_aliases={0: 0},
        compiler_params=pltpu.CompilerParams(dimension_semantics=("parallel",)),
    )(to2d(logits), to2d(null_logits))
    return out.reshape(-1)[:n].reshape(shape).astype(out_dtype)


# ----------------------------- synthetic UNet --------------------------------


def _time_features(time, hidden):
    half = hidden // 2
    freqs = jnp.exp(-jnp.log(10000.0) * jnp.arange(half, dtype=jnp.float32) / half)
    ang = time.astype(jnp.float32)[:, None] * freqs[None, :]
    return jnp.concatenate([jnp.sin(ang), jnp.cos(ang)], axis=-1)   # [B, hidden]


class SyntheticUNet:
    """Tiny UNet stand-in: conv3x3 -> (+time & text cond) -> SiLU -> conv3x3."""

    def __init__(self, in_channels, hidden, text_dim, key):
        ks = jax.random.split(key, 4)
        s = 0.05
        self.in_channels = in_channels
        self.hidden = hidden
        self.text_dim = text_dim
        # Lane padding to 128 (real UNet channel counts are already multiples).
        self.cp = _round_up(in_channels, 128)
        self.np1 = _round_up(hidden, 128)
        self.np2 = _round_up(in_channels, 128)

        # conv1: PyTorch layout [out, in, 3, 3] -> tap-major [9, in, out] -> pad.
        w1_pt = s * jax.random.normal(ks[0], (hidden, in_channels, 3, 3), jnp.float32)
        w1 = jnp.transpose(w1_pt, (2, 3, 1, 0)).reshape(9, in_channels, hidden)
        self.w1 = jnp.pad(
            w1, ((0, 0), (0, self.cp - in_channels), (0, self.np1 - hidden))
        ).astype(jnp.bfloat16)
        self.b1 = jnp.zeros((1, self.np1), jnp.float32)

        # conv2
        w2_pt = s * jax.random.normal(ks[1], (in_channels, hidden, 3, 3), jnp.float32)
        w2 = jnp.transpose(w2_pt, (2, 3, 1, 0)).reshape(9, hidden, in_channels)
        self.w2 = jnp.pad(
            w2, ((0, 0), (0, self.np1 - hidden), (0, self.np2 - in_channels))
        ).astype(jnp.bfloat16)
        self.b2 = jnp.zeros((1, self.np2), jnp.float32)

        # Fused conditioning projection: [t_feat | pooled_text] @ w_c + b_c.
        w_t = s * jax.random.normal(ks[2], (hidden, hidden), jnp.float32)
        w_e = s * jax.random.normal(ks[3], (text_dim, hidden), jnp.float32)
        w_c = jnp.concatenate([w_t, w_e], axis=0)                    # [hid+D, hid]
        self.w_c = jnp.pad(w_c, ((0, 0), (0, self.np1 - hidden)))    # f32, tiny
        self.b_c = jnp.zeros((1, self.np1), jnp.float32)

        # f32 reference copies (HWIO) for the numeric self-check in __main__.
        self.w1_hwio = jnp.transpose(w1_pt, (2, 3, 1, 0))            # [3,3,in,hid]
        self.w2_hwio = jnp.transpose(w2_pt, (2, 3, 1, 0))            # [3,3,hid,in]
        self.w_c_ref = w_c

    def __call__(self, x, time, text_embed):
        # x: [B, C, H, W] (NCHW); time: [B]; text_embed: [B, S, D]
        B, C, H, W = x.shape
        Hp, Wp = H + 2, W + 2
        E = Wp + 1  # row extension for the 9 tap shifts

        # --- conditioning: ONE fused Pallas linear (time feats ++ pooled text) ---
        t_feat = _time_features(time, self.hidden)                    # [B, hid]
        txt = jnp.mean(text_embed.astype(jnp.float32), axis=1)        # [B, D]
        cond_in = jnp.concatenate([t_feat, txt], axis=-1)             # [B, hid+D]
        cond = pallas_cond_linear(cond_in, self.w_c, self.b_c)        # [B, Np1] f32
        cond3 = cond[:, None, :]                                      # [B, 1, Np1]

        # --- conv1 input: NHWC, channel-pad to 128 lanes, spatial zero-pad,
        #     flatten to padded-frame rows, extend rows for tap shifts (bf16) ---
        x_nhwc = jnp.transpose(x, (0, 2, 3, 1)).astype(jnp.bfloat16)
        x_fr = jnp.pad(x_nhwc, ((0, 0), (1, 1), (1, 1), (0, self.cp - C)))
        x_fr = x_fr.reshape(B, Hp * Wp, self.cp)
        x_ext = jnp.pad(x_fr, ((0, 0), (E, E), (0, 0)))

        # conv1 (+bias +cond, SiLU); output IS the zero-padded frame for conv2.
        h_fr = pallas_conv3x3(x_ext, self.w1, self.b1, H, W, cond=cond3,
                              out_dtype=jnp.bfloat16)                 # [B,Hp*Wp,Np1]

        # conv2 (+bias), lane-dense (padded) output channels, f32 out.
        h_ext = jnp.pad(h_fr, ((0, 0), (E, E), (0, 0)))
        y_fr = pallas_conv3x3(h_ext, self.w2, self.b2, H, W, cond=None,
                              out_dtype=jnp.float32)                  # [B,Hp*Wp,Np2]

        y = y_fr.reshape(B, Hp, Wp, -1)[:, 1:H + 1, 1:W + 1, :C]
        return jnp.transpose(y, (0, 3, 1, 2))                         # NCHW


# ----------------------------- PrecondModel ---------------------------------


class PrecondModel:
    def __init__(self, unet, loss_type):
        self.unet = unet
        self.rng = None
        self.inference = False
        if loss_type == "l1":
            self.loss_fn = lambda a, b: jnp.mean(jnp.abs(a - b))
        elif loss_type == "l2":
            self.loss_fn = lambda a, b: jnp.mean((a - b) ** 2)
        elif loss_type == "huber":
            def _smooth_l1(a, b, beta=1.0):
                d = jnp.abs(a - b)
                return jnp.mean(jnp.where(d < beta, 0.5 * d * d / beta, d - 0.5 * beta))
            self.loss_fn = _smooth_l1
        else:
            raise NotImplementedError(f"{loss_type} loss is not supported")

    def set_inference_mode(self, value):
        self.inference = value

    def set_rng(self, generator):
        self.rng = generator

    def forward(self, **model_kwargs):
        return self.unet(**model_kwargs)

    def forward_with_cond_scale(self, *args, text_embed=None, cond_scale=1.0, **kwargs):
        logits_only = cond_scale == 1.0   # cond_scale is a Python float (as in spec)
        if logits_only:
            return self.forward(*args, text_embed=text_embed, **kwargs)
        # Run the conditional and null passes as ONE batched forward (2B):
        # halves launches / weight DMA and doubles M per conv matmul.
        def dup(v):
            return jnp.concatenate([v, v], axis=0) if isinstance(v, jax.Array) else v
        args2 = tuple(dup(a) for a in args)
        kwargs2 = {k: dup(v) for k, v in kwargs.items()}
        te2 = jnp.concatenate([text_embed, jnp.zeros_like(text_embed)], axis=0)
        both = self.forward(*args2, text_embed=te2, **kwargs2)
        bsz = text_embed.shape[0]
        logits, null_logits = both[:bsz], both[bsz:]
        # CFG combine runs in a tiled Pallas kernel (logits aliased to output).
        return pallas_cfg_combine(logits, null_logits, cond_scale)


# ----------------------------- reference (pure JAX, for self-check) ----------


def reference_forward(unet, x, time, text_embed):
    x_nhwc = jnp.transpose(x, (0, 2, 3, 1)).astype(jnp.float32)
    t_feat = _time_features(time, unet.hidden)
    txt = jnp.mean(text_embed.astype(jnp.float32), axis=1)
    cond = jnp.concatenate([t_feat, txt], axis=-1) @ unet.w_c_ref     # [B, hid]
    dn = ("NHWC", "HWIO", "NHWC")
    h = jax.lax.conv_general_dilated(
        x_nhwc, unet.w1_hwio, (1, 1), "SAME", dimension_numbers=dn,
        precision=jax.lax.Precision.HIGHEST)
    h = h + cond[:, None, None, :]
    h = h * jax.nn.sigmoid(h)
    y = jax.lax.conv_general_dilated(
        h, unet.w2_hwio, (1, 1), "SAME", dimension_numbers=dn,
        precision=jax.lax.Precision.HIGHEST)
    return jnp.transpose(y, (0, 3, 1, 2))


# ----------------------------- demo ------------------------------------------


if __name__ == "__main__":
    key = jax.random.PRNGKey(0)
    kx, kt, ke, kp = jax.random.split(key, 4)

    B, C, H, W = 2, 4, 16, 16      # NCHW image, matches PyTorch conv convention
    S, D = 8, 32                   # text sequence / embed dim
    HID = 32

    x = jax.random.normal(kx, (B, C, H, W), jnp.float32)
    time = jax.random.uniform(kt, (B,), jnp.float32)
    text_embed = jax.random.normal(ke, (B, S, D), jnp.float32)

    unet = SyntheticUNet(in_channels=C, hidden=HID, text_dim=D, key=kp)
    model = PrecondModel(unet, loss_type="l2")

    # jit so XLA fuses the layout plumbing between pallas_calls and honors the
    # logits->output alias in the CFG combine (cond_scale stays a Python float).
    fwd = jax.jit(lambda xx, tt, ee: model.forward(x=xx, time=tt, text_embed=ee))
    fwd_cfg = jax.jit(lambda xx, tt, ee: model.forward_with_cond_scale(
        x=xx, time=tt, text_embed=ee, cond_scale=3.0))

    out = fwd(x, time, text_embed)
    out_cfg = fwd_cfg(x, time, text_embed)
    jax.block_until_ready((out, out_cfg))

    assert out.shape == (B, C, H, W)
    assert out_cfg.shape == (B, C, H, W)
    assert jnp.all(jnp.isfinite(out)) and jnp.all(jnp.isfinite(out_cfg))

    # Numeric self-check vs pure-JAX f32 reference (loose tol: bf16 MXU operands).
    ref = reference_forward(unet, x, time, text_embed)
    assert jnp.allclose(out, ref, atol=5e-2, rtol=5e-2), float(
        jnp.max(jnp.abs(out - ref)))

    # CFG combine check against the Pallas forward outputs (tight tol).
    out_null = fwd(x, time, jnp.zeros_like(text_embed))
    cfg_check = out_null + (out - out_null) * 3.0
    assert jnp.allclose(out_cfg, cfg_check, atol=1e-3, rtol=1e-3), float(
        jnp.max(jnp.abs(out_cfg - cfg_check)))

    print("KERNEL_OK")
</pallas_src>

<mosaic_0001>
module attributes {stable_mosaic.version = 11 : i64} {
  func.func @_cond_linear_kernel(%arg0: memref<2x64xf32, #tpu.memory_space<vmem>>, %arg1: memref<64x128xf32, #tpu.memory_space<vmem>>, %arg2: memref<1x128xf32, #tpu.memory_space<vmem>>, %arg3: memref<2x128xf32, #tpu.memory_space<vmem>>) attributes {dimension_semantics = [], scalar_prefetch = 0 : i64, scratch_operands = 0 : i64, tpu.core_type = #tpu.core_type<tc>} {
    %c0 = arith.constant 0 : index
    %c0_0 = arith.constant 0 : index
    %0 = vector.load %arg0[%c0, %c0_0] : memref<2x64xf32, #tpu.memory_space<vmem>>, vector<2x64xf32>
    %c0_1 = arith.constant 0 : index
    %c0_2 = arith.constant 0 : index
    %1 = vector.load %arg1[%c0_1, %c0_2] : memref<64x128xf32, #tpu.memory_space<vmem>>, vector<64x128xf32>
    %cst = arith.constant dense<0.000000e+00> : vector<2x128xf32>
    %2 = tpu.matmul %0, %1, %cst {dimension_numbers = #tpu.dot_dimension_numbers<[1], [0], [0], [1], [0, 0, 1, 1], [], []>} : vector<2x64xf32>, vector<64x128xf32>, vector<2x128xf32> -> vector<2x128xf32>
    %c0_3 = arith.constant 0 : index
    %c0_4 = arith.constant 0 : index
    %3 = vector.load %arg2[%c0_3, %c0_4] : memref<1x128xf32, #tpu.memory_space<vmem>>, vector<1x128xf32>
    %4 = vector.broadcast %3 : vector<1x128xf32> to vector<2x128xf32>
    %5 = arith.addf %2, %4 : vector<2x128xf32>
    %c0_5 = arith.constant 0 : index
    %c0_6 = arith.constant 0 : index
    %6 = vector.load %arg3[%c0_5, %c0_6] : memref<2x128xf32, #tpu.memory_space<vmem>>, vector<2x128xf32>
    tpu.vector_store %arg3[%c0_5, %c0_6], %5 {strides = array<i32>} : memref<2x128xf32, #tpu.memory_space<vmem>>, vector<2x128xf32>,
    return
  }
}

module attributes {stable_mosaic.version = 11 : i64} {
  func.func @_conv3x3_bias_kernel(%arg0: i32, %arg1: memref<1x362x128xbf16, #tpu.memory_space<vmem>>, %arg2: memref<9x128x128xbf16, #tpu.memory_space<vmem>>, %arg3: memref<1x128xf32, #tpu.memory_space<vmem>>, %arg4: memref<1x324x128xf32, #tpu.memory_space<vmem>>) attributes {dimension_semantics = [#tpu.dimension_semantics<parallel>], iteration_bounds = array<i64: 2>, scalar_prefetch = 0 : i64, scratch_operands = 0 : i64, tpu.core_type = #tpu.core_type<tc>, window_params = [{transform_indices = @transform_0, window_bounds = array<i64: 1, 362, 128>}, {pipeline_mode = #tpu.pipeline_mode<synchronous>, transform_indices = @transform_1, window_bounds = array<i64: 9, 128, 128>}, {pipeline_mode = #tpu.pipeline_mode<synchronous>, transform_indices = @transform_2, window_bounds = array<i64: 1, 128>}, {transform_indices = @transform_3, window_bounds = array<i64: 1, 324, 128>}]} {
    %c0 = arith.constant 0 : index
    %c0_0 = arith.constant 0 : index
    %c0_1 = arith.constant 0 : index
    %0 = vector.load %arg1[%c0, %c0_0, %c0_1] : memref<1x362x128xbf16, #tpu.memory_space<vmem>>, vector<1x324x128xbf16>
    %1 = vector.shape_cast %0 : vector<1x324x128xbf16> to vector<324x128xbf16>
    %c0_2 = arith.constant 0 : index
    %c0_3 = arith.constant 0 : index
    %c0_4 = arith.constant 0 : index
    %2 = vector.load %arg2[%c0_2, %c0_3, %c0_4] : memref<9x128x128xbf16, #tpu.memory_space<vmem>>, vector<1x128x128xbf16>
    %3 = vector.shape_cast %2 : vector<1x128x128xbf16> to vector<128x128xbf16>
    %cst = arith.constant dense<0.000000e+00> : vector<324x128xf32>
    %4 = tpu.matmul %1, %3, %cst {dimension_numbers = #tpu.dot_dimension_numbers<[1], [0], [0], [1], [0, 0, 1, 1], [], []>} : vector<324x128xbf16>, vector<128x128xbf16>, vector<324x128xf32> -> vector<324x128xf32>
    %c0_5 = arith.constant 0 : index
    %c1 = arith.constant 1 : index
    %c0_6 = arith.constant 0 : index
    %5 = vector.load %arg1[%c0_5, %c1, %c0_6] : memref<1x362x128xbf16, #tpu.memory_space<vmem>>, vector<1x324x128xbf16>
    %6 = vector.shape_cast %5 : vector<1x324x128xbf16> to vector<324x128xbf16>
    %c1_7 = arith.constant 1 : index
    %c0_8 = arith.constant 0 : index
    %c0_9 = arith.constant 0 : index
    %7 = vector.load %arg2[%c1_7, %c0_8, %c0_9] : memref<9x128x128xbf16, #tpu.memory_space<vmem>>, vector<1x128x128xbf16>
    %8 = vector.shape_cast %7 : vector<1x128x128xbf16> to vector<128x128xbf16>
    %cst_10 = arith.constant dense<0.000000e+00> : vector<324x128xf32>
    %9 = tpu.matmul %6, %8, %cst_10 {dimension_numbers = #tpu.dot_dimension_numbers<[1], [0], [0], [1], [0, 0, 1, 1], [], []>} : vector<324x128xbf16>, vector<128x128xbf16>, vector<324x128xf32> -> vector<324x128xf32>
    %10 = arith.addf %4, %9 : vector<324x128xf32>
    %c0_11 = arith.constant 0 : index
    %c2 = arith.constant 2 : index
    %c0_12 = arith.constant 0 : index
    %11 = vector.load %arg1[%c0_11, %c2, %c0_12] : memref<1x362x128xbf16, #tpu.memory_space<vmem>>, vector<1x324x128xbf16>
    %12 = vector.shape_cast %11 : vector<1x324x128xbf16> to vector<324x128xbf16>
    %c2_13 = arith.constant 2 : index
    %c0_14 = arith.constant 0 : index
    %c0_15 = arith.constant 0 : index
    %13 = vector.load %arg2[%c2_13, %c0_14, %c0_15] : memref<9x128x128xbf16, #tpu.memory_space<vmem>>, vector<1x128x128xbf16>
    %14 = vector.shape_cast %13 : vector<1x128x128xbf16> to vector<128x128xbf16>
    %cst_16 = arith.constant dense<0.000000e+00> : vector<324x128xf32>
    %15 = tpu.matmul %12, %14, %cst_16 {dimension_numbers = #tpu.dot_dimension_numbers<[1], [0], [0], [1], [0, 0, 1, 1], [], []>} : vector<324x128xbf16>, vector<128x128xbf16>, vector<324x128xf32> -> vector<324x128xf32>
    %16 = arith.addf %10, %15 : vector<324x128xf32>
    %c0_17 = arith.constant 0 : index
    %c18 = arith.constant 18 : index
    %c0_18 = arith.constant 0 : index
    %17 = vector.load %arg1[%c0_17, %c18, %c0_18] : memref<1x362x128xbf16, #tpu.memory_space<vmem>>, vector<1x324x128xbf16>
    %18 = vector.shape_cast %17 : vector<1x324x128xbf16> to vector<324x128xbf16>
    %c3 = arith.constant 3 : index
    %c0_19 = arith.constant 0 : index
    %c0_20 = arith.constant 0 : index
    %19 = vector.load %arg2[%c3, %c0_19, %c0_20] : memref<9x128x128xbf16, #tpu.memory_space<vmem>>, vector<1x128x128xbf16>
    %20 = vector.shape_cast %19 : vector<1x128x128xbf16> to vector<128x128xbf16>
    %cst_21 = arith.constant dense<0.000000e+00> : vector<324x128xf32>
    %21 = tpu.matmul %18, %20, %cst_21 {dimension_numbers = #tpu.dot_dimension_numbers<[1], [0], [0], [1], [0, 0, 1, 1], [], []>} : vector<324x128xbf16>, vector<128x128xbf16>, vector<324x128xf32> -> vector<324x128xf32>
    %22 = arith.addf %16, %21 : vector<324x128xf32>
    %c0_22 = arith.constant 0 : index
    %c19 = arith.constant 19 : index
    %c0_23 = arith.constant 0 : index
    %23 = vector.load %arg1[%c0_22, %c19, %c0_23] : memref<1x362x128xbf16, #tpu.memory_space<vmem>>, vector<1x324x128xbf16>
    %24 = vector.shape_cast %23 : vector<1x324x128xbf16> to vector<324x128xbf16>
    %c4 = arith.constant 4 : index
    %c0_24 = arith.constant 0 : index
    %c0_25 = arith.constant 0 : index
    %25 = vector.load %arg2[%c4, %c0_24, %c0_25] : memref<9x128x128xbf16, #tpu.memory_space<vmem>>, vector<1x128x128xbf16>
    %26 = vector.shape_cast %25 : vector<1x128x128xbf16> to vector<128x128xbf16>
    %cst_26 = arith.constant dense<0.000000e+00> : vector<324x128xf32>
    %27 = tpu.matmul %24, %26, %cst_26 {dimension_numbers = #tpu.dot_dimension_numbers<[1], [0], [0], [1], [0, 0, 1, 1], [], []>} : vector<324x128xbf16>, vector<128x128xbf16>, vector<324x128xf32> -> vector<324x128xf32>
    %28 = arith.addf %22, %27 : vector<324x128xf32>
    %c0_27 = arith.constant 0 : index
    %c20 = arith.constant 20 : index
    %c0_28 = arith.constant 0 : index
    %29 = vector.load %arg1[%c0_27, %c20, %c0_28] : memref<1x362x128xbf16, #tpu.memory_space<vmem>>, vector<1x324x128xbf16>
    %30 = vector.shape_cast %29 : vector<1x324x128xbf16> to vector<324x128xbf16>
    %c5 = arith.constant 5 : index
    %c0_29 = arith.constant 0 : index
    %c0_30 = arith.constant 0 : index
    %31 = vector.load %arg2[%c5, %c0_29, %c0_30] : memref<9x128x128xbf16, #tpu.memory_space<vmem>>, vector<1x128x128xbf16>
    %32 = vector.shape_cast %31 : vector<1x128x128xbf16> to vector<128x128xbf16>
    %cst_31 = arith.constant dense<0.000000e+00> : vector<324x128xf32>
    %33 = tpu.matmul %30, %32, %cst_31 {dimension_numbers = #tpu.dot_dimension_numbers<[1], [0], [0], [1], [0, 0, 1, 1], [], []>} : vector<324x128xbf16>, vector<128x128xbf16>, vector<324x128xf32> -> vector<324x128xf32>
    %34 = arith.addf %28, %33 : vector<324x128xf32>
    %c0_32 = arith.constant 0 : index
    %c36 = arith.constant 36 : index
    %c0_33 = arith.constant 0 : index
    %35 = vector.load %arg1[%c0_32, %c36, %c0_33] : memref<1x362x128xbf16, #tpu.memory_space<vmem>>, vector<1x324x128xbf16>
    %36 = vector.shape_cast %35 : vector<1x324x128xbf16> to vector<324x128xbf16>
    %c6 = arith.constant 6 : index
    %c0_34 = arith.constant 0 : index
    %c0_35 = arith.constant 0 : index
    %37 = vector.load %arg2[%c6, %c0_34, %c0_35] : memref<9x128x128xbf16, #tpu.memory_space<vmem>>, vector<1x128x128xbf16>
    %38 = vector.shape_cast %37 : vector<1x128x128xbf16> to vector<128x128xbf16>
    %cst_36 = arith.constant dense<0.000000e+00> : vector<324x128xf32>
    %39 = tpu.matmul %36, %38, %cst_36 {dimension_numbers = #tpu.dot_dimension_numbers<[1], [0], [0], [1], [0, 0, 1, 1], [], []>} : vector<324x128xbf16>, vector<128x128xbf16>, vector<324x128xf32> -> vector<324x128xf32>
    %40 = arith.addf %34, %39 : vector<324x128xf32>
    %c0_37 = arith.constant 0 : index
    %c37 = arith.constant 37 : index
    %c0_38 = arith.constant 0 : index
    %41 = vector.load %arg1[%c0_37, %c37, %c0_38] : memref<1x362x128xbf16, #tpu.memory_space<vmem>>, vector<1x324x128xbf16>
    %42 = vector.shape_cast %41 : vector<1x324x128xbf16> to vector<324x128xbf16>
    %c7 = arith.constant 7 : index
    %c0_39 = arith.constant 0 : index
    %c0_40 = arith.constant 0 : index
    %43 = vector.load %arg2[%c7, %c0_39, %c0_40] : memref<9x128x128xbf16, #tpu.memory_space<vmem>>, vector<1x128x128xbf16>
    %44 = vector.shape_cast %43 : vector<1x128x128xbf16> to vector<128x128xbf16>
    %cst_41 = arith.constant dense<0.000000e+00> : vector<324x128xf32>
    %45 = tpu.matmul %42, %44, %cst_41 {dimension_numbers = #tpu.dot_dimension_numbers<[1], [0], [0], [1], [0, 0, 1, 1], [], []>} : vector<324x128xbf16>, vector<128x128xbf16>, vector<324x128xf32> -> vector<324x128xf32>
    %46 = arith.addf %40, %45 : vector<324x128xf32>
    %c0_42 = arith.constant 0 : index
    %c38 = arith.constant 38 : index
    %c0_43 = arith.constant 0 : index
    %47 = vector.load %arg1[%c0_42, %c38, %c0_43] : memref<1x362x128xbf16, #tpu.memory_space<vmem>>, vector<1x324x128xbf16>
    %48 = vector.shape_cast %47 : vector<1x324x128xbf16> to vector<324x128xbf16>
    %c8 = arith.constant 8 : index
    %c0_44 = arith.constant 0 : index
    %c0_45 = arith.constant 0 : index
    %49 = vector.load %arg2[%c8, %c0_44, %c0_45] : memref<9x128x128xbf16, #tpu.memory_space<vmem>>, vector<1x128x128xbf16>
    %50 = vector.shape_cast %49 : vector<1x128x128xbf16> to vector<128x128xbf16>
    %cst_46 = arith.constant dense<0.000000e+00> : vector<324x128xf32>
    %51 = tpu.matmul %48, %50, %cst_46 {dimension_numbers = #tpu.dot_dimension_numbers<[1], [0], [0], [1], [0, 0, 1, 1], [], []>} : vector<324x128xbf16>, vector<128x128xbf16>, vector<324x128xf32> -> vector<324x128xf32>
    %52 = arith.addf %46, %51 : vector<324x128xf32>
    %c0_47 = arith.constant 0 : index
    %c0_48 = arith.constant 0 : index
    %53 = vector.load %arg3[%c0_47, %c0_48] : memref<1x128xf32, #tpu.memory_space<vmem>>, vector<1x128xf32>
    %54 = vector.broadcast %53 : vector<1x128xf32> to vector<324x128xf32>
    %55 = arith.addf %52, %54 : vector<324x128xf32>
    %c0_49 = arith.constant 0 : index
    %c0_50 = arith.constant 0 : index
    %c0_51 = arith.constant 0 : index
    %56 = vector.load %arg4[%c0_49, %c0_50, %c0_51] : memref<1x324x128xf32, #tpu.memory_space<vmem>>, vector<1x324x128xf32>
    %57 = vector.shape_cast %56 : vector<1x324x128xf32> to vector<324x128xf32>
    %58 = vector.shape_cast %55 : vector<324x128xf32> to vector<1x324x128xf32>
    tpu.vector_store %arg4[%c0_49, %c0_50, %c0_51], %58 {strides = array<i32>} : memref<1x324x128xf32, #tpu.memory_space<vmem>>, vector<1x324x128xf32>,
    return
  }
  func.func @transform_0(%arg0: i32) -> (i32, i32, i32) {
    %c0_i32 = arith.constant 0 : i32
    %c0_i32_0 = arith.constant 0 : i32
    %c0_i32_1 = arith.constant 0 : i32
    return %arg0, %c0_i32, %c0_i32_0 : i32, i32, i32
  }
  func.func @transform_1(%arg0: i32) -> (i32, i32, i32) {
    %c0_i32 = arith.constant 0 : i32
    %c0_i32_0 = arith.constant 0 : i32
    %c0_i32_1 = arith.constant 0 : i32
    %c0_i32_2 = arith.constant 0 : i32
    return %c0_i32, %c0_i32_0, %c0_i32_1 : i32, i32, i32
  }
  func.func @transform_2(%arg0: i32) -> (i32, i32) {
    %c0_i32 = arith.constant 0 : i32
    %c0_i32_0 = arith.constant 0 : i32
    %c0_i32_1 = arith.constant 0 : i32
    return %c0_i32, %c0_i32_0 : i32, i32
  }
  func.func @transform_3(%arg0: i32) -> (i32, i32, i32) {
    %c0_i32 = arith.constant 0 : i32
    %c0_i32_0 = arith.constant 0 : i32
    %c0_i32_1 = arith.constant 0 : i32
    return %arg0, %c0_i32, %c0_i32_0 : i32, i32, i32
  }
}

module attributes {stable_mosaic.version = 11 : i64} {
  func.func @_conv3x3_cond_silu_kernel(%arg0: i32, %arg1: memref<1x362x128xbf16, #tpu.memory_space<vmem>>, %arg2: memref<9x128x128xbf16, #tpu.memory_space<vmem>>, %arg3: memref<1x128xf32, #tpu.memory_space<vmem>>, %arg4: memref<1x1x128xf32, #tpu.memory_space<vmem>>, %arg5: memref<324x1xf32, #tpu.memory_space<vmem>>, %arg6: memref<1x324x128xbf16, #tpu.memory_space<vmem>>) attributes {dimension_semantics = [#tpu.dimension_semantics<parallel>], iteration_bounds = array<i64: 2>, scalar_prefetch = 0 : i64, scratch_operands = 0 : i64, tpu.core_type = #tpu.core_type<tc>, window_params = [{transform_indices = @transform_0, window_bounds = array<i64: 1, 362, 128>}, {pipeline_mode = #tpu.pipeline_mode<synchronous>, transform_indices = @transform_1, window_bounds = array<i64: 9, 128, 128>}, {pipeline_mode = #tpu.pipeline_mode<synchronous>, transform_indices = @transform_2, window_bounds = array<i64: 1, 128>}, {transform_indices = @transform_3, window_bounds = array<i64: 1, 1, 128>}, {pipeline_mode = #tpu.pipeline_mode<synchronous>, transform_indices = @transform_4, window_bounds = array<i64: 324, 1>}, {transform_indices = @transform_5, window_bounds = array<i64: 1, 324, 128>}]} {
    %c0 = arith.constant 0 : index
    %c0_0 = arith.constant 0 : index
    %c0_1 = arith.constant 0 : index
    %0 = vector.load %arg1[%c0, %c0_0, %c0_1] : memref<1x362x128xbf16, #tpu.memory_space<vmem>>, vector<1x324x128xbf16>
    %1 = vector.shape_cast %0 : vector<1x324x128xbf16> to vector<324x128xbf16>
    %c0_2 = arith.constant 0 : index
    %c0_3 = arith.constant 0 : index
    %c0_4 = arith.constant 0 : index
    %2 = vector.load %arg2[%c0_2, %c0_3, %c0_4] : memref<9x128x128xbf16, #tpu.memory_space<vmem>>, vector<1x128x128xbf16>
    %3 = vector.shape_cast %2 : vector<1x128x128xbf16> to vector<128x128xbf16>
    %cst = arith.constant dense<0.000000e+00> : vector<324x128xf32>
    %4 = tpu.matmul %1, %3, %cst {dimension_numbers = #tpu.dot_dimension_numbers<[1], [0], [0], [1], [0, 0, 1, 1], [], []>} : vector<324x128xbf16>, vector<128x128xbf16>, vector<324x128xf32> -> vector<324x128xf32>
    %c0_5 = arith.constant 0 : index
    %c1 = arith.constant 1 : index
    %c0_6 = arith.constant 0 : index
    %5 = vector.load %arg1[%c0_5, %c1, %c0_6] : memref<1x362x128xbf16, #tpu.memory_space<vmem>>, vector<1x324x128xbf16>
    %6 = vector.shape_cast %5 : vector<1x324x128xbf16> to vector<324x128xbf16>
    %c1_7 = arith.constant 1 : index
    %c0_8 = arith.constant 0 : index
    %c0_9 = arith.constant 0 : index
    %7 = vector.load %arg2[%c1_7, %c0_8, %c0_9] : memref<9x128x128xbf16, #tpu.memory_space<vmem>>, vector<1x128x128xbf16>
    %8 = vector.shape_cast %7 : vector<1x128x128xbf16> to vector<128x128xbf16>
    %cst_10 = arith.constant dense<0.000000e+00> : vector<324x128xf32>
    %9 = tpu.matmul %6, %8, %cst_10 {dimension_numbers = #tpu.dot_dimension_numbers<[1], [0], [0], [1], [0, 0, 1, 1], [], []>} : vector<324x128xbf16>, vector<128x128xbf16>, vector<324x128xf32> -> vector<324x128xf32>
    %10 = arith.addf %4, %9 : vector<324x128xf32>
    %c0_11 = arith.constant 0 : index
    %c2 = arith.constant 2 : index
    %c0_12 = arith.constant 0 : index
    %11 = vector.load %arg1[%c0_11, %c2, %c0_12] : memref<1x362x128xbf16, #tpu.memory_space<vmem>>, vector<1x324x128xbf16>
    %12 = vector.shape_cast %11 : vector<1x324x128xbf16> to vector<324x128xbf16>
    %c2_13 = arith.constant 2 : index
    %c0_14 = arith.constant 0 : index
    %c0_15 = arith.constant 0 : index
    %13 = vector.load %arg2[%c2_13, %c0_14, %c0_15] : memref<9x128x128xbf16, #tpu.memory_space<vmem>>, vector<1x128x128xbf16>
    %14 = vector.shape_cast %13 : vector<1x128x128xbf16> to vector<128x128xbf16>
    %cst_16 = arith.constant dense<0.000000e+00> : vector<324x128xf32>
    %15 = tpu.matmul %12, %14, %cst_16 {dimension_numbers = #tpu.dot_dimension_numbers<[1], [0], [0], [1], [0, 0, 1, 1], [], []>} : vector<324x128xbf16>, vector<128x128xbf16>, vector<324x128xf32> -> vector<324x128xf32>
    %16 = arith.addf %10, %15 : vector<324x128xf32>
    %c0_17 = arith.constant 0 : index
    %c18 = arith.constant 18 : index
    %c0_18 = arith.constant 0 : index
    %17 = vector.load %arg1[%c0_17, %c18, %c0_18] : memref<1x362x128xbf16, #tpu.memory_space<vmem>>, vector<1x324x128xbf16>
    %18 = vector.shape_cast %17 : vector<1x324x128xbf16> to vector<324x128xbf16>
    %c3 = arith.constant 3 : index
    %c0_19 = arith.constant 0 : index
    %c0_20 = arith.constant 0 : index
    %19 = vector.load %arg2[%c3, %c0_19, %c0_20] : memref<9x128x128xbf16, #tpu.memory_space<vmem>>, vector<1x128x128xbf16>
    %20 = vector.shape_cast %19 : vector<1x128x128xbf16> to vector<128x128xbf16>
    %cst_21 = arith.constant dense<0.000000e+00> : vector<324x128xf32>
    %21 = tpu.matmul %18, %20, %cst_21 {dimension_numbers = #tpu.dot_dimension_numbers<[1], [0], [0], [1], [0, 0, 1, 1], [], []>} : vector<324x128xbf16>, vector<128x128xbf16>, vector<324x128xf32> -> vector<324x128xf32>
    %22 = arith.addf %16, %21 : vector<324x128xf32>
    %c0_22 = arith.constant 0 : index
    %c19 = arith.constant 19 : index
    %c0_23 = arith.constant 0 : index
    %23 = vector.load %arg1[%c0_22, %c19, %c0_23] : memref<1x362x128xbf16, #tpu.memory_space<vmem>>, vector<1x324x128xbf16>
    %24 = vector.shape_cast %23 : vector<1x324x128xbf16> to vector<324x128xbf16>
    %c4 = arith.constant 4 : index
    %c0_24 = arith.constant 0 : index
    %c0_25 = arith.constant 0 : index
    %25 = vector.load %arg2[%c4, %c0_24, %c0_25] : memref<9x128x128xbf16, #tpu.memory_space<vmem>>, vector<1x128x128xbf16>
    %26 = vector.shape_cast %25 : vector<1x128x128xbf16> to vector<128x128xbf16>
    %cst_26 = arith.constant dense<0.000000e+00> : vector<324x128xf32>
    %27 = tpu.matmul %24, %26, %cst_26 {dimension_numbers = #tpu.dot_dimension_numbers<[1], [0], [0], [1], [0, 0, 1, 1], [], []>} : vector<324x128xbf16>, vector<128x128xbf16>, vector<324x128xf32> -> vector<324x128xf32>
    %28 = arith.addf %22, %27 : vector<324x128xf32>
    %c0_27 = arith.constant 0 : index
    %c20 = arith.constant 20 : index
    %c0_28 = arith.constant 0 : index
    %29 = vector.load %arg1[%c0_27, %c20, %c0_28] : memref<1x362x128xbf16, #tpu.memory_space<vmem>>, vector<1x324x128xbf16>
    %30 = vector.shape_cast %29 : vector<1x324x128xbf16> to vector<324x128xbf16>
    %c5 = arith.constant 5 : index
    %c0_29 = arith.constant 0 : index
    %c0_30 = arith.constant 0 : index
    %31 = vector.load %arg2[%c5, %c0_29, %c0_30] : memref<9x128x128xbf16, #tpu.memory_space<vmem>>, vector<1x128x128xbf16>
    %32 = vector.shape_cast %31 : vector<1x128x128xbf16> to vector<128x128xbf16>
    %cst_31 = arith.constant dense<0.000000e+00> : vector<324x128xf32>
    %33 = tpu.matmul %30, %32, %cst_31 {dimension_numbers = #tpu.dot_dimension_numbers<[1], [0], [0], [1], [0, 0, 1, 1], [], []>} : vector<324x128xbf16>, vector<128x128xbf16>, vector<324x128xf32> -> vector<324x128xf32>
    %34 = arith.addf %28, %33 : vector<324x128xf32>
    %c0_32 = arith.constant 0 : index
    %c36 = arith.constant 36 : index
    %c0_33 = arith.constant 0 : index
    %35 = vector.load %arg1[%c0_32, %c36, %c0_33] : memref<1x362x128xbf16, #tpu.memory_space<vmem>>, vector<1x324x128xbf16>
    %36 = vector.shape_cast %35 : vector<1x324x128xbf16> to vector<324x128xbf16>
    %c6 = arith.constant 6 : index
    %c0_34 = arith.constant 0 : index
    %c0_35 = arith.constant 0 : index
    %37 = vector.load %arg2[%c6, %c0_34, %c0_35] : memref<9x128x128xbf16, #tpu.memory_space<vmem>>, vector<1x128x128xbf16>
    %38 = vector.shape_cast %37 : vector<1x128x128xbf16> to vector<128x128xbf16>
    %cst_36 = arith.constant dense<0.000000e+00> : vector<324x128xf32>
    %39 = tpu.matmul %36, %38, %cst_36 {dimension_numbers = #tpu.dot_dimension_numbers<[1], [0], [0], [1], [0, 0, 1, 1], [], []>} : vector<324x128xbf16>, vector<128x128xbf16>, vector<324x128xf32> -> vector<324x128xf32>
    %40 = arith.addf %34, %39 : vector<324x128xf32>
    %c0_37 = arith.constant 0 : index
    %c37 = arith.constant 37 : index
    %c0_38 = arith.constant 0 : index
    %41 = vector.load %arg1[%c0_37, %c37, %c0_38] : memref<1x362x128xbf16, #tpu.memory_space<vmem>>, vector<1x324x128xbf16>
    %42 = vector.shape_cast %41 : vector<1x324x128xbf16> to vector<324x128xbf16>
    %c7 = arith.constant 7 : index
    %c0_39 = arith.constant 0 : index
    %c0_40 = arith.constant 0 : index
    %43 = vector.load %arg2[%c7, %c0_39, %c0_40] : memref<9x128x128xbf16, #tpu.memory_space<vmem>>, vector<1x128x128xbf16>
    %44 = vector.shape_cast %43 : vector<1x128x128xbf16> to vector<128x128xbf16>
    %cst_41 = arith.constant dense<0.000000e+00> : vector<324x128xf32>
    %45 = tpu.matmul %42, %44, %cst_41 {dimension_numbers = #tpu.dot_dimension_numbers<[1], [0], [0], [1], [0, 0, 1, 1], [], []>} : vector<324x128xbf16>, vector<128x128xbf16>, vector<324x128xf32> -> vector<324x128xf32>
    %46 = arith.addf %40, %45 : vector<324x128xf32>
    %c0_42 = arith.constant 0 : index
    %c38 = arith.constant 38 : index
    %c0_43 = arith.constant 0 : index
    %47 = vector.load %arg1[%c0_42, %c38, %c0_43] : memref<1x362x128xbf16, #tpu.memory_space<vmem>>, vector<1x324x128xbf16>
    %48 = vector.shape_cast %47 : vector<1x324x128xbf16> to vector<324x128xbf16>
    %c8 = arith.constant 8 : index
    %c0_44 = arith.constant 0 : index
    %c0_45 = arith.constant 0 : index
    %49 = vector.load %arg2[%c8, %c0_44, %c0_45] : memref<9x128x128xbf16, #tpu.memory_space<vmem>>, vector<1x128x128xbf16>
    %50 = vector.shape_cast %49 : vector<1x128x128xbf16> to vector<128x128xbf16>
    %cst_46 = arith.constant dense<0.000000e+00> : vector<324x128xf32>
    %51 = tpu.matmul %48, %50, %cst_46 {dimension_numbers = #tpu.dot_dimension_numbers<[1], [0], [0], [1], [0, 0, 1, 1], [], []>} : vector<324x128xbf16>, vector<128x128xbf16>, vector<324x128xf32> -> vector<324x128xf32>
    %52 = arith.addf %46, %51 : vector<324x128xf32>
    %c0_47 = arith.constant 0 : index
    %c0_48 = arith.constant 0 : index
    %53 = vector.load %arg3[%c0_47, %c0_48] : memref<1x128xf32, #tpu.memory_space<vmem>>, vector<1x128xf32>
    %54 = vector.broadcast %53 : vector<1x128xf32> to vector<324x128xf32>
    %55 = arith.addf %52, %54 : vector<324x128xf32>
    %c0_49 = arith.constant 0 : index
    %c0_50 = arith.constant 0 : index
    %c0_51 = arith.constant 0 : index
    %56 = vector.load %arg4[%c0_49, %c0_50, %c0_51] : memref<1x1x128xf32, #tpu.memory_space<vmem>>, vector<1x1x128xf32>
    %57 = vector.shape_cast %56 : vector<1x1x128xf32> to vector<1x128xf32>
    %58 = vector.broadcast %57 : vector<1x128xf32> to vector<324x128xf32>
    %59 = arith.addf %55, %58 : vector<324x128xf32>
    %60 = arith.negf %59 : vector<324x128xf32>
    %61 = math.exp %60 : vector<324x128xf32>
    %cst_52 = arith.constant 1.000000e+00 : f32
    %62 = vector.broadcast %cst_52 : f32 to vector<324x128xf32>
    %63 = arith.addf %62, %61 : vector<324x128xf32>
    %64 = arith.divf %62, %63 : vector<324x128xf32>
    %65 = arith.mulf %59, %64 : vector<324x128xf32>
    %c0_53 = arith.constant 0 : index
    %c0_54 = arith.constant 0 : index
    %66 = vector.load %arg5[%c0_53, %c0_54] : memref<324x1xf32, #tpu.memory_space<vmem>>, vector<324x1xf32>
    %67 = vector.broadcast %66 : vector<324x1xf32> to vector<324x128xf32>
    %68 = arith.mulf %65, %67 : vector<324x128xf32>
    %69 = arith.truncf %68 : vector<324x128xf32> to vector<324x128xbf16>
    %c0_55 = arith.constant 0 : index
    %c0_56 = arith.constant 0 : index
    %c0_57 = arith.constant 0 : index
    %70 = vector.load %arg6[%c0_55, %c0_56, %c0_57] : memref<1x324x128xbf16, #tpu.memory_space<vmem>>, vector<1x324x128xbf16>
    %71 = vector.shape_cast %70 : vector<1x324x128xbf16> to vector<324x128xbf16>
    %72 = vector.shape_cast %69 : vector<324x128xbf16> to vector<1x324x128xbf16>
    tpu.vector_store %arg6[%c0_55, %c0_56, %c0_57], %72 {strides = array<i32>} : memref<1x324x128xbf16, #tpu.memory_space<vmem>>, vector<1x324x128xbf16>,
    return
  }
  func.func @transform_0(%arg0: i32) -> (i32, i32, i32) {
    %c0_i32 = arith.constant 0 : i32
    %c0_i32_0 = arith.constant 0 : i32
    %c0_i32_1 = arith.constant 0 : i32
    return %arg0, %c0_i32, %c0_i32_0 : i32, i32, i32
  }
  func.func @transform_1(%arg0: i32) -> (i32, i32, i32) {
    %c0_i32 = arith.constant 0 : i32
    %c0_i32_0 = arith.constant 0 : i32
    %c0_i32_1 = arith.constant 0 : i32
    %c0_i32_2 = arith.constant 0 : i32
    return %c0_i32, %c0_i32_0, %c0_i32_1 : i32, i32, i32
  }
  func.func @transform_2(%arg0: i32) -> (i32, i32) {
    %c0_i32 = arith.constant 0 : i32
    %c0_i32_0 = arith.constant 0 : i32
    %c0_i32_1 = arith.constant 0 : i32
    return %c0_i32, %c0_i32_0 : i32, i32
  }
  func.func @transform_3(%arg0: i32) -> (i32, i32, i32) {
    %c0_i32 = arith.constant 0 : i32
    %c0_i32_0 = arith.constant 0 : i32
    %c0_i32_1 = arith.constant 0 : i32
    return %arg0, %c0_i32, %c0_i32_0 : i32, i32, i32
  }
  func.func @transform_4(%arg0: i32) -> (i32, i32) {
    %c0_i32 = arith.constant 0 : i32
    %c0_i32_0 = arith.constant 0 : i32
    %c0_i32_1 = arith.constant 0 : i32
    return %c0_i32, %c0_i32_0 : i32, i32
  }
  func.func @transform_5(%arg0: i32) -> (i32, i32, i32) {
    %c0_i32 = arith.constant 0 : i32
    %c0_i32_0 = arith.constant 0 : i32
    %c0_i32_1 = arith.constant 0 : i32
    return %arg0, %c0_i32, %c0_i32_0 : i32, i32, i32
  }
}

</mosaic_0001>

<bundles_post_ra>
// kernel: _lambda_.3
= control target key start
LH: loop header
LB: loop body
LE: loop exit
PB: predicated region body
PF: predicated region fallthrough
CT: control target
= control target key end

     0   :  { %8 = vsyncpa [#allocation3], 0  ;;  %s181_s12 = smov [#allocation2]   ;;  %s218_s0 = inlined_call_operand.vmem [shape: f32[2,64], index: 0, kind: input, shape index: {}]   ;;  %s219_s1 = inlined_call_operand.hbm [shape: f32[64,128], index: 1, kind: input, shape index: {}]   ;;  %s220_s2 = inlined_call_operand.vmem [shape: f32[1,128], index: 2, kind: input, shape index: {}]   ;;  %s221_s3 = inlined_call_operand.vmem [shape: f32[2,128], index: 3, kind: output, shape index: {}]  }
   0x1   :  { %s16_s13 = sshll.u32 %s181_s12, 4  ;;  %s17_s13 = int_to_ptr.vmem [resolvable:$true] %s16_s13 }
   0x2   :  { %s167_s14 = scalar_lea.vmem %s17_s13, 1024  ;;  %p172_p1 = scmp.lt.s32.totalorder %s17_s13, %s17_s13 }
   0x3   :  { %p168_p0 = scmp.ne.s32.totalorder %s17_s13, %s167_s14  ;;  %p173_p2 = scmp.lt.s32.totalorder %s167_s14, %s167_s14 }
   0x5   :  { %p174_p3 = por %p173_p2, %p172_p1 }
   0x7   :  { %p175_p4 = pnand %p174_p3, %p168_p0 }
   0x9   :  { %178 = shalt.err (!%p175_p4)
}
   0xa   :  { %s182_s15 = smov 128   ;;  %s183_s16 = smov 8  }
   0xb   :  { %22 = dma.hbm_to_vmem [thread:$0]  %s219_s1, 1024, %s17_s13, [#allocation3], %s182_s15, %s182_s15, %s183_s16  }
   0xc   :  { %179 = dma.done.wait [#allocation3], 1024  }
   0xd   :  { %180 = vsyncadd [#allocation3], 4294966272  ;;  %v184_v0 = vmov 0.0   ;;  %vm185_vm0 = vmmov 0   ;;  %v36_v1 = vld [vmem:[#allocation2 + $0x38] sm:$0xff]  ;;  %v35_v2 = vld [vmem:[#allocation2 + $0x30] sm:$0xff] }
   0xe   :  { %135 = vmatprep.subr.mxu0 %v184_v0  ;;  %151 = vmatprep.mubr.msk.f32.mxu0 %vm185_vm0, %v184_v0  ;;  %v34_v3 = vld [vmem:[#allocation2 + $0x28] sm:$0xff]  ;;  %v33_v4 = vld [vmem:[#allocation2 + $0x20] sm:$0xff]  ;;  %v32_v5 = vld [vmem:[#allocation2 + $0x18] sm:$0xff]  ;;  %vm44_vm1 = vcmask 523264  }
   0xf   :  { %136 = vmatpush3.msra.mxu0 %v36_v1  ;;  %v31_v6 = vld [vmem:[#allocation2 + $0x10] sm:$0xff]  ;;  %v30_v7 = vld [vmem:[#allocation2 + $0x8] sm:$0xff]  ;;  %v29_v8 = vld [vmem:[#allocation2] sm:$0xff] }
  0x10   :  { %137 = vmatprep.subr.mxu0 %v184_v0  ;;  %v28_v9 = vld [vmem:[%s218_s0] sm:$0x3] }
  0x11   :  { %138 = vmatpush3.msra.mxu0 %v35_v2  ;;  %v124_v10 = vld [vmem:[%s220_s2] ss:$0 sm:$0xff] }
  0x12   :  { %139 = vmatprep.subr.mxu0 %v184_v0 }
  0x13   :  { %140 = vmatpush3.msra.mxu0 %v34_v3 }
  0x14   :  { %141 = vmatprep.subr.mxu0 %v184_v0 }
  0x15   :  { %142 = vmatpush3.msra.mxu0 %v33_v4 }
  0x16   :  { %143 = vmatprep.subr.mxu0 %v184_v0 }
  0x17   :  { %144 = vmatpush3.msra.mxu0 %v32_v5 }
  0x18   :  { %145 = vmatprep.subr.mxu0 %v184_v0 }
  0x19   :  { %146 = vmatpush3.msra.mxu0 %v31_v6 }
  0x1a   :  { %147 = vmatprep.subr.mxu0 %v184_v0 }
  0x1b   :  { %148 = vmatpush3.msra.mxu0 %v30_v7 }
  0x1c   :  { %149 = vmatprep.subr.mxu0 %v184_v0 }
  0x1d   :  { %150 = vmatpush3.msra.mxu0 %v29_v8 }
  0x1e   :  { %152 = vmatmul.mubr.msk.f32.vlgmr.msra.gmra.mxu0 %vm44_vm1, %v28_v9 }
  0xde   :  { %v114_v11 = vpop.f32.mrf.mxu0 }
  0xdf   :  { %v115_v12 = vadd.f32 %v124_v10, %v114_v11 }
  0xe0   :  { %v153_v13 = vpop.f32.mrf.mxu0 }
  0xe1   :  { %118 = vst [vmem:[%s221_s3] sm:$0x3] %v115_v12 }
  0xe2   :  { %123 = vsyncpa [#allocation3], 1 }

// kernel: _lambda_.5
= control target key start
LH: loop header
LB: loop body
LE: loop exit
PB: predicated region body
PF: predicated region fallthrough
CT: control target
= control target key end

     0   :  { %s6235_s12 = smov 0   ;;  %s8071_s0 = inlined_call_operand.vmem [shape: bf16[2,362,128], index: 0, kind: input, shape index: {}]   ;;  %s8072_s1 = inlined_call_operand.vmem [shape: bf16[9,128,128], index: 1, kind: input, shape index: {}]   ;;  %s8073_s2 = inlined_call_operand.vmem [shape: f32[1,128], index: 2, kind: input, shape index: {}]   ;;  %s8074_s3 = inlined_call_operand.vmem [shape: f32[2,324,128], index: 3, kind: output, shape index: {}]  }
   0x1 LB: > { %s4529_s13 = sadd.s32 4294967295, %s6211_s12   ;;  %p4533_p0 = scmp.ge.s32.totalorder %s6211_s12, 1  ;;  %s6211_s12 = sphi %s6235_s12, %s13_s12  }
   0x2   : > { %p137_p1 = scmp.lt.s32.totalorder %s6211_s12, 3 }
   0x4   : > { %p138_p2 = pnand %p4533_p0, %p137_p1 }
   0x6   : > { %141 = sbr.rel (%p138_p2) target bundleno = 995 (0x3e3), region = 32 }
   0xb   : > { %v6017_v0 = vld [vmem:[%s8072_s1 + $0x78] sm:$0xff]   ;;  %v8075_v1 = vmov 0.0   ;;  %v6018_v2 = vld [vmem:[%s8072_s1 + $0x70] sm:$0xff]   ;;  %p161_p3 = scmp.lt.s32.totalorder %s4529_s13, 1  ;;  %vm6214_vm0 = vmmov 0   ;;  %v6019_v3 = vld [vmem:[%s8072_s1 + $0x68] sm:$0xff]  }
   0xc   : > { %5089 = vmatprep.subr.bf16.mxu0 %v8075_v1  ;;  %5989 = vmatprep.subr.bf16.mxu1 %v8075_v1  ;;  %v6020_v4 = vld [vmem:[%s8072_s1 + $0x60] sm:$0xff]   ;;  %v6021_v9 = vld [vmem:[%s8072_s1 + $0x58] sm:$0xff]   ;;  %v6022_v11 = vld [vmem:[%s8072_s1 + $0x50] sm:$0xff]   ;;  %vm350_vm1 = vsmask.f32 7424  ;;  %vm1080_vm2 = vcmask 1046528  }
   0xd   : > { %5090 = vmatpush3.bf16.msra.mxu0 %v6017_v0  ;;  %5997 = vmatpush3.bf16.msra.mxu1 %v6017_v0  ;;  %s8087_s13 = smov (!%p161_p3, %s4529_s13), 1  ;;  %v6023_v15 = vld [vmem:[%s8072_s1 + $0x48] sm:$0xff]   ;;  %v6024_v22 = vld [vmem:[%s8072_s1 + $0x40] sm:$0xff]   ;;  %v6029_v29 = vld [vmem:[%s8072_s1 + $0xb8] sm:$0xff]   ;;  %vm1965_vm3 = vsmask.f32 6400 }
   0xe   : > { %5091 = vmatprep.subr.bf16.mxu0 %v8075_v1  ;;  %5990 = vmatprep.subr.bf16.mxu1 %v8075_v1  ;;  %s6005_s20 = smul.u32 184, %s8087_s13  ;;  %v6032_v36 = vld [vmem:[%s8072_s1 + $0x38] sm:$0xff]   ;;  %v6033_v37 = vld [vmem:[%s8072_s1 + $0xb0] sm:$0xff]   ;;  %v6037_v51 = vld [vmem:[%s8072_s1 + $0xa8] sm:$0xff]   ;;  %vm2485_vm4 = vcmask 1045504   ;;  %vm4033_vm6 = vcmask 1044480  }
   0xf   : > { %5105 = vmatprep.mubr.msk.bf16.mxu0 %vm6214_vm0, %v8075_v1  ;;  %5149 = vmatprep.mubr.msk.bf16.mxu1 %vm6214_vm0, %v8075_v1  ;;  %v6036_v41 = vld [vmem:[%s8072_s1 + $0x30] sm:$0xff]   ;;  %v6040_v55 = vld [vmem:[%s8072_s1 + $0x28] sm:$0xff]   ;;  %vm3513_vm5 = vsmask.f32 5376 }
  0x10   : > { %s6268_s23 = scalar_lea.vmem %s8071_s0, %s6005_s20 }
  0x11   : > { %5092 = vmatpush3.bf16.msra.mxu0 %v6018_v2  ;;  %5998 = vmatpush3.bf16.msra.mxu1 %v6018_v2  ;;  %v172_v5 = vld [vmem:[%s6268_s23] sm:$0xf]  ;;  %v6275_v6 = vld [vmem:[%s6268_s23 + $0x4] sm:$0xf]  ;;  %v6027_v8 = vld [vmem:[%s6268_s23 + $0x58] sm:$0xff]  }
  0x12   : > { %5093 = vmatprep.subr.bf16.mxu0 %v8075_v1  ;;  %5991 = vmatprep.subr.bf16.mxu1 %v8075_v1  ;;  %v6280_v7 = vcombine.low %v172_v5, %v6275_v6  ;;  %v6289_v10 = vld [vmem:[%s6268_s23 + $0x8] sm:$0xff]   ;;  %v6028_v13 = vld [vmem:[%s6268_s23 + $0x60] sm:$0xff]   ;;  %v439_v14 = vshll.u32 %v6027_v8, 16  ;;  %v443_v19 = vshrl.u32 %v6027_v8, 16  ;;  %v6311_v24 = vld [vmem:[%s6268_s23 + $0x10] sm:$0xff]  }
  0x13   : > { %v359_v17 = vshll.u32 %v6289_v10, 16  ;;  %v447_v21 = vshll.u32 %v6028_v13, 16  ;;  %v6031_v28 = vld [vmem:[%s6268_s23 + $0x68] sm:$0xff]   ;;  %v363_v30 = vshrl.u32 %v6289_v10, 16  ;;  %v367_v31 = vshll.u32 %v6311_v24, 16  ;;  %v6333_v38 = vld [vmem:[%s6268_s23 + $0x18] sm:$0xff]  }
  0x14   : > { %v354_v12 = vshll.u32 %v6280_v7, 16  ;;  %v352_v16 = vshrl.u32 %v6280_v7, 16  ;;  %v6303_v20 = vrot.slane %v439_v14, 1  ;;  %v451_v34 = vshrl.u32 %v6028_v13, 16  ;;  %v6336_v39 = vld [vmem:[%s6268_s23 + $0x70] sm:$0xff]   ;;  %v6344_v45 = vld [vmem:[%s6268_s23 + $0x20] sm:$0xff]  }
  0x15   : > { %5094 = vmatpush3.bf16.msra.mxu0 %v6019_v3  ;;  %5999 = vmatpush3.bf16.msra.mxu1 %v6019_v3  ;;  %v361_v23 = vrot.slane %v359_v17, 1  ;;  %v449_v27 = vrot.slane %v447_v21, 1  ;;  %v455_v35 = vshll.u32 %v6031_v28, 16  ;;  %v369_v40 = vrot.slane %v367_v31, 1  ;;  %v6350_v47 = vld [vmem:[%s6268_s23 + $0x78] sm:$0xff]   ;;  %v6366_v56 = vld [vmem:[%s6268_s23 + $0x28] sm:$0xff]  }
  0x16   : > { %5095 = vmatprep.subr.bf16.mxu0 %v8075_v1  ;;  %5992 = vmatprep.subr.bf16.mxu1 %v8075_v1  ;;  %v356_v18 = vrot.slane %v354_v12, 1  ;;  %v445_v26 = vor.u32 %v443_v19, %v6303_v20  ;;  %v371_v46 = vshrl.u32 %v6311_v24, 16  ;;  %v375_v48 = vshll.u32 %v6333_v38, 16  ;;  %v6371_v58 = vld [vmem:[%s6268_s23 + $0x80] sm:$0xff]   ;;  %v6376_v62 = vld [vmem:[%s6268_s23 + $0x30] sm:$0xff]   ;;  %v6400_v14 = vld [vmem:[%s6268_s23 + $0x88] sm:$0xff]  }
  0x17   : > { %v365_v42 = vor.u32 %v363_v30, %v361_v23  ;;  %v453_v43 = vor.u32 %v451_v34, %v449_v27  ;;  %v457_v44 = vrot.slane %v455_v35, 1  ;;  %v463_v49 = vshll.u32 %v6336_v39, 16  ;;  %v6044_v12 = vld [vmem:[%s8072_s1 + $0x20] sm:$0xff]   ;;  %v6411_v21 = vld [vmem:[%s6268_s23 + $0x50] sm:$0xff]  }
  0x18   : > { %v357_v25 = vor.u32 %v356_v18, %v352_v16  ;;  %v450_v33 = vsel %vm350_vm1, %v445_v26, %v449_v27  ;;  %v459_v50 = vshrl.u32 %v6031_v28, 16  ;;  %v383_v54 = vshll.u32 %v6344_v45, 16  ;;  %v6047_v16 = vld [vmem:[%s8072_s1 + $0x98] sm:$0xff]   ;;  %v6425_v27 = vld [vmem:[%s6268_s23 + $0x90] sm:$0xff]  }
  0x19   : > { %5096 = vmatpush3.bf16.msra.mxu0 %v6020_v4  ;;  %6000 = vmatpush3.bf16.msra.mxu1 %v6020_v4  ;;  %v370_v52 = vsel %vm350_vm1, %v365_v42, %v369_v40  ;;  %v458_v53 = vsel %vm350_vm1, %v453_v43, %v457_v44  ;;  %v471_v57 = vshll.u32 %v6350_v47, 16  ;;  %v377_v59 = vrot.slane %v375_v48, 1  ;;  %v6050_v26 = vld [vmem:[%s8072_s1 + $0x18] sm:$0xff]   ;;  %v6053_v35 = vld [vmem:[%s8072_s1 + $0x90] sm:$0xff]  }
  0x1a   : > { %5097 = vmatprep.subr.bf16.mxu0 %v8075_v1  ;;  %5993 = vmatprep.subr.bf16.mxu1 %v8075_v1  ;;  %v362_v32 = vsel %vm350_vm1, %v357_v25, %v361_v23  ;;  %v465_v60 = vrot.slane %v463_v49, 1  ;;  %v379_v61 = vshrl.u32 %v6333_v38, 16  ;;  %v373_v63 = vor.u32 %v371_v46, %v369_v40  ;;  %v6417_v25 = vld [vmem:[%s6268_s23 + $0x38] sm:$0xff]  }
  0x1b   : > { %v461_v0 = vor.u32 %v459_v50, %v457_v44  ;;  %v6382_v2 = vrot.slane %v383_v54, 1  ;;  %v467_v3 = vshrl.u32 %v6336_v39, 16  ;;  %v387_v4 = vshrl.u32 %v6344_v45, 16  ;;  %v6054_v39 = vld [vmem:[%s8072_s1 + $0x10] sm:$0xff]   ;;  %v6452_v44 = vld [vmem:[%s6268_s23 + $0x40] sm:$0xff]   ;;  %v6057_v50 = vld [vmem:[%s8072_s1 + $0x88] sm:$0xff]  }
  0x1c   : > { %v391_v5 = vshll.u32 %v6366_v56, 16  ;;  %v6387_v8 = vrot.slane %v471_v57, 1  ;;  %v475_v13 = vshrl.u32 %v6350_v47, 16  ;;  %v378_v17 = vsel %vm350_vm1, %v373_v63, %v377_v59  ;;  %v6471_v57 = vld [vmem:[%s6268_s23 + $0x98] sm:$0xff]  }
  0x1d   : > { %5098 = vmatpush3.bf16.msra.mxu0 %v6021_v9  ;;  %6001 = vmatpush3.bf16.msra.mxu1 %v6021_v9  ;;  %v479_v9 = vshll.u32 %v6371_v58, 16  ;;  %v466_v18 = vsel %vm350_vm1, %v461_v0, %v465_v60  ;;  %v395_v23 = vshrl.u32 %v6366_v56, 16  ;;  %v431_v28 = vshll.u32 %v6411_v21, 16 }
  0x1e   : > { %5099 = vmatprep.subr.bf16.mxu0 %v8075_v1  ;;  %5994 = vmatprep.subr.bf16.mxu1 %v8075_v1  ;;  %v6408_v19 = vrot.slane %v391_v5, 1  ;;  %v483_v30 = vshrl.u32 %v6371_v58, 16  ;;  %v487_v31 = vshll.u32 %v6400_v14, 16  ;;  %v469_v34 = vor.u32 %v467_v3, %v465_v60  ;;  %v6061_v60 = vld [vmem:[%s8072_s1 + $0x80] sm:$0xff]  }
  0x1f   : > { %v403_v40 = vshrl.u32 %v6376_v62, 16  ;;  %v491_v49 = vshrl.u32 %v6400_v14, 16  ;;  %v499_v58 = vshrl.u32 %v6425_v27, 16  ;;  %v477_v63 = vor.u32 %v475_v13, %v6387_v8 }
  0x20   : > { %v489_v43 = vrot.slane %v487_v31, 1  ;;  %v474_v48 = vsel %vm350_vm1, %v469_v34, %v6387_v8  ;;  %v397_v47 = vor.u32 %v395_v23, %v6408_v19  ;;  %v6511_v8 = vld [vmem:[%s6268_s23 + $0x48] sm:$0xff]   ;;  %v419_v13 = vshrl.u32 %v6452_v44, 16 }
  0x21   : > { %5100 = vmatpush3.bf16.msra.mxu0 %v6022_v11  ;;  %6002 = vmatpush3.bf16.msra.mxu1 %v6022_v11  ;;  %v6043_v11 = vld [vmem:[%s8072_s1 + $0xa0] sm:$0xff]   ;;  %v423_v14 = vshll.u32 %v6511_v8, 16 }
  0x22   : > { %5101 = vmatprep.subr.bf16.mxu0 %v8075_v1  ;;  %5995 = vmatprep.subr.bf16.mxu1 %v8075_v1 }
  0x25   : > { %5102 = vmatpush3.bf16.msra.mxu0 %v6023_v15  ;;  %6003 = vmatpush3.bf16.msra.mxu1 %v6023_v15  ;;  %v399_v15 = vshll.u32 %v6376_v62, 16 }
  0x26   : > { %5103 = vmatprep.subr.bf16.mxu0 %v8075_v1  ;;  %5996 = vmatprep.subr.bf16.mxu1 %v8075_v1 }
  0x29   : > { %5104 = vmatpush3.bf16.msra.mxu0 %v6024_v22  ;;  %6004 = vmatpush3.bf16.msra.mxu1 %v6024_v22  ;;  %v6413_v22 = vrot.slane %v479_v9, 1 }
  0x2a   : > { %5289 = vmatprep.subr.bf16.mxu0 %v8075_v1  ;;  %5189 = vmatprep.subr.bf16.mxu1 %v8075_v1 }
  0x2b   : > { %v482_v3 = vsel %vm350_vm1, %v477_v63, %v6413_v22  ;;  %v6075_v63 = vld [vmem:[%s8072_s1 + $0xc8] sm:$0xff]  }
  0x2c   : > { %5106 = vmatmul.mubr.bf16.vlgmr.msra.gmra.mxu0 %v362_v32  ;;  %5150 = vmatmul.mubr.bf16.vlgmr.msra.gmra.mxu1 %v450_v33  ;;  %v435_v32 = vshrl.u32 %v6411_v21, 16  ;;  %v381_v33 = vor.u32 %v379_v61, %v377_v59  ;;  %v6060_v59 = vld [vmem:[%s8072_s1] sm:$0xff]   ;;  %v389_v61 = vor.u32 %v387_v4, %v6382_v2  ;;  %v485_v4 = vor.u32 %v483_v30, %v6413_v22 }
  0x2d   : > { %5290 = vmatpush3.bf16.msra.mxu0 %v6029_v29  ;;  %5109 = vmatprep.mubr.msk.bf16.mxu0 %vm6214_vm0, %v8075_v1  ;;  %v6428_v29 = vrot.slane %v399_v15, 1  ;;  %v6519_v15 = vld [vmem:[%s6268_s23 + $0xa0] ss:$0 sps:$4 sm:$0x77]   ;;  %v507_v22 = vshrl.u32 %v6471_v57, 16  ;;  %v425_v30 = vrot.slane %v423_v14, 1 }
  0x2e   : > { %5153 = vmatprep.mubr.msk.bf16.mxu1 %vm6214_vm0, %v8075_v1  ;;  %5190 = vmatpush3.bf16.msra.mxu1 %v6032_v36  ;;  %v6440_v36 = vrot.slane %v431_v28, 1  ;;  %v386_v46 = vsel %vm350_vm1, %v381_v33, %v6382_v2  ;;  %v394_v0 = vsel %vm350_vm1, %v389_v61, %v6408_v19  ;;  %v503_v2 = vshll.u32 %v6471_v57, 16  ;;  %v6072_v61 = vld [vmem:[%s8072_s1 + $0x118] sm:$0xff]  }
  0x2f   : > { %5291 = vmatprep.subr.bf16.mxu0 %v8075_v1  ;;  %5191 = vmatprep.subr.bf16.mxu1 %v8075_v1  ;;  %v402_v9 = vsel %vm350_vm1, %v397_v47, %v6428_v29  ;;  %v511_v23 = vshll.u32 %v6519_v15, 16  ;;  %v1090_v47 = vrot.slane %v6366_v56, 1 }
  0x30   : > { %v437_v42 = vor.u32 %v435_v32, %v6440_v36 }
  0x31   : > { %5292 = vmatpush3.bf16.msra.mxu0 %v6033_v37  ;;  %v407_v37 = vshll.u32 %v6417_v25, 16  ;;  %v513_v31 = vrot.slane %v511_v23, 1  ;;  %v6180_v23 = vld [vmem:[%s6268_s23 + $0x68] sm:$0xff]  }
  0x32   : > { %5192 = vmatpush3.bf16.msra.mxu1 %v6036_v41  ;;  %5293 = vmatprep.subr.bf16.mxu0 %v8075_v1  ;;  %v495_v41 = vshll.u32 %v6425_v27, 16 }
  0x33   : > { %5193 = vmatprep.subr.bf16.mxu1 %v8075_v1 }
  0x34   : > { %5110 = vmatmul.mubr.bf16.gmra.mxu0 %v370_v52  ;;  %5154 = vmatmul.mubr.bf16.gmra.mxu1 %v458_v53  ;;  %v409_v52 = vrot.slane %v407_v37, 1  ;;  %v6058_v53 = vld [vmem:[%s8072_s1 + $0x8] sm:$0xff]   ;;  %v497_v54 = vrot.slane %v495_v41, 1  ;;  %v427_v37 = vshrl.u32 %v6511_v8, 16 }
  0x35   : > { %5113 = vmatprep.mubr.msk.bf16.mxu0 %vm6214_vm0, %v8075_v1  ;;  %5157 = vmatprep.mubr.msk.bf16.mxu1 %vm6214_vm0, %v8075_v1 }
  0x36   : > { %5294 = vmatpush3.bf16.msra.mxu0 %v6037_v51  ;;  %5194 = vmatpush3.bf16.msra.mxu1 %v6040_v55  ;;  %v6464_v51 = vsel %vm350_vm1, %v437_v42, %v6303_v20  ;;  %v411_v55 = vshrl.u32 %v6417_v25, 16  ;;  %v415_v20 = vshll.u32 %v6452_v44, 16  ;;  %v501_v27 = vor.u32 %v499_v58, %v497_v54  ;;  %v6071_v58 = vld [vmem:[%s8072_s1 + $0xd8] sm:$0xff]  }
  0x37   : > { %5295 = vmatprep.subr.bf16.mxu0 %v8075_v1  ;;  %5195 = vmatprep.subr.bf16.mxu1 %v8075_v1 }
  0x38   : > { %v417_v5 = vrot.slane %v415_v20, 1  ;;  %v1086_v20 = vrot.slane %v6333_v38, 1 }
  0x3a   : > { %5296 = vmatpush3.bf16.msra.mxu0 %v6043_v11  ;;  %5196 = vmatpush3.bf16.msra.mxu1 %v6044_v12  ;;  %v490_v11 = vsel %vm350_vm1, %v485_v4, %v489_v43  ;;  %v505_v12 = vrot.slane %v503_v2, 1  ;;  %v421_v32 = vor.u32 %v419_v13, %v417_v5  ;;  %v6076_v2 = vld [vmem:[%s8072_s1 + $0x108] sm:$0xff]   ;;  %v6078_v4 = vld [vmem:[%s8072_s1 + $0x100] sm:$0xff]  }
  0x3b   : > { %5297 = vmatprep.subr.bf16.mxu0 %v8075_v1  ;;  %5197 = vmatprep.subr.bf16.mxu1 %v8075_v1 }
  0x3c   : > { %5114 = vmatmul.mubr.bf16.gmra.mxu0 %v378_v17  ;;  %5158 = vmatmul.mubr.bf16.gmra.mxu1 %v466_v18  ;;  %v493_v17 = vor.u32 %v491_v49, %v489_v43  ;;  %v509_v33 = vor.u32 %v507_v22, %v505_v12  ;;  %v426_v34 = vsel %vm350_vm1, %v421_v32, %v425_v30  ;;  %v1059_v43 = vld [vmem:[%s6268_s23] sm:$0xe] }
  0x3d   : > { %5117 = vmatprep.mubr.msk.bf16.mxu0 %vm6214_vm0, %v8075_v1  ;;  %5161 = vmatprep.mubr.msk.bf16.mxu1 %vm6214_vm0, %v8075_v1 }
  0x3e   : > { %5298 = vmatpush3.bf16.msra.mxu0 %v6047_v16  ;;  %5198 = vmatpush3.bf16.msra.mxu1 %v6050_v26  ;;  %v405_v16 = vor.u32 %v403_v40, %v6428_v29  ;;  %v498_v19 = vsel %vm350_vm1, %v493_v17, %v497_v54  ;;  %v413_v26 = vor.u32 %v411_v55, %v409_v52  ;;  %v6069_v54 = vld [vmem:[%s8072_s1 + $0xe0] sm:$0xff]   ;;  %v6068_v55 = vld [vmem:[%s8072_s1 + $0x128] sm:$0xff]  }
  0x3f   : > { %5299 = vmatprep.subr.bf16.mxu0 %v8075_v1  ;;  %5199 = vmatprep.subr.bf16.mxu1 %v8075_v1  ;;  %v506_v29 = vsel %vm350_vm1, %v501_v27, %v505_v12  ;;  %v429_v40 = vor.u32 %v427_v37, %v425_v30 }
  0x40   : > { %v410_v18 = vsel %vm350_vm1, %v405_v16, %v409_v52  ;;  %v418_v28 = vsel %vm350_vm1, %v413_v26, %v417_v5  ;;  %v6067_v52 = vld [vmem:[%s8072_s1 + $0xe8] sm:$0xff]   ;;  %v1106_v26 = vrot.slane %v6180_v23, 1 }
  0x41   : > { %v434_v42 = vsel %vm350_vm1, %v429_v40, %v6440_v36  ;;  %v6065_v36 = vld [vmem:[%s8072_s1 + $0xf0] sm:$0xff]  }
  0x42   : > { %5300 = vmatpush3.bf16.msra.mxu0 %v6053_v35  ;;  %5200 = vmatpush3.bf16.msra.mxu1 %v6054_v39  ;;  %v514_v35 = vsel %vm350_vm1, %v509_v33, %v513_v31  ;;  %v515_v39 = vshrl.u32 %v6519_v15, 16  ;;  %v6182_v33 = vld [vmem:[%s6268_s23 + $0x78] sm:$0xff]  }
  0x43   : > { %5301 = vmatprep.subr.bf16.mxu0 %v8075_v1  ;;  %5201 = vmatprep.subr.bf16.mxu1 %v8075_v1 }
  0x44   : > { %5118 = vmatmul.mubr.bf16.gmra.mxu0 %v386_v46  ;;  %5162 = vmatmul.mubr.bf16.gmra.mxu1 %v474_v48  ;;  %v517_v41 = vor.u32 %v515_v39, %v513_v31  ;;  %v4606_v46 = vcombine.low %v1059_v43, %v6275_v6  ;;  %v6063_v48 = vld [vmem:[%s8072_s1 + $0xf8] sm:$0xff]  }
  0x45   : > { %5121 = vmatprep.mubr.msk.bf16.mxu0 %vm6214_vm0, %v8075_v1  ;;  %5165 = vmatprep.mubr.msk.bf16.mxu1 %vm6214_vm0, %v8075_v1 }
  0x46   : > { %5302 = vmatpush3.bf16.msra.mxu0 %v6057_v50  ;;  %5202 = vmatpush3.bf16.msra.mxu1 %v6058_v53  ;;  %v1081_v49 = vrot.slane %v4606_v46, 1  ;;  %v1082_v50 = vrot.slane %v6289_v10, 1  ;;  %v6066_v53 = vld [vmem:[%s8072_s1 + $0x130] sm:$0xff]  }
  0x47   : > { %5203 = vmatprep.subr.bf16.mxu1 %v8075_v1  ;;  %5303 = vmatprep.subr.bf16.mxu0 %v8075_v1 }
  0x48   : > { %v1083_v6 = vsel %vm1080_vm2, %v1081_v49, %v1082_v50  ;;  %v6183_v49 = vld [vmem:[%s6268_s23 + $0x80] sm:$0xff]  }
  0x4a   : > { %5204 = vmatpush3.bf16.msra.mxu1 %v6060_v59  ;;  %5304 = vmatpush3.bf16.msra.mxu0 %v6061_v60  ;;  %v6070_v59 = vld [vmem:[%s8072_s1 + $0x120] sm:$0xff]  }
  0x4b   : > { %5389 = vmatprep.subr.bf16.mxu1 %v8075_v1  ;;  %5489 = vmatprep.subr.bf16.mxu0 %v8075_v1 }
  0x4c   : > { %5122 = vmatmul.mubr.bf16.gmra.mxu0 %v394_v0  ;;  %5166 = vmatmul.mubr.bf16.gmra.mxu1 %v482_v3  ;;  %v1088_v0 = vrot.slane %v6344_v45, 1  ;;  %v6074_v3 = vld [vmem:[%s8072_s1 + $0x110] sm:$0xff]  }
  0x4d   : > { %5125 = vmatprep.mubr.msk.bf16.mxu0 %vm6214_vm0, %v8075_v1  ;;  %5169 = vmatprep.mubr.msk.bf16.mxu1 %vm6214_vm0, %v8075_v1 }
  0x4e   : > { %v1089_v5 = vsel %vm1080_vm2, %v1086_v20, %v1088_v0 }
  0x54   : > { %5126 = vmatmul.mubr.bf16.gmra.mxu0 %v402_v9  ;;  %5170 = vmatmul.mubr.bf16.gmra.mxu1 %v490_v11  ;;  %v1092_v9 = vrot.slane %v6376_v62, 1 }
  0x55   : > { %5129 = vmatprep.mubr.msk.bf16.mxu0 %vm6214_vm0, %v8075_v1  ;;  %5173 = vmatprep.mubr.msk.bf16.mxu1 %vm6214_vm0, %v8075_v1 }
  0x56   : > { %v1093_v11 = vsel %vm1080_vm2, %v1090_v47, %v1092_v9 }
  0x5c   : > { %5130 = vmatmul.mubr.bf16.gmra.mxu0 %v410_v18  ;;  %5174 = vmatmul.mubr.bf16.gmra.mxu1 %v498_v19 }
  0x5d   : > { %5133 = vmatprep.mubr.msk.bf16.mxu0 %vm6214_vm0, %v8075_v1  ;;  %5177 = vmatprep.mubr.msk.bf16.mxu1 %vm6214_vm0, %v8075_v1 }
  0x64   : > { %5134 = vmatmul.mubr.bf16.gmra.mxu0 %v418_v28  ;;  %5178 = vmatmul.mubr.bf16.gmra.mxu1 %v506_v29  ;;  %v6181_v28 = vld [vmem:[%s6268_s23 + $0x70] sm:$0xff]  }
  0x65   : > { %5137 = vmatprep.mubr.msk.bf16.mxu0 %vm6214_vm0, %v8075_v1  ;;  %5181 = vmatprep.mubr.msk.bf16.mxu1 %vm6214_vm0, %v8075_v1  ;;  %v1108_v29 = vrot.slane %v6181_v28, 1 }
  0x67   : > { %v1109_v30 = vsel %vm1080_vm2, %v1106_v26, %v1108_v29 }
  0x6c   : > { %5138 = vmatmul.mubr.bf16.gmra.mxu0 %v426_v34  ;;  %5182 = vmatmul.mubr.bf16.gmra.mxu1 %v514_v35  ;;  %v1110_v34 = vrot.slane %v6182_v33, 1 }
  0x6d   : > { %5141 = vmatprep.mubr.msk.bf16.mxu0 %vm6214_vm0, %v8075_v1  ;;  %5185 = vmatprep.mubr.msk.bf16.mxu1 %vm6214_vm0, %v8075_v1 }
  0x74   : > { %5142 = vmatmul.mubr.bf16.gmra.mxu0 %v434_v42  ;;  %5186 = vmatmul.mubr.bf16.gmra.mxu1 %v517_v41  ;;  %v1111_v41 = vsel %vm1080_vm2, %v1108_v29, %v1110_v34 }
  0x75   : > { %5145 = vmatprep.mubr.msk.bf16.mxu0 %vm6214_vm0, %v8075_v1  ;;  %5205 = vmatprep.mubr.msk.bf16.mxu1 %vm6214_vm0, %v8075_v1 }
  0x7c   : > { %5146 = vmatmul.mubr.bf16.gmra.mxu0 %v6464_v51  ;;  %5206 = vmatmul.mubr.bf16.vlgmr.msra.gmra.mxu1 %v6280_v7  ;;  %v6064_v51 = vld [vmem:[%s8072_s1 + $0x138] sm:$0xff]   ;;  %v1084_v7 = vrot.slane %v6311_v24, 1 }
  0x7d   : > { %5209 = vmatprep.mubr.msk.bf16.mxu1 %vm6214_vm0, %v8075_v1  ;;  %5305 = vmatprep.mubr.msk.bf16.mxu0 %vm6214_vm0, %v8075_v1 }
  0x7e   : > { %5390 = vmatpush3.bf16.msra.mxu1 %v6063_v48  ;;  %v1087_v60 = vsel %vm1080_vm2, %v1084_v7, %v1086_v20 }
  0x7f   : > { %5391 = vmatprep.subr.bf16.mxu1 %v8075_v1 }
  0x82   : > { %5392 = vmatpush3.bf16.msra.mxu1 %v6065_v36 }
  0x83   : > { %5393 = vmatprep.subr.bf16.mxu1 %v8075_v1 }
  0x84   : > { %5210 = vmatmul.mubr.bf16.gmra.mxu1 %v6289_v10  ;;  %5306 = vmatmul.mubr.bf16.vlgmr.msra.gmra.mxu0 %v1083_v6  ;;  %v1085_v10 = vsel %vm1080_vm2, %v1082_v50, %v1084_v7  ;;  %v1112_v50 = vrot.slane %v6183_v49, 1 }
  0x85   : > { %5490 = vmatpush3.bf16.msra.mxu0 %v6064_v51  ;;  %5213 = vmatprep.mubr.msk.bf16.mxu1 %vm6214_vm0, %v8075_v1 }
  0x86   : > { %5309 = vmatprep.mubr.msk.bf16.mxu0 %vm6214_vm0, %v8075_v1  ;;  %5491 = vmatprep.subr.bf16.mxu0 %v8075_v1 }
  0x87   : > { %5394 = vmatpush3.bf16.msra.mxu1 %v6067_v52  ;;  %v1113_v52 = vsel %vm1080_vm2, %v1110_v34, %v1112_v50 }
  0x88   : > { %5395 = vmatprep.subr.bf16.mxu1 %v8075_v1 }
  0x89   : > { %5492 = vmatpush3.bf16.msra.mxu0 %v6066_v53 }
  0x8a   : > { %5493 = vmatprep.subr.bf16.mxu0 %v8075_v1 }
  0x8b   : > { %5396 = vmatpush3.bf16.msra.mxu1 %v6069_v54 }
  0x8c   : > { %5214 = vmatmul.mubr.bf16.gmra.mxu1 %v6311_v24  ;;  %5310 = vmatmul.mubr.bf16.gmra.mxu0 %v1085_v10  ;;  %v6073_v24 = vld [vmem:[%s8072_s1 + $0xd0] sm:$0xff]  }
  0x8d   : > { %5217 = vmatprep.mubr.msk.bf16.mxu1 %vm6214_vm0, %v8075_v1  ;;  %5313 = vmatprep.mubr.msk.bf16.mxu0 %vm6214_vm0, %v8075_v1 }
  0x8e   : > { %5494 = vmatpush3.bf16.msra.mxu0 %v6068_v55  ;;  %5397 = vmatprep.subr.bf16.mxu1 %v8075_v1 }
  0x8f   : > { %5495 = vmatprep.subr.bf16.mxu0 %v8075_v1  ;;  %5398 = vmatpush3.bf16.msra.mxu1 %v6071_v58  ;;  %v6184_v58 = vld [vmem:[%s6268_s23 + $0x88] sm:$0xff]  }
  0x90   : > { %5399 = vmatprep.subr.bf16.mxu1 %v8075_v1  ;;  %v1114_v20 = vrot.slane %v6184_v58, 1 }
  0x92   : > { %5496 = vmatpush3.bf16.msra.mxu0 %v6070_v59 }
  0x93   : > { %5497 = vmatprep.subr.bf16.mxu0 %v8075_v1  ;;  %5400 = vmatpush3.bf16.msra.mxu1 %v6073_v24 }
  0x94   : > { %5218 = vmatmul.mubr.bf16.gmra.mxu1 %v6333_v38  ;;  %5314 = vmatmul.mubr.bf16.gmra.mxu0 %v1087_v60  ;;  %v6077_v38 = vld [vmem:[%s8072_s1 + $0xc0] sm:$0xff]  }
  0x95   : > { %5221 = vmatprep.mubr.msk.bf16.mxu1 %vm6214_vm0, %v8075_v1  ;;  %5317 = vmatprep.mubr.msk.bf16.mxu0 %vm6214_vm0, %v8075_v1 }
  0x96   : > { %5498 = vmatpush3.bf16.msra.mxu0 %v6072_v61  ;;  %5401 = vmatprep.subr.bf16.mxu1 %v8075_v1 }
  0x97   : > { %5499 = vmatprep.subr.bf16.mxu0 %v8075_v1  ;;  %5402 = vmatpush3.bf16.msra.mxu1 %v6075_v63  ;;  %v1115_v63 = vsel %vm1080_vm2, %v1112_v50, %v1114_v20 }
  0x98   : > { %5403 = vmatprep.subr.bf16.mxu1 %v8075_v1 }
  0x9a   : > { %5500 = vmatpush3.bf16.msra.mxu0 %v6074_v3 }
  0x9b   : > { %5501 = vmatprep.subr.bf16.mxu0 %v8075_v1  ;;  %5404 = vmatpush3.bf16.msra.mxu1 %v6077_v38 }
  0x9c   : > { %5222 = vmatmul.mubr.bf16.gmra.mxu1 %v6344_v45  ;;  %5318 = vmatmul.mubr.bf16.gmra.mxu0 %v1089_v5  ;;  %v1091_v45 = vsel %vm1080_vm2, %v1088_v0, %v1090_v47 }
  0x9d   : > { %5225 = vmatprep.mubr.msk.bf16.mxu1 %vm6214_vm0, %v8075_v1  ;;  %5321 = vmatprep.mubr.msk.bf16.mxu0 %vm6214_vm0, %v8075_v1 }
  0x9e   : > { %5502 = vmatpush3.bf16.msra.mxu0 %v6076_v2  ;;  %5589 = vmatprep.subr.bf16.mxu1 %v8075_v1  ;;  %v6185_v2 = vld [vmem:[%s6268_s23 + $0x90] sm:$0xff]  }
  0x9f   : > { %5503 = vmatprep.subr.bf16.mxu0 %v8075_v1  ;;  %v1116_v47 = vrot.slane %v6185_v2, 1 }
  0xa2   : > { %5504 = vmatpush3.bf16.msra.mxu0 %v6078_v4 }
  0xa3   : > { %5689 = vmatprep.subr.bf16.mxu0 %v8075_v1 }
  0xa4   : > { %5226 = vmatmul.mubr.bf16.gmra.mxu1 %v6366_v56  ;;  %5322 = vmatmul.mubr.bf16.gmra.mxu0 %v1091_v45  ;;  %v1094_v56 = vrot.slane %v6417_v25, 1 }
  0xa5   : > { %5229 = vmatprep.mubr.msk.bf16.mxu1 %vm6214_vm0, %v8075_v1  ;;  %5325 = vmatprep.mubr.msk.bf16.mxu0 %vm6214_vm0, %v8075_v1 }
  0xa6   : > { %v1095_v12 = vsel %vm1080_vm2, %v1092_v9, %v1094_v56 }
  0xac   : > { %5230 = vmatmul.mubr.bf16.gmra.mxu1 %v6376_v62  ;;  %5326 = vmatmul.mubr.bf16.gmra.mxu0 %v1093_v11  ;;  %v1096_v62 = vrot.slane %v6452_v44, 1 }
  0xad   : > { %5233 = vmatprep.mubr.msk.bf16.mxu1 %vm6214_vm0, %v8075_v1  ;;  %5329 = vmatprep.mubr.msk.bf16.mxu0 %vm6214_vm0, %v8075_v1 }
  0xae   : > { %v1097_v13 = vsel %vm1080_vm2, %v1094_v56, %v1096_v62  ;;  %v1117_v56 = vsel %vm1080_vm2, %v1114_v20, %v1116_v47 }
  0xb4   : > { %5234 = vmatmul.mubr.bf16.gmra.mxu1 %v6417_v25  ;;  %5330 = vmatmul.mubr.bf16.gmra.mxu0 %v1095_v12  ;;  %v1098_v25 = vrot.slane %v6511_v8, 1 }
  0xb5   : > { %5237 = vmatprep.mubr.msk.bf16.mxu1 %vm6214_vm0, %v8075_v1  ;;  %5333 = vmatprep.mubr.msk.bf16.mxu0 %vm6214_vm0, %v8075_v1 }
  0xb6   : > { %v1099_v14 = vsel %vm1080_vm2, %v1096_v62, %v1098_v25 }
  0xbc   : > { %5238 = vmatmul.mubr.bf16.gmra.mxu1 %v6452_v44  ;;  %5334 = vmatmul.mubr.bf16.gmra.mxu0 %v1097_v13  ;;  %v1100_v44 = vrot.slane %v6411_v21, 1 }
  0xbd   : > { %5241 = vmatprep.mubr.msk.bf16.mxu1 %vm6214_vm0, %v8075_v1  ;;  %5337 = vmatprep.mubr.msk.bf16.mxu0 %vm6214_vm0, %v8075_v1 }
  0xbe   : > { %v1101_v16 = vsel %vm1080_vm2, %v1098_v25, %v1100_v44 }
  0xc4   : > { %5242 = vmatmul.mubr.bf16.gmra.mxu1 %v6511_v8  ;;  %5338 = vmatmul.mubr.bf16.gmra.mxu0 %v1099_v14  ;;  %v6178_v8 = vld [vmem:[%s6268_s23 + $0x58] sm:$0xff]   ;;  %v1118_v14 = vrot.slane %v6471_v57, 1 }
  0xc5   : > { %5245 = vmatprep.mubr.msk.bf16.mxu1 %vm6214_vm0, %v8075_v1  ;;  %5341 = vmatprep.mubr.msk.bf16.mxu0 %vm6214_vm0, %v8075_v1  ;;  %v1102_v17 = vrot.slane %v6178_v8, 1 }
  0xc7   : > { %v1103_v18 = vsel %vm1080_vm2, %v1100_v44, %v1102_v17 }
  0xcc   : > { %5246 = vmatmul.mubr.bf16.gmra.mxu1 %v6411_v21  ;;  %5342 = vmatmul.mubr.bf16.gmra.mxu0 %v1101_v16  ;;  %v6179_v21 = vld [vmem:[%s6268_s23 + $0x60] sm:$0xff]  }
  0xcd   : > { %5249 = vmatprep.mubr.msk.bf16.mxu1 %vm6214_vm0, %v8075_v1  ;;  %5345 = vmatprep.mubr.msk.bf16.mxu0 %vm6214_vm0, %v8075_v1  ;;  %v1104_v19 = vrot.slane %v6179_v21, 1 }
  0xcf   : > { %v1105_v22 = vsel %vm1080_vm2, %v1102_v17, %v1104_v19  ;;  %v1107_v27 = vsel %vm1080_vm2, %v1104_v19, %v1106_v26  ;;  %v1120_v26 = vrot.slane %v6519_v15, 1 }
  0xd4   : > { %5250 = vmatmul.mubr.bf16.gmra.mxu1 %v6178_v8  ;;  %5346 = vmatmul.mubr.bf16.gmra.mxu0 %v1103_v18  ;;  %v1119_v18 = vsel %vm1080_vm2, %v1116_v47, %v1118_v14 }
  0xd5   : > { %5253 = vmatprep.mubr.msk.bf16.mxu1 %vm6214_vm0, %v8075_v1  ;;  %5349 = vmatprep.mubr.msk.bf16.mxu0 %vm6214_vm0, %v8075_v1 }
  0xdc   : > { %5254 = vmatmul.mubr.bf16.gmra.mxu1 %v6179_v21  ;;  %5350 = vmatmul.mubr.bf16.gmra.mxu0 %v1105_v22 }
  0xdd   : > { %5257 = vmatprep.mubr.msk.bf16.mxu1 %vm6214_vm0, %v8075_v1  ;;  %5353 = vmatprep.mubr.msk.bf16.mxu0 %vm6214_vm0, %v8075_v1 }
  0xe4   : > { %5258 = vmatmul.mubr.bf16.gmra.mxu1 %v6180_v23  ;;  %5354 = vmatmul.mubr.bf16.gmra.mxu0 %v1107_v27  ;;  %v1432_v27 = vld [vmem:[%s6268_s23 + $0x8] sm:$0xe] }
  0xe5   : > { %5261 = vmatprep.mubr.msk.bf16.mxu1 %vm6214_vm0, %v8075_v1  ;;  %5357 = vmatprep.mubr.msk.bf16.mxu0 %vm6214_vm0, %v8075_v1 }
  0xec   : > { %v6716_v31 = vpop.f32.mrf.mxu0  ;;  %v6718_v32 = vpop.f32.mrf.mxu1  ;;  %5262 = vmatmul.mubr.bf16.gmra.mxu1 %v6181_v28  ;;  %5358 = vmatmul.mubr.bf16.gmra.mxu0 %v1109_v30  ;;  %v1433_v28 = vld [vmem:[%s6268_s23 + $0xc] sm:$0xf] }
  0xed   : > { %5265 = vmatprep.mubr.msk.bf16.mxu1 %vm6214_vm0, %v8075_v1  ;;  %5361 = vmatprep.mubr.msk.bf16.mxu0 %vm6214_vm0, %v8075_v1 }
  0xee   : > { %v5107_v35 = vpop.f32.mrf.mxu0  ;;  %v5151_v37 = vpop.f32.mrf.mxu1 }
  0xef   : > { %v6079_v35 = vld [vmem:[%s6268_s23 + $0xa0] ss:$0 sps:$4 sm:$0x33]   ;;  %v4631_v37 = vcombine.low %v1432_v27, %v1433_v28 }
  0xf0   : > { %v6725_v39 = vpop.f32.mrf.mxu0  ;;  %v6727_v40 = vpop.f32.mrf.mxu1 }
  0xf1   : > { %v1593_v15 = vrot.slane %v4631_v37, 1 }
  0xf2   : > { %v5108_v42 = vpop.f32.mrf.mxu0  ;;  %v5152_v43 = vpop.f32.mrf.mxu1 }
  0xf4   : > { %v6730_v46 = vpop.f32.mrf.mxu0  ;;  %v6732_v48 = vpop.f32.mrf.mxu1  ;;  %5266 = vmatmul.mubr.bf16.gmra.mxu1 %v6182_v33  ;;  %5362 = vmatmul.mubr.bf16.gmra.mxu0 %v1111_v41  ;;  %v1121_v41 = vsel %vm1080_vm2, %v1118_v14, %v1120_v26 }
  0xf5   : > { %5269 = vmatprep.mubr.msk.bf16.mxu1 %vm6214_vm0, %v8075_v1  ;;  %5365 = vmatprep.mubr.msk.bf16.mxu0 %vm6214_vm0, %v8075_v1 }
  0xf6   : > { %v5111_v36 = vpop.f32.mrf.mxu0  ;;  %v5155_v6 = vpop.f32.mrf.mxu1 }
  0xf7   : > { %v1967_v6 = vshrl.u32 %v4631_v37, 16 }
  0xf8   : > { %v6739_v51 = vpop.f32.mrf.mxu0  ;;  %v6741_v7 = vpop.f32.mrf.mxu1 }
  0xfa   : > { %v5112_v53 = vpop.f32.mrf.mxu0  ;;  %v5156_v54 = vpop.f32.mrf.mxu1 }
  0xfc   : > { %v6744_v55 = vpop.f32.mrf.mxu0  ;;  %v6746_v10 = vpop.f32.mrf.mxu1  ;;  %5270 = vmatmul.mubr.bf16.gmra.mxu1 %v6183_v49  ;;  %5366 = vmatmul.mubr.bf16.gmra.mxu0 %v1113_v52  ;;  %v1970_v52 = vshll.u32 %v4631_v37, 16 }
  0xfd   : > { %5273 = vmatprep.mubr.msk.bf16.mxu1 %vm6214_vm0, %v8075_v1  ;;  %5369 = vmatprep.mubr.msk.bf16.mxu0 %vm6214_vm0, %v8075_v1 }
  0xfe   : > { %v5115_v59 = vpop.f32.mrf.mxu0  ;;  %v5159_v24 = vpop.f32.mrf.mxu1 }
 0x100   : > { %v6753_v60 = vpop.f32.mrf.mxu0  ;;  %v6755_v61 = vpop.f32.mrf.mxu1 }
 0x102   : > { %v5116_v0 = vpop.f32.mrf.mxu0  ;;  %v5160_v3 = vpop.f32.mrf.mxu1 }
 0x103   : > { %v6082_v0 = vld [vmem:[%s6268_s23 + $0x18] sm:$0xff]   ;;  %v1969_v3 = vrot.slane %v1967_v6, 1 }
 0x104   : > { %v6758_v38 = vpop.f32.mrf.mxu0  ;;  %v6760_v5 = vpop.f32.mrf.mxu1  ;;  %5274 = vmatmul.mubr.bf16.gmra.mxu1 %v6184_v58  ;;  %5370 = vmatmul.mubr.bf16.gmra.mxu0 %v1115_v63 }
 0x105   : > { %5277 = vmatprep.mubr.msk.bf16.mxu1 %vm6214_vm0, %v8075_v1  ;;  %5373 = vmatprep.mubr.msk.bf16.mxu0 %vm6214_vm0, %v8075_v1 }
 0x106   : > { %v5119_v4 = vpop.f32.mrf.mxu0  ;;  %v5163_v45 = vpop.f32.mrf.mxu1 }
 0x108   : > { %v6767_v9 = vpop.f32.mrf.mxu0  ;;  %v6769_v11 = vpop.f32.mrf.mxu1 }
 0x10a   : > { %v5120_v12 = vpop.f32.mrf.mxu0  ;;  %v5164_v62 = vpop.f32.mrf.mxu1 }
 0x10b   : > { %v6083_v12 = vld [vmem:[%s8072_s1 + $0x178] sm:$0xff]  }
 0x10c   : > { %v6772_v13 = vpop.f32.mrf.mxu0  ;;  %v6774_v25 = vpop.f32.mrf.mxu1  ;;  %5278 = vmatmul.mubr.bf16.gmra.mxu1 %v6185_v2  ;;  %5374 = vmatmul.mubr.bf16.gmra.mxu0 %v1117_v56  ;;  %v1972_v2 = vrot.slane %v1970_v52, 2  ;;  %v6092_v52 = vld [vmem:[%s8072_s1 + $0x168] sm:$0xff]  }
 0x10d   : > { %5281 = vmatprep.mubr.msk.bf16.mxu1 %vm6214_vm0, %v8075_v1  ;;  %5377 = vmatprep.mubr.msk.bf16.mxu0 %vm6214_vm0, %v8075_v1 }
 0x10e   : > { %v5123_v44 = vpop.f32.mrf.mxu0  ;;  %v5167_v16 = vpop.f32.mrf.mxu1 }
 0x10f   : > { %v1596_v44 = vrot.slane %v6082_v0, 1  ;;  %v1973_v16 = vor.u32 %v1972_v2, %v1969_v3 }
 0x110   : > { %v6781_v8 = vpop.f32.mrf.mxu0  ;;  %v6783_v17 = vpop.f32.mrf.mxu1 }
 0x112   : > { %v5124_v21 = vpop.f32.mrf.mxu0  ;;  %v5168_v19 = vpop.f32.mrf.mxu1 }
 0x113   : > { %v1984_v21 = vshrl.u32 %v6082_v0, 16  ;;  %v1987_v19 = vshll.u32 %v6082_v0, 16  ;;  %v6088_v0 = vld [vmem:[%s8072_s1 + $0x1b0] sm:$0xff]  }
 0x114   : > { %v6786_v22 = vpop.f32.mrf.mxu0  ;;  %v6788_v23 = vpop.f32.mrf.mxu1  ;;  %5282 = vmatmul.mubr.bf16.gmra.mxu1 %v6471_v57  ;;  %5378 = vmatmul.mubr.bf16.gmra.mxu0 %v1119_v18  ;;  %v6081_v57 = vld [vmem:[%s6268_s23 + $0x10] sm:$0xff]  }
 0x115   : > { %5285 = vmatprep.mubr.msk.bf16.mxu1 %vm6214_vm0, %v8075_v1  ;;  %5381 = vmatprep.mubr.msk.bf16.mxu0 %vm6214_vm0, %v8075_v1  ;;  %v1594_v36 = vrot.slane %v6081_v57, 1  ;;  %v1975_v53 = vshrl.u32 %v6081_v57, 16  ;;  %v1978_v54 = vshll.u32 %v6081_v57, 16  ;;  %v6084_v57 = vld [vmem:[%s8072_s1 + $0x1b8] sm:$0xff]  }
 0x116   : > { %v5127_v29 = vpop.f32.mrf.mxu0  ;;  %v5171_v30 = vpop.f32.mrf.mxu1 }
 0x117   : > { %v1595_v63 = vsel %vm1080_vm2, %v1593_v15, %v1594_v36  ;;  %v1977_v47 = vrot.slane %v1975_v53, 1  ;;  %v1980_v4 = vrot.slane %v1978_v54, 2 }
 0x118   : > { %v6798_v33 = vpop.f32.mrf.mxu0  ;;  %v6800_v34 = vpop.f32.mrf.mxu1 }
 0x119   : > { %v1981_v18 = vor.u32 %v1980_v4, %v1977_v47  ;;  %v6096_v47 = vld [vmem:[%s8072_s1 + $0x160] sm:$0xff]  }
 0x11a   : > { %v5128_v42 = vpop.f32.mrf.mxu0  ;;  %v5172_v43 = vpop.f32.mrf.mxu1 }
 0x11b   : > { %v1982_v37 = vsel %vm1965_vm3, %v1973_v16, %v1981_v18  ;;  %v1986_v42 = vrot.slane %v1984_v21, 1  ;;  %v1989_v43 = vrot.slane %v1987_v19, 2  ;;  %v6876_v16 = vld [vmem:[%s6268_s23 + $0x28] sm:$0xff]  }
 0x11c   : > { %v6805_v49 = vpop.f32.mrf.mxu0  ;;  %v6807_v50 = vpop.f32.mrf.mxu1  ;;  %5286 = vmatmul.mubr.bf16.gmra.mxu1 %v6079_v35  ;;  %5382 = vmatmul.mubr.bf16.gmra.mxu0 %v1121_v41  ;;  %v1597_v35 = vsel %vm1080_vm2, %v1594_v36, %v1596_v44  ;;  %v6844_v41 = vld [vmem:[%s6268_s23 + $0x20] sm:$0xff]  }
 0x11d   : > { %5385 = vmatprep.mubr.msk.bf16.mxu0 %vm6214_vm0, %v8075_v1  ;;  %5405 = vmatprep.mubr.msk.bf16.mxu1 %vm6214_vm0, %v8075_v1  ;;  %v1598_v54 = vrot.slane %v6844_v41, 1 }
 0x11e   : > { %v5131_v58 = vpop.f32.mrf.mxu0  ;;  %v5175_v20 = vpop.f32.mrf.mxu1 }
 0x11f   : > { %v1990_v58 = vor.u32 %v1989_v43, %v1986_v42  ;;  %v1993_v20 = vshrl.u32 %v6844_v41, 16  ;;  %v2005_v42 = vshll.u32 %v6876_v16, 16 }
 0x120   : > { %v6813_v59 = vpop.f32.mrf.mxu0  ;;  %v6815_v24 = vpop.f32.mrf.mxu1 }
 0x121   : > { %v1995_v21 = vrot.slane %v1993_v20, 1 }
 0x122   : > { %v5132_v45 = vpop.f32.mrf.mxu0  ;;  %v5176_v56 = vpop.f32.mrf.mxu1 }
 0x123   : > { %v1599_v56 = vsel %vm1080_vm2, %v1596_v44, %v1598_v54  ;;  %v6101_v44 = vld [vmem:[%s8072_s1 + $0x158] sm:$0xff]  }
 0x124   : > { %v6822_v62 = vpop.f32.mrf.mxu0  ;;  %v6824_v14 = vpop.f32.mrf.mxu1  ;;  %5386 = vmatmul.mubr.bf16.gmra.mxu0 %v1120_v26  ;;  %5406 = vmatmul.mubr.bf16.vlgmr.msra.gmra.mxu1 %v1595_v63  ;;  %v6087_v26 = vld [vmem:[%s8072_s1 + $0x170] sm:$0xff]   ;;  %v1996_v63 = vshll.u32 %v6844_v41, 16  ;;  %v2002_v41 = vshrl.u32 %v6876_v16, 16 }
 0x125   : > { %5409 = vmatprep.mubr.msk.bf16.mxu1 %vm6214_vm0, %v8075_v1  ;;  %5505 = vmatprep.mubr.msk.bf16.mxu0 %vm6214_vm0, %v8075_v1 }
 0x126   : > { %v5135_v27 = vpop.f32.mrf.mxu0  ;;  %v5179_v28 = vpop.f32.mrf.mxu1  ;;  %5590 = vmatpush3.bf16.msra.mxu1 %v6083_v12  ;;  %v1991_v12 = vsel %vm1965_vm3, %v1981_v18, %v1990_v58  ;;  %v1998_v19 = vrot.slane %v1996_v63, 2 }
 0x127   : > { %5591 = vmatprep.subr.bf16.mxu1 %v8075_v1 }
 0x128   : > { %v6834_v29 = vpop.f32.mrf.mxu0  ;;  %v6836_v30 = vpop.f32.mrf.mxu1 }
 0x12a   : > { %v5136_v15 = vpop.f32.mrf.mxu0  ;;  %v5180_v6 = vpop.f32.mrf.mxu1  ;;  %5592 = vmatpush3.bf16.msra.mxu1 %v6087_v26  ;;  %v6093_v26 = vld [vmem:[%s8072_s1 + $0x1a8] sm:$0xff]  }
 0x12b   : > { %5593 = vmatprep.subr.bf16.mxu1 %v8075_v1  ;;  %v6098_v6 = vld [vmem:[%s8072_s1 + $0x1a0] sm:$0xff]  }
 0x12c   : > { %v6850_v36 = vpop.f32.mrf.mxu0  ;;  %v6852_v53 = vpop.f32.mrf.mxu1  ;;  %5410 = vmatmul.mubr.bf16.gmra.mxu1 %v1597_v35  ;;  %5506 = vmatmul.mubr.bf16.vlgmr.msra.gmra.mxu0 %v1982_v37  ;;  %v1600_v37 = vrot.slane %v6876_v16, 1 }
 0x12d   : > { %5690 = vmatpush3.bf16.msra.mxu0 %v6084_v57  ;;  %5413 = vmatprep.mubr.msk.bf16.mxu1 %vm6214_vm0, %v8075_v1  ;;  %v1999_v57 = vor.u32 %v1998_v19, %v1995_v21  ;;  %v6102_v21 = vld [vmem:[%s8072_s1 + $0x198] sm:$0xff]  }
 0x12e   : > { %v5139_v3 = vpop.f32.mrf.mxu0  ;;  %v5183_v2 = vpop.f32.mrf.mxu1  ;;  %5509 = vmatprep.mubr.msk.bf16.mxu0 %vm6214_vm0, %v8075_v1  ;;  %5691 = vmatprep.subr.bf16.mxu0 %v8075_v1 }
 0x12f   : > { %5594 = vmatpush3.bf16.msra.mxu1 %v6092_v52  ;;  %v6106_v52 = vld [vmem:[%s8072_s1 + $0x150] sm:$0xff]   ;;  %v2000_v3 = vsel %vm1965_vm3, %v1990_v58, %v1999_v57 }
 0x130   : > { %v6868_v4 = vpop.f32.mrf.mxu0  ;;  %v6870_v45 = vpop.f32.mrf.mxu1  ;;  %5595 = vmatprep.subr.bf16.mxu1 %v8075_v1  ;;  %v6910_v2 = vld [vmem:[%s6268_s23 + $0x30] sm:$0xff]  }
 0x131   : > { %5692 = vmatpush3.bf16.msra.mxu0 %v6088_v0  ;;  %v1601_v0 = vsel %vm1080_vm2, %v1598_v54, %v1600_v37  ;;  %v6110_v54 = vld [vmem:[%s8072_s1 + $0x148] sm:$0xff]  }
 0x132   : > { %v5140_v27 = vpop.f32.mrf.mxu0  ;;  %v5184_v28 = vpop.f32.mrf.mxu1  ;;  %5693 = vmatprep.subr.bf16.mxu0 %v8075_v1 }
 0x133   : > { %5596 = vmatpush3.bf16.msra.mxu1 %v6096_v47  ;;  %v2004_v47 = vrot.slane %v2002_v41, 1  ;;  %v1602_v27 = vrot.slane %v6910_v2, 1 }
 0x134   : > { %v6885_v35 = vpop.f32.mrf.mxu0  ;;  %v6887_v18 = vpop.f32.mrf.mxu1  ;;  %5414 = vmatmul.mubr.bf16.gmra.mxu1 %v1599_v56  ;;  %5510 = vmatmul.mubr.bf16.gmra.mxu0 %v1991_v12  ;;  %v2007_v56 = vrot.slane %v2005_v42, 2 }
 0x135   : > { %5417 = vmatprep.mubr.msk.bf16.mxu1 %vm6214_vm0, %v8075_v1  ;;  %5513 = vmatprep.mubr.msk.bf16.mxu0 %vm6214_vm0, %v8075_v1 }
 0x136   : > { %v5143_v43 = vpop.f32.mrf.mxu0  ;;  %v5187_v15 = vpop.f32.mrf.mxu1  ;;  %5694 = vmatpush3.bf16.msra.mxu0 %v6093_v26  ;;  %5597 = vmatprep.subr.bf16.mxu1 %v8075_v1  ;;  %v2008_v28 = vor.u32 %v2007_v56, %v2004_v47  ;;  %v2011_v26 = vshrl.u32 %v6910_v2, 16 }
 0x137   : > { %5695 = vmatprep.subr.bf16.mxu0 %v8075_v1  ;;  %5598 = vmatpush3.bf16.msra.mxu1 %v6101_v44  ;;  %v2014_v44 = vshll.u32 %v6910_v2, 16  ;;  %v6107_v43 = vld [vmem:[%s8072_s1 + $0x190] sm:$0xff]   ;;  %v6115_v15 = vld [vmem:[%s8072_s1 + $0x140] sm:$0xff]  }
 0x138   : > { %v6904_v20 = vpop.f32.mrf.mxu0  ;;  %v784_v63 = vpop.f32.mrf.mxu1  ;;  %5599 = vmatprep.subr.bf16.mxu1 %v8075_v1  ;;  %v2013_v2 = vrot.slane %v2011_v26, 1 }
 0x139   : > { %v6090_v63 = vld [vmem:[%s6268_s23 + $0x38] sm:$0xff]   ;;  %v2016_v47 = vrot.slane %v2014_v44, 2 }
 0x13a   : > { %v5144_v12 = vpop.f32.mrf.mxu0  ;;  %v5188_v16 = vpop.f32.mrf.mxu1  ;;  %5696 = vmatpush3.bf16.msra.mxu0 %v6098_v6  ;;  %v2020_v44 = vshrl.u32 %v6090_v63, 16 }
 0x13b   : > { %5697 = vmatprep.subr.bf16.mxu0 %v8075_v1  ;;  %5600 = vmatpush3.bf16.msra.mxu1 %v6106_v52  ;;  %v6111_v16 = vld [vmem:[%s8072_s1 + $0x188] sm:$0xff]   ;;  %v2017_v26 = vor.u32 %v2016_v47, %v2013_v2  ;;  %v6091_v2 = vld [vmem:[%s6268_s23 + $0x40] sm:$0xff]  }
 0x13c   : > { %v6919_v19 = vpop.f32.mrf.mxu0  ;;  %v893_v58 = vpop.f32.mrf.mxu1  ;;  %5418 = vmatmul.mubr.bf16.gmra.mxu1 %v1601_v0  ;;  %5514 = vmatmul.mubr.bf16.gmra.mxu0 %v2000_v3  ;;  %v1603_v0 = vsel %vm1080_vm2, %v1600_v37, %v1602_v27  ;;  %v2009_v3 = vsel %vm1965_vm3, %v1999_v57, %v2008_v28  ;;  %v1604_v37 = vrot.slane %v6090_v63, 1 }
 0x13d   : > { %5421 = vmatprep.mubr.msk.bf16.mxu1 %vm6214_vm0, %v8075_v1  ;;  %5517 = vmatprep.mubr.msk.bf16.mxu0 %vm6214_vm0, %v8075_v1 }
 0x13e   : > { %v5147_v41 = vpop.f32.mrf.mxu0  ;;  %v5207_v42 = vpop.f32.mrf.mxu1  ;;  %5698 = vmatpush3.bf16.msra.mxu0 %v6102_v21  ;;  %5601 = vmatprep.subr.bf16.mxu1 %v8075_v1  ;;  %v894_v21 = vadd.f32 %v893_v58, %v6716_v31  ;;  %v2023_v31 = vshll.u32 %v6090_v63, 16  ;;  %v2018_v63 = vsel %vm1965_vm3, %v2008_v28, %v2017_v26 }
 0x13f   : > { %5699 = vmatprep.subr.bf16.mxu0 %v8075_v1  ;;  %5602 = vmatpush3.bf16.msra.mxu1 %v6110_v54 }
 0x140   : > { %v6936_v6 = vpop.f32.mrf.mxu0  ;;  %v896_v52 = vpop.f32.mrf.mxu1  ;;  %5603 = vmatprep.subr.bf16.mxu1 %v8075_v1 }
 0x142   : > { %v5148_v56 = vpop.f32.mrf.mxu0  ;;  %v5208_v12 = vpop.f32.mrf.mxu1  ;;  %5700 = vmatpush3.bf16.msra.mxu0 %v6107_v43  ;;  %v6116_v43 = vld [vmem:[%s8072_s1 + $0x180] sm:$0xff]  }
 0x143   : > { %5701 = vmatprep.subr.bf16.mxu0 %v8075_v1  ;;  %5604 = vmatpush3.bf16.msra.mxu1 %v6115_v15  ;;  %v897_v15 = vadd.f32 %v896_v52, %v6725_v39  ;;  %v1605_v56 = vsel %vm1080_vm2, %v1602_v27, %v1604_v37  ;;  %v2022_v12 = vrot.slane %v2020_v44, 1  ;;  %v1606_v27 = vrot.slane %v6091_v2, 1 }
 0x144   : > { %v901_v54 = vpop.f32.mrf.mxu1  ;;  %v1225_v41 = vpop.f32.mrf.mxu0  ;;  %5422 = vmatmul.mubr.bf16.gmra.mxu1 %v1603_v0  ;;  %5518 = vmatmul.mubr.bf16.gmra.mxu0 %v2009_v3  ;;  %v2029_v44 = vshrl.u32 %v6091_v2, 16 }
 0x145   : > { %v6947_v57 = vadd.f32 %v1225_v41, %v894_v21  ;;  %5425 = vmatprep.mubr.msk.bf16.mxu1 %vm6214_vm0, %v8075_v1  ;;  %5521 = vmatprep.mubr.msk.bf16.mxu0 %vm6214_vm0, %v8075_v1 }
 0x146   : > { %v5211_v58 = vpop.f32.mrf.mxu1  ;;  %v5307_v42 = vpop.f32.mrf.mxu0  ;;  %5702 = vmatpush3.bf16.msra.mxu0 %v6111_v16  ;;  %5789 = vmatprep.subr.bf16.mxu1 %v8075_v1  ;;  %v2025_v16 = vrot.slane %v2023_v31, 2  ;;  %v2032_v31 = vshll.u32 %v6091_v2, 16 }
 0x147   : > { %5703 = vmatprep.subr.bf16.mxu0 %v8075_v1  ;;  %v902_v58 = vadd.f32 %v901_v54, %v6730_v46 }
 0x148   : > { %v904_v0 = vpop.f32.mrf.mxu1  ;;  %v1228_v3 = vpop.f32.mrf.mxu0  ;;  %v2026_v28 = vor.u32 %v2025_v16, %v2022_v12 }
 0x149   : > { %v6961_v47 = vadd.f32 %v1228_v3, %v897_v15 }
 0x14a   : > { %v5212_v21 = vpop.f32.mrf.mxu1  ;;  %v5308_v41 = vpop.f32.mrf.mxu0  ;;  %5704 = vmatpush3.bf16.msra.mxu0 %v6116_v43  ;;  %v905_v43 = vadd.f32 %v904_v0, %v6739_v51 }
 0x14b   : > { %5889 = vmatprep.subr.bf16.mxu0 %v8075_v1  ;;  %v2027_v41 = vsel %vm1965_vm3, %v2017_v26, %v2026_v28 }
 0x14c   : > { %v909_v39 = vpop.f32.mrf.mxu1  ;;  %v1233_v52 = vpop.f32.mrf.mxu0  ;;  %5426 = vmatmul.mubr.bf16.gmra.mxu1 %v1605_v56  ;;  %5522 = vmatmul.mubr.bf16.gmra.mxu0 %v2018_v63  ;;  %v1607_v56 = vsel %vm1080_vm2, %v1604_v37, %v1606_v27  ;;  %v6094_v63 = vld [vmem:[%s6268_s23 + $0x48] sm:$0xff]   ;;  %v8079_v37 = vmov 0.0  }
 0x14d   : > { %v6966_v42 = vadd.f32 %v1233_v52, %v902_v58  ;;  %5429 = vmatprep.mubr.msk.bf16.mxu1 %vm6214_vm0, %v8075_v1  ;;  %5525 = vmatprep.mubr.msk.bf16.mxu0 %vm6214_vm0, %v8075_v1  ;;  %v2031_v58 = vrot.slane %v2029_v44, 1  ;;  %v2034_v52 = vrot.slane %v2032_v31, 2  ;;  %v910_v12 = vadd.f32 %v909_v39, %v6744_v55 }
 0x14e   : > { %v5215_v46 = vpop.f32.mrf.mxu1  ;;  %v5311_v54 = vpop.f32.mrf.mxu0  ;;  %v1608_v51 = vrot.slane %v6094_v63, 1  ;;  %v2038_v44 = vshrl.u32 %v6094_v63, 16 }
 0x14f   : > { %8077 = vst [vmem:[#allocation2_spill] sm:$0xff] %v6966_v42  ;;  %v2035_v26 = vor.u32 %v2034_v52, %v2031_v58 }
 0x150   : > { %v912_v15 = vpop.f32.mrf.mxu1  ;;  %v1236_v3 = vpop.f32.mrf.mxu0  ;;  %v1609_v54 = vsel %vm1080_vm2, %v1606_v27, %v1608_v51 }
 0x151   : > { %v6975_v21 = vadd.f32 %v1236_v3, %v905_v43  ;;  %v913_v55 = vadd.f32 %v912_v15, %v6753_v60  ;;  %v6095_v43 = vld [vmem:[%s6268_s23 + $0x50] sm:$0xff]  }
 0x152   : > { %v5216_v42 = vpop.f32.mrf.mxu1  ;;  %v5312_v1 = vpop.f32.mrf.mxu0  ;;  %v1610_v60 = vrot.slane %v6095_v43, 1 }
 0x153   : > { %v2041_v42 = vshll.u32 %v6094_v63, 16 }
 0x154   : > { %v917_v2 = vpop.f32.mrf.mxu1  ;;  %v1241_v16 = vpop.f32.mrf.mxu0  ;;  %5430 = vmatmul.mubr.bf16.gmra.mxu1 %v1607_v56  ;;  %5526 = vmatmul.mubr.bf16.gmra.mxu0 %v2027_v41  ;;  %v2036_v56 = vsel %vm1965_vm3, %v2026_v28, %v2035_v26  ;;  %v2040_v41 = vrot.slane %v2038_v44, 1  ;;  %v2047_v28 = vshrl.u32 %v6095_v43, 16  ;;  %v2050_v44 = vshll.u32 %v6095_v43, 16 }
 0x155   : > { %v6979_v0 = vadd.f32 %v1241_v16, %v910_v12  ;;  %5433 = vmatprep.mubr.msk.bf16.mxu1 %vm6214_vm0, %v8079_v37  ;;  %5529 = vmatprep.mubr.msk.bf16.mxu0 %vm6214_vm0, %v8079_v37  ;;  %v2043_v12 = vrot.slane %v2041_v42, 2  ;;  %v918_v58 = vadd.f32 %v917_v2, %v6758_v38 }
 0x156   : > { %v5219_v1 = vpop.f32.mrf.mxu1  ;;  %v5315_v31 = vpop.f32.mrf.mxu0 }
 0x157   : > { %8078 = vst [vmem:[#allocation3_spill] sm:$0xff] %v6979_v0  ;;  %v2044_v27 = vor.u32 %v2043_v12, %v2040_v41  ;;  %v1611_v31 = vsel %vm1080_vm2, %v1608_v51, %v1610_v60 }
 0x158   : > { %v920_v39 = vpop.f32.mrf.mxu1  ;;  %v1244_v46 = vpop.f32.mrf.mxu0 }
 0x159   : > { %v6988_v3 = vadd.f32 %v1244_v46, %v913_v55  ;;  %v921_v38 = vadd.f32 %v920_v39, %v6767_v9  ;;  %v6097_v55 = vld [vmem:[%s6268_s23 + $0x58] sm:$0xff]  }
 0x15a   : > { %v5220_v16 = vpop.f32.mrf.mxu1  ;;  %v5316_v0 = vpop.f32.mrf.mxu0  ;;  %v1612_v9 = vrot.slane %v6097_v55, 1 }
 0x15b   : > { %v2052_v16 = vrot.slane %v2050_v44, 2 }
 0x15c   : > { %v925_v63 = vpop.f32.mrf.mxu1  ;;  %v1249_v52 = vpop.f32.mrf.mxu0  ;;  %5434 = vmatmul.mubr.bf16.gmra.mxu1 %v1609_v54  ;;  %5530 = vmatmul.mubr.bf16.gmra.mxu0 %v2036_v56  ;;  %v2045_v54 = vsel %vm1965_vm3, %v2035_v26, %v2044_v27  ;;  %v2049_v56 = vrot.slane %v2047_v28, 1  ;;  %v2056_v26 = vshrl.u32 %v6097_v55, 16  ;;  %v2059_v28 = vshll.u32 %v6097_v55, 16 }
 0x15d   : > { %v6992_v15 = vadd.f32 %v1249_v52, %v918_v58  ;;  %5437 = vmatprep.mubr.msk.bf16.mxu1 %vm6214_vm0, %v8079_v37  ;;  %5533 = vmatprep.mubr.msk.bf16.mxu0 %vm6214_vm0, %v8079_v37  ;;  %v926_v41 = vadd.f32 %v925_v63, %v6772_v13 }
 0x15e   : > { %v5223_v0 = vpop.f32.mrf.mxu1  ;;  %v5319_v42 = vpop.f32.mrf.mxu0  ;;  %v2053_v51 = vor.u32 %v2052_v16, %v2049_v56 }
 0x160   : > { %v928_v2 = vpop.f32.mrf.mxu1  ;;  %v1252_v1 = vpop.f32.mrf.mxu0 }
 0x161   : > { %v7001_v46 = vadd.f32 %v1252_v1, %v921_v38  ;;  %v929_v13 = vadd.f32 %v928_v2, %v6781_v8  ;;  %v1613_v38 = vsel %vm1080_vm2, %v1610_v60, %v1612_v9  ;;  %v6099_v1 = vld [vmem:[%s6268_s23 + $0x60] sm:$0xff]  }
 0x162   : > { %v5224_v58 = vpop.f32.mrf.mxu1  ;;  %v5320_v52 = vpop.f32.mrf.mxu0  ;;  %v1614_v8 = vrot.slane %v6099_v1, 1 }
 0x163   : > { %v2058_v58 = vrot.slane %v2056_v26, 1  ;;  %v2061_v52 = vrot.slane %v2059_v28, 2  ;;  %v2068_v26 = vshll.u32 %v6099_v1, 16 }
 0x164   : > { %v933_v43 = vpop.f32.mrf.mxu1  ;;  %v1257_v12 = vpop.f32.mrf.mxu0  ;;  %5438 = vmatmul.mubr.bf16.gmra.mxu1 %v1611_v31  ;;  %5534 = vmatmul.mubr.bf16.gmra.mxu0 %v2045_v54  ;;  %v2054_v54 = vsel %vm1965_vm3, %v2044_v27, %v2053_v51  ;;  %v2065_v27 = vshrl.u32 %v6099_v1, 16 }
 0x165   : > { %v7005_v39 = vadd.f32 %v1257_v12, %v926_v41  ;;  %5441 = vmatprep.mubr.msk.bf16.mxu1 %vm6214_vm0, %v8079_v37  ;;  %5537 = vmatprep.mubr.msk.bf16.mxu0 %vm6214_vm0, %v8079_v37  ;;  %v934_v56 = vadd.f32 %v933_v43, %v6786_v22  ;;  %v2062_v60 = vor.u32 %v2061_v52, %v2058_v58 }
 0x166   : > { %v5227_v44 = vpop.f32.mrf.mxu1  ;;  %v5323_v0 = vpop.f32.mrf.mxu0 }
 0x168   : > { %v936_v63 = vpop.f32.mrf.mxu1  ;;  %v1260_v42 = vpop.f32.mrf.mxu0 }
 0x169   : > { %v7014_v31 = vadd.f32 %v1260_v42, %v929_v13  ;;  %v937_v22 = vadd.f32 %v936_v63, %v6798_v33  ;;  %v1615_v13 = vsel %vm1080_vm2, %v1612_v9, %v1614_v8  ;;  %v6100_v42 = vld [vmem:[%s6268_s23 + $0x68] sm:$0xff]  }
 0x16a   : > { %v5228_v41 = vpop.f32.mrf.mxu1  ;;  %v5324_v12 = vpop.f32.mrf.mxu0  ;;  %v1616_v33 = vrot.slane %v6100_v42, 1 }
 0x16b   : > { %v2067_v41 = vrot.slane %v2065_v27, 1  ;;  %v2070_v12 = vrot.slane %v2068_v26, 2  ;;  %v2077_v27 = vshll.u32 %v6100_v42, 16 }
 0x16c   : > { %v941_v55 = vpop.f32.mrf.mxu1  ;;  %v1265_v16 = vpop.f32.mrf.mxu0  ;;  %5442 = vmatmul.mubr.bf16.gmra.mxu1 %v1613_v38  ;;  %5538 = vmatmul.mubr.bf16.gmra.mxu0 %v2054_v54  ;;  %v2063_v54 = vsel %vm1965_vm3, %v2053_v51, %v2062_v60  ;;  %v2074_v51 = vshrl.u32 %v6100_v42, 16 }
 0x16d   : > { %v7018_v2 = vadd.f32 %v1265_v16, %v934_v56  ;;  %5445 = vmatprep.mubr.msk.bf16.mxu1 %vm6214_vm0, %v8079_v37  ;;  %5541 = vmatprep.mubr.msk.bf16.mxu0 %vm6214_vm0, %v8079_v37  ;;  %v942_v58 = vadd.f32 %v941_v55, %v6805_v49  ;;  %v2071_v9 = vor.u32 %v2070_v12, %v2067_v41 }
 0x16e   : > { %v5231_v28 = vpop.f32.mrf.mxu1  ;;  %v5327_v44 = vpop.f32.mrf.mxu0 }
 0x170   : > { %v944_v43 = vpop.f32.mrf.mxu1  ;;  %v1268_v0 = vpop.f32.mrf.mxu0 }
 0x171   : > { %v7027_v38 = vadd.f32 %v1268_v0, %v937_v22  ;;  %v945_v49 = vadd.f32 %v944_v43, %v6813_v59  ;;  %v1617_v22 = vsel %vm1080_vm2, %v1614_v8, %v1616_v33  ;;  %v6103_v0 = vld [vmem:[%s6268_s23 + $0x70] sm:$0xff]  }
 0x172   : > { %v5232_v56 = vpop.f32.mrf.mxu1  ;;  %v5328_v16 = vpop.f32.mrf.mxu0  ;;  %v1618_v59 = vrot.slane %v6103_v0, 1 }
 0x173   : > { %v2076_v56 = vrot.slane %v2074_v51, 1  ;;  %v2079_v16 = vrot.slane %v2077_v27, 2  ;;  %v2086_v51 = vshll.u32 %v6103_v0, 16 }
 0x174   : > { %v949_v1 = vpop.f32.mrf.mxu1  ;;  %v1273_v52 = vpop.f32.mrf.mxu0  ;;  %5446 = vmatmul.mubr.bf16.gmra.mxu1 %v1615_v13  ;;  %5542 = vmatmul.mubr.bf16.gmra.mxu0 %v2063_v54  ;;  %v2072_v54 = vsel %vm1965_vm3, %v2062_v60, %v2071_v9  ;;  %v2083_v60 = vshrl.u32 %v6103_v0, 16 }
 0x175   : > { %v7031_v63 = vadd.f32 %v1273_v52, %v942_v58  ;;  %5449 = vmatprep.mubr.msk.bf16.mxu1 %vm6214_vm0, %v8079_v37  ;;  %5545 = vmatprep.mubr.msk.bf16.mxu0 %vm6214_vm0, %v8079_v37  ;;  %v950_v41 = vadd.f32 %v949_v1, %v6822_v62  ;;  %v2080_v8 = vor.u32 %v2079_v16, %v2076_v56 }
 0x176   : > { %v5235_v26 = vpop.f32.mrf.mxu1  ;;  %v5331_v28 = vpop.f32.mrf.mxu0 }
 0x178   : > { %v952_v55 = vpop.f32.mrf.mxu1  ;;  %v1276_v44 = vpop.f32.mrf.mxu0 }
 0x179   : > { %v7040_v13 = vadd.f32 %v1276_v44, %v945_v49  ;;  %v953_v62 = vadd.f32 %v952_v55, %v6834_v29  ;;  %v1619_v49 = vsel %vm1080_vm2, %v1616_v33, %v1618_v59  ;;  %v6104_v44 = vld [vmem:[%s6268_s23 + $0x78] sm:$0xff]  }
 0x17a   : > { %v5236_v58 = vpop.f32.mrf.mxu1  ;;  %v5332_v52 = vpop.f32.mrf.mxu0  ;;  %v1620_v29 = vrot.slane %v6104_v44, 1 }
 0x17b   : > { %v2085_v58 = vrot.slane %v2083_v60, 1  ;;  %v2088_v52 = vrot.slane %v2086_v51, 2  ;;  %v2095_v60 = vshll.u32 %v6104_v44, 16 }
 0x17c   : > { %v957_v42 = vpop.f32.mrf.mxu1  ;;  %v1281_v12 = vpop.f32.mrf.mxu0  ;;  %5450 = vmatmul.mubr.bf16.gmra.mxu1 %v1617_v22  ;;  %5546 = vmatmul.mubr.bf16.gmra.mxu0 %v2072_v54  ;;  %v2081_v54 = vsel %vm1965_vm3, %v2071_v9, %v2080_v8  ;;  %v2092_v9 = vshrl.u32 %v6104_v44, 16 }
 0x17d   : > { %v7044_v43 = vadd.f32 %v1281_v12, %v950_v41  ;;  %5453 = vmatprep.mubr.msk.bf16.mxu1 %vm6214_vm0, %v8079_v37  ;;  %5549 = vmatprep.mubr.msk.bf16.mxu0 %vm6214_vm0, %v8079_v37  ;;  %v958_v56 = vadd.f32 %v957_v42, %v6850_v36  ;;  %v2089_v33 = vor.u32 %v2088_v52, %v2085_v58 }
 0x17e   : > { %v5239_v27 = vpop.f32.mrf.mxu1  ;;  %v5335_v26 = vpop.f32.mrf.mxu0 }
 0x180   : > { %v960_v1 = vpop.f32.mrf.mxu1  ;;  %v1284_v28 = vpop.f32.mrf.mxu0 }
 0x181   : > { %v7053_v22 = vadd.f32 %v1284_v28, %v953_v62  ;;  %v961_v36 = vadd.f32 %v960_v1, %v6868_v4  ;;  %v1621_v62 = vsel %vm1080_vm2, %v1618_v59, %v1620_v29  ;;  %v6105_v28 = vld [vmem:[%s6268_s23 + $0x80] sm:$0xff]  }
 0x182   : > { %v5240_v41 = vpop.f32.mrf.mxu1  ;;  %v5336_v12 = vpop.f32.mrf.mxu0  ;;  %v1622_v4 = vrot.slane %v6105_v28, 1 }
 0x183   : > { %v2094_v41 = vrot.slane %v2092_v9, 1  ;;  %v2097_v12 = vrot.slane %v2095_v60, 2  ;;  %v2104_v9 = vshll.u32 %v6105_v28, 16 }
 0x184   : > { %v965_v0 = vpop.f32.mrf.mxu1  ;;  %v1289_v16 = vpop.f32.mrf.mxu0  ;;  %5454 = vmatmul.mubr.bf16.gmra.mxu1 %v1619_v49  ;;  %5550 = vmatmul.mubr.bf16.gmra.mxu0 %v2081_v54  ;;  %v2090_v54 = vsel %vm1965_vm3, %v2080_v8, %v2089_v33  ;;  %v2101_v8 = vshrl.u32 %v6105_v28, 16 }
 0x185   : > { %v7057_v55 = vadd.f32 %v1289_v16, %v958_v56  ;;  %5457 = vmatprep.mubr.msk.bf16.mxu1 %vm6214_vm0, %v8079_v37  ;;  %5553 = vmatprep.mubr.msk.bf16.mxu0 %vm6214_vm0, %v8079_v37  ;;  %v966_v58 = vadd.f32 %v965_v0, %v6885_v35  ;;  %v2098_v59 = vor.u32 %v2097_v12, %v2094_v41 }
 0x186   : > { %v5243_v51 = vpop.f32.mrf.mxu1  ;;  %v5339_v27 = vpop.f32.mrf.mxu0 }
 0x188   : > { %v968_v42 = vpop.f32.mrf.mxu1  ;;  %v1292_v26 = vpop.f32.mrf.mxu0 }
 0x189   : > { %v7066_v49 = vadd.f32 %v1292_v26, %v961_v36  ;;  %v969_v35 = vadd.f32 %v968_v42, %v6904_v20  ;;  %v1623_v36 = vsel %vm1080_vm2, %v1620_v29, %v1622_v4  ;;  %v6108_v26 = vld [vmem:[%s6268_s23 + $0x88] sm:$0xff]  }
 0x18a   : > { %v5244_v56 = vpop.f32.mrf.mxu1  ;;  %v5340_v16 = vpop.f32.mrf.mxu0  ;;  %v1624_v20 = vrot.slane %v6108_v26, 1 }
 0x18b   : > { %v2103_v56 = vrot.slane %v2101_v8, 1  ;;  %v2106_v16 = vrot.slane %v2104_v9, 2  ;;  %v2113_v8 = vshll.u32 %v6108_v26, 16 }
 0x18c   : > { %v973_v44 = vpop.f32.mrf.mxu1  ;;  %v1297_v52 = vpop.f32.mrf.mxu0  ;;  %5458 = vmatmul.mubr.bf16.gmra.mxu1 %v1621_v62  ;;  %5554 = vmatmul.mubr.bf16.gmra.mxu0 %v2090_v54  ;;  %v2099_v54 = vsel %vm1965_vm3, %v2089_v33, %v2098_v59  ;;  %v2110_v33 = vshrl.u32 %v6108_v26, 16 }
 0x18d   : > { %v7070_v1 = vadd.f32 %v1297_v52, %v966_v58  ;;  %5461 = vmatprep.mubr.msk.bf16.mxu1 %vm6214_vm0, %v8079_v37  ;;  %5557 = vmatprep.mubr.msk.bf16.mxu0 %vm6214_vm0, %v8079_v37  ;;  %v974_v41 = vadd.f32 %v973_v44, %v6919_v19  ;;  %v2107_v29 = vor.u32 %v2106_v16, %v2103_v56 }
 0x18e   : > { %v5247_v60 = vpop.f32.mrf.mxu1  ;;  %v5343_v51 = vpop.f32.mrf.mxu0 }
 0x190   : > { %v976_v0 = vpop.f32.mrf.mxu1  ;;  %v1300_v27 = vpop.f32.mrf.mxu0 }
 0x191   : > { %v7079_v62 = vadd.f32 %v1300_v27, %v969_v35  ;;  %v977_v19 = vadd.f32 %v976_v0, %v6936_v6  ;;  %v1625_v35 = vsel %vm1080_vm2, %v1622_v4, %v1624_v20  ;;  %v6109_v27 = vld [vmem:[%s6268_s23 + $0x90] sm:$0xff]  }
 0x192   : > { %v5248_v58 = vpop.f32.mrf.mxu1  ;;  %v5344_v52 = vpop.f32.mrf.mxu0  ;;  %v1626_v6 = vrot.slane %v6109_v27, 1 }
 0x193   : > { %v2112_v58 = vrot.slane %v2110_v33, 1  ;;  %v2115_v52 = vrot.slane %v2113_v8, 2  ;;  %v2122_v33 = vshll.u32 %v6109_v27, 16 }
 0x194   : > { %v981_v28 = vpop.f32.mrf.mxu1  ;;  %v1305_v12 = vpop.f32.mrf.mxu0  ;;  %5462 = vmatmul.mubr.bf16.gmra.mxu1 %v1623_v36  ;;  %5558 = vmatmul.mubr.bf16.gmra.mxu0 %v2099_v54  ;;  %v2108_v54 = vsel %vm1965_vm3, %v2098_v59, %v2107_v29  ;;  %v2119_v59 = vshrl.u32 %v6109_v27, 16 }
 0x195   : > { %v7083_v42 = vadd.f32 %v1305_v12, %v974_v41  ;;  %5465 = vmatprep.mubr.msk.bf16.mxu1 %vm6214_vm0, %v8079_v37  ;;  %5561 = vmatprep.mubr.msk.bf16.mxu0 %vm6214_vm0, %v8079_v37  ;;  %v982_v56 = vadd.f32 %v981_v28, %v6718_v32  ;;  %v2116_v4 = vor.u32 %v2115_v52, %v2112_v58 }
 0x196   : > { %v5251_v9 = vpop.f32.mrf.mxu1  ;;  %v5347_v60 = vpop.f32.mrf.mxu0 }
 0x198   : > { %v984_v44 = vpop.f32.mrf.mxu1  ;;  %v1308_v51 = vpop.f32.mrf.mxu0 }
 0x199   : > { %v7092_v36 = vadd.f32 %v1308_v51, %v977_v19  ;;  %v985_v32 = vadd.f32 %v984_v44, %v6727_v40  ;;  %v1627_v19 = vsel %vm1080_vm2, %v1624_v20, %v1626_v6  ;;  %v6112_v51 = vld [vmem:[%s6268_s23 + $0x98] sm:$0xff]  }
 0x19a   : > { %v5252_v41 = vpop.f32.mrf.mxu1  ;;  %v5348_v12 = vpop.f32.mrf.mxu0  ;;  %v1628_v40 = vrot.slane %v6112_v51, 1 }
 0x19b   : > { %v2121_v41 = vrot.slane %v2119_v59, 1  ;;  %v2124_v12 = vrot.slane %v2122_v33, 2  ;;  %v2131_v59 = vshll.u32 %v6112_v51, 16 }
 0x19c   : > { %v989_v26 = vpop.f32.mrf.mxu1  ;;  %v1313_v16 = vpop.f32.mrf.mxu0  ;;  %5466 = vmatmul.mubr.bf16.gmra.mxu1 %v1625_v35  ;;  %5562 = vmatmul.mubr.bf16.gmra.mxu0 %v2108_v54  ;;  %v2117_v54 = vsel %vm1965_vm3, %v2107_v29, %v2116_v4  ;;  %v2128_v29 = vshrl.u32 %v6112_v51, 16 }
 0x19d   : > { %v7096_v0 = vadd.f32 %v1313_v16, %v982_v56  ;;  %5469 = vmatprep.mubr.msk.bf16.mxu1 %vm6214_vm0, %v8079_v37  ;;  %5565 = vmatprep.mubr.msk.bf16.mxu0 %vm6214_vm0, %v8079_v37  ;;  %v990_v58 = vadd.f32 %v989_v26, %v6732_v48  ;;  %v2125_v20 = vor.u32 %v2124_v12, %v2121_v41 }
 0x19e   : > { %v5255_v8 = vpop.f32.mrf.mxu1  ;;  %v5351_v9 = vpop.f32.mrf.mxu0 }
 0x1a0   : > { %v992_v28 = vpop.f32.mrf.mxu1  ;;  %v1316_v60 = vpop.f32.mrf.mxu0 }
 0x1a1   : > { %v7105_v35 = vadd.f32 %v1316_v60, %v985_v32  ;;  %v993_v48 = vadd.f32 %v992_v28, %v6741_v7  ;;  %v1629_v32 = vsel %vm1080_vm2, %v1626_v6, %v1628_v40  ;;  %v7118_v60 = vld [vmem:[%s6268_s23 + $0xa0] sm:$0xff]  }
 0x1a2   : > { %v5256_v56 = vpop.f32.mrf.mxu1  ;;  %v5352_v16 = vpop.f32.mrf.mxu0  ;;  %v1630_v7 = vrot.slane %v7118_v60, 1  ;;  %v2137_v28 = vshrl.u32 %v7118_v60, 16 }
 0x1a3   : > { %v2130_v56 = vrot.slane %v2128_v29, 1  ;;  %v2133_v16 = vrot.slane %v2131_v59, 2 }
 0x1a4   : > { %v997_v27 = vpop.f32.mrf.mxu1  ;;  %v1321_v52 = vpop.f32.mrf.mxu0  ;;  %5470 = vmatmul.mubr.bf16.gmra.mxu1 %v1627_v19  ;;  %5566 = vmatmul.mubr.bf16.gmra.mxu0 %v2117_v54  ;;  %v2126_v54 = vsel %vm1965_vm3, %v2116_v4, %v2125_v20 }
 0x1a5   : > { %v7109_v44 = vadd.f32 %v1321_v52, %v990_v58  ;;  %5473 = vmatprep.mubr.msk.bf16.mxu1 %vm6214_vm0, %v8079_v37  ;;  %5569 = vmatprep.mubr.msk.bf16.mxu0 %vm6214_vm0, %v8079_v37  ;;  %v998_v51 = vadd.f32 %v997_v27, %v6746_v10  ;;  %v2134_v4 = vor.u32 %v2133_v16, %v2130_v56  ;;  %v2140_v10 = vshll.u32 %v7118_v60, 16  ;;  %v7140_v56 = vld [vmem:[%s6268_s23 + $0xa8] ss:$0 sps:$4 sm:$0xff]  }
 0x1a6   : > { %v5259_v33 = vpop.f32.mrf.mxu1  ;;  %v5355_v8 = vpop.f32.mrf.mxu0 }
 0x1a8   : > { %v1000_v26 = vpop.f32.mrf.mxu1  ;;  %v1324_v9 = vpop.f32.mrf.mxu0 }
 0x1a9   : > { %v7120_v19 = vadd.f32 %v1324_v9, %v993_v48  ;;  %v1001_v59 = vadd.f32 %v1000_v26, %v6755_v61  ;;  %v1631_v48 = vsel %vm1080_vm2, %v1628_v40, %v1630_v7  ;;  %v6114_v9 = vld [vmem:[%s6268_s23 + $0xa8] ss:$0 sps:$4 sm:$0x77]  }
 0x1aa   : > { %v5260_v58 = vpop.f32.mrf.mxu1  ;;  %v5356_v41 = vpop.f32.mrf.mxu0  ;;  %v1632_v61 = vrot.slane %v6114_v9, 1 }
 0x1ab   : > { %v2139_v58 = vrot.slane %v2137_v28, 1  ;;  %v2142_v41 = vrot.slane %v2140_v10, 2  ;;  %v2149_v28 = vshll.u32 %v7140_v56, 16 }
 0x1ac   : > { %v1005_v12 = vpop.f32.mrf.mxu1  ;;  %v1329_v52 = vpop.f32.mrf.mxu0  ;;  %5474 = vmatmul.mubr.bf16.gmra.mxu1 %v1629_v32  ;;  %5570 = vmatmul.mubr.bf16.gmra.mxu0 %v2126_v54  ;;  %v2135_v54 = vsel %vm1965_vm3, %v2125_v20, %v2134_v4  ;;  %v2146_v20 = vshrl.u32 %v7140_v56, 16 }
 0x1ad   : > { %v7125_v6 = vadd.f32 %v1329_v52, %v998_v51  ;;  %5477 = vmatprep.mubr.msk.bf16.mxu1 %vm6214_vm0, %v8079_v37  ;;  %5573 = vmatprep.mubr.msk.bf16.mxu0 %vm6214_vm0, %v8079_v37  ;;  %v1006_v52 = vadd.f32 %v1005_v12, %v6760_v5  ;;  %v2143_v40 = vor.u32 %v2142_v41, %v2139_v58 }
 0x1ae   : > { %v5263_v27 = vpop.f32.mrf.mxu1  ;;  %v5359_v29 = vpop.f32.mrf.mxu0 }
 0x1b0   : > { %v1008_v33 = vpop.f32.mrf.mxu1  ;;  %v1332_v8 = vpop.f32.mrf.mxu0 }
 0x1b1   : > { %v7136_v32 = vadd.f32 %v1332_v8, %v1001_v59  ;;  %v1009_v12 = vadd.f32 %v1008_v33, %v6769_v11 }
 0x1b2   : > { %v5264_v16 = vpop.f32.mrf.mxu1  ;;  %v5360_v51 = vpop.f32.mrf.mxu0 }
 0x1b3   : > { %v2148_v16 = vrot.slane %v2146_v20, 1  ;;  %v2151_v51 = vrot.slane %v2149_v28, 2  ;;  %v2464_v20 = vld [vmem:[%s6268_s23 + $0x8] sm:$0xc] }
 0x1b4   : > { %v1013_v27 = vpop.f32.mrf.mxu1  ;;  %v1337_v29 = vpop.f32.mrf.mxu0  ;;  %5478 = vmatmul.mubr.bf16.gmra.mxu1 %v1631_v48  ;;  %5574 = vmatmul.mubr.bf16.gmra.mxu0 %v2135_v54  ;;  %v1633_v48 = vsel %vm1080_vm2, %v1630_v7, %v1632_v61  ;;  %v2144_v54 = vsel %vm1965_vm3, %v2134_v4, %v2143_v40 }
 0x1b5   : > { %v7143_v26 = vadd.f32 %v1337_v29, %v1006_v52  ;;  %5481 = vmatprep.mubr.msk.bf16.mxu1 %vm6214_vm0, %v8079_v37  ;;  %5577 = vmatprep.mubr.msk.bf16.mxu0 %vm6214_vm0, %v8079_v37  ;;  %v1014_v52 = vadd.f32 %v1013_v27, %v6774_v25  ;;  %v2152_v7 = vor.u32 %v2151_v51, %v2148_v16 }
 0x1b6   : > { %v5267_v10 = vpop.f32.mrf.mxu1  ;;  %v5363_v5 = vpop.f32.mrf.mxu0 }
 0x1b8   : > { %v1016_v59 = vpop.f32.mrf.mxu1  ;;  %v1340_v8 = vpop.f32.mrf.mxu0 }
 0x1b9   : > { %v7153_v9 = vadd.f32 %v1340_v8, %v1009_v12  ;;  %v1017_v28 = vadd.f32 %v1016_v59, %v6783_v17  ;;  %v2153_v12 = vsel %vm1965_vm3, %v2143_v40, %v2152_v7  ;;  %v6186_v8 = vld [vmem:[%s6268_s23 + $0xc] sm:$0xf]  ;;  %v6187_v59 = vld [vmem:[%s6268_s23 + $0x10] sm:$0xff]  }
 0x1ba   : > { %v5268_v58 = vpop.f32.mrf.mxu1  ;;  %v5364_v41 = vpop.f32.mrf.mxu0  ;;  %v2487_v51 = vrot.slane %v6187_v59, 2 }
 0x1bc   : > { %v1021_v29 = vpop.f32.mrf.mxu1  ;;  %v1345_v10 = vpop.f32.mrf.mxu0  ;;  %5482 = vmatmul.mubr.bf16.gmra.mxu1 %v1633_v48  ;;  %5578 = vmatmul.mubr.bf16.gmra.mxu0 %v2144_v54  ;;  %v4701_v48 = vcombine.low %v2464_v20, %v6186_v8 }
 0x1bd   : > { %v7157_v11 = vadd.f32 %v1345_v10, %v1014_v52  ;;  %5485 = vmatprep.mubr.msk.bf16.mxu1 %vm6214_vm0, %v8079_v37  ;;  %5581 = vmatprep.mubr.msk.bf16.mxu0 %vm6214_vm0, %v8079_v37  ;;  %v1022_v41 = vadd.f32 %v1021_v29, %v6788_v23 }
 0x1be   : > { %v5271_v4 = vpop.f32.mrf.mxu1  ;;  %v5367_v33 = vpop.f32.mrf.mxu0  ;;  %v2486_v40 = vrot.slane %v4701_v48, 2  ;;  %v6121_v48 = vld [vmem:[%s8072_s1 + $0x1f8] sm:$0xff]  }
 0x1c0   : > { %v1024_v25 = vpop.f32.mrf.mxu1  ;;  %v1348_v27 = vpop.f32.mrf.mxu0  ;;  %v2488_v20 = vsel %vm2485_vm4, %v2486_v40, %v2487_v51 }
 0x1c1   : > { %v7165_v5 = vadd.f32 %v1348_v27, %v1017_v28  ;;  %v1025_v23 = vadd.f32 %v1024_v25, %v6800_v34  ;;  %v6119_v28 = vld [vmem:[%s6268_s23 + $0x10] sm:$0xfc]   ;;  %v6120_v27 = vld [vmem:[%s6268_s23 + $0x18] sm:$0xff]  }
 0x1c2   : > { %v5272_v54 = vpop.f32.mrf.mxu1  ;;  %v5368_v58 = vpop.f32.mrf.mxu0  ;;  %v6188_v25 = vld [vmem:[%s6268_s23 + $0x18] sm:$0xff]   ;;  %v2998_v40 = vrot.slane %v6119_v28, 2  ;;  %v2999_v59 = vrot.slane %v6120_v27, 2 }
 0x1c3   : > { %v6122_v27 = vld [vmem:[%s8072_s1 + $0x238] sm:$0xff]  }
 0x1c4   : > { %v1029_v52 = vpop.f32.mrf.mxu1  ;;  %v1353_v16 = vpop.f32.mrf.mxu0  ;;  %5486 = vmatmul.mubr.bf16.gmra.mxu1 %v1632_v61  ;;  %5582 = vmatmul.mubr.bf16.gmra.mxu0 %v2153_v12  ;;  %v3000_v28 = vsel %vm2485_vm4, %v2998_v40, %v2999_v59 }
 0x1c5   : > { %v7170_v17 = vadd.f32 %v1353_v16, %v1022_v41  ;;  %5585 = vmatprep.mubr.msk.bf16.mxu0 %vm6214_vm0, %v8079_v37  ;;  %5605 = vmatprep.mubr.msk.bf16.mxu1 %vm6214_vm0, %v8079_v37  ;;  %v1030_v54 = vadd.f32 %v1029_v52, %v6807_v50  ;;  %v2489_v16 = vrot.slane %v6188_v25, 2  ;;  %v6125_v50 = vld [vmem:[%s8072_s1 + $0x1f0] sm:$0xff]   ;;  %v6189_v25 = vld [vmem:[%s6268_s23 + $0x20] sm:$0xff]  }
 0x1c6   : > { %v5275_v10 = vpop.f32.mrf.mxu1  ;;  %v5371_v4 = vpop.f32.mrf.mxu0  ;;  %v2491_v40 = vrot.slane %v6189_v25, 2  ;;  %v6190_v25 = vld [vmem:[%s6268_s23 + $0x28] sm:$0xff]  }
 0x1c8   : > { %v1032_v61 = vpop.f32.mrf.mxu1  ;;  %v1356_v29 = vpop.f32.mrf.mxu0 }
 0x1c9   : > { %v7178_v33 = vadd.f32 %v1356_v29, %v1025_v23 }
 0x1ca   : > { %v5276_v12 = vpop.f32.mrf.mxu1  ;;  %v5372_v8 = vpop.f32.mrf.mxu0 }
 0x1cb   : > { %v7207_v12 = vld [vmem:[%s6268_s23 + $0x20] sm:$0xff]  }
 0x1cc   : > { %v1037_v58 = vpop.f32.mrf.mxu1  ;;  %v1361_v41 = vpop.f32.mrf.mxu0  ;;  %5586 = vmatmul.mubr.bf16.gmra.mxu0 %v2152_v7  ;;  %5606 = vmatmul.mubr.bf16.vlgmr.msra.gmra.mxu1 %v2488_v20  ;;  %v1033_v7 = vadd.f32 %v1032_v61, %v6815_v24  ;;  %v2490_v20 = vsel %vm2485_vm4, %v2487_v51, %v2489_v16  ;;  %v6130_v51 = vld [vmem:[%s8072_s1 + $0x1e8] sm:$0xff]  }
 0x1cd   : > { %v7187_v34 = vadd.f32 %v1361_v41, %v1030_v54  ;;  %5609 = vmatprep.mubr.msk.bf16.mxu1 %vm6214_vm0, %v8079_v37  ;;  %5705 = vmatprep.mubr.msk.bf16.mxu0 %vm6214_vm0, %v8079_v37  ;;  %v1038_v24 = vadd.f32 %v1037_v58, %v6824_v14  ;;  %v3001_v14 = vrot.slane %v7207_v12, 2  ;;  %v6126_v58 = vld [vmem:[%s8072_s1 + $0x230] sm:$0xff]  }
 0x1ce   : > { %v5279_v10 = vpop.f32.mrf.mxu1  ;;  %v5375_v4 = vpop.f32.mrf.mxu0  ;;  %5790 = vmatpush3.bf16.msra.mxu1 %v6121_v48 }
 0x1cf   : > { %5791 = vmatprep.subr.bf16.mxu1 %v8079_v37  ;;  %v3002_v12 = vsel %vm2485_vm4, %v2999_v59, %v3001_v14 }
 0x1d0   : > { %v1040_v52 = vpop.f32.mrf.mxu1  ;;  %v1364_v23 = vpop.f32.mrf.mxu0 }
 0x1d1   : > { %v7199_v29 = vadd.f32 %v1364_v23, %v1033_v7  ;;  %v6134_v7 = vld [vmem:[%s8072_s1 + $0x1e0] sm:$0xff]  }
 0x1d2   : > { %v5280_v8 = vpop.f32.mrf.mxu1  ;;  %v5376_v48 = vpop.f32.mrf.mxu0  ;;  %5792 = vmatpush3.bf16.msra.mxu1 %v6125_v50  ;;  %v1041_v50 = vadd.f32 %v1040_v52, %v6836_v30 }
 0x1d3   : > { %5793 = vmatprep.subr.bf16.mxu1 %v8079_v37  ;;  %v7236_v8 = vld [vmem:[%s6268_s23 + $0x28] sm:$0xff]  }
 0x1d4   : > { %v1045_v61 = vpop.f32.mrf.mxu1  ;;  %v1369_v54 = vpop.f32.mrf.mxu0  ;;  %5610 = vmatmul.mubr.bf16.gmra.mxu1 %v2490_v20  ;;  %5706 = vmatmul.mubr.bf16.vlgmr.msra.gmra.mxu0 %v3000_v28  ;;  %v6131_v48 = vld [vmem:[%s8072_s1 + $0x228] sm:$0xff]  }
 0x1d5   : > { %v7214_v41 = vadd.f32 %v1369_v54, %v1038_v24  ;;  %5890 = vmatpush3.bf16.msra.mxu0 %v6122_v27  ;;  %5613 = vmatprep.mubr.msk.bf16.mxu1 %vm6214_vm0, %v8079_v37  ;;  %v2492_v27 = vsel %vm2485_vm4, %v2489_v16, %v2491_v40  ;;  %v1046_v24 = vadd.f32 %v1045_v61, %v6852_v53  ;;  %v6139_v16 = vld [vmem:[%s8072_s1 + $0x1d8] sm:$0xff]   ;;  %v3003_v53 = vrot.slane %v7236_v8, 2 }
 0x1d6   : > { %v5283_v10 = vpop.f32.mrf.mxu1  ;;  %v5379_v4 = vpop.f32.mrf.mxu0  ;;  %5709 = vmatprep.mubr.msk.bf16.mxu0 %vm6214_vm0, %v8079_v37  ;;  %5891 = vmatprep.subr.bf16.mxu0 %v8079_v37 }
 0x1d7   : > { %5794 = vmatpush3.bf16.msra.mxu1 %v6130_v51  ;;  %v6136_v4 = vld [vmem:[%s8072_s1 + $0x220] sm:$0xff]  }
 0x1d8   : > { %v1048_v23 = vpop.f32.mrf.mxu1  ;;  %v1372_v20 = vpop.f32.mrf.mxu0  ;;  %5795 = vmatprep.subr.bf16.mxu1 %v8079_v37 }
 0x1d9   : > { %v7231_v28 = vadd.f32 %v1372_v20, %v1041_v50  ;;  %5892 = vmatpush3.bf16.msra.mxu0 %v6126_v58  ;;  %v2493_v58 = vrot.slane %v6190_v25, 2  ;;  %v1049_v50 = vadd.f32 %v1048_v23, %v6870_v45 }
 0x1da   : > { %v5284_v30 = vpop.f32.mrf.mxu1  ;;  %v5380_v52 = vpop.f32.mrf.mxu0  ;;  %5893 = vmatprep.subr.bf16.mxu0 %v8079_v37 }
 0x1db   : > { %5796 = vmatpush3.bf16.msra.mxu1 %v6134_v7  ;;  %v6144_v7 = vld [vmem:[%s8072_s1 + $0x1d0] sm:$0xff]   ;;  %v2494_v8 = vsel %vm2485_vm4, %v2491_v40, %v2493_v58  ;;  %v3004_v30 = vsel %vm2485_vm4, %v3001_v14, %v3003_v53  ;;  %v6148_v40 = vld [vmem:[%s8072_s1 + $0x1c8] sm:$0xff]  }
 0x1dc   : > { %v1053_v59 = vpop.f32.mrf.mxu1  ;;  %v1377_v51 = vpop.f32.mrf.mxu0  ;;  %5614 = vmatmul.mubr.bf16.gmra.mxu1 %v2492_v27  ;;  %5710 = vmatmul.mubr.bf16.gmra.mxu0 %v3002_v12  ;;  %v7269_v52 = vld [vmem:[%s6268_s23 + $0x30] sm:$0xff]  }
 0x1dd   : > { %v7246_v54 = vadd.f32 %v1377_v51, %v1046_v24  ;;  %5617 = vmatprep.mubr.msk.bf16.mxu1 %vm6214_vm0, %v8079_v37  ;;  %5713 = vmatprep.mubr.msk.bf16.mxu0 %vm6214_vm0, %v8079_v37  ;;  %v1054_v24 = vadd.f32 %v1053_v59, %v6887_v18  ;;  %v6191_v18 = vld [vmem:[%s6268_s23 + $0x30] sm:$0xff]  }
 0x1de   : > { %v5287_v61 = vpop.f32.mrf.mxu1  ;;  %v5383_v10 = vpop.f32.mrf.mxu0  ;;  %5894 = vmatpush3.bf16.msra.mxu0 %v6131_v48  ;;  %5797 = vmatprep.subr.bf16.mxu1 %v8079_v37  ;;  %v6140_v48 = vld [vmem:[%s8072_s1 + $0x218] sm:$0xff]   ;;  %v2495_v59 = vrot.slane %v6191_v18, 2 }
 0x1df   : > { %5895 = vmatprep.subr.bf16.mxu0 %v8079_v37  ;;  %5798 = vmatpush3.bf16.msra.mxu1 %v6139_v16  ;;  %v3005_v61 = vrot.slane %v7269_v52, 2  ;;  %v6128_v52 = vld [vmem:[%s6268_s23 + $0x38] sm:$0xff]  }
 0x1e0   : > { %v1056_v20 = vpop.f32.mrf.mxu1  ;;  %v1380_v27 = vpop.f32.mrf.mxu0  ;;  %5799 = vmatprep.subr.bf16.mxu1 %v8079_v37  ;;  %v3007_v18 = vrot.slane %v6128_v52, 2  ;;  %v6129_v52 = vld [vmem:[%s6268_s23 + $0x40] sm:$0xff]  }
 0x1e1   : > { %v7264_v12 = vadd.f32 %v1380_v27, %v1049_v50  ;;  %v6145_v50 = vld [vmem:[%s8072_s1 + $0x210] sm:$0xff]  }
 0x1e2   : > { %v5288_v45 = vpop.f32.mrf.mxu1  ;;  %v5384_v23 = vpop.f32.mrf.mxu0  ;;  %5896 = vmatpush3.bf16.msra.mxu0 %v6136_v4 }
 0x1e3   : > { %5897 = vmatprep.subr.bf16.mxu0 %v8079_v37  ;;  %5800 = vmatpush3.bf16.msra.mxu1 %v6144_v7 }
 0x1e4   : > { %v1385_v14 = vpop.f32.mrf.mxu0  ;;  %v1737_v16 = vpop.f32.mrf.mxu1  ;;  %5618 = vmatmul.mubr.bf16.gmra.mxu1 %v2494_v8  ;;  %5714 = vmatmul.mubr.bf16.gmra.mxu0 %v3004_v30  ;;  %v2496_v8 = vsel %vm2485_vm4, %v2493_v58, %v2495_v59  ;;  %v3006_v30 = vsel %vm2485_vm4, %v3003_v53, %v3005_v61  ;;  %v6192_v53 = vld [vmem:[%s6268_s23 + $0x38] sm:$0xff]  }
 0x1e5   : > { %v7279_v51 = vadd.f32 %v1385_v14, %v1054_v24  ;;  %v1903_v25 = vadd.f32 %v1737_v16, %v6947_v57  ;;  %5621 = vmatprep.mubr.msk.bf16.mxu1 %vm6214_vm0, %v8079_v37  ;;  %5717 = vmatprep.mubr.msk.bf16.mxu0 %vm6214_vm0, %v8079_v37  ;;  %v6153_v57 = vld [vmem:[%s8072_s1 + $0x1c0] sm:$0xff]   ;;  %v2497_v16 = vrot.slane %v6192_v53, 2 }
 0x1e6   : > { %v5387_v10 = vpop.f32.mrf.mxu0  ;;  %v5407_v4 = vpop.f32.mrf.mxu1  ;;  %5898 = vmatpush3.bf16.msra.mxu0 %v6140_v48  ;;  %5801 = vmatprep.subr.bf16.mxu1 %v8079_v37  ;;  %v6149_v48 = vld [vmem:[%s8072_s1 + $0x208] sm:$0xff]  }
 0x1e7   : > { %5899 = vmatprep.subr.bf16.mxu0 %v8079_v37  ;;  %5802 = vmatpush3.bf16.msra.mxu1 %v6148_v40 }
 0x1e8   : > { %v1388_v7 = vpop.f32.mrf.mxu0  ;;  %v1740_v20 = vpop.f32.mrf.mxu1  ;;  %5803 = vmatprep.subr.bf16.mxu1 %v8079_v37 }
 0x1e9   : > { %v1904_v27 = vadd.f32 %v1740_v20, %v6961_v47  ;;  %v8080_v47 = vld [vmem:[#allocation2_spill] sm:$0xff] }
 0x1ea   : > { %v5388_v45 = vpop.f32.mrf.mxu0  ;;  %v5408_v23 = vpop.f32.mrf.mxu1  ;;  %5900 = vmatpush3.bf16.msra.mxu0 %v6145_v50  ;;  %v6154_v50 = vld [vmem:[%s8072_s1 + $0x200] sm:$0xff]  }
 0x1eb   : > { %5901 = vmatprep.subr.bf16.mxu0 %v8079_v37  ;;  %5804 = vmatpush3.bf16.msra.mxu1 %v6153_v57 }
 0x1ec   : > { %v1745_v24 = vpop.f32.mrf.mxu1  ;;  %v2257_v40 = vpop.f32.mrf.mxu0  ;;  %5622 = vmatmul.mubr.bf16.gmra.mxu1 %v2496_v8  ;;  %5718 = vmatmul.mubr.bf16.gmra.mxu0 %v3006_v30  ;;  %v2498_v8 = vsel %vm2485_vm4, %v2495_v59, %v2497_v16  ;;  %v3008_v30 = vsel %vm2485_vm4, %v3005_v61, %v3007_v18  ;;  %v3009_v61 = vrot.slane %v6129_v52, 2 }
 0x1ed   : > { %v1905_v58 = vadd.f32 %v1745_v24, %v8080_v47  ;;  %v7306_v14 = vadd.f32 %v2257_v40, %v1903_v25  ;;  %5625 = vmatprep.mubr.msk.bf16.mxu1 %vm6214_vm0, %v8079_v37  ;;  %5721 = vmatprep.mubr.msk.bf16.mxu0 %vm6214_vm0, %v8079_v37  ;;  %v8081_v40 = vld [vmem:[#allocation3_spill] sm:$0xff] }
 0x1ee   : > { %v5411_v10 = vpop.f32.mrf.mxu1  ;;  %v5507_v4 = vpop.f32.mrf.mxu0  ;;  %5902 = vmatpush3.bf16.msra.mxu0 %v6149_v48 }
 0x1ef   : > { %5903 = vmatprep.subr.bf16.mxu0 %v8079_v37 }
 0x1f0   : > { %v1748_v25 = vpop.f32.mrf.mxu1  ;;  %v2260_v57 = vpop.f32.mrf.mxu0 }
 0x1f1   : > { %v1906_v7 = vadd.f32 %v1748_v25, %v6975_v21  ;;  %v7318_v20 = vadd.f32 %v2260_v57, %v1904_v27  ;;  %v6193_v21 = vld [vmem:[%s6268_s23 + $0x40] sm:$0xff]  }
 0x1f2   : > { %v5412_v45 = vpop.f32.mrf.mxu1  ;;  %v5508_v23 = vpop.f32.mrf.mxu0  ;;  %5904 = vmatpush3.bf16.msra.mxu0 %v6154_v50  ;;  %v2499_v59 = vrot.slane %v6193_v21, 2 }
 0x1f4   : > { %v1753_v48 = vpop.f32.mrf.mxu1  ;;  %v2265_v24 = vpop.f32.mrf.mxu0  ;;  %5626 = vmatmul.mubr.bf16.gmra.mxu1 %v2498_v8  ;;  %5722 = vmatmul.mubr.bf16.gmra.mxu0 %v3008_v30  ;;  %v3010_v8 = vsel %vm2485_vm4, %v3007_v18, %v3009_v61  ;;  %v6132_v30 = vld [vmem:[%s6268_s23 + $0x48] sm:$0xff]  }
 0x1f5   : > { %v1907_v47 = vadd.f32 %v1753_v48, %v8081_v40  ;;  %v7324_v53 = vadd.f32 %v2265_v24, %v1905_v58  ;;  %5629 = vmatprep.mubr.msk.bf16.mxu1 %vm6214_vm0, %v8079_v37  ;;  %5725 = vmatprep.mubr.msk.bf16.mxu0 %vm6214_vm0, %v8079_v37  ;;  %v2500_v58 = vsel %vm2485_vm4, %v2497_v16, %v2499_v59  ;;  %v3011_v18 = vrot.slane %v6132_v30, 2 }
 0x1f6   : > { %v5415_v27 = vpop.f32.mrf.mxu1  ;;  %v5511_v10 = vpop.f32.mrf.mxu0 }
 0x1f8   : > { %v1756_v4 = vpop.f32.mrf.mxu1  ;;  %v2268_v50 = vpop.f32.mrf.mxu0 }
 0x1f9   : > { %v1908_v25 = vadd.f32 %v1756_v4, %v6988_v3  ;;  %v7332_v57 = vadd.f32 %v2268_v50, %v1906_v7  ;;  %v6194_v3 = vld [vmem:[%s6268_s23 + $0x48] sm:$0xff]  }
 0x1fa   : > { %v5416_v45 = vpop.f32.mrf.mxu1  ;;  %v5512_v23 = vpop.f32.mrf.mxu0  ;;  %v2501_v16 = vrot.slane %v6194_v3, 2 }
 0x1fc   : > { %v1761_v48 = vpop.f32.mrf.mxu1  ;;  %v2273_v24 = vpop.f32.mrf.mxu0  ;;  %5630 = vmatmul.mubr.bf16.gmra.mxu1 %v2500_v58  ;;  %5726 = vmatmul.mubr.bf16.gmra.mxu0 %v3010_v8  ;;  %v6133_v58 = vld [vmem:[%s6268_s23 + $0x50] sm:$0xff]  }
 0x1fd   : > { %v1909_v52 = vadd.f32 %v1761_v48, %v6992_v15  ;;  %v7338_v40 = vadd.f32 %v2273_v24, %v1907_v47  ;;  %5633 = vmatprep.mubr.msk.bf16.mxu1 %vm6214_vm0, %v8079_v37  ;;  %5729 = vmatprep.mubr.msk.bf16.mxu0 %vm6214_vm0, %v8079_v37  ;;  %v2502_v15 = vsel %vm2485_vm4, %v2499_v59, %v2501_v16 }
 0x1fe   : > { %v5419_v7 = vpop.f32.mrf.mxu1  ;;  %v5515_v21 = vpop.f32.mrf.mxu0  ;;  %v3012_v47 = vsel %vm2485_vm4, %v3009_v61, %v3011_v18  ;;  %v3013_v61 = vrot.slane %v6133_v58, 2 }
 0x200   : > { %v1764_v27 = vpop.f32.mrf.mxu1  ;;  %v2276_v10 = vpop.f32.mrf.mxu0 }
 0x201   : > { %v1910_v4 = vadd.f32 %v1764_v27, %v7001_v46  ;;  %v7346_v50 = vadd.f32 %v2276_v10, %v1908_v25  ;;  %v6195_v46 = vld [vmem:[%s6268_s23 + $0x50] sm:$0xff]  }
 0x202   : > { %v5420_v8 = vpop.f32.mrf.mxu1  ;;  %v5516_v45 = vpop.f32.mrf.mxu0  ;;  %v2503_v59 = vrot.slane %v6195_v46, 2 }
 0x204   : > { %v1769_v23 = vpop.f32.mrf.mxu1  ;;  %v2281_v48 = vpop.f32.mrf.mxu0  ;;  %5634 = vmatmul.mubr.bf16.gmra.mxu1 %v2502_v15  ;;  %5730 = vmatmul.mubr.bf16.gmra.mxu0 %v3012_v47  ;;  %v6135_v15 = vld [vmem:[%s6268_s23 + $0x58] sm:$0xff]  }
 0x205   : > { %v1911_v30 = vadd.f32 %v1769_v23, %v7005_v39  ;;  %v7352_v24 = vadd.f32 %v2281_v48, %v1909_v52  ;;  %5637 = vmatprep.mubr.msk.bf16.mxu1 %vm6214_vm0, %v8079_v37  ;;  %5733 = vmatprep.mubr.msk.bf16.mxu0 %vm6214_vm0, %v8079_v37  ;;  %v2504_v39 = vsel %vm2485_vm4, %v2501_v16, %v2503_v59 }
 0x206   : > { %v5423_v25 = vpop.f32.mrf.mxu1  ;;  %v5519_v3 = vpop.f32.mrf.mxu0  ;;  %v3014_v52 = vsel %vm2485_vm4, %v3011_v18, %v3013_v61  ;;  %v3015_v18 = vrot.slane %v6135_v15, 2 }
 0x208   : > { %v1772_v7 = vpop.f32.mrf.mxu1  ;;  %v2284_v21 = vpop.f32.mrf.mxu0 }
 0x209   : > { %v1912_v27 = vadd.f32 %v1772_v7, %v7014_v31  ;;  %v7360_v10 = vadd.f32 %v2284_v21, %v1910_v4  ;;  %v6196_v31 = vld [vmem:[%s6268_s23 + $0x58] sm:$0xff]  }
 0x20a   : > { %v5424_v47 = vpop.f32.mrf.mxu1  ;;  %v5520_v8 = vpop.f32.mrf.mxu0  ;;  %v2505_v16 = vrot.slane %v6196_v31, 2 }
 0x20c   : > { %v1777_v45 = vpop.f32.mrf.mxu1  ;;  %v2289_v23 = vpop.f32.mrf.mxu0  ;;  %5638 = vmatmul.mubr.bf16.gmra.mxu1 %v2504_v39  ;;  %5734 = vmatmul.mubr.bf16.gmra.mxu0 %v3014_v52  ;;  %v6137_v39 = vld [vmem:[%s6268_s23 + $0x60] sm:$0xff]  }
 0x20d   : > { %v1913_v58 = vadd.f32 %v1777_v45, %v7018_v2  ;;  %v7366_v48 = vadd.f32 %v2289_v23, %v1911_v30  ;;  %5641 = vmatprep.mubr.msk.bf16.mxu1 %vm6214_vm0, %v8079_v37  ;;  %5737 = vmatprep.mubr.msk.bf16.mxu0 %vm6214_vm0, %v8079_v37  ;;  %v2506_v2 = vsel %vm2485_vm4, %v2503_v59, %v2505_v16 }
 0x20e   : > { %v5427_v4 = vpop.f32.mrf.mxu1  ;;  %v5523_v46 = vpop.f32.mrf.mxu0  ;;  %v3016_v30 = vsel %vm2485_vm4, %v3013_v61, %v3015_v18  ;;  %v3017_v61 = vrot.slane %v6137_v39, 2 }
 0x210   : > { %v1780_v25 = vpop.f32.mrf.mxu1  ;;  %v2292_v3 = vpop.f32.mrf.mxu0 }
 0x211   : > { %v1914_v7 = vadd.f32 %v1780_v25, %v7027_v38  ;;  %v7374_v21 = vadd.f32 %v2292_v3, %v1912_v27  ;;  %v6197_v38 = vld [vmem:[%s6268_s23 + $0x60] sm:$0xff]  }
 0x212   : > { %v5428_v52 = vpop.f32.mrf.mxu1  ;;  %v5524_v47 = vpop.f32.mrf.mxu0  ;;  %v2507_v59 = vrot.slane %v6197_v38, 2 }
 0x214   : > { %v1785_v8 = vpop.f32.mrf.mxu1  ;;  %v2297_v45 = vpop.f32.mrf.mxu0  ;;  %5642 = vmatmul.mubr.bf16.gmra.mxu1 %v2506_v2  ;;  %5738 = vmatmul.mubr.bf16.gmra.mxu0 %v3016_v30  ;;  %v6138_v2 = vld [vmem:[%s6268_s23 + $0x68] sm:$0xff]  }
 0x215   : > { %v1915_v15 = vadd.f32 %v1785_v8, %v7031_v63  ;;  %v7380_v23 = vadd.f32 %v2297_v45, %v1913_v58  ;;  %5645 = vmatprep.mubr.msk.bf16.mxu1 %vm6214_vm0, %v8079_v37  ;;  %5741 = vmatprep.mubr.msk.bf16.mxu0 %vm6214_vm0, %v8079_v37  ;;  %v2508_v63 = vsel %vm2485_vm4, %v2505_v16, %v2507_v59 }
 0x216   : > { %v5431_v27 = vpop.f32.mrf.mxu1  ;;  %v5527_v31 = vpop.f32.mrf.mxu0  ;;  %v3018_v58 = vsel %vm2485_vm4, %v3015_v18, %v3017_v61  ;;  %v3019_v18 = vrot.slane %v6138_v2, 2 }
 0x218   : > { %v1788_v4 = vpop.f32.mrf.mxu1  ;;  %v2300_v46 = vpop.f32.mrf.mxu0 }
 0x219   : > { %v1916_v25 = vadd.f32 %v1788_v4, %v7040_v13  ;;  %v7388_v3 = vadd.f32 %v2300_v46, %v1914_v7  ;;  %v6198_v13 = vld [vmem:[%s6268_s23 + $0x68] sm:$0xff]  }
 0x21a   : > { %v5432_v30 = vpop.f32.mrf.mxu1  ;;  %v5528_v52 = vpop.f32.mrf.mxu0  ;;  %v2509_v16 = vrot.slane %v6198_v13, 2 }
 0x21c   : > { %v1793_v47 = vpop.f32.mrf.mxu1  ;;  %v2305_v8 = vpop.f32.mrf.mxu0  ;;  %5646 = vmatmul.mubr.bf16.gmra.mxu1 %v2508_v63  ;;  %5742 = vmatmul.mubr.bf16.gmra.mxu0 %v3018_v58  ;;  %v6141_v63 = vld [vmem:[%s6268_s23 + $0x70] sm:$0xff]  }
 0x21d   : > { %v1917_v39 = vadd.f32 %v1793_v47, %v7044_v43  ;;  %v7394_v45 = vadd.f32 %v2305_v8, %v1915_v15  ;;  %5649 = vmatprep.mubr.msk.bf16.mxu1 %vm6214_vm0, %v8079_v37  ;;  %5745 = vmatprep.mubr.msk.bf16.mxu0 %vm6214_vm0, %v8079_v37  ;;  %v2510_v43 = vsel %vm2485_vm4, %v2507_v59, %v2509_v16 }
 0x21e   : > { %v5435_v7 = vpop.f32.mrf.mxu1  ;;  %v5531_v38 = vpop.f32.mrf.mxu0  ;;  %v3020_v15 = vsel %vm2485_vm4, %v3017_v61, %v3019_v18  ;;  %v3021_v61 = vrot.slane %v6141_v63, 2 }
 0x220   : > { %v1796_v27 = vpop.f32.mrf.mxu1  ;;  %v2308_v31 = vpop.f32.mrf.mxu0 }
 0x221   : > { %v1918_v4 = vadd.f32 %v1796_v27, %v7053_v22  ;;  %v7402_v46 = vadd.f32 %v2308_v31, %v1916_v25  ;;  %v6199_v22 = vld [vmem:[%s6268_s23 + $0x70] sm:$0xff]  }
 0x222   : > { %v5436_v58 = vpop.f32.mrf.mxu1  ;;  %v5532_v30 = vpop.f32.mrf.mxu0  ;;  %v2511_v59 = vrot.slane %v6199_v22, 2 }
 0x224   : > { %v1801_v52 = vpop.f32.mrf.mxu1  ;;  %v2313_v47 = vpop.f32.mrf.mxu0  ;;  %5650 = vmatmul.mubr.bf16.gmra.mxu1 %v2510_v43  ;;  %5746 = vmatmul.mubr.bf16.gmra.mxu0 %v3020_v15  ;;  %v6142_v43 = vld [vmem:[%s6268_s23 + $0x78] sm:$0xff]  }
 0x225   : > { %v1919_v2 = vadd.f32 %v1801_v52, %v7057_v55  ;;  %v7408_v8 = vadd.f32 %v2313_v47, %v1917_v39  ;;  %5653 = vmatprep.mubr.msk.bf16.mxu1 %vm6214_vm0, %v8079_v37  ;;  %5749 = vmatprep.mubr.msk.bf16.mxu0 %vm6214_vm0, %v8079_v37  ;;  %v2512_v55 = vsel %vm2485_vm4, %v2509_v16, %v2511_v59 }
 0x226   : > { %v5439_v25 = vpop.f32.mrf.mxu1  ;;  %v5535_v13 = vpop.f32.mrf.mxu0  ;;  %v3022_v39 = vsel %vm2485_vm4, %v3019_v18, %v3021_v61  ;;  %v3023_v18 = vrot.slane %v6142_v43, 2 }
 0x228   : > { %v1804_v7 = vpop.f32.mrf.mxu1  ;;  %v2316_v38 = vpop.f32.mrf.mxu0 }
 0x229   : > { %v1920_v27 = vadd.f32 %v1804_v7, %v7066_v49  ;;  %v7416_v31 = vadd.f32 %v2316_v38, %v1918_v4  ;;  %v6200_v49 = vld [vmem:[%s6268_s23 + $0x78] sm:$0xff]  }
 0x22a   : > { %v5440_v15 = vpop.f32.mrf.mxu1  ;;  %v5536_v58 = vpop.f32.mrf.mxu0  ;;  %v2513_v16 = vrot.slane %v6200_v49, 2 }
 0x22c   : > { %v1809_v30 = vpop.f32.mrf.mxu1  ;;  %v2321_v52 = vpop.f32.mrf.mxu0  ;;  %5654 = vmatmul.mubr.bf16.gmra.mxu1 %v2512_v55  ;;  %5750 = vmatmul.mubr.bf16.gmra.mxu0 %v3022_v39  ;;  %v6143_v55 = vld [vmem:[%s6268_s23 + $0x80] sm:$0xff]  }
 0x22d   : > { %v1921_v63 = vadd.f32 %v1809_v30, %v7070_v1  ;;  %v7422_v47 = vadd.f32 %v2321_v52, %v1919_v2  ;;  %5657 = vmatprep.mubr.msk.bf16.mxu1 %vm6214_vm0, %v8079_v37  ;;  %5753 = vmatprep.mubr.msk.bf16.mxu0 %vm6214_vm0, %v8079_v37  ;;  %v2514_v1 = vsel %vm2485_vm4, %v2511_v59, %v2513_v16 }
 0x22e   : > { %v5443_v4 = vpop.f32.mrf.mxu1  ;;  %v5539_v22 = vpop.f32.mrf.mxu0  ;;  %v3024_v2 = vsel %vm2485_vm4, %v3021_v61, %v3023_v18  ;;  %v3025_v61 = vrot.slane %v6143_v55, 2 }
 0x230   : > { %v1812_v25 = vpop.f32.mrf.mxu1  ;;  %v2324_v13 = vpop.f32.mrf.mxu0 }
 0x231   : > { %v1922_v7 = vadd.f32 %v1812_v25, %v7079_v62  ;;  %v7430_v38 = vadd.f32 %v2324_v13, %v1920_v27  ;;  %v6201_v62 = vld [vmem:[%s6268_s23 + $0x80] sm:$0xff]  }
 0x232   : > { %v5444_v39 = vpop.f32.mrf.mxu1  ;;  %v5540_v15 = vpop.f32.mrf.mxu0  ;;  %v2515_v59 = vrot.slane %v6201_v62, 2 }
 0x234   : > { %v1817_v58 = vpop.f32.mrf.mxu1  ;;  %v2329_v30 = vpop.f32.mrf.mxu0  ;;  %5658 = vmatmul.mubr.bf16.gmra.mxu1 %v2514_v1  ;;  %5754 = vmatmul.mubr.bf16.gmra.mxu0 %v3024_v2  ;;  %v6146_v1 = vld [vmem:[%s6268_s23 + $0x88] sm:$0xff]  }
 0x235   : > { %v1923_v43 = vadd.f32 %v1817_v58, %v7083_v42  ;;  %v7436_v52 = vadd.f32 %v2329_v30, %v1921_v63  ;;  %5661 = vmatprep.mubr.msk.bf16.mxu1 %vm6214_vm0, %v8079_v37  ;;  %5757 = vmatprep.mubr.msk.bf16.mxu0 %vm6214_vm0, %v8079_v37  ;;  %v2516_v42 = vsel %vm2485_vm4, %v2513_v16, %v2515_v59 }
 0x236   : > { %v5447_v27 = vpop.f32.mrf.mxu1  ;;  %v5543_v49 = vpop.f32.mrf.mxu0  ;;  %v3026_v63 = vsel %vm2485_vm4, %v3023_v18, %v3025_v61  ;;  %v3027_v18 = vrot.slane %v6146_v1, 2 }
 0x238   : > { %v1820_v4 = vpop.f32.mrf.mxu1  ;;  %v2332_v22 = vpop.f32.mrf.mxu0 }
 0x239   : > { %v1924_v25 = vadd.f32 %v1820_v4, %v7092_v36  ;;  %v7444_v13 = vadd.f32 %v2332_v22, %v1922_v7  ;;  %v6202_v36 = vld [vmem:[%s6268_s23 + $0x88] sm:$0xff]  }
 0x23a   : > { %v5448_v2 = vpop.f32.mrf.mxu1  ;;  %v5544_v39 = vpop.f32.mrf.mxu0  ;;  %v2517_v16 = vrot.slane %v6202_v36, 2 }
 0x23c   : > { %v1825_v15 = vpop.f32.mrf.mxu1  ;;  %v2337_v58 = vpop.f32.mrf.mxu0  ;;  %5662 = vmatmul.mubr.bf16.gmra.mxu1 %v2516_v42  ;;  %5758 = vmatmul.mubr.bf16.gmra.mxu0 %v3026_v63  ;;  %v6147_v42 = vld [vmem:[%s6268_s23 + $0x90] sm:$0xff]  }
 0x23d   : > { %v1925_v55 = vadd.f32 %v1825_v15, %v7096_v0  ;;  %v7450_v30 = vadd.f32 %v2337_v58, %v1923_v43  ;;  %5665 = vmatprep.mubr.msk.bf16.mxu1 %vm6214_vm0, %v8079_v37  ;;  %5761 = vmatprep.mubr.msk.bf16.mxu0 %vm6214_vm0, %v8079_v37  ;;  %v2518_v0 = vsel %vm2485_vm4, %v2515_v59, %v2517_v16 }
 0x23e   : > { %v5451_v7 = vpop.f32.mrf.mxu1  ;;  %v5547_v62 = vpop.f32.mrf.mxu0  ;;  %v3028_v43 = vsel %vm2485_vm4, %v3025_v61, %v3027_v18  ;;  %v3029_v61 = vrot.slane %v6147_v42, 2 }
 0x240   : > { %v1828_v27 = vpop.f32.mrf.mxu1  ;;  %v2340_v49 = vpop.f32.mrf.mxu0 }
 0x241   : > { %v1926_v4 = vadd.f32 %v1828_v27, %v7105_v35  ;;  %v7458_v22 = vadd.f32 %v2340_v49, %v1924_v25  ;;  %v6203_v35 = vld [vmem:[%s6268_s23 + $0x90] sm:$0xff]  }
 0x242   : > { %v5452_v63 = vpop.f32.mrf.mxu1  ;;  %v5548_v2 = vpop.f32.mrf.mxu0  ;;  %v2519_v59 = vrot.slane %v6203_v35, 2 }
 0x244   : > { %v1833_v39 = vpop.f32.mrf.mxu1  ;;  %v2345_v15 = vpop.f32.mrf.mxu0  ;;  %5666 = vmatmul.mubr.bf16.gmra.mxu1 %v2518_v0  ;;  %5762 = vmatmul.mubr.bf16.gmra.mxu0 %v3028_v43  ;;  %v6150_v0 = vld [vmem:[%s6268_s23 + $0x98] sm:$0xff]  }
 0x245   : > { %v1927_v1 = vadd.f32 %v1833_v39, %v7109_v44  ;;  %v7464_v58 = vadd.f32 %v2345_v15, %v1925_v55  ;;  %5669 = vmatprep.mubr.msk.bf16.mxu1 %vm6214_vm0, %v8079_v37  ;;  %5765 = vmatprep.mubr.msk.bf16.mxu0 %vm6214_vm0, %v8079_v37  ;;  %v2520_v44 = vsel %vm2485_vm4, %v2517_v16, %v2519_v59 }
 0x246   : > { %v5455_v25 = vpop.f32.mrf.mxu1  ;;  %v5551_v36 = vpop.f32.mrf.mxu0  ;;  %v3030_v55 = vsel %vm2485_vm4, %v3027_v18, %v3029_v61  ;;  %v3031_v18 = vrot.slane %v6150_v0, 2 }
 0x248   : > { %v1836_v7 = vpop.f32.mrf.mxu1  ;;  %v2348_v62 = vpop.f32.mrf.mxu0 }
 0x249   : > { %v1928_v27 = vadd.f32 %v1836_v7, %v7120_v19  ;;  %v7472_v49 = vadd.f32 %v2348_v62, %v1926_v4  ;;  %v6204_v19 = vld [vmem:[%s6268_s23 + $0x98] sm:$0xff]  }
 0x24a   : > { %v5456_v43 = vpop.f32.mrf.mxu1  ;;  %v5552_v63 = vpop.f32.mrf.mxu0  ;;  %v2521_v16 = vrot.slane %v6204_v19, 2 }
 0x24c   : > { %v1841_v2 = vpop.f32.mrf.mxu1  ;;  %v2353_v39 = vpop.f32.mrf.mxu0  ;;  %5670 = vmatmul.mubr.bf16.gmra.mxu1 %v2520_v44  ;;  %5766 = vmatmul.mubr.bf16.gmra.mxu0 %v3030_v55  ;;  %v6151_v44 = vld [vmem:[%s6268_s23 + $0xa0] sm:$0xff]  }
 0x24d   : > { %v1929_v42 = vadd.f32 %v1841_v2, %v7125_v6  ;;  %v7478_v15 = vadd.f32 %v2353_v39, %v1927_v1  ;;  %5673 = vmatprep.mubr.msk.bf16.mxu1 %vm6214_vm0, %v8079_v37  ;;  %5769 = vmatprep.mubr.msk.bf16.mxu0 %vm6214_vm0, %v8079_v37  ;;  %v2522_v6 = vsel %vm2485_vm4, %v2519_v59, %v2521_v16  ;;  %v3033_v59 = vrot.slane %v6151_v44, 2 }
 0x24e   : > { %v5459_v4 = vpop.f32.mrf.mxu1  ;;  %v5555_v35 = vpop.f32.mrf.mxu0  ;;  %v3032_v1 = vsel %vm2485_vm4, %v3029_v61, %v3031_v18 }
 0x250   : > { %v1844_v25 = vpop.f32.mrf.mxu1  ;;  %v2356_v36 = vpop.f32.mrf.mxu0 }
 0x251   : > { %v1930_v7 = vadd.f32 %v1844_v25, %v7136_v32  ;;  %v7486_v62 = vadd.f32 %v2356_v36, %v1928_v27  ;;  %v2523_v32 = vrot.slane %v7118_v60, 2  ;;  %v6152_v36 = vld [vmem:[%s6268_s23 + $0xa8] sm:$0xff]  }
 0x252   : > { %v5460_v55 = vpop.f32.mrf.mxu1  ;;  %v5556_v43 = vpop.f32.mrf.mxu0 }
 0x254   : > { %v1849_v63 = vpop.f32.mrf.mxu1  ;;  %v2361_v2 = vpop.f32.mrf.mxu0  ;;  %5674 = vmatmul.mubr.bf16.gmra.mxu1 %v2522_v6  ;;  %5770 = vmatmul.mubr.bf16.gmra.mxu0 %v3032_v1 }
 0x255   : > { %v1931_v0 = vadd.f32 %v1849_v63, %v7143_v26  ;;  %v7492_v39 = vadd.f32 %v2361_v2, %v1929_v42  ;;  %5677 = vmatprep.mubr.msk.bf16.mxu1 %vm6214_vm0, %v8079_v37  ;;  %5773 = vmatprep.mubr.msk.bf16.mxu0 %vm6214_vm0, %v8079_v37  ;;  %v2524_v26 = vsel %vm2485_vm4, %v2521_v16, %v2523_v32  ;;  %v3035_v16 = vrot.slane %v6152_v36, 2 }
 0x256   : > { %v5463_v61 = vpop.f32.mrf.mxu1  ;;  %v5559_v27 = vpop.f32.mrf.mxu0  ;;  %v3034_v42 = vsel %vm2485_vm4, %v3031_v18, %v3033_v59  ;;  %v3349_v18 = vld [vmem:[%s6268_s23 + $0x10] sm:$0xc] }
 0x258   : > { %v1852_v19 = vpop.f32.mrf.mxu1  ;;  %v2364_v4 = vpop.f32.mrf.mxu0 }
 0x259   : > { %v1932_v35 = vadd.f32 %v1852_v19, %v7153_v9  ;;  %v7500_v25 = vadd.f32 %v2364_v4, %v1930_v7  ;;  %v2525_v9 = vrot.slane %v7140_v56, 2  ;;  %v7515_v7 = vld [vmem:[%s6268_s23 + $0x14] sm:$0xf]  ;;  %v3036_v56 = vsel %vm2485_vm4, %v3033_v59, %v3035_v16 }
 0x25a   : > { %v5464_v6 = vpop.f32.mrf.mxu1  ;;  %v5560_v1 = vpop.f32.mrf.mxu0 }
 0x25c   : > { %v1857_v55 = vpop.f32.mrf.mxu1  ;;  %v2369_v60 = vpop.f32.mrf.mxu0  ;;  %5678 = vmatmul.mubr.bf16.gmra.mxu1 %v2524_v26  ;;  %5774 = vmatmul.mubr.bf16.gmra.mxu0 %v3034_v42  ;;  %v2526_v26 = vsel %vm2485_vm4, %v2523_v32, %v2525_v9  ;;  %v7527_v42 = vld [vmem:[%s6268_s23 + $0x18] sm:$0xff]  }
 0x25d   : > { %v1933_v44 = vadd.f32 %v1857_v55, %v7157_v11  ;;  %v7506_v43 = vadd.f32 %v2369_v60, %v1931_v0  ;;  %5681 = vmatprep.mubr.msk.bf16.mxu1 %vm6214_vm0, %v8079_v37  ;;  %5777 = vmatprep.mubr.msk.bf16.mxu0 %vm6214_vm0, %v8079_v37  ;;  %v7518_v11 = vld [vmem:[%s6268_s23 + $0xb0] ss:$0 sps:$4 sm:$0xff]   ;;  %v4771_v0 = vcombine.low %v3349_v18, %v7515_v7  ;;  %v3523_v32 = vshrl.u32 %v7527_v42, 16 }
 0x25e   : > { %v5467_v63 = vpop.f32.mrf.mxu1  ;;  %v5563_v2 = vpop.f32.mrf.mxu0  ;;  %v3037_v60 = vrot.slane %v7518_v11, 2  ;;  %v3526_v59 = vshll.u32 %v7527_v42, 16 }
 0x25f   : > { %v3515_v18 = vshrl.u32 %v4771_v0, 16  ;;  %v3518_v63 = vshll.u32 %v4771_v0, 16 }
 0x260   : > { %v1860_v61 = vpop.f32.mrf.mxu1  ;;  %v2372_v27 = vpop.f32.mrf.mxu0  ;;  %v3038_v0 = vsel %vm2485_vm4, %v3035_v16, %v3037_v60 }
 0x261   : > { %v1934_v19 = vadd.f32 %v1860_v61, %v7165_v5  ;;  %v7522_v4 = vadd.f32 %v2372_v27, %v1932_v35 }
 0x262   : > { %v5468_v36 = vpop.f32.mrf.mxu1  ;;  %v5564_v6 = vpop.f32.mrf.mxu0 }
 0x263   : > { %8082 = vst [vmem:[#allocation2_spill] sm:$0xff] %v7522_v4  ;;  %v3525_v6 = vrot.slane %v3523_v32, 2  ;;  %v4012_v32 = vld [vmem:[%s6268_s23 + $0x10] sm:$0x8] }
 0x264   : > { %v1865_v1 = vpop.f32.mrf.mxu1  ;;  %v2377_v55 = vpop.f32.mrf.mxu0  ;;  %5682 = vmatmul.mubr.bf16.gmra.mxu1 %v2526_v26  ;;  %5778 = vmatmul.mubr.bf16.gmra.mxu0 %v3036_v56  ;;  %v3517_v26 = vrot.slane %v3515_v18, 2 }
 0x265   : > { %v1935_v5 = vadd.f32 %v1865_v1, %v7170_v17  ;;  %v7531_v35 = vadd.f32 %v2377_v55, %v1933_v44  ;;  %5685 = vmatprep.mubr.msk.bf16.mxu1 %vm6214_vm0, %v8079_v37  ;;  %5781 = vmatprep.mubr.msk.bf16.mxu0 %vm6214_vm0, %v8079_v37  ;;  %v3520_v17 = vrot.slane %v3518_v63, 3  ;;  %v7541_v44 = vld [vmem:[%s6268_s23 + $0x20] sm:$0xff]   ;;  %v3528_v1 = vrot.slane %v3526_v59, 3 }
 0x266   : > { %v5471_v2 = vpop.f32.mrf.mxu1  ;;  %v5567_v61 = vpop.f32.mrf.mxu0  ;;  %v3532_v16 = vshrl.u32 %v7541_v44, 16  ;;  %v3535_v18 = vshll.u32 %v7541_v44, 16 }
 0x267   : > { %8083 = vst [vmem:[#allocation3_spill] sm:$0xff] %v7531_v35  ;;  %v3521_v61 = vor.u32 %v3520_v17, %v3517_v26  ;;  %v7557_v26 = vld [vmem:[%s6268_s23 + $0x28] sm:$0xff]   ;;  %v4816_v17 = vcombine.low %v4012_v32, %v7515_v7 }
 0x268   : > { %v1868_v27 = vpop.f32.mrf.mxu1  ;;  %v2380_v11 = vpop.f32.mrf.mxu0 }
 0x269   : > { %v1936_v56 = vadd.f32 %v1868_v27, %v7178_v33  ;;  %v7544_v36 = vadd.f32 %v2380_v11, %v1934_v19  ;;  %v3529_v19 = vor.u32 %v3528_v1, %v3525_v6  ;;  %v3534_v11 = vrot.slane %v3532_v16, 2 }
 0x26a   : > { %v5472_v55 = vpop.f32.mrf.mxu1  ;;  %v5568_v35 = vpop.f32.mrf.mxu0  ;;  %v3541_v16 = vshrl.u32 %v7557_v26, 16  ;;  %v4034_v7 = vrot.slane %v4816_v17, 3 }
 0x26c   : > { %v1873_v4 = vpop.f32.mrf.mxu1  ;;  %v2385_v2 = vpop.f32.mrf.mxu0  ;;  %5686 = vmatmul.mubr.bf16.gmra.mxu1 %v2525_v9  ;;  %5782 = vmatmul.mubr.bf16.gmra.mxu0 %v3038_v0  ;;  %v3537_v0 = vrot.slane %v3535_v18, 3  ;;  %v3544_v18 = vshll.u32 %v7557_v26, 16 }
 0x26d   : > { %v1937_v63 = vadd.f32 %v1873_v4, %v7187_v34  ;;  %v7549_v33 = vadd.f32 %v2385_v2, %v1935_v5  ;;  %5785 = vmatprep.mubr.msk.bf16.mxu0 %vm6214_vm0, %v8079_v37  ;;  %5805 = vmatprep.mubr.msk.bf16.mxu1 %vm6214_vm0, %v8079_v37  ;;  %v3530_v5 = vsel %vm3513_vm5, %v3521_v61, %v3529_v19 }
 0x26e   : > { %v5475_v35 = vpop.f32.mrf.mxu1  ;;  %v5571_v9 = vpop.f32.mrf.mxu0 }
 0x26f   : > { %v3538_v35 = vor.u32 %v3537_v0, %v3534_v11  ;;  %v3546_v11 = vrot.slane %v3544_v18, 3 }
 0x270   : > { %v1876_v59 = vpop.f32.mrf.mxu1  ;;  %v2388_v27 = vpop.f32.mrf.mxu0 }
 0x271   : > { %v1938_v34 = vadd.f32 %v1876_v59, %v7199_v29  ;;  %v7560_v4 = vadd.f32 %v2388_v27, %v1936_v56  ;;  %v3543_v27 = vrot.slane %v3541_v16, 2  ;;  %v3539_v0 = vsel %vm3513_vm5, %v3529_v19, %v3538_v35 }
 0x272   : > { %v5476_v55 = vpop.f32.mrf.mxu1  ;;  %v5572_v6 = vpop.f32.mrf.mxu0  ;;  %v4037_v16 = vrot.slane %v7541_v44, 3 }
 0x273   : > { %v7580_v55 = vld [vmem:[%s6268_s23 + $0x30] sm:$0xff]  }
 0x274   : > { %v1881_v1 = vpop.f32.mrf.mxu1  ;;  %v2393_v2 = vpop.f32.mrf.mxu0  ;;  %5786 = vmatmul.mubr.bf16.gmra.mxu0 %v3037_v60  ;;  %5806 = vmatmul.mubr.bf16.vlgmr.msra.gmra.mxu1 %v3530_v5  ;;  %v4035_v60 = vrot.slane %v7527_v42, 3  ;;  %v3550_v19 = vshrl.u32 %v7580_v55, 16  ;;  %v3553_v18 = vshll.u32 %v7580_v55, 16 }
 0x275   : > { %v1939_v9 = vadd.f32 %v1881_v1, %v7214_v41  ;;  %v7567_v29 = vadd.f32 %v2393_v2, %v1937_v63  ;;  %5809 = vmatprep.mubr.msk.bf16.mxu1 %vm6214_vm0, %v8079_v37  ;;  %5905 = vmatprep.mubr.msk.bf16.mxu0 %vm6214_vm0, %v8079_v37  ;;  %v3547_v2 = vor.u32 %v3546_v11, %v3543_v27 }
 0x276   : > { %v5479_v56 = vpop.f32.mrf.mxu1  ;;  %v5575_v61 = vpop.f32.mrf.mxu0  ;;  %v4036_v5 = vsel %vm4033_vm6, %v4034_v7, %v4035_v60  ;;  %v3552_v11 = vrot.slane %v3550_v19, 2 }
 0x277   : > { %v3548_v44 = vsel %vm3513_vm5, %v3538_v35, %v3547_v2 }
 0x278   : > { %v1884_v32 = vpop.f32.mrf.mxu1  ;;  %v2396_v59 = vpop.f32.mrf.mxu0 }
 0x279   : > { %v1940_v41 = vadd.f32 %v1884_v32, %v7231_v28  ;;  %v7575_v63 = vadd.f32 %v2396_v59, %v1938_v34 }
 0x27a   : > { %v5480_v17 = vpop.f32.mrf.mxu1  ;;  %v5576_v6 = vpop.f32.mrf.mxu0 }
 0x27c   : > { %v1889_v42 = vpop.f32.mrf.mxu1  ;;  %v2401_v1 = vpop.f32.mrf.mxu0  ;;  %5810 = vmatmul.mubr.bf16.gmra.mxu1 %v3539_v0  ;;  %5906 = vmatmul.mubr.bf16.vlgmr.msra.gmra.mxu0 %v4036_v5  ;;  %v3555_v0 = vrot.slane %v3553_v18, 3 }
 0x27d   : > { %v1941_v28 = vadd.f32 %v1889_v42, %v7246_v54  ;;  %v7584_v34 = vadd.f32 %v2401_v1, %v1939_v9  ;;  %5813 = vmatprep.mubr.msk.bf16.mxu1 %vm6214_vm0, %v8079_v37  ;;  %5909 = vmatprep.mubr.msk.bf16.mxu0 %vm6214_vm0, %v8079_v37  ;;  %v4038_v54 = vsel %vm4033_vm6, %v4035_v60, %v4037_v16  ;;  %v7595_v9 = vld [vmem:[%s6268_s23 + $0x38] sm:$0xff]  }
 0x27e   : > { %v5483_v7 = vpop.f32.mrf.mxu1  ;;  %v5579_v56 = vpop.f32.mrf.mxu0  ;;  %v3559_v1 = vshrl.u32 %v7595_v9, 16  ;;  %v3562_v35 = vshll.u32 %v7595_v9, 16 }
 0x280   : > { %v1892_v61 = vpop.f32.mrf.mxu1  ;;  %v2404_v32 = vpop.f32.mrf.mxu0 }
 0x281   : > { %v1942_v59 = vadd.f32 %v1892_v61, %v7264_v12  ;;  %v7598_v27 = vadd.f32 %v2404_v32, %v1940_v41  ;;  %v3556_v12 = vor.u32 %v3555_v0, %v3552_v11  ;;  %v4039_v41 = vrot.slane %v7557_v26, 3 }
 0x282   : > { %v5484_v5 = vpop.f32.mrf.mxu1  ;;  %v5580_v17 = vpop.f32.mrf.mxu0  ;;  %v3561_v32 = vrot.slane %v3559_v1, 2  ;;  %v4041_v0 = vrot.slane %v7580_v55, 3 }
 0x283   : > { %v7615_v5 = vld [vmem:[%s6268_s23 + $0x40] sm:$0xff]  }
 0x284   : > { %v1897_v6 = vpop.f32.mrf.mxu1  ;;  %v2409_v42 = vpop.f32.mrf.mxu0  ;;  %5814 = vmatmul.mubr.bf16.gmra.mxu1 %v3548_v44  ;;  %5910 = vmatmul.mubr.bf16.gmra.mxu0 %v4038_v54  ;;  %v3564_v44 = vrot.slane %v3562_v35, 3 }
 0x285   : > { %v1943_v60 = vadd.f32 %v1897_v6, %v7279_v51  ;;  %v7603_v7 = vadd.f32 %v2409_v42, %v1941_v28  ;;  %5817 = vmatprep.mubr.msk.bf16.mxu1 %vm6214_vm0, %v8079_v37  ;;  %5913 = vmatprep.mubr.msk.bf16.mxu0 %vm6214_vm0, %v8079_v37  ;;  %v3557_v51 = vsel %vm3513_vm5, %v3547_v2, %v3556_v12  ;;  %v3568_v2 = vshrl.u32 %v7615_v5, 16 }
 0x286   : > { %v5487_v19 = vpop.f32.mrf.mxu1  ;;  %v5583_v18 = vpop.f32.mrf.mxu0  ;;  %v4040_v28 = vsel %vm4033_vm6, %v4037_v16, %v4039_v41  ;;  %v3565_v26 = vor.u32 %v3564_v44, %v3561_v32  ;;  %v3571_v16 = vshll.u32 %v7615_v5, 16 }
 0x287   : > { %v3570_v32 = vrot.slane %v3568_v2, 2 }
 0x288   : > { %v1900_v56 = vpop.f32.mrf.mxu1  ;;  %v2412_v61 = vpop.f32.mrf.mxu0  ;;  %v3566_v55 = vsel %vm3513_vm5, %v3556_v12, %v3565_v26  ;;  %v3573_v44 = vrot.slane %v3571_v16, 3 }
 0x289   : > { %v7610_v54 = vadd.f32 %v2412_v61, %v1942_v59  ;;  %v4042_v61 = vsel %vm4033_vm6, %v4039_v41, %v4041_v0  ;;  %v4043_v41 = vrot.slane %v7595_v9, 3 }
 0x28a   : > { %v5488_v17 = vpop.f32.mrf.mxu1  ;;  %v5584_v6 = vpop.f32.mrf.mxu0 }
 0x28c   : > { %v2417_v42 = vpop.f32.mrf.mxu0  ;;  %v2630_v11 = vpop.f32.mrf.mxu1  ;;  %5818 = vmatmul.mubr.bf16.gmra.mxu1 %v3557_v51  ;;  %5914 = vmatmul.mubr.bf16.gmra.mxu0 %v4040_v28 }
 0x28d   : > { %v7618_v1 = vadd.f32 %v2417_v42, %v1943_v60  ;;  %v2796_v59 = vadd.f32 %v2630_v11, %v7306_v14  ;;  %5821 = vmatprep.mubr.msk.bf16.mxu1 %vm6214_vm0, %v8079_v37  ;;  %5917 = vmatprep.mubr.msk.bf16.mxu0 %vm6214_vm0, %v8079_v37  ;;  %v7629_v60 = vld [vmem:[%s6268_s23 + $0x48] sm:$0xff]  }
 0x28e   : > { %v5587_v35 = vpop.f32.mrf.mxu0  ;;  %v5607_v19 = vpop.f32.mrf.mxu1  ;;  %v3577_v42 = vshrl.u32 %v7629_v60, 16  ;;  %v3580_v11 = vshll.u32 %v7629_v60, 16 }
 0x290   : > { %v2420_v18 = vpop.f32.mrf.mxu0  ;;  %v2633_v56 = vpop.f32.mrf.mxu1 }
 0x291   : > { %v2797_v14 = vadd.f32 %v2633_v56, %v7318_v20  ;;  %v3574_v20 = vor.u32 %v3573_v44, %v3570_v32  ;;  %v3579_v56 = vrot.slane %v3577_v42, 2  ;;  %v4045_v42 = vrot.slane %v7615_v5, 3 }
 0x292   : > { %v5588_v51 = vpop.f32.mrf.mxu0  ;;  %v5608_v28 = vpop.f32.mrf.mxu1 }
 0x293   : > { %v4044_v51 = vsel %vm4033_vm6, %v4041_v0, %v4043_v41  ;;  %v7649_v28 = vld [vmem:[%s6268_s23 + $0x50] sm:$0xff]  }
 0x294   : > { %v2638_v17 = vpop.f32.mrf.mxu1  ;;  %v3142_v6 = vpop.f32.mrf.mxu0  ;;  %5822 = vmatmul.mubr.bf16.gmra.mxu1 %v3566_v55  ;;  %5918 = vmatmul.mubr.bf16.gmra.mxu0 %v4042_v61  ;;  %v3582_v55 = vrot.slane %v3580_v11, 3  ;;  %v3589_v0 = vshll.u32 %v7649_v28, 16 }
 0x295   : > { %v2798_v12 = vadd.f32 %v2638_v17, %v7324_v53  ;;  %v7636_v35 = vadd.f32 %v3142_v6, %v2796_v59  ;;  %5825 = vmatprep.mubr.msk.bf16.mxu1 %vm6214_vm0, %v8079_v37  ;;  %5921 = vmatprep.mubr.msk.bf16.mxu0 %vm6214_vm0, %v8079_v37  ;;  %v3575_v59 = vsel %vm3513_vm5, %v3565_v26, %v3574_v20  ;;  %v3586_v26 = vshrl.u32 %v7649_v28, 16 }
 0x296   : > { %v5611_v2 = vpop.f32.mrf.mxu1  ;;  %v5707_v16 = vpop.f32.mrf.mxu0  ;;  %v3583_v6 = vor.u32 %v3582_v55, %v3579_v56 }
 0x297   : > { %v3588_v55 = vrot.slane %v3586_v26, 2 }
 0x298   : > { %v2641_v19 = vpop.f32.mrf.mxu1  ;;  %v3145_v18 = vpop.f32.mrf.mxu0  ;;  %v3584_v5 = vsel %vm3513_vm5, %v3574_v20, %v3583_v6 }
 0x299   : > { %v2799_v53 = vadd.f32 %v2641_v19, %v7332_v57  ;;  %v7644_v61 = vadd.f32 %v3145_v18, %v2797_v14 }
 0x29a   : > { %v5612_v17 = vpop.f32.mrf.mxu1  ;;  %v5708_v32 = vpop.f32.mrf.mxu0 }
 0x29c   : > { %v2646_v44 = vpop.f32.mrf.mxu1  ;;  %v3150_v9 = vpop.f32.mrf.mxu0  ;;  %5826 = vmatmul.mubr.bf16.gmra.mxu1 %v3575_v59  ;;  %5922 = vmatmul.mubr.bf16.gmra.mxu0 %v4044_v51  ;;  %v3591_v59 = vrot.slane %v3589_v0, 3 }
 0x29d   : > { %v2800_v57 = vadd.f32 %v2646_v44, %v7338_v40  ;;  %v7653_v14 = vadd.f32 %v3150_v9, %v2798_v12  ;;  %5829 = vmatprep.mubr.msk.bf16.mxu1 %vm6214_vm0, %v8079_v37  ;;  %5925 = vmatprep.mubr.msk.bf16.mxu0 %vm6214_vm0, %v8079_v37  ;;  %v4046_v40 = vsel %vm4033_vm6, %v4043_v41, %v4045_v42  ;;  %v7664_v12 = vld [vmem:[%s6268_s23 + $0x58] sm:$0xff]  }
 0x29e   : > { %v5615_v11 = vpop.f32.mrf.mxu1  ;;  %v5711_v2 = vpop.f32.mrf.mxu0  ;;  %v3595_v9 = vshrl.u32 %v7664_v12, 16  ;;  %v3598_v20 = vshll.u32 %v7664_v12, 16 }
 0x2a0   : > { %v2649_v16 = vpop.f32.mrf.mxu1  ;;  %v3153_v19 = vpop.f32.mrf.mxu0 }
 0x2a1   : > { %v2801_v18 = vadd.f32 %v2649_v16, %v7346_v50  ;;  %v7667_v56 = vadd.f32 %v3153_v19, %v2799_v53  ;;  %v3592_v50 = vor.u32 %v3591_v59, %v3588_v55  ;;  %v4047_v53 = vrot.slane %v7629_v60, 3 }
 0x2a2   : > { %v5616_v51 = vpop.f32.mrf.mxu1  ;;  %v5712_v17 = vpop.f32.mrf.mxu0  ;;  %v3597_v19 = vrot.slane %v3595_v9, 2  ;;  %v4049_v9 = vrot.slane %v7649_v28, 3 }
 0x2a3   : > { %v4048_v51 = vsel %vm4033_vm6, %v4045_v42, %v4047_v53  ;;  %v7685_v17 = vld [vmem:[%s6268_s23 + $0x60] sm:$0xff]  }
 0x2a4   : > { %v2654_v32 = vpop.f32.mrf.mxu1  ;;  %v3158_v44 = vpop.f32.mrf.mxu0  ;;  %5830 = vmatmul.mubr.bf16.gmra.mxu1 %v3584_v5  ;;  %5926 = vmatmul.mubr.bf16.gmra.mxu0 %v4046_v40  ;;  %v3600_v5 = vrot.slane %v3598_v20, 3  ;;  %v3607_v42 = vshll.u32 %v7685_v17, 16 }
 0x2a5   : > { %v2802_v41 = vadd.f32 %v2654_v32, %v7352_v24  ;;  %v7672_v11 = vadd.f32 %v3158_v44, %v2800_v57  ;;  %5833 = vmatprep.mubr.msk.bf16.mxu1 %vm6214_vm0, %v8079_v37  ;;  %5929 = vmatprep.mubr.msk.bf16.mxu0 %vm6214_vm0, %v8079_v37  ;;  %v3593_v57 = vsel %vm3513_vm5, %v3583_v6, %v3592_v50  ;;  %v3604_v6 = vshrl.u32 %v7685_v17, 16 }
 0x2a6   : > { %v5619_v26 = vpop.f32.mrf.mxu1  ;;  %v5715_v0 = vpop.f32.mrf.mxu0  ;;  %v3601_v44 = vor.u32 %v3600_v5, %v3597_v19 }
 0x2a7   : > { %v3606_v5 = vrot.slane %v3604_v6, 2 }
 0x2a8   : > { %v2657_v2 = vpop.f32.mrf.mxu1  ;;  %v3161_v16 = vpop.f32.mrf.mxu0  ;;  %v3602_v28 = vsel %vm3513_vm5, %v3592_v50, %v3601_v44 }
 0x2a9   : > { %v2803_v24 = vadd.f32 %v2657_v2, %v7360_v10  ;;  %v7680_v40 = vadd.f32 %v3161_v16, %v2801_v18 }
 0x2aa   : > { %v5620_v32 = vpop.f32.mrf.mxu1  ;;  %v5716_v55 = vpop.f32.mrf.mxu0 }
 0x2ac   : > { %v2662_v59 = vpop.f32.mrf.mxu1  ;;  %v3166_v60 = vpop.f32.mrf.mxu0  ;;  %5834 = vmatmul.mubr.bf16.gmra.mxu1 %v3593_v57  ;;  %5930 = vmatmul.mubr.bf16.gmra.mxu0 %v4048_v51  ;;  %v3609_v57 = vrot.slane %v3607_v42, 3 }
 0x2ad   : > { %v2804_v10 = vadd.f32 %v2662_v59, %v7366_v48  ;;  %v7689_v18 = vadd.f32 %v3166_v60, %v2802_v41  ;;  %5837 = vmatprep.mubr.msk.bf16.mxu1 %vm6214_vm0, %v8079_v37  ;;  %5933 = vmatprep.mubr.msk.bf16.mxu0 %vm6214_vm0, %v8079_v37  ;;  %v4050_v48 = vsel %vm4033_vm6, %v4047_v53, %v4049_v9  ;;  %v7700_v41 = vld [vmem:[%s6268_s23 + $0x68] sm:$0xff]  }
 0x2ae   : > { %v5623_v20 = vpop.f32.mrf.mxu1  ;;  %v5719_v26 = vpop.f32.mrf.mxu0  ;;  %v3613_v60 = vshrl.u32 %v7700_v41, 16  ;;  %v3616_v50 = vshll.u32 %v7700_v41, 16 }
 0x2b0   : > { %v2665_v0 = vpop.f32.mrf.mxu1  ;;  %v3169_v2 = vpop.f32.mrf.mxu0 }
 0x2b1   : > { %v2805_v16 = vadd.f32 %v2665_v0, %v7374_v21  ;;  %v7703_v19 = vadd.f32 %v3169_v2, %v2803_v24  ;;  %v3610_v21 = vor.u32 %v3609_v57, %v3606_v5  ;;  %v4051_v24 = vrot.slane %v7664_v12, 3 }
 0x2b2   : > { %v5624_v51 = vpop.f32.mrf.mxu1  ;;  %v5720_v32 = vpop.f32.mrf.mxu0  ;;  %v3615_v2 = vrot.slane %v3613_v60, 2  ;;  %v4053_v60 = vrot.slane %v7685_v17, 3 }
 0x2b3   : > { %v4052_v51 = vsel %vm4033_vm6, %v4049_v9, %v4051_v24  ;;  %v7721_v32 = vld [vmem:[%s6268_s23 + $0x70] sm:$0xff]  }
 0x2b4   : > { %v2670_v55 = vpop.f32.mrf.mxu1  ;;  %v3174_v59 = vpop.f32.mrf.mxu0  ;;  %5838 = vmatmul.mubr.bf16.gmra.mxu1 %v3602_v28  ;;  %5934 = vmatmul.mubr.bf16.gmra.mxu0 %v4050_v48  ;;  %v3618_v28 = vrot.slane %v3616_v50, 3  ;;  %v3625_v9 = vshll.u32 %v7721_v32, 16 }
 0x2b5   : > { %v2806_v53 = vadd.f32 %v2670_v55, %v7380_v23  ;;  %v7708_v20 = vadd.f32 %v3174_v59, %v2804_v10  ;;  %5841 = vmatprep.mubr.msk.bf16.mxu1 %vm6214_vm0, %v8079_v37  ;;  %5937 = vmatprep.mubr.msk.bf16.mxu0 %vm6214_vm0, %v8079_v37  ;;  %v3611_v10 = vsel %vm3513_vm5, %v3601_v44, %v3610_v21  ;;  %v3622_v44 = vshrl.u32 %v7721_v32, 16 }
 0x2b6   : > { %v5627_v6 = vpop.f32.mrf.mxu1  ;;  %v5723_v42 = vpop.f32.mrf.mxu0  ;;  %v3619_v59 = vor.u32 %v3618_v28, %v3615_v2 }
 0x2b7   : > { %v3624_v28 = vrot.slane %v3622_v44, 2 }
 0x2b8   : > { %v2673_v26 = vpop.f32.mrf.mxu1  ;;  %v3177_v0 = vpop.f32.mrf.mxu0  ;;  %v3620_v17 = vsel %vm3513_vm5, %v3610_v21, %v3619_v59 }
 0x2b9   : > { %v2807_v23 = vadd.f32 %v2673_v26, %v7388_v3  ;;  %v7716_v48 = vadd.f32 %v3177_v0, %v2805_v16 }
 0x2ba   : > { %v5628_v55 = vpop.f32.mrf.mxu1  ;;  %v5724_v5 = vpop.f32.mrf.mxu0 }
 0x2bc   : > { %v2678_v57 = vpop.f32.mrf.mxu1  ;;  %v3182_v12 = vpop.f32.mrf.mxu0  ;;  %5842 = vmatmul.mubr.bf16.gmra.mxu1 %v3611_v10  ;;  %5938 = vmatmul.mubr.bf16.gmra.mxu0 %v4052_v51  ;;  %v3627_v10 = vrot.slane %v3625_v9, 3 }
 0x2bd   : > { %v2808_v3 = vadd.f32 %v2678_v57, %v7394_v45  ;;  %v7725_v16 = vadd.f32 %v3182_v12, %v2806_v53  ;;  %5845 = vmatprep.mubr.msk.bf16.mxu1 %vm6214_vm0, %v8079_v37  ;;  %5941 = vmatprep.mubr.msk.bf16.mxu0 %vm6214_vm0, %v8079_v37  ;;  %v4054_v45 = vsel %vm4033_vm6, %v4051_v24, %v4053_v60  ;;  %v7736_v53 = vld [vmem:[%s6268_s23 + $0x78] sm:$0xff]  }
 0x2be   : > { %v5631_v50 = vpop.f32.mrf.mxu1  ;;  %v5727_v6 = vpop.f32.mrf.mxu0  ;;  %v3631_v12 = vshrl.u32 %v7736_v53, 16  ;;  %v3634_v21 = vshll.u32 %v7736_v53, 16 }
 0x2c0   : > { %v2681_v42 = vpop.f32.mrf.mxu1  ;;  %v3185_v26 = vpop.f32.mrf.mxu0 }
 0x2c1   : > { %v2809_v0 = vadd.f32 %v2681_v42, %v7402_v46  ;;  %v7739_v2 = vadd.f32 %v3185_v26, %v2807_v23  ;;  %v3628_v46 = vor.u32 %v3627_v10, %v3624_v28  ;;  %v4055_v23 = vrot.slane %v7700_v41, 3 }
 0x2c2   : > { %v5632_v51 = vpop.f32.mrf.mxu1  ;;  %v5728_v55 = vpop.f32.mrf.mxu0  ;;  %v3633_v26 = vrot.slane %v3631_v12, 2  ;;  %v4057_v12 = vrot.slane %v7721_v32, 3 }
 0x2c3   : > { %v4056_v51 = vsel %vm4033_vm6, %v4053_v60, %v4055_v23  ;;  %v7757_v55 = vld [vmem:[%s6268_s23 + $0x80] sm:$0xff]  }
 0x2c4   : > { %v2686_v5 = vpop.f32.mrf.mxu1  ;;  %v3190_v57 = vpop.f32.mrf.mxu0  ;;  %5846 = vmatmul.mubr.bf16.gmra.mxu1 %v3620_v17  ;;  %5942 = vmatmul.mubr.bf16.gmra.mxu0 %v4054_v45  ;;  %v3636_v17 = vrot.slane %v3634_v21, 3  ;;  %v3643_v60 = vshll.u32 %v7757_v55, 16 }
 0x2c5   : > { %v2810_v24 = vadd.f32 %v2686_v5, %v7408_v8  ;;  %v7744_v50 = vadd.f32 %v3190_v57, %v2808_v3  ;;  %5849 = vmatprep.mubr.msk.bf16.mxu1 %vm6214_vm0, %v8079_v37  ;;  %5945 = vmatprep.mubr.msk.bf16.mxu0 %vm6214_vm0, %v8079_v37  ;;  %v3629_v3 = vsel %vm3513_vm5, %v3619_v59, %v3628_v46  ;;  %v3640_v59 = vshrl.u32 %v7757_v55, 16 }
 0x2c6   : > { %v5635_v44 = vpop.f32.mrf.mxu1  ;;  %v5731_v9 = vpop.f32.mrf.mxu0  ;;  %v3637_v57 = vor.u32 %v3636_v17, %v3633_v26 }
 0x2c7   : > { %v3642_v17 = vrot.slane %v3640_v59, 2 }
 0x2c8   : > { %v2689_v6 = vpop.f32.mrf.mxu1  ;;  %v3193_v42 = vpop.f32.mrf.mxu0  ;;  %v3638_v32 = vsel %vm3513_vm5, %v3628_v46, %v3637_v57 }
 0x2c9   : > { %v2811_v8 = vadd.f32 %v2689_v6, %v7416_v31  ;;  %v7752_v45 = vadd.f32 %v3193_v42, %v2809_v0 }
 0x2ca   : > { %v5636_v5 = vpop.f32.mrf.mxu1  ;;  %v5732_v28 = vpop.f32.mrf.mxu0 }
 0x2cc   : > { %v2694_v10 = vpop.f32.mrf.mxu1  ;;  %v3198_v41 = vpop.f32.mrf.mxu0  ;;  %5850 = vmatmul.mubr.bf16.gmra.mxu1 %v3629_v3  ;;  %5946 = vmatmul.mubr.bf16.gmra.mxu0 %v4056_v51  ;;  %v3645_v3 = vrot.slane %v3643_v60, 3 }
 0x2cd   : > { %v2812_v31 = vadd.f32 %v2694_v10, %v7422_v47  ;;  %v7761_v0 = vadd.f32 %v3198_v41, %v2810_v24  ;;  %5853 = vmatprep.mubr.msk.bf16.mxu1 %vm6214_vm0, %v8079_v37  ;;  %5949 = vmatprep.mubr.msk.bf16.mxu0 %vm6214_vm0, %v8079_v37  ;;  %v4058_v47 = vsel %vm4033_vm6, %v4055_v23, %v4057_v12  ;;  %v7772_v24 = vld [vmem:[%s6268_s23 + $0x88] sm:$0xff]  }
 0x2ce   : > { %v5639_v21 = vpop.f32.mrf.mxu1  ;;  %v5735_v44 = vpop.f32.mrf.mxu0  ;;  %v3649_v41 = vshrl.u32 %v7772_v24, 16  ;;  %v3652_v46 = vshll.u32 %v7772_v24, 16 }
 0x2d0   : > { %v2697_v9 = vpop.f32.mrf.mxu1  ;;  %v3201_v6 = vpop.f32.mrf.mxu0 }
 0x2d1   : > { %v2813_v42 = vadd.f32 %v2697_v9, %v7430_v38  ;;  %v7775_v26 = vadd.f32 %v3201_v6, %v2811_v8  ;;  %v3646_v38 = vor.u32 %v3645_v3, %v3642_v17  ;;  %v4059_v8 = vrot.slane %v7736_v53, 3 }
 0x2d2   : > { %v5640_v51 = vpop.f32.mrf.mxu1  ;;  %v5736_v5 = vpop.f32.mrf.mxu0  ;;  %v3651_v6 = vrot.slane %v3649_v41, 2  ;;  %v4061_v41 = vrot.slane %v7757_v55, 3 }
 0x2d3   : > { %v4060_v51 = vsel %vm4033_vm6, %v4057_v12, %v4059_v8  ;;  %v7793_v5 = vld [vmem:[%s6268_s23 + $0x90] sm:$0xff]  }
 0x2d4   : > { %v2702_v28 = vpop.f32.mrf.mxu1  ;;  %v3206_v10 = vpop.f32.mrf.mxu0  ;;  %5854 = vmatmul.mubr.bf16.gmra.mxu1 %v3638_v32  ;;  %5950 = vmatmul.mubr.bf16.gmra.mxu0 %v4058_v47  ;;  %v3654_v32 = vrot.slane %v3652_v46, 3  ;;  %v3661_v12 = vshll.u32 %v7793_v5, 16 }
 0x2d5   : > { %v2814_v23 = vadd.f32 %v2702_v28, %v7436_v52  ;;  %v7780_v21 = vadd.f32 %v3206_v10, %v2812_v31  ;;  %5857 = vmatprep.mubr.msk.bf16.mxu1 %vm6214_vm0, %v8079_v37  ;;  %5953 = vmatprep.mubr.msk.bf16.mxu0 %vm6214_vm0, %v8079_v37  ;;  %v3647_v31 = vsel %vm3513_vm5, %v3637_v57, %v3646_v38  ;;  %v3658_v57 = vshrl.u32 %v7793_v5, 16 }
 0x2d6   : > { %v5643_v59 = vpop.f32.mrf.mxu1  ;;  %v5739_v60 = vpop.f32.mrf.mxu0  ;;  %v3655_v10 = vor.u32 %v3654_v32, %v3651_v6 }
 0x2d7   : > { %v3660_v32 = vrot.slane %v3658_v57, 2 }
 0x2d8   : > { %v2705_v44 = vpop.f32.mrf.mxu1  ;;  %v3209_v9 = vpop.f32.mrf.mxu0  ;;  %v3656_v55 = vsel %vm3513_vm5, %v3646_v38, %v3655_v10 }
 0x2d9   : > { %v2815_v52 = vadd.f32 %v2705_v44, %v7444_v13  ;;  %v7788_v47 = vadd.f32 %v3209_v9, %v2813_v42 }
 0x2da   : > { %v5644_v28 = vpop.f32.mrf.mxu1  ;;  %v5740_v17 = vpop.f32.mrf.mxu0 }
 0x2dc   : > { %v2710_v3 = vpop.f32.mrf.mxu1  ;;  %v3214_v53 = vpop.f32.mrf.mxu0  ;;  %5858 = vmatmul.mubr.bf16.gmra.mxu1 %v3647_v31  ;;  %5954 = vmatmul.mubr.bf16.gmra.mxu0 %v4060_v51  ;;  %v3663_v31 = vrot.slane %v3661_v12, 3 }
 0x2dd   : > { %v2816_v13 = vadd.f32 %v2710_v3, %v7450_v30  ;;  %v7797_v42 = vadd.f32 %v3214_v53, %v2814_v23  ;;  %5861 = vmatprep.mubr.msk.bf16.mxu1 %vm6214_vm0, %v8079_v37  ;;  %5957 = vmatprep.mubr.msk.bf16.mxu0 %vm6214_vm0, %v8079_v37  ;;  %v4062_v30 = vsel %vm4033_vm6, %v4059_v8, %v4061_v41  ;;  %v7808_v23 = vld [vmem:[%s6268_s23 + $0x98] sm:$0xff]  }
 0x2de   : > { %v5647_v46 = vpop.f32.mrf.mxu1  ;;  %v5743_v59 = vpop.f32.mrf.mxu0  ;;  %v3667_v53 = vshrl.u32 %v7808_v23, 16  ;;  %v3670_v38 = vshll.u32 %v7808_v23, 16 }
 0x2e0   : > { %v2713_v60 = vpop.f32.mrf.mxu1  ;;  %v3217_v44 = vpop.f32.mrf.mxu0 }
 0x2e1   : > { %v2817_v9 = vadd.f32 %v2713_v60, %v7458_v22  ;;  %v7811_v6 = vadd.f32 %v3217_v44, %v2815_v52  ;;  %v3664_v22 = vor.u32 %v3663_v31, %v3660_v32  ;;  %v4063_v52 = vrot.slane %v7772_v24, 3 }
 0x2e2   : > { %v5648_v51 = vpop.f32.mrf.mxu1  ;;  %v5744_v28 = vpop.f32.mrf.mxu0  ;;  %v3669_v44 = vrot.slane %v3667_v53, 2  ;;  %v4065_v53 = vrot.slane %v7793_v5, 3 }
 0x2e3   : > { %v4064_v51 = vsel %vm4033_vm6, %v4061_v41, %v4063_v52  ;;  %v7829_v28 = vld [vmem:[%s6268_s23 + $0xa0] sm:$0xff]  }
 0x2e4   : > { %v2718_v17 = vpop.f32.mrf.mxu1  ;;  %v3222_v3 = vpop.f32.mrf.mxu0  ;;  %5862 = vmatmul.mubr.bf16.gmra.mxu1 %v3656_v55  ;;  %5958 = vmatmul.mubr.bf16.gmra.mxu0 %v4062_v30  ;;  %v3672_v55 = vrot.slane %v3670_v38, 3  ;;  %v3679_v41 = vshll.u32 %v7829_v28, 16 }
 0x2e5   : > { %v2818_v8 = vadd.f32 %v2718_v17, %v7464_v58  ;;  %v7816_v46 = vadd.f32 %v3222_v3, %v2816_v13  ;;  %5865 = vmatprep.mubr.msk.bf16.mxu1 %vm6214_vm0, %v8079_v37  ;;  %5961 = vmatprep.mubr.msk.bf16.mxu0 %vm6214_vm0, %v8079_v37  ;;  %v3665_v13 = vsel %vm3513_vm5, %v3655_v10, %v3664_v22  ;;  %v3676_v10 = vshrl.u32 %v7829_v28, 16 }
 0x2e6   : > { %v5651_v57 = vpop.f32.mrf.mxu1  ;;  %v5747_v12 = vpop.f32.mrf.mxu0  ;;  %v3673_v3 = vor.u32 %v3672_v55, %v3669_v44 }
 0x2e7   : > { %v3678_v55 = vrot.slane %v3676_v10, 2 }
 0x2e8   : > { %v2721_v59 = vpop.f32.mrf.mxu1  ;;  %v3225_v60 = vpop.f32.mrf.mxu0  ;;  %v3674_v5 = vsel %vm3513_vm5, %v3664_v22, %v3673_v3 }
 0x2e9   : > { %v2819_v58 = vadd.f32 %v2721_v59, %v7472_v49  ;;  %v7824_v30 = vadd.f32 %v3225_v60, %v2817_v9 }
 0x2ea   : > { %v5652_v17 = vpop.f32.mrf.mxu1  ;;  %v5748_v32 = vpop.f32.mrf.mxu0 }
 0x2ec   : > { %v2726_v31 = vpop.f32.mrf.mxu1  ;;  %v3230_v24 = vpop.f32.mrf.mxu0  ;;  %5866 = vmatmul.mubr.bf16.gmra.mxu1 %v3665_v13  ;;  %5962 = vmatmul.mubr.bf16.gmra.mxu0 %v4064_v51  ;;  %v3681_v13 = vrot.slane %v3679_v41, 3 }
 0x2ed   : > { %v2820_v49 = vadd.f32 %v2726_v31, %v7478_v15  ;;  %v7833_v9 = vadd.f32 %v3230_v24, %v2818_v8  ;;  %5869 = vmatprep.mubr.msk.bf16.mxu1 %vm6214_vm0, %v8079_v37  ;;  %5965 = vmatprep.mubr.msk.bf16.mxu0 %vm6214_vm0, %v8079_v37  ;;  %v4066_v15 = vsel %vm4033_vm6, %v4063_v52, %v4065_v53  ;;  %v7844_v8 = vld [vmem:[%s6268_s23 + $0xa8] sm:$0xff]  }
 0x2ee   : > { %v5655_v38 = vpop.f32.mrf.mxu1  ;;  %v5751_v57 = vpop.f32.mrf.mxu0  ;;  %v3685_v24 = vshrl.u32 %v7844_v8, 16  ;;  %v3688_v22 = vshll.u32 %v7844_v8, 16 }
 0x2f0   : > { %v2729_v12 = vpop.f32.mrf.mxu1  ;;  %v3233_v59 = vpop.f32.mrf.mxu0 }
 0x2f1   : > { %v2821_v60 = vadd.f32 %v2729_v12, %v7486_v62  ;;  %v7847_v44 = vadd.f32 %v3233_v59, %v2819_v58  ;;  %v3682_v62 = vor.u32 %v3681_v13, %v3678_v55  ;;  %v4067_v58 = vrot.slane %v7808_v23, 3 }
 0x2f2   : > { %v5656_v51 = vpop.f32.mrf.mxu1  ;;  %v5752_v17 = vpop.f32.mrf.mxu0  ;;  %v3687_v59 = vrot.slane %v3685_v24, 2  ;;  %v4069_v24 = vrot.slane %v7829_v28, 3 }
 0x2f3   : > { %v4068_v51 = vsel %vm4033_vm6, %v4065_v53, %v4067_v58  ;;  %v7865_v17 = vld [vmem:[%s6268_s23 + $0xb0] sm:$0x1f]   ;;  %s6006_s23 = smul.u32 328, %s8087_s13 }
 0x2f4   : > { %v2734_v32 = vpop.f32.mrf.mxu1  ;;  %v3238_v31 = vpop.f32.mrf.mxu0  ;;  %5870 = vmatmul.mubr.bf16.gmra.mxu1 %v3674_v5  ;;  %5966 = vmatmul.mubr.bf16.gmra.mxu0 %v4066_v15  ;;  %v3690_v5 = vrot.slane %v3688_v22, 3  ;;  %v3697_v53 = vshll.u32 %v7865_v17, 16 }
 0x2f5   : > { %v2822_v52 = vadd.f32 %v2734_v32, %v7492_v39  ;;  %v7852_v38 = vadd.f32 %v3238_v31, %v2820_v49  ;;  %5873 = vmatprep.mubr.msk.bf16.mxu1 %vm6214_vm0, %v8079_v37  ;;  %5969 = vmatprep.mubr.msk.bf16.mxu0 %vm6214_vm0, %v8079_v37  ;;  %v3683_v49 = vsel %vm3513_vm5, %v3673_v3, %v3682_v62  ;;  %v3694_v3 = vshrl.u32 %v7865_v17, 16  ;;  %s7944_s21 = scalar_lea.vmem %s8074_s3, %s6006_s23 }
 0x2f6   : > { %v5659_v10 = vpop.f32.mrf.mxu1  ;;  %v5755_v41 = vpop.f32.mrf.mxu0  ;;  %v3691_v31 = vor.u32 %v3690_v5, %v3687_v59 }
 0x2f7   : > { %v3696_v5 = vrot.slane %v3694_v3, 2 }
 0x2f8   : > { %v2737_v57 = vpop.f32.mrf.mxu1  ;;  %v3241_v12 = vpop.f32.mrf.mxu0  ;;  %v3692_v28 = vsel %vm3513_vm5, %v3682_v62, %v3691_v31 }
 0x2f9   : > { %v2823_v39 = vadd.f32 %v2737_v57, %v7500_v25  ;;  %v7860_v15 = vadd.f32 %v3241_v12, %v2821_v60 }
 0x2fa   : > { %v5660_v32 = vpop.f32.mrf.mxu1  ;;  %v5756_v55 = vpop.f32.mrf.mxu0 }
 0x2fc   : > { %v2742_v13 = vpop.f32.mrf.mxu1  ;;  %v3246_v23 = vpop.f32.mrf.mxu0  ;;  %5874 = vmatmul.mubr.bf16.gmra.mxu1 %v3683_v49  ;;  %5970 = vmatmul.mubr.bf16.gmra.mxu0 %v4068_v51  ;;  %v3699_v49 = vrot.slane %v3697_v53, 3 }
 0x2fd   : > { %v2824_v22 = vadd.f32 %v2742_v13, %v7506_v43  ;;  %v7869_v25 = vadd.f32 %v3246_v23, %v2822_v52  ;;  %5877 = vmatprep.mubr.msk.bf16.mxu1 %vm6214_vm0, %v8079_v37  ;;  %5973 = vmatprep.mubr.msk.bf16.mxu0 %vm6214_vm0, %v8079_v37  ;;  %v4070_v43 = vsel %vm4033_vm6, %v4067_v58, %v4069_v24  ;;  %v8084_v52 = vld [vmem:[#allocation2_spill] sm:$0xff]  ;;  %v8085_v23 = vld [vmem:[#allocation3_spill] sm:$0xff]  ;;  %v4071_v58 = vrot.slane %v7844_v8, 3 }
 0x2fe   : > { %v5663_v60 = vpop.f32.mrf.mxu1  ;;  %v5759_v10 = vpop.f32.mrf.mxu0  ;;  %v3700_v62 = vor.u32 %v3699_v49, %v3696_v5 }
 0x300   : > { %v2745_v41 = vpop.f32.mrf.mxu1  ;;  %v3249_v57 = vpop.f32.mrf.mxu0 }
 0x301   : > { %v2825_v12 = vadd.f32 %v2745_v41, %v8084_v52  ;;  %v7880_v59 = vadd.f32 %v3249_v57, %v2823_v39 }
 0x302   : > { %v5664_v51 = vpop.f32.mrf.mxu1  ;;  %v5760_v32 = vpop.f32.mrf.mxu0 }
 0x304   : > { %v2750_v55 = vpop.f32.mrf.mxu1  ;;  %v3254_v13 = vpop.f32.mrf.mxu0  ;;  %5878 = vmatmul.mubr.bf16.gmra.mxu1 %v3692_v28  ;;  %5974 = vmatmul.mubr.bf16.gmra.mxu0 %v4070_v43  ;;  %v4072_v43 = vsel %vm4033_vm6, %v4069_v24, %v4071_v58 }
 0x305   : > { %v2826_v60 = vadd.f32 %v2750_v55, %v8085_v23  ;;  %v7883_v10 = vadd.f32 %v3254_v13, %v2824_v22  ;;  %5881 = vmatprep.mubr.msk.bf16.mxu1 %vm6214_vm0, %v8079_v37  ;;  %5977 = vmatprep.mubr.msk.bf16.mxu0 %vm6214_vm0, %v8079_v37  ;;  %v3701_v22 = vsel %vm3513_vm5, %v3691_v31, %v3700_v62 }
 0x306   : > { %v5667_v39 = vpop.f32.mrf.mxu1  ;;  %v5763_v3 = vpop.f32.mrf.mxu0 }
 0x308   : > { %v2753_v53 = vpop.f32.mrf.mxu1  ;;  %v3257_v41 = vpop.f32.mrf.mxu0 }
 0x309   : > { %v2827_v57 = vadd.f32 %v2753_v53, %v7544_v36  ;;  %v7891_v28 = vadd.f32 %v3257_v41, %v2825_v12  ;;  %v4073_v36 = vrot.slane %v7865_v17, 3 }
 0x30a   : > { %v5668_v52 = vpop.f32.mrf.mxu1  ;;  %v5764_v51 = vpop.f32.mrf.mxu0 }
 0x30c   : > { %v2758_v32 = vpop.f32.mrf.mxu1  ;;  %v3262_v55 = vpop.f32.mrf.mxu0  ;;  %5882 = vmatmul.mubr.bf16.gmra.mxu1 %v3701_v22  ;;  %5978 = vmatmul.mubr.bf16.gmra.mxu0 %v4072_v43 }
 0x30d   : > { %v2828_v8 = vadd.f32 %v2758_v32, %v7549_v33  ;;  %v7896_v5 = vadd.f32 %v3262_v55, %v2826_v60  ;;  %5885 = vmatprep.mubr.msk.bf16.mxu1 %vm6214_vm0, %v8079_v37  ;;  %5981 = vmatprep.mubr.msk.bf16.mxu0 %vm6214_vm0, %v8079_v37  ;;  %v4074_v33 = vsel %vm4033_vm6, %v4071_v58, %v4073_v36 }
 0x30e   : > { %v5671_v31 = vpop.f32.mrf.mxu1  ;;  %v5767_v24 = vpop.f32.mrf.mxu0 }
 0x310   : > { %v2761_v12 = vpop.f32.mrf.mxu1  ;;  %v3265_v49 = vpop.f32.mrf.mxu0 }
 0x311   : > { %v2829_v13 = vadd.f32 %v2761_v12, %v7560_v4  ;;  %v7904_v23 = vadd.f32 %v3265_v49, %v2827_v57 }
 0x312   : > { %v5672_v60 = vpop.f32.mrf.mxu1  ;;  %v5768_v39 = vpop.f32.mrf.mxu0 }
 0x314   : > { %v2766_v3 = vpop.f32.mrf.mxu1  ;;  %v3270_v53 = vpop.f32.mrf.mxu0  ;;  %5886 = vmatmul.mubr.bf16.gmra.mxu1 %v3700_v62  ;;  %5982 = vmatmul.mubr.bf16.gmra.mxu0 %v4074_v33 }
 0x315   : > { %v2830_v41 = vadd.f32 %v2766_v3, %v7567_v29  ;;  %v7908_v22 = vadd.f32 %v3270_v53, %v2828_v8  ;;  %5985 = vmatprep.mubr.msk.bf16.mxu0 %vm6214_vm0, %v8079_v37 }
 0x316   : > { %v5675_v17 = vpop.f32.mrf.mxu1  ;;  %v5771_v43 = vpop.f32.mrf.mxu0 }
 0x318   : > { %v2769_v4 = vpop.f32.mrf.mxu1  ;;  %v3273_v57 = vpop.f32.mrf.mxu0 }
 0x319   : > { %v2831_v52 = vadd.f32 %v2769_v4, %v7575_v63  ;;  %v7913_v58 = vadd.f32 %v3273_v57, %v2829_v13 }
 0x31a   : > { %v5676_v51 = vpop.f32.mrf.mxu1  ;;  %v5772_v32 = vpop.f32.mrf.mxu0 }
 0x31c   : > { %v2774_v55 = vpop.f32.mrf.mxu1  ;;  %v3278_v62 = vpop.f32.mrf.mxu0  ;;  %5986 = vmatmul.mubr.bf16.gmra.mxu0 %v4073_v36 }
 0x31d   : > { %v2832_v29 = vadd.f32 %v2774_v55, %v7584_v34  ;;  %v7916_v8 = vadd.f32 %v3278_v62, %v2830_v41 }
 0x31e   : > { %v5679_v31 = vpop.f32.mrf.mxu1  ;;  %v5775_v24 = vpop.f32.mrf.mxu0 }
 0x320   : > { %v2777_v37 = vpop.f32.mrf.mxu1  ;;  %v3281_v12 = vpop.f32.mrf.mxu0 }
 0x321   : > { %v2833_v49 = vadd.f32 %v2777_v37, %v7598_v27  ;;  %v7919_v33 = vadd.f32 %v3281_v12, %v2831_v52 }
 0x322   : > { %v5680_v63 = vpop.f32.mrf.mxu1  ;;  %v5776_v13 = vpop.f32.mrf.mxu0 }
 0x324   : > { %v2782_v60 = vpop.f32.mrf.mxu1  ;;  %v3286_v39 = vpop.f32.mrf.mxu0 }
 0x325   : > { %v2834_v3 = vadd.f32 %v2782_v60, %v7603_v7  ;;  %v7922_v53 = vadd.f32 %v3286_v39, %v2832_v29 }
 0x326   : > { %v5683_v36 = vpop.f32.mrf.mxu1  ;;  %v5779_v34 = vpop.f32.mrf.mxu0 }
 0x328   : > { %v2785_v41 = vpop.f32.mrf.mxu1  ;;  %v3289_v17 = vpop.f32.mrf.mxu0 }
 0x329   : > { %v2835_v43 = vadd.f32 %v2785_v41, %v7610_v54  ;;  %v7925_v4 = vadd.f32 %v3289_v17, %v2833_v49 }
 0x32a   : > { %v5684_v57 = vpop.f32.mrf.mxu1  ;;  %v5780_v27 = vpop.f32.mrf.mxu0 }
 0x32c   : > { %v2790_v52 = vpop.f32.mrf.mxu1  ;;  %v3294_v51 = vpop.f32.mrf.mxu0 }
 0x32d   : > { %v2836_v32 = vadd.f32 %v2790_v52, %v7618_v1  ;;  %v7928_v55 = vadd.f32 %v3294_v51, %v2834_v3 }
 0x32e   : > { %v5687_v62 = vpop.f32.mrf.mxu1  ;;  %v5783_v7 = vpop.f32.mrf.mxu0 }
 0x330   : > { %v2793_v29 = vpop.f32.mrf.mxu1  ;;  %v3297_v31 = vpop.f32.mrf.mxu0 }
 0x331   : > { %v7930_v24 = vadd.f32 %v3297_v31, %v2835_v43  ;;  %v7939_v43 = vld [vmem:[%s8073_s2] ss:$0 sm:$0xff] }
 0x332   : > { %v5688_v37 = vpop.f32.mrf.mxu1  ;;  %v5784_v12 = vpop.f32.mrf.mxu0 }
 0x334   : > { %v3302_v54 = vpop.f32.mrf.mxu0  ;;  %v3805_v49 = vpop.f32.mrf.mxu1 }
 0x335   : > { %v7932_v63 = vadd.f32 %v3302_v54, %v2836_v32  ;;  %v3971_v34 = vadd.f32 %v3805_v49, %v7636_v35 }
 0x336   : > { %v5787_v13 = vpop.f32.mrf.mxu0  ;;  %v5807_v60 = vpop.f32.mrf.mxu1 }
 0x338   : > { %v3305_v39 = vpop.f32.mrf.mxu0  ;;  %v3808_v36 = vpop.f32.mrf.mxu1 }
 0x339   : > { %v3972_v51 = vadd.f32 %v3808_v36, %v7644_v61 }
 0x33a   : > { %v5788_v1 = vpop.f32.mrf.mxu0  ;;  %v5808_v3 = vpop.f32.mrf.mxu1 }
 0x33c   : > { %v3813_v41 = vpop.f32.mrf.mxu1  ;;  %v4178_v17 = vpop.f32.mrf.mxu0 }
 0x33d   : > { %v4344_v57 = vadd.f32 %v4178_v17, %v3971_v34  ;;  %v3973_v37 = vadd.f32 %v3813_v41, %v7653_v14 }
 0x33e   : > { %v5811_v27 = vpop.f32.mrf.mxu1  ;;  %v5907_v52 = vpop.f32.mrf.mxu0 }
 0x33f   : > { %v4392_v35 = vadd.f32 %v7939_v43, %v4344_v57 }
 0x340   : > { %v3816_v32 = vpop.f32.mrf.mxu1  ;;  %v4181_v62 = vpop.f32.mrf.mxu0 }
 0x341   : > { %4433 = vst [vmem:[%s7944_s21] sm:$0xff] %v4392_v35  ;;  %v4345_v7 = vadd.f32 %v4181_v62, %v3972_v51  ;;  %v3974_v39 = vadd.f32 %v3816_v32, %v7667_v56 }
 0x342   : > { %v5812_v29 = vpop.f32.mrf.mxu1  ;;  %v5908_v31 = vpop.f32.mrf.mxu0 }
 0x343   : > { %v4393_v12 = vadd.f32 %v7939_v43, %v4345_v7 }
 0x344   : > { %v3821_v54 = vpop.f32.mrf.mxu1  ;;  %v4186_v49 = vpop.f32.mrf.mxu0 }
 0x345   : > { %4434 = vst [vmem:[%s7944_s21 + $0x8] sm:$0xff] %v4393_v12  ;;  %v4346_v13 = vadd.f32 %v4186_v49, %v3973_v37  ;;  %v3975_v41 = vadd.f32 %v3821_v54, %v7672_v11 }
 0x346   : > { %v5815_v60 = vpop.f32.mrf.mxu1  ;;  %v5911_v61 = vpop.f32.mrf.mxu0 }
 0x347   : > { %v4394_v36 = vadd.f32 %v7939_v43, %v4346_v13 }
 0x348   : > { %v3824_v1 = vpop.f32.mrf.mxu1  ;;  %v4189_v3 = vpop.f32.mrf.mxu0 }
 0x349   : > { %4435 = vst [vmem:[%s7944_s21 + $0x10] sm:$0xff] %v4394_v36  ;;  %v4347_v34 = vadd.f32 %v4189_v3, %v3974_v39  ;;  %v3976_v32 = vadd.f32 %v3824_v1, %v7680_v40 }
 0x34a   : > { %v5816_v17 = vpop.f32.mrf.mxu1  ;;  %v5912_v14 = vpop.f32.mrf.mxu0 }
 0x34b   : > { %v4395_v57 = vadd.f32 %v7939_v43, %v4347_v34 }
 0x34c   : > { %v3829_v27 = vpop.f32.mrf.mxu1  ;;  %v4194_v52 = vpop.f32.mrf.mxu0 }
 0x34d   : > { %4436 = vst [vmem:[%s7944_s21 + $0x18] sm:$0xff] %v4395_v57  ;;  %v4348_v51 = vadd.f32 %v4194_v52, %v3975_v41  ;;  %v3977_v12 = vadd.f32 %v3829_v27, %v7689_v18 }
 0x34e   : > { %v5819_v35 = vpop.f32.mrf.mxu1  ;;  %v5915_v56 = vpop.f32.mrf.mxu0 }
 0x34f   : > { %v4396_v62 = vadd.f32 %v7939_v43, %v4348_v51 }
 0x350   : > { %v3832_v7 = vpop.f32.mrf.mxu1  ;;  %v4197_v29 = vpop.f32.mrf.mxu0 }
 0x351   : > { %4437 = vst [vmem:[%s7944_s21 + $0x20] sm:$0xff] %v4396_v62  ;;  %v4349_v31 = vadd.f32 %v4197_v29, %v3976_v32  ;;  %v3978_v39 = vadd.f32 %v3832_v7, %v7703_v19 }
 0x352   : > { %v5820_v37 = vpop.f32.mrf.mxu1  ;;  %v5916_v11 = vpop.f32.mrf.mxu0 }
 0x353   : > { %v4397_v54 = vadd.f32 %v7939_v43, %v4349_v31 }
 0x354   : > { %v3837_v49 = vpop.f32.mrf.mxu1  ;;  %v4202_v13 = vpop.f32.mrf.mxu0 }
 0x355   : > { %4438 = vst [vmem:[%s7944_s21 + $0x28] sm:$0xff] %v4397_v54  ;;  %v4350_v60 = vadd.f32 %v4202_v13, %v3977_v12  ;;  %v3979_v14 = vadd.f32 %v3837_v49, %v7708_v20 }
 0x356   : > { %v5823_v61 = vpop.f32.mrf.mxu1  ;;  %v5919_v40 = vpop.f32.mrf.mxu0 }
 0x357   : > { %v4398_v36 = vadd.f32 %v7939_v43, %v4350_v60 }
 0x358   : > { %v3840_v1 = vpop.f32.mrf.mxu1  ;;  %v4205_v3 = vpop.f32.mrf.mxu0 }
 0x359   : > { %4439 = vst [vmem:[%s7944_s21 + $0x30] sm:$0xff] %v4398_v36  ;;  %v4351_v34 = vadd.f32 %v4205_v3, %v3978_v39  ;;  %v3980_v35 = vadd.f32 %v3840_v1, %v7716_v48 }
 0x35a   : > { %v5824_v17 = vpop.f32.mrf.mxu1  ;;  %v5920_v18 = vpop.f32.mrf.mxu0 }
 0x35b   : > { %v4399_v41 = vadd.f32 %v7939_v43, %v4351_v34 }
 0x35c   : > { %v3845_v57 = vpop.f32.mrf.mxu1  ;;  %v4210_v27 = vpop.f32.mrf.mxu0 }
 0x35d   : > { %4440 = vst [vmem:[%s7944_s21 + $0x38] sm:$0xff] %v4399_v41  ;;  %v4352_v52 = vadd.f32 %v4210_v27, %v3979_v14  ;;  %v3981_v31 = vadd.f32 %v3845_v57, %v7725_v16 }
 0x35e   : > { %v5827_v51 = vpop.f32.mrf.mxu1  ;;  %v5923_v19 = vpop.f32.mrf.mxu0 }
 0x35f   : > { %v4400_v56 = vadd.f32 %v7939_v43, %v4352_v52 }
 0x360   : > { %v3848_v32 = vpop.f32.mrf.mxu1  ;;  %v4213_v62 = vpop.f32.mrf.mxu0 }
 0x361   : > { %4441 = vst [vmem:[%s7944_s21 + $0x40] sm:$0xff] %v4400_v56  ;;  %v4353_v7 = vadd.f32 %v4213_v62, %v3980_v35  ;;  %v3982_v13 = vadd.f32 %v3848_v32, %v7739_v2 }
 0x362   : > { %v5828_v29 = vpop.f32.mrf.mxu1  ;;  %v5924_v20 = vpop.f32.mrf.mxu0 }
 0x363   : > { %v4401_v37 = vadd.f32 %v7939_v43, %v4353_v7 }
 0x364   : > { %v3853_v11 = vpop.f32.mrf.mxu1  ;;  %v4218_v12 = vpop.f32.mrf.mxu0 }
 0x365   : > { %4442 = vst [vmem:[%s7944_s21 + $0x48] sm:$0xff] %v4401_v37  ;;  %v4354_v54 = vadd.f32 %v4218_v12, %v3981_v31  ;;  %v3983_v1 = vadd.f32 %v3853_v11, %v7744_v50 }
 0x366   : > { %v5831_v49 = vpop.f32.mrf.mxu1  ;;  %v5927_v48 = vpop.f32.mrf.mxu0 }
 0x367   : > { %v4402_v60 = vadd.f32 %v7939_v43, %v4354_v54 }
 0x368   : > { %v3856_v61 = vpop.f32.mrf.mxu1  ;;  %v4221_v40 = vpop.f32.mrf.mxu0 }
 0x369   : > { %4443 = vst [vmem:[%s7944_s21 + $0x50] sm:$0xff] %v4402_v60  ;;  %v4355_v39 = vadd.f32 %v4221_v40, %v3982_v13  ;;  %v3984_v41 = vadd.f32 %v3856_v61, %v7752_v45 }
 0x36a   : > { %v5832_v36 = vpop.f32.mrf.mxu1  ;;  %v5928_v16 = vpop.f32.mrf.mxu0 }
 0x36b   : > { %v4403_v3 = vadd.f32 %v7939_v43, %v4355_v39 }
 0x36c   : > { %v3861_v34 = vpop.f32.mrf.mxu1  ;;  %v4226_v17 = vpop.f32.mrf.mxu0 }
 0x36d   : > { %4444 = vst [vmem:[%s7944_s21 + $0x58] sm:$0xff] %v4403_v3  ;;  %v4356_v18 = vadd.f32 %v4226_v17, %v3983_v1  ;;  %v3985_v35 = vadd.f32 %v3861_v34, %v7761_v0 }
 0x36e   : > { %v5835_v14 = vpop.f32.mrf.mxu1  ;;  %v5931_v2 = vpop.f32.mrf.mxu0 }
 0x36f   : > { %v4404_v57 = vadd.f32 %v7939_v43, %v4356_v18 }
 0x370   : > { %v3864_v27 = vpop.f32.mrf.mxu1  ;;  %v4229_v52 = vpop.f32.mrf.mxu0 }
 0x371   : > { %4445 = vst [vmem:[%s7944_s21 + $0x60] sm:$0xff] %v4404_v57  ;;  %v4357_v51 = vadd.f32 %v4229_v52, %v3984_v41  ;;  %v3986_v20 = vadd.f32 %v3864_v27, %v7775_v26 }
 0x372   : > { %v5836_v19 = vpop.f32.mrf.mxu1  ;;  %v5932_v50 = vpop.f32.mrf.mxu0 }
 0x373   : > { %v4405_v56 = vadd.f32 %v7939_v43, %v4357_v51 }
 0x374   : > { %v3869_v32 = vpop.f32.mrf.mxu1  ;;  %v4234_v62 = vpop.f32.mrf.mxu0 }
 0x375   : > { %4446 = vst [vmem:[%s7944_s21 + $0x68] sm:$0xff] %v4405_v56  ;;  %v4358_v7 = vadd.f32 %v4234_v62, %v3985_v35  ;;  %v3987_v49 = vadd.f32 %v3869_v32, %v7780_v21 }
 0x376   : > { %v5839_v29 = vpop.f32.mrf.mxu1  ;;  %v5935_v45 = vpop.f32.mrf.mxu0 }
 0x377   : > { %v4406_v31 = vadd.f32 %v7939_v43, %v4358_v7 }
 0x378   : > { %v3872_v37 = vpop.f32.mrf.mxu1  ;;  %v4237_v11 = vpop.f32.mrf.mxu0 }
 0x379   : > { %4447 = vst [vmem:[%s7944_s21 + $0x70] sm:$0xff] %v4406_v31  ;;  %v4359_v12 = vadd.f32 %v4237_v11, %v3986_v20  ;;  %v3988_v39 = vadd.f32 %v3872_v37, %v7788_v47 }
 0x37a   : > { %v5840_v54 = vpop.f32.mrf.mxu1  ;;  %v5936_v0 = vpop.f32.mrf.mxu0 }
 0x37b   : > { %v4407_v48 = vadd.f32 %v7939_v43, %v4359_v12 }
 0x37c   : > { %v3877_v13 = vpop.f32.mrf.mxu1  ;;  %v4242_v60 = vpop.f32.mrf.mxu0 }
 0x37d   : > { %4448 = vst [vmem:[%s7944_s21 + $0x78] sm:$0xff] %v4407_v48  ;;  %v4360_v61 = vadd.f32 %v4242_v60, %v3987_v49  ;;  %v3989_v17 = vadd.f32 %v3877_v13, %v7797_v42 }
 0x37e   : > { %v5843_v40 = vpop.f32.mrf.mxu1  ;;  %v5939_v26 = vpop.f32.mrf.mxu0 }
 0x37f   : > { %v4408_v36 = vadd.f32 %v7939_v43, %v4360_v61 }
 0x380   : > { %v3880_v16 = vpop.f32.mrf.mxu1  ;;  %v4245_v1 = vpop.f32.mrf.mxu0 }
 0x381   : > { %4449 = vst [vmem:[%s7944_s21 + $0x80] sm:$0xff] %v4408_v36  ;;  %v4361_v3 = vadd.f32 %v4245_v1, %v3988_v39  ;;  %v3990_v27 = vadd.f32 %v3880_v16, %v7811_v6 }
 0x382   : > { %v5844_v34 = vpop.f32.mrf.mxu1  ;;  %v5940_v21 = vpop.f32.mrf.mxu0 }
 0x383   : > { %v4409_v18 = vadd.f32 %v7939_v43, %v4361_v3 }
 0x384   : > { %v3885_v14 = vpop.f32.mrf.mxu1  ;;  %v4250_v2 = vpop.f32.mrf.mxu0 }
 0x385   : > { %4450 = vst [vmem:[%s7944_s21 + $0x88] sm:$0xff] %v4409_v18  ;;  %v4362_v41 = vadd.f32 %v4250_v2, %v3989_v17  ;;  %v3991_v56 = vadd.f32 %v3885_v14, %v7816_v46 }
 0x386   : > { %v5847_v57 = vpop.f32.mrf.mxu1  ;;  %v5943_v47 = vpop.f32.mrf.mxu0 }
 0x387   : > { %v4410_v52 = vadd.f32 %v7939_v43, %v4362_v41 }
 0x388   : > { %v3888_v51 = vpop.f32.mrf.mxu1  ;;  %v4253_v19 = vpop.f32.mrf.mxu0 }
 0x389   : > { %4451 = vst [vmem:[%s7944_s21 + $0x90] sm:$0xff] %v4410_v52  ;;  %v4363_v50 = vadd.f32 %v4253_v19, %v3990_v27  ;;  %v3992_v20 = vadd.f32 %v3888_v51, %v7824_v30 }
 0x38a   : > { %v5848_v35 = vpop.f32.mrf.mxu1  ;;  %v5944_v42 = vpop.f32.mrf.mxu0 }
 0x38b   : > { %v4411_v32 = vadd.f32 %v7939_v43, %v4363_v50 }
 0x38c   : > { %v3893_v62 = vpop.f32.mrf.mxu1  ;;  %v4258_v7 = vpop.f32.mrf.mxu0 }
 0x38d   : > { %4452 = vst [vmem:[%s7944_s21 + $0x98] sm:$0xff] %v4411_v32  ;;  %v4364_v29 = vadd.f32 %v4258_v7, %v3991_v56  ;;  %v3993_v0 = vadd.f32 %v3893_v62, %v7833_v9 }
 0x38e   : > { %v5851_v45 = vpop.f32.mrf.mxu1  ;;  %v5947_v6 = vpop.f32.mrf.mxu0 }
 0x38f   : > { %v4412_v31 = vadd.f32 %v7939_v43, %v4364_v29 }
 0x390   : > { %v3896_v37 = vpop.f32.mrf.mxu1  ;;  %v4261_v11 = vpop.f32.mrf.mxu0 }
 0x391   : > { %4453 = vst [vmem:[%s7944_s21 + $0xa0] sm:$0xff] %v4412_v31  ;;  %v4365_v12 = vadd.f32 %v4261_v11, %v3992_v20  ;;  %v3994_v40 = vadd.f32 %v3896_v37, %v7847_v44 }
 0x392   : > { %v5852_v54 = vpop.f32.mrf.mxu1  ;;  %v5948_v46 = vpop.f32.mrf.mxu0 }
 0x393   : > { %v4413_v49 = vadd.f32 %v7939_v43, %v4365_v12 }
 0x394   : > { %v3901_v48 = vpop.f32.mrf.mxu1  ;;  %v4266_v13 = vpop.f32.mrf.mxu0 }
 0x395   : > { %4454 = vst [vmem:[%s7944_s21 + $0xa8] sm:$0xff] %v4413_v49  ;;  %v4366_v60 = vadd.f32 %v4266_v13, %v3993_v0  ;;  %v3995_v3 = vadd.f32 %v3901_v48, %v7852_v38 }
 0x396   : > { %v5855_v61 = vpop.f32.mrf.mxu1  ;;  %v5951_v30 = vpop.f32.mrf.mxu0 }
 0x397   : > { %v4414_v26 = vadd.f32 %v7939_v43, %v4366_v60 }
 0x398   : > { %v3904_v39 = vpop.f32.mrf.mxu1  ;;  %v4269_v36 = vpop.f32.mrf.mxu0 }
 0x399   : > { %4455 = vst [vmem:[%s7944_s21 + $0xb0] sm:$0xff] %v4414_v26  ;;  %v4367_v16 = vadd.f32 %v4269_v36, %v3994_v40  ;;  %v3996_v2 = vadd.f32 %v3904_v39, %v7860_v15 }
 0x39a   : > { %v5856_v1 = vpop.f32.mrf.mxu1  ;;  %v5952_v9 = vpop.f32.mrf.mxu0 }
 0x39b   : > { %v4415_v34 = vadd.f32 %v7939_v43, %v4367_v16 }
 0x39c   : > { %v3909_v21 = vpop.f32.mrf.mxu1  ;;  %v4274_v17 = vpop.f32.mrf.mxu0 }
 0x39d   : > { %4456 = vst [vmem:[%s7944_s21 + $0xb8] sm:$0xff] %v4415_v34  ;;  %v4368_v18 = vadd.f32 %v4274_v17, %v3995_v3  ;;  %v3997_v51 = vadd.f32 %v3909_v21, %v7869_v25 }
 0x39e   : > { %v5859_v14 = vpop.f32.mrf.mxu1  ;;  %v5955_v44 = vpop.f32.mrf.mxu0 }
 0x39f   : > { %v4416_v41 = vadd.f32 %v7939_v43, %v4368_v18 }
 0x3a0   : > { %v3912_v57 = vpop.f32.mrf.mxu1  ;;  %v4277_v47 = vpop.f32.mrf.mxu0 }
 0x3a1   : > { %4457 = vst [vmem:[%s7944_s21 + $0xc0] sm:$0xff] %v4416_v41  ;;  %v4369_v27 = vadd.f32 %v4277_v47, %v3996_v2  ;;  %v3998_v32 = vadd.f32 %v3912_v57, %v7880_v59 }
 0x3a2   : > { %v5860_v52 = vpop.f32.mrf.mxu1  ;;  %v5956_v38 = vpop.f32.mrf.mxu0 }
 0x3a3   : > { %v4417_v19 = vadd.f32 %v7939_v43, %v4369_v27 }
 0x3a4   : > { %v3917_v50 = vpop.f32.mrf.mxu1  ;;  %v4282_v35 = vpop.f32.mrf.mxu0 }
 0x3a5   : > { %4458 = vst [vmem:[%s7944_s21 + $0xc8] sm:$0xff] %v4417_v19  ;;  %v4370_v42 = vadd.f32 %v4282_v35, %v3997_v51  ;;  %v3999_v20 = vadd.f32 %v3917_v50, %v7883_v10 }
 0x3a6   : > { %v5863_v56 = vpop.f32.mrf.mxu1  ;;  %v5959_v15 = vpop.f32.mrf.mxu0 }
 0x3a7   : > { %v4418_v62 = vadd.f32 %v7939_v43, %v4370_v42 }
 0x3a8   : > { %v3920_v7 = vpop.f32.mrf.mxu1  ;;  %v4285_v29 = vpop.f32.mrf.mxu0 }
 0x3a9   : > { %4459 = vst [vmem:[%s7944_s21 + $0xd0] sm:$0xff] %v4418_v62  ;;  %v4371_v45 = vadd.f32 %v4285_v29, %v3998_v32  ;;  %v4000_v46 = vadd.f32 %v3920_v7, %v7891_v28 }
 0x3aa   : > { %v5864_v6 = vpop.f32.mrf.mxu1  ;;  %v5960_v25 = vpop.f32.mrf.mxu0 }
 0x3ab   : > { %v4419_v31 = vadd.f32 %v7939_v43, %v4371_v45 }
 0x3ac   : > { %v3925_v37 = vpop.f32.mrf.mxu1  ;;  %v4290_v11 = vpop.f32.mrf.mxu0 }
 0x3ad   : > { %4460 = vst [vmem:[%s7944_s21 + $0xd8] sm:$0xff] %v4419_v31  ;;  %v4372_v12 = vadd.f32 %v4290_v11, %v3999_v20  ;;  %v4001_v61 = vadd.f32 %v3925_v37, %v7896_v5 }
 0x3ae   : > { %v5867_v54 = vpop.f32.mrf.mxu1  ;;  %v5963_v59 = vpop.f32.mrf.mxu0 }
 0x3af   : > { %v4420_v0 = vadd.f32 %v7939_v43, %v4372_v12 }
 0x3b0   : > { %v3928_v49 = vpop.f32.mrf.mxu1  ;;  %v4293_v48 = vpop.f32.mrf.mxu0 }
 0x3b1   : > { %4461 = vst [vmem:[%s7944_s21 + $0xe0] sm:$0xff] %v4420_v0  ;;  %v4373_v13 = vadd.f32 %v4293_v48, %v4000_v46  ;;  %v4002_v16 = vadd.f32 %v3928_v49, %v7904_v23 }
 0x3b2   : > { %v5868_v60 = vpop.f32.mrf.mxu1  ;;  %v5964_v10 = vpop.f32.mrf.mxu0 }
 0x3b3   : > { %v4421_v30 = vadd.f32 %v7939_v43, %v4373_v13 }
 0x3b4   : > { %v3933_v40 = vpop.f32.mrf.mxu1  ;;  %v4298_v26 = vpop.f32.mrf.mxu0 }
 0x3b5   : > { %4462 = vst [vmem:[%s7944_s21 + $0xe8] sm:$0xff] %v4421_v30  ;;  %v4374_v39 = vadd.f32 %v4298_v26, %v4001_v61  ;;  %v4003_v17 = vadd.f32 %v3933_v40, %v7908_v22 }
 0x3b6   : > { %v5871_v36 = vpop.f32.mrf.mxu1  ;;  %v5967_v28 = vpop.f32.mrf.mxu0 }
 0x3b7   : > { %v4422_v1 = vadd.f32 %v7939_v43, %v4374_v39 }
 0x3b8   : > { %v3936_v9 = vpop.f32.mrf.mxu1  ;;  %v4301_v3 = vpop.f32.mrf.mxu0 }
 0x3b9   : > { %4463 = vst [vmem:[%s7944_s21 + $0xf0] sm:$0xff] %v4422_v1  ;;  %v4375_v34 = vadd.f32 %v4301_v3, %v4002_v16  ;;  %v4004_v57 = vadd.f32 %v3936_v9, %v7913_v58 }
 0x3ba   : > { %v5872_v21 = vpop.f32.mrf.mxu1  ;;  %v5968_v5 = vpop.f32.mrf.mxu0 }
 0x3bb   : > { %v4423_v18 = vadd.f32 %v7939_v43, %v4375_v34 }
 0x3bc   : > { %v3941_v14 = vpop.f32.mrf.mxu1  ;;  %v4306_v44 = vpop.f32.mrf.mxu0 }
 0x3bd   : > { %4464 = vst [vmem:[%s7944_s21 + $0xf8] sm:$0xff] %v4423_v18  ;;  %v4376_v2 = vadd.f32 %v4306_v44, %v4003_v17  ;;  %v4005_v19 = vadd.f32 %v3941_v14, %v7916_v8 }
 0x3be   : > { %v5875_v41 = vpop.f32.mrf.mxu1  ;;  %v5971_v23 = vpop.f32.mrf.mxu0 }
 0x3bf   : > { %v4424_v47 = vadd.f32 %v7939_v43, %v4376_v2 }
 0x3c0   : > { %v3944_v27 = vpop.f32.mrf.mxu1  ;;  %v4309_v52 = vpop.f32.mrf.mxu0 }
 0x3c1   : > { %4465 = vst [vmem:[%s7944_s21 + $0x100] sm:$0xff] %v4424_v47  ;;  %v4377_v38 = vadd.f32 %v4309_v52, %v4004_v57  ;;  %v4006_v32 = vadd.f32 %v3944_v27, %v7919_v33 }
 0x3c2   : > { %v5876_v51 = vpop.f32.mrf.mxu1  ;;  %v5972_v22 = vpop.f32.mrf.mxu0 }
 0x3c3   : > { %v4425_v50 = vadd.f32 %v7939_v43, %v4377_v38 }
 0x3c4   : > { %v3949_v35 = vpop.f32.mrf.mxu1  ;;  %v4314_v42 = vpop.f32.mrf.mxu0 }
 0x3c5   : > { %4466 = vst [vmem:[%s7944_s21 + $0x108] sm:$0xff] %v4425_v50  ;;  %v4378_v56 = vadd.f32 %v4314_v42, %v4005_v19  ;;  %v4007_v25 = vadd.f32 %v3949_v35, %v7922_v53 }
 0x3c6   : > { %v5879_v15 = vpop.f32.mrf.mxu1  ;;  %v5975_v58 = vpop.f32.mrf.mxu0 }
 0x3c7   : > { %v4426_v62 = vadd.f32 %v7939_v43, %v4378_v56 }
 0x3c8   : > { %v3952_v7 = vpop.f32.mrf.mxu1  ;;  %v4317_v29 = vpop.f32.mrf.mxu0 }
 0x3c9   : > { %4467 = vst [vmem:[%s7944_s21 + $0x110] sm:$0xff] %v4426_v62  ;;  %v4379_v45 = vadd.f32 %v4317_v29, %v4006_v32  ;;  %v4008_v54 = vadd.f32 %v3952_v7, %v7925_v4 }
 0x3ca   : > { %v5880_v6 = vpop.f32.mrf.mxu1  ;;  %v5976_v8 = vpop.f32.mrf.mxu0 }
 0x3cb   : > { %v4427_v20 = vadd.f32 %v7939_v43, %v4379_v45 }
 0x3cc   : > { %v3957_v31 = vpop.f32.mrf.mxu1  ;;  %v4322_v37 = vpop.f32.mrf.mxu0 }
 0x3cd   : > { %4468 = vst [vmem:[%s7944_s21 + $0x118] sm:$0xff] %v4427_v20  ;;  %v4380_v11 = vadd.f32 %v4322_v37, %v4007_v25  ;;  %v4009_v13 = vadd.f32 %v3957_v31, %v7928_v55 }
 0x3ce   : > { %v5883_v12 = vpop.f32.mrf.mxu1  ;;  %v5979_v33 = vpop.f32.mrf.mxu0 }
 0x3cf   : > { %v4428_v59 = vadd.f32 %v7939_v43, %v4380_v11 }
 0x3d0   : > { %v3960_v46 = vpop.f32.mrf.mxu1  ;;  %v4325_v0 = vpop.f32.mrf.mxu0 }
 0x3d1   : > { %4469 = vst [vmem:[%s7944_s21 + $0x120] sm:$0xff] %v4428_v59  ;;  %v4381_v49 = vadd.f32 %v4325_v0, %v4008_v54  ;;  %v4010_v26 = vadd.f32 %v3960_v46, %v7930_v24 }
 0x3d2   : > { %v5884_v48 = vpop.f32.mrf.mxu1  ;;  %v5980_v53 = vpop.f32.mrf.mxu0 }
 0x3d3   : > { %v4429_v60 = vadd.f32 %v7939_v43, %v4381_v49 }
 0x3d4   : > { %v3965_v10 = vpop.f32.mrf.mxu1  ;;  %v4330_v61 = vpop.f32.mrf.mxu0 }
 0x3d5   : > { %4470 = vst [vmem:[%s7944_s21 + $0x128] sm:$0xff] %v4429_v60  ;;  %v4382_v30 = vadd.f32 %v4330_v61, %v4009_v13  ;;  %v4011_v9 = vadd.f32 %v3965_v10, %v7932_v63 }
 0x3d6   : > { %v5983_v40 = vpop.f32.mrf.mxu0  ;;  %v5887_v4 = vpop.f32.mrf.mxu1 }
 0x3d7   : > { %v4430_v39 = vadd.f32 %v7939_v43, %v4382_v30 }
 0x3d8   : > { %v4333_v36 = vpop.f32.mrf.mxu0  ;;  %v3968_v28 = vpop.f32.mrf.mxu1 }
 0x3d9   : > { %4471 = vst [vmem:[%s7944_s21 + $0x130] sm:$0xff] %v4430_v39  ;;  %v4383_v16 = vadd.f32 %v4333_v36, %v4010_v26 }
 0x3da   : > { %v5984_v1 = vpop.f32.mrf.mxu0  ;;  %v5888_v55 = vpop.f32.mrf.mxu1 }
 0x3db   : > { %v4431_v3 = vadd.f32 %v7939_v43, %v4383_v16 }
 0x3dc   : > { %v4338_v34 = vpop.f32.mrf.mxu0 }
 0x3dd   : > { %4472 = vst [vmem:[%s7944_s21 + $0x138] sm:$0xff] %v4431_v3  ;;  %v4384_v21 = vadd.f32 %v4338_v34, %v4011_v9 }
 0x3de   : > { %v5987_v5 = vpop.f32.mrf.mxu0 }
 0x3df   : > { %v4432_v17 = vadd.f32 %v7939_v43, %v4384_v21 }
 0x3e0   : > { %v4341_v24 = vpop.f32.mrf.mxu0 }
 0x3e1   : > { %4473 = vst [vmem:[%s7944_s21 + $0x140] sm:$0xf] %v4432_v17 }
 0x3e2   : > { %v5988_v18 = vpop.f32.mrf.mxu0 }
 0x3e3 PF: > { %s13_s12 = sadd.s32 1, %s6211_s12  }
 0x3e4   : > { %p10_p4 = scmp.ge.s32.totalorder %s13_s12, 4  }
 0x3e6   :  { %12 = sbr.rel (!%p10_p4) target bundleno = 1 (0x1), region = 70 }

// kernel: _lambda_.4
= control target key start
LH: loop header
LB: loop body
LE: loop exit
PB: predicated region body
PF: predicated region fallthrough
CT: control target
= control target key end

     0   :  { %s7522_s18 = smov 0   ;;  %s9691_s0 = inlined_call_operand.vmem [shape: bf16[2,362,128], index: 0, kind: input, shape index: {}]   ;;  %s9692_s1 = inlined_call_operand.vmem [shape: bf16[9,128,128], index: 1, kind: input, shape index: {}]   ;;  %s9693_s2 = inlined_call_operand.vmem [shape: f32[1,128], index: 2, kind: input, shape index: {}]   ;;  %s9694_s3 = inlined_call_operand.vmem [shape: f32[2,1,128], index: 3, kind: input, shape index: {}]   ;;  %s9695_s4 = inlined_call_operand.vmem [shape: f32[324,1], index: 4, kind: input, shape index: {}]   ;;  %s9696_s5 = inlined_call_operand.vmem [shape: bf16[2,324,128], index: 5, kind: output, shape index: {}]  }
   0x1 LB: > { %s5393_s19 = sadd.s32 4294967295, %s7487_s18   ;;  %p5397_p0 = scmp.ge.s32.totalorder %s7487_s18, 1  ;;  %s7487_s18 = sphi %s7522_s18, %s15_s18  }
   0x2   : > { %p195_p1 = scmp.lt.s32.totalorder %s7487_s18, 3 }
   0x4   : > { %p196_p2 = pnand %p5397_p0, %p195_p1 }
   0x6   : > { %199 = sbr.rel (%p196_p2) target bundleno = 1035 (0x40b), region = 40 }
   0xb   : > { %v7127_v0 = vld [vmem:[%s9692_s1 + $0x78] sm:$0xff]   ;;  %v9697_v1 = vmov 0.0   ;;  %v7128_v2 = vld [vmem:[%s9692_s1 + $0x70] sm:$0xff]   ;;  %p226_p3 = scmp.lt.s32.totalorder %s5393_s19, 1  ;;  %vm7490_vm0 = vmmov 0   ;;  %v7129_v3 = vld [vmem:[%s9692_s1 + $0x68] sm:$0xff]  }
   0xc   : > { %6196 = vmatprep.subr.bf16.mxu0 %v9697_v1  ;;  %7096 = vmatprep.subr.bf16.mxu1 %v9697_v1  ;;  %v7130_v4 = vld [vmem:[%s9692_s1 + $0x60] sm:$0xff]   ;;  %v7131_v8 = vld [vmem:[%s9692_s1 + $0x58] sm:$0xff]   ;;  %v7132_v10 = vld [vmem:[%s9692_s1 + $0x50] sm:$0xff]   ;;  %vm418_vm1 = vsmask.f32 7424  ;;  %vm1148_vm2 = vcmask 1046528  }
   0xd   : > { %6197 = vmatpush3.bf16.msra.mxu0 %v7127_v0  ;;  %7104 = vmatpush3.bf16.msra.mxu1 %v7127_v0  ;;  %s9711_s19 = smov (!%p226_p3, %s5393_s19), 1  ;;  %v7133_v15 = vld [vmem:[%s9692_s1 + $0x48] sm:$0xff]   ;;  %v7134_v22 = vld [vmem:[%s9692_s1 + $0x40] sm:$0xff]   ;;  %v7139_v29 = vld [vmem:[%s9692_s1 + $0xb8] sm:$0xff]   ;;  %vm2033_vm3 = vsmask.f32 6400 }
   0xe   : > { %6198 = vmatprep.subr.bf16.mxu0 %v9697_v1  ;;  %7097 = vmatprep.subr.bf16.mxu1 %v9697_v1  ;;  %s7112_s26 = smul.u32 184, %s9711_s19  ;;  %v7140_v30 = vld [vmem:[%s9692_s1 + $0x38] sm:$0xff]   ;;  %v7143_v38 = vld [vmem:[%s9692_s1 + $0xb0] sm:$0xff]   ;;  %v7147_v55 = vld [vmem:[%s9692_s1 + $0xa8] sm:$0xff]   ;;  %vm2553_vm4 = vcmask 1045504   ;;  %vm4101_vm6 = vcmask 1044480   ;;  %s9357_s6 = scalar_lea.vmem %s9694_s3, %s9711_s19 }
   0xf   : > { %6212 = vmatprep.mubr.msk.bf16.mxu0 %vm7490_vm0, %v9697_v1  ;;  %6256 = vmatprep.mubr.msk.bf16.mxu1 %vm7490_vm0, %v9697_v1  ;;  %v7146_v45 = vld [vmem:[%s9692_s1 + $0x30] sm:$0xff]   ;;  %v7150_v57 = vld [vmem:[%s9692_s1 + $0x28] sm:$0xff]   ;;  %vm3581_vm5 = vsmask.f32 5376  ;;  %s7113_s9 = smul.u32 164, %s9711_s19 }
  0x10   : > { %s7555_s29 = scalar_lea.vmem %s9691_s0, %s7112_s26 }
  0x11   : > { %6199 = vmatpush3.bf16.msra.mxu0 %v7128_v2  ;;  %7105 = vmatpush3.bf16.msra.mxu1 %v7128_v2  ;;  %v240_v5 = vld [vmem:[%s7555_s29] sm:$0xf]  ;;  %v7562_v6 = vld [vmem:[%s7555_s29 + $0x4] sm:$0xf]  ;;  %v7137_v9 = vld [vmem:[%s7555_s29 + $0x58] sm:$0xff]   ;;  %s9438_s11 = scalar_lea.vmem %s9696_s5, %s7113_s9 }
  0x12   : > { %6200 = vmatprep.subr.bf16.mxu0 %v9697_v1  ;;  %7098 = vmatprep.subr.bf16.mxu1 %v9697_v1  ;;  %v7567_v7 = vcombine.low %v240_v5, %v7562_v6  ;;  %v7579_v11 = vld [vmem:[%s7555_s29 + $0x8] sm:$0xff]   ;;  %v7138_v13 = vld [vmem:[%s7555_s29 + $0x60] sm:$0xff]   ;;  %v507_v14 = vshll.u32 %v7137_v9, 16  ;;  %v511_v20 = vshrl.u32 %v7137_v9, 16  ;;  %v7598_v24 = vld [vmem:[%s7555_s29 + $0x10] sm:$0xff]  }
  0x13   : > { %v427_v17 = vshll.u32 %v7579_v11, 16  ;;  %v515_v21 = vshll.u32 %v7138_v13, 16  ;;  %v7602_v28 = vld [vmem:[%s7555_s29 + $0x68] sm:$0xff]   ;;  %v431_v31 = vshrl.u32 %v7579_v11, 16  ;;  %v435_v32 = vshll.u32 %v7598_v24, 16  ;;  %v7620_v37 = vld [vmem:[%s7555_s29 + $0x18] sm:$0xff]  }
  0x14   : > { %v422_v12 = vshll.u32 %v7567_v7, 16  ;;  %v420_v16 = vshrl.u32 %v7567_v7, 16  ;;  %v7590_v19 = vrot.slane %v507_v14, 1  ;;  %v519_v35 = vshrl.u32 %v7138_v13, 16  ;;  %v7626_v39 = vld [vmem:[%s7555_s29 + $0x70] sm:$0xff]   ;;  %v7629_v41 = vld [vmem:[%s7555_s29 + $0x20] sm:$0xff]  }
  0x15   : > { %6201 = vmatpush3.bf16.msra.mxu0 %v7129_v3  ;;  %7106 = vmatpush3.bf16.msra.mxu1 %v7129_v3  ;;  %v429_v23 = vrot.slane %v427_v17, 1  ;;  %v517_v27 = vrot.slane %v515_v21, 1  ;;  %v523_v36 = vshll.u32 %v7602_v28, 16  ;;  %v437_v40 = vrot.slane %v435_v32, 1  ;;  %v7640_v47 = vld [vmem:[%s7555_s29 + $0x78] sm:$0xff]   ;;  %v7646_v49 = vld [vmem:[%s7555_s29 + $0x28] sm:$0xff]  }
  0x16   : > { %6202 = vmatprep.subr.bf16.mxu0 %v9697_v1  ;;  %7099 = vmatprep.subr.bf16.mxu1 %v9697_v1  ;;  %v424_v18 = vrot.slane %v422_v12, 1  ;;  %v513_v26 = vor.u32 %v511_v20, %v7590_v19  ;;  %v443_v46 = vshll.u32 %v7620_v37, 16  ;;  %v531_v48 = vshll.u32 %v7626_v39, 16  ;;  %v7663_v59 = vld [vmem:[%s7555_s29 + $0x80] sm:$0xff]   ;;  %v7671_v2 = vld [vmem:[%s7555_s29 + $0x30] sm:$0xff]   ;;  %v7157_v17 = vld [vmem:[%s9692_s1 + $0x98] sm:$0xff]  }
  0x17   : > { %v433_v42 = vor.u32 %v431_v31, %v429_v23  ;;  %v521_v43 = vor.u32 %v519_v35, %v517_v27  ;;  %v525_v44 = vrot.slane %v523_v36, 1  ;;  %v439_v50 = vshrl.u32 %v7598_v24, 16  ;;  %v7153_v12 = vld [vmem:[%s9692_s1 + $0xa0] sm:$0xff]  }
  0x18   : > { %v425_v25 = vor.u32 %v424_v18, %v420_v16  ;;  %v518_v34 = vsel %vm418_vm1, %v513_v26, %v517_v27  ;;  %v451_v51 = vshll.u32 %v7629_v41, 16  ;;  %v527_v54 = vshrl.u32 %v7602_v28, 16  ;;  %v7154_v13 = vld [vmem:[%s9692_s1 + $0x20] sm:$0xff]   ;;  %v7158_v26 = vld [vmem:[%s9692_s1 + $0x18] sm:$0xff]   ;;  %v7712_v27 = vld [vmem:[%s7555_s29 + $0x50] sm:$0xff]  }
  0x19   : > { %6203 = vmatpush3.bf16.msra.mxu0 %v7130_v4  ;;  %7107 = vmatpush3.bf16.msra.mxu1 %v7130_v4  ;;  %v438_v52 = vsel %vm418_vm1, %v433_v42, %v437_v40  ;;  %v526_v53 = vsel %vm418_vm1, %v521_v43, %v525_v44  ;;  %v447_v56 = vshrl.u32 %v7620_v37, 16  ;;  %v539_v58 = vshll.u32 %v7640_v47, 16  ;;  %v7742_v43 = vld [vmem:[%s7555_s29 + $0x40] sm:$0xff]  }
  0x1a   : > { %6204 = vmatprep.subr.bf16.mxu0 %v9697_v1  ;;  %7100 = vmatprep.subr.bf16.mxu1 %v9697_v1  ;;  %v430_v33 = vsel %vm418_vm1, %v425_v25, %v429_v23  ;;  %v445_v60 = vrot.slane %v443_v46, 1  ;;  %v533_v61 = vrot.slane %v531_v48, 1  ;;  %v535_v62 = vshrl.u32 %v7626_v39, 16  ;;  %v7164_v39 = vld [vmem:[%s9692_s1 + $0x10] sm:$0xff]  }
  0x1b   : > { %v459_v63 = vshll.u32 %v7646_v49, 16  ;;  %v7668_v0 = vrot.slane %v451_v51, 1  ;;  %v441_v3 = vor.u32 %v439_v50, %v437_v40  ;;  %v529_v4 = vor.u32 %v527_v54, %v525_v44  ;;  %v7168_v54 = vld [vmem:[%s9692_s1 + $0x88] sm:$0xff]  }
  0x1c   : > { %v455_v5 = vshrl.u32 %v7629_v41, 16  ;;  %v7681_v9 = vrot.slane %v539_v58, 1  ;;  %v467_v16 = vshll.u32 %v7671_v2, 16  ;;  %v463_v25 = vshrl.u32 %v7646_v49, 16 }
  0x1d   : > { %6205 = vmatpush3.bf16.msra.mxu0 %v7131_v8  ;;  %7108 = vmatpush3.bf16.msra.mxu1 %v7131_v8  ;;  %v7679_v8 = vld [vmem:[%s7555_s29 + $0x88] sm:$0xff]   ;;  %v7690_v14 = vrot.slane %v459_v63, 1  ;;  %v446_v18 = vsel %vm418_vm1, %v441_v3, %v445_v60  ;;  %v534_v20 = vsel %vm418_vm1, %v529_v4, %v533_v61  ;;  %v449_v28 = vor.u32 %v447_v56, %v445_v60  ;;  %v7170_v60 = vld [vmem:[%s9692_s1] sm:$0xff]  }
  0x1e   : > { %6206 = vmatprep.subr.bf16.mxu0 %v9697_v1  ;;  %7101 = vmatprep.subr.bf16.mxu1 %v9697_v1  ;;  %v555_v21 = vshll.u32 %v7679_v8, 16  ;;  %v499_v31 = vshll.u32 %v7712_v27, 16  ;;  %v503_v32 = vshrl.u32 %v7712_v27, 16  ;;  %v471_v42 = vshrl.u32 %v7671_v2, 16 }
  0x1f   : > { %v559_v44 = vshrl.u32 %v7679_v8, 16  ;;  %v454_v48 = vsel %vm418_vm1, %v449_v28, %v7668_v0  ;;  %v483_v56 = vshll.u32 %v7742_v43, 16  ;;  %v7804_v8 = vld [vmem:[%s7555_s29 + $0x48] sm:$0xff]  }
  0x20   : > { %v7728_v35 = vrot.slane %v555_v21, 1  ;;  %v7737_v40 = vrot.slane %v499_v31, 1 }
  0x21   : > { %6207 = vmatpush3.bf16.msra.mxu0 %v7132_v10  ;;  %7109 = vmatpush3.bf16.msra.mxu1 %v7132_v10  ;;  %v547_v10 = vshll.u32 %v7663_v59, 16  ;;  %v485_v4 = vrot.slane %v483_v56, 1  ;;  %v7178_v56 = vld [vmem:[%s9692_s1 + $0x128] sm:$0xff]  }
  0x22   : > { %6208 = vmatprep.subr.bf16.mxu0 %v9697_v1  ;;  %7102 = vmatprep.subr.bf16.mxu1 %v9697_v1  ;;  %v505_v46 = vor.u32 %v503_v32, %v7737_v40 }
  0x23   : > { %v7705_v23 = vrot.slane %v547_v10, 1 }
  0x25   : > { %6209 = vmatpush3.bf16.msra.mxu0 %v7133_v15  ;;  %7110 = vmatpush3.bf16.msra.mxu1 %v7133_v15  ;;  %v543_v15 = vshrl.u32 %v7640_v47, 16  ;;  %v465_v47 = vor.u32 %v463_v25, %v7690_v14 }
  0x26   : > { %6210 = vmatprep.subr.bf16.mxu0 %v9697_v1  ;;  %7103 = vmatprep.subr.bf16.mxu1 %v9697_v1 }
  0x29   : > { %6211 = vmatpush3.bf16.msra.mxu0 %v7134_v22  ;;  %7111 = vmatpush3.bf16.msra.mxu1 %v7134_v22  ;;  %v7703_v22 = vld [vmem:[%s7555_s29 + $0x38] sm:$0xff]  }
  0x2a   : > { %6396 = vmatprep.subr.bf16.mxu0 %v9697_v1  ;;  %6296 = vmatprep.subr.bf16.mxu1 %v9697_v1  ;;  %v475_v36 = vshll.u32 %v7703_v22, 16 }
  0x2c   : > { %6213 = vmatmul.mubr.bf16.vlgmr.msra.gmra.mxu0 %v430_v33  ;;  %6257 = vmatmul.mubr.bf16.vlgmr.msra.gmra.mxu1 %v518_v34  ;;  %v537_v33 = vor.u32 %v535_v62, %v533_v61  ;;  %v7726_v34 = vrot.slane %v467_v16, 1  ;;  %v477_v51 = vrot.slane %v475_v36, 1  ;;  %v457_v61 = vor.u32 %v455_v5, %v7668_v0  ;;  %v7813_v16 = vld [vmem:[%s7555_s29 + $0xa0] ss:$0 sps:$4 sm:$0x77]  }
  0x2d   : > { %6397 = vmatpush3.bf16.msra.mxu0 %v7139_v29  ;;  %6216 = vmatprep.mubr.msk.bf16.mxu0 %vm7490_vm0, %v9697_v1  ;;  %v551_v29 = vshrl.u32 %v7663_v59, 16  ;;  %v545_v62 = vor.u32 %v543_v15, %v7681_v9  ;;  %v491_v15 = vshll.u32 %v7804_v8, 16  ;;  %v495_v36 = vshrl.u32 %v7804_v8, 16 }
  0x2e   : > { %6260 = vmatprep.mubr.msk.bf16.mxu1 %vm7490_vm0, %v9697_v1  ;;  %6297 = vmatpush3.bf16.msra.mxu1 %v7140_v30  ;;  %v7718_v30 = vld [vmem:[%s7555_s29 + $0x90] sm:$0xff]   ;;  %v542_v50 = vsel %vm418_vm1, %v537_v33, %v7681_v9  ;;  %v462_v63 = vsel %vm418_vm1, %v457_v61, %v7690_v14  ;;  %v470_v9 = vsel %vm418_vm1, %v465_v47, %v7726_v34  ;;  %v7182_v61 = vld [vmem:[%s9692_s1 + $0x118] sm:$0xff]   ;;  %v1158_v47 = vrot.slane %v7646_v49, 1 }
  0x2f   : > { %6398 = vmatprep.subr.bf16.mxu0 %v9697_v1  ;;  %6298 = vmatprep.subr.bf16.mxu1 %v9697_v1  ;;  %v567_v59 = vshrl.u32 %v7718_v30, 16  ;;  %v550_v3 = vsel %vm418_vm1, %v545_v62, %v7705_v23  ;;  %v553_v5 = vor.u32 %v551_v29, %v7705_v23  ;;  %v473_v14 = vor.u32 %v471_v42, %v7726_v34  ;;  %v7185_v62 = vld [vmem:[%s9692_s1 + $0xc8] sm:$0xff]  }
  0x30   : > { %v579_v23 = vshll.u32 %v7813_v16, 16 }
  0x31   : > { %6399 = vmatpush3.bf16.msra.mxu0 %v7143_v38  ;;  %v7163_v38 = vld [vmem:[%s9692_s1 + $0x90] sm:$0xff]   ;;  %v558_v10 = vsel %vm418_vm1, %v553_v5, %v7728_v35  ;;  %v7188_v5 = vld [vmem:[%s9692_s1 + $0x100] sm:$0xff]  }
  0x32   : > { %6299 = vmatpush3.bf16.msra.mxu1 %v7146_v45  ;;  %6400 = vmatprep.subr.bf16.mxu0 %v9697_v1  ;;  %v563_v45 = vshll.u32 %v7718_v30, 16  ;;  %v493_v30 = vrot.slane %v491_v15, 1  ;;  %v581_v31 = vrot.slane %v579_v23, 1  ;;  %v7454_v23 = vld [vmem:[%s7555_s29 + $0x68] sm:$0xff]  }
  0x33   : > { %6300 = vmatprep.subr.bf16.mxu1 %v9697_v1 }
  0x34   : > { %6217 = vmatmul.mubr.bf16.gmra.mxu0 %v438_v52  ;;  %6261 = vmatmul.mubr.bf16.gmra.mxu1 %v526_v53  ;;  %v479_v52 = vshrl.u32 %v7703_v22, 16  ;;  %v7167_v53 = vld [vmem:[%s9692_s1 + $0x8] sm:$0xff]   ;;  %v565_v58 = vrot.slane %v563_v45, 1  ;;  %v1127_v45 = vld [vmem:[%s7555_s29] sm:$0xe] }
  0x35   : > { %6220 = vmatprep.mubr.msk.bf16.mxu0 %vm7490_vm0, %v9697_v1  ;;  %6264 = vmatprep.mubr.msk.bf16.mxu1 %vm7490_vm0, %v9697_v1 }
  0x36   : > { %6401 = vmatpush3.bf16.msra.mxu0 %v7147_v55  ;;  %6301 = vmatpush3.bf16.msra.mxu1 %v7150_v57  ;;  %v7761_v55 = vsel %vm418_vm1, %v505_v46, %v7590_v19  ;;  %v7765_v57 = vld [vmem:[%s7555_s29 + $0x98] sm:$0xff]   ;;  %v7171_v19 = vld [vmem:[%s9692_s1 + $0x80] sm:$0xff]   ;;  %v481_v25 = vor.u32 %v479_v52, %v477_v51  ;;  %v5470_v46 = vcombine.low %v1127_v45, %v7562_v6 }
  0x37   : > { %6402 = vmatprep.subr.bf16.mxu0 %v9697_v1  ;;  %6302 = vmatprep.subr.bf16.mxu1 %v9697_v1  ;;  %v571_v0 = vshll.u32 %v7765_v57, 16  ;;  %v575_v21 = vshrl.u32 %v7765_v57, 16  ;;  %v7174_v52 = vld [vmem:[%s9692_s1 + $0x138] sm:$0xff]  }
  0x38   : > { %v486_v28 = vsel %vm418_vm1, %v481_v25, %v485_v4  ;;  %v1174_v25 = vrot.slane %v7454_v23, 1 }
  0x3a   : > { %6403 = vmatpush3.bf16.msra.mxu0 %v7153_v12  ;;  %6303 = vmatpush3.bf16.msra.mxu1 %v7154_v13  ;;  %v573_v12 = vrot.slane %v571_v0, 1  ;;  %v487_v13 = vshrl.u32 %v7742_v43, 16  ;;  %v7186_v0 = vld [vmem:[%s9692_s1 + $0x108] sm:$0xff]  }
  0x3b   : > { %6404 = vmatprep.subr.bf16.mxu0 %v9697_v1  ;;  %6304 = vmatprep.subr.bf16.mxu1 %v9697_v1 }
  0x3c   : > { %6221 = vmatmul.mubr.bf16.gmra.mxu0 %v446_v18  ;;  %6265 = vmatmul.mubr.bf16.gmra.mxu1 %v534_v20  ;;  %v478_v18 = vsel %vm418_vm1, %v473_v14, %v477_v51  ;;  %v489_v32 = vor.u32 %v487_v13, %v485_v4  ;;  %v577_v33 = vor.u32 %v575_v21, %v573_v12  ;;  %v1150_v51 = vrot.slane %v7579_v11, 1 }
  0x3d   : > { %6224 = vmatprep.mubr.msk.bf16.mxu0 %vm7490_vm0, %v9697_v1  ;;  %6268 = vmatprep.mubr.msk.bf16.mxu1 %vm7490_vm0, %v9697_v1 }
  0x3e   : > { %6405 = vmatpush3.bf16.msra.mxu0 %v7157_v17  ;;  %6305 = vmatpush3.bf16.msra.mxu1 %v7158_v26  ;;  %v561_v17 = vor.u32 %v559_v44, %v7728_v35  ;;  %v569_v26 = vor.u32 %v567_v59, %v565_v58  ;;  %v494_v34 = vsel %vm418_vm1, %v489_v32, %v493_v30  ;;  %v1154_v59 = vrot.slane %v7620_v37, 1 }
  0x3f   : > { %6406 = vmatprep.subr.bf16.mxu0 %v9697_v1  ;;  %6306 = vmatprep.subr.bf16.mxu1 %v9697_v1  ;;  %v582_v35 = vsel %vm418_vm1, %v577_v33, %v581_v31  ;;  %v7456_v33 = vld [vmem:[%s7555_s29 + $0x78] sm:$0xff]  }
  0x40   : > { %v566_v20 = vsel %vm418_vm1, %v561_v17, %v565_v58  ;;  %v574_v29 = vsel %vm418_vm1, %v569_v26, %v573_v12  ;;  %v7181_v58 = vld [vmem:[%s9692_s1 + $0xd8] sm:$0xff]  }
  0x42   : > { %6407 = vmatpush3.bf16.msra.mxu0 %v7163_v38  ;;  %6307 = vmatpush3.bf16.msra.mxu1 %v7164_v39  ;;  %v583_v38 = vshrl.u32 %v7813_v16, 16  ;;  %v497_v39 = vor.u32 %v495_v36, %v493_v30 }
  0x43   : > { %6308 = vmatprep.subr.bf16.mxu1 %v9697_v1  ;;  %6408 = vmatprep.subr.bf16.mxu0 %v9697_v1 }
  0x44   : > { %6225 = vmatmul.mubr.bf16.gmra.mxu0 %v454_v48  ;;  %6269 = vmatmul.mubr.bf16.gmra.mxu1 %v542_v50  ;;  %v585_v42 = vor.u32 %v583_v38, %v581_v31  ;;  %v502_v44 = vsel %vm418_vm1, %v497_v39, %v7737_v40  ;;  %v7172_v48 = vld [vmem:[%s9692_s1 + $0xf8] sm:$0xff]   ;;  %v1149_v50 = vrot.slane %v5470_v46, 1  ;;  %v7175_v40 = vld [vmem:[%s9692_s1 + $0xf0] sm:$0xff]  }
  0x45   : > { %6228 = vmatprep.mubr.msk.bf16.mxu0 %vm7490_vm0, %v9697_v1  ;;  %6272 = vmatprep.mubr.msk.bf16.mxu1 %vm7490_vm0, %v9697_v1 }
  0x46   : > { %6309 = vmatpush3.bf16.msra.mxu1 %v7167_v53  ;;  %6409 = vmatpush3.bf16.msra.mxu0 %v7168_v54  ;;  %v1151_v6 = vsel %vm1148_vm2, %v1149_v50, %v1150_v51  ;;  %v7177_v53 = vld [vmem:[%s9692_s1 + $0xe8] sm:$0xff]   ;;  %v7176_v54 = vld [vmem:[%s9692_s1 + $0x130] sm:$0xff]   ;;  %v7457_v50 = vld [vmem:[%s7555_s29 + $0x80] sm:$0xff]  }
  0x47   : > { %6310 = vmatprep.subr.bf16.mxu1 %v9697_v1  ;;  %6410 = vmatprep.subr.bf16.mxu0 %v9697_v1 }
  0x4a   : > { %6311 = vmatpush3.bf16.msra.mxu1 %v7170_v60  ;;  %6411 = vmatpush3.bf16.msra.mxu0 %v7171_v19  ;;  %v7180_v60 = vld [vmem:[%s9692_s1 + $0x120] sm:$0xff]  }
  0x4b   : > { %6496 = vmatprep.subr.bf16.mxu1 %v9697_v1  ;;  %6596 = vmatprep.subr.bf16.mxu0 %v9697_v1 }
  0x4c   : > { %6229 = vmatmul.mubr.bf16.gmra.mxu0 %v462_v63  ;;  %6273 = vmatmul.mubr.bf16.gmra.mxu1 %v550_v3  ;;  %v1156_v63 = vrot.slane %v7629_v41, 1  ;;  %v7184_v3 = vld [vmem:[%s9692_s1 + $0x110] sm:$0xff]  }
  0x4d   : > { %6232 = vmatprep.mubr.msk.bf16.mxu0 %vm7490_vm0, %v9697_v1  ;;  %6276 = vmatprep.mubr.msk.bf16.mxu1 %vm7490_vm0, %v9697_v1 }
  0x4e   : > { %v1157_v4 = vsel %vm1148_vm2, %v1154_v59, %v1156_v63 }
  0x54   : > { %6233 = vmatmul.mubr.bf16.gmra.mxu0 %v470_v9  ;;  %6277 = vmatmul.mubr.bf16.gmra.mxu1 %v558_v10  ;;  %v1160_v9 = vrot.slane %v7671_v2, 1 }
  0x55   : > { %6236 = vmatprep.mubr.msk.bf16.mxu0 %vm7490_vm0, %v9697_v1  ;;  %6280 = vmatprep.mubr.msk.bf16.mxu1 %vm7490_vm0, %v9697_v1 }
  0x56   : > { %v1161_v10 = vsel %vm1148_vm2, %v1158_v47, %v1160_v9 }
  0x5c   : > { %6237 = vmatmul.mubr.bf16.gmra.mxu0 %v478_v18  ;;  %6281 = vmatmul.mubr.bf16.gmra.mxu1 %v566_v20 }
  0x5d   : > { %6240 = vmatprep.mubr.msk.bf16.mxu0 %vm7490_vm0, %v9697_v1  ;;  %6284 = vmatprep.mubr.msk.bf16.mxu1 %vm7490_vm0, %v9697_v1 }
  0x64   : > { %6241 = vmatmul.mubr.bf16.gmra.mxu0 %v486_v28  ;;  %6285 = vmatmul.mubr.bf16.gmra.mxu1 %v574_v29  ;;  %v7455_v28 = vld [vmem:[%s7555_s29 + $0x70] sm:$0xff]  }
  0x65   : > { %6244 = vmatprep.mubr.msk.bf16.mxu0 %vm7490_vm0, %v9697_v1  ;;  %6288 = vmatprep.mubr.msk.bf16.mxu1 %vm7490_vm0, %v9697_v1  ;;  %v1176_v29 = vrot.slane %v7455_v28, 1 }
  0x67   : > { %v1177_v30 = vsel %vm1148_vm2, %v1174_v25, %v1176_v29 }
  0x6c   : > { %6245 = vmatmul.mubr.bf16.gmra.mxu0 %v494_v34  ;;  %6289 = vmatmul.mubr.bf16.gmra.mxu1 %v582_v35  ;;  %v1178_v34 = vrot.slane %v7456_v33, 1 }
  0x6d   : > { %6248 = vmatprep.mubr.msk.bf16.mxu0 %vm7490_vm0, %v9697_v1  ;;  %6292 = vmatprep.mubr.msk.bf16.mxu1 %vm7490_vm0, %v9697_v1 }
  0x74   : > { %6249 = vmatmul.mubr.bf16.gmra.mxu0 %v502_v44  ;;  %6293 = vmatmul.mubr.bf16.gmra.mxu1 %v585_v42  ;;  %v1179_v42 = vsel %vm1148_vm2, %v1176_v29, %v1178_v34 }
  0x75   : > { %6252 = vmatprep.mubr.msk.bf16.mxu0 %vm7490_vm0, %v9697_v1  ;;  %6312 = vmatprep.mubr.msk.bf16.mxu1 %vm7490_vm0, %v9697_v1 }
  0x7c   : > { %6253 = vmatmul.mubr.bf16.gmra.mxu0 %v7761_v55  ;;  %6313 = vmatmul.mubr.bf16.vlgmr.msra.gmra.mxu1 %v7567_v7  ;;  %v1152_v7 = vrot.slane %v7598_v24, 1  ;;  %v7179_v55 = vld [vmem:[%s9692_s1 + $0xe0] sm:$0xff]  }
  0x7d   : > { %6316 = vmatprep.mubr.msk.bf16.mxu1 %vm7490_vm0, %v9697_v1  ;;  %6412 = vmatprep.mubr.msk.bf16.mxu0 %vm7490_vm0, %v9697_v1 }
  0x7e   : > { %6497 = vmatpush3.bf16.msra.mxu1 %v7172_v48  ;;  %v1155_v19 = vsel %vm1148_vm2, %v1152_v7, %v1154_v59 }
  0x7f   : > { %6498 = vmatprep.subr.bf16.mxu1 %v9697_v1 }
  0x82   : > { %6499 = vmatpush3.bf16.msra.mxu1 %v7175_v40 }
  0x83   : > { %6500 = vmatprep.subr.bf16.mxu1 %v9697_v1 }
  0x84   : > { %6317 = vmatmul.mubr.bf16.gmra.mxu1 %v7579_v11  ;;  %6413 = vmatmul.mubr.bf16.vlgmr.msra.gmra.mxu0 %v1151_v6  ;;  %v1153_v11 = vsel %vm1148_vm2, %v1150_v51, %v1152_v7  ;;  %v1180_v51 = vrot.slane %v7457_v50, 1 }
  0x85   : > { %6597 = vmatpush3.bf16.msra.mxu0 %v7174_v52  ;;  %6320 = vmatprep.mubr.msk.bf16.mxu1 %vm7490_vm0, %v9697_v1 }
  0x86   : > { %6416 = vmatprep.mubr.msk.bf16.mxu0 %vm7490_vm0, %v9697_v1  ;;  %6598 = vmatprep.subr.bf16.mxu0 %v9697_v1 }
  0x87   : > { %6501 = vmatpush3.bf16.msra.mxu1 %v7177_v53  ;;  %v1181_v53 = vsel %vm1148_vm2, %v1178_v34, %v1180_v51 }
  0x88   : > { %6502 = vmatprep.subr.bf16.mxu1 %v9697_v1 }
  0x89   : > { %6599 = vmatpush3.bf16.msra.mxu0 %v7176_v54 }
  0x8a   : > { %6600 = vmatprep.subr.bf16.mxu0 %v9697_v1 }
  0x8b   : > { %6503 = vmatpush3.bf16.msra.mxu1 %v7179_v55 }
  0x8c   : > { %6321 = vmatmul.mubr.bf16.gmra.mxu1 %v7598_v24  ;;  %6417 = vmatmul.mubr.bf16.gmra.mxu0 %v1153_v11  ;;  %v7183_v24 = vld [vmem:[%s9692_s1 + $0xd0] sm:$0xff]  }
  0x8d   : > { %6324 = vmatprep.mubr.msk.bf16.mxu1 %vm7490_vm0, %v9697_v1  ;;  %6420 = vmatprep.mubr.msk.bf16.mxu0 %vm7490_vm0, %v9697_v1 }
  0x8e   : > { %6601 = vmatpush3.bf16.msra.mxu0 %v7178_v56  ;;  %6504 = vmatprep.subr.bf16.mxu1 %v9697_v1 }
  0x8f   : > { %6602 = vmatprep.subr.bf16.mxu0 %v9697_v1  ;;  %6505 = vmatpush3.bf16.msra.mxu1 %v7181_v58  ;;  %v7458_v58 = vld [vmem:[%s7555_s29 + $0x88] sm:$0xff]  }
  0x90   : > { %6506 = vmatprep.subr.bf16.mxu1 %v9697_v1  ;;  %v1182_v59 = vrot.slane %v7458_v58, 1 }
  0x92   : > { %6603 = vmatpush3.bf16.msra.mxu0 %v7180_v60 }
  0x93   : > { %6604 = vmatprep.subr.bf16.mxu0 %v9697_v1  ;;  %6507 = vmatpush3.bf16.msra.mxu1 %v7183_v24 }
  0x94   : > { %6325 = vmatmul.mubr.bf16.gmra.mxu1 %v7620_v37  ;;  %6421 = vmatmul.mubr.bf16.gmra.mxu0 %v1155_v19  ;;  %v7187_v37 = vld [vmem:[%s9692_s1 + $0xc0] sm:$0xff]  }
  0x95   : > { %6328 = vmatprep.mubr.msk.bf16.mxu1 %vm7490_vm0, %v9697_v1  ;;  %6424 = vmatprep.mubr.msk.bf16.mxu0 %vm7490_vm0, %v9697_v1 }
  0x96   : > { %6605 = vmatpush3.bf16.msra.mxu0 %v7182_v61  ;;  %6508 = vmatprep.subr.bf16.mxu1 %v9697_v1 }
  0x97   : > { %6606 = vmatprep.subr.bf16.mxu0 %v9697_v1  ;;  %6509 = vmatpush3.bf16.msra.mxu1 %v7185_v62  ;;  %v1183_v62 = vsel %vm1148_vm2, %v1180_v51, %v1182_v59 }
  0x98   : > { %6510 = vmatprep.subr.bf16.mxu1 %v9697_v1 }
  0x9a   : > { %6607 = vmatpush3.bf16.msra.mxu0 %v7184_v3 }
  0x9b   : > { %6608 = vmatprep.subr.bf16.mxu0 %v9697_v1  ;;  %6511 = vmatpush3.bf16.msra.mxu1 %v7187_v37 }
  0x9c   : > { %6329 = vmatmul.mubr.bf16.gmra.mxu1 %v7629_v41  ;;  %6425 = vmatmul.mubr.bf16.gmra.mxu0 %v1157_v4  ;;  %v1159_v41 = vsel %vm1148_vm2, %v1156_v63, %v1158_v47 }
  0x9d   : > { %6332 = vmatprep.mubr.msk.bf16.mxu1 %vm7490_vm0, %v9697_v1  ;;  %6428 = vmatprep.mubr.msk.bf16.mxu0 %vm7490_vm0, %v9697_v1 }
  0x9e   : > { %6609 = vmatpush3.bf16.msra.mxu0 %v7186_v0  ;;  %6696 = vmatprep.subr.bf16.mxu1 %v9697_v1  ;;  %v7459_v0 = vld [vmem:[%s7555_s29 + $0x90] sm:$0xff]  }
  0x9f   : > { %6610 = vmatprep.subr.bf16.mxu0 %v9697_v1  ;;  %v1184_v47 = vrot.slane %v7459_v0, 1 }
  0xa2   : > { %6611 = vmatpush3.bf16.msra.mxu0 %v7188_v5 }
  0xa3   : > { %6796 = vmatprep.subr.bf16.mxu0 %v9697_v1 }
  0xa4   : > { %6333 = vmatmul.mubr.bf16.gmra.mxu1 %v7646_v49  ;;  %6429 = vmatmul.mubr.bf16.gmra.mxu0 %v1159_v41  ;;  %v1162_v49 = vrot.slane %v7703_v22, 1 }
  0xa5   : > { %6336 = vmatprep.mubr.msk.bf16.mxu1 %vm7490_vm0, %v9697_v1  ;;  %6432 = vmatprep.mubr.msk.bf16.mxu0 %vm7490_vm0, %v9697_v1 }
  0xa6   : > { %v1163_v12 = vsel %vm1148_vm2, %v1160_v9, %v1162_v49 }
  0xac   : > { %6337 = vmatmul.mubr.bf16.gmra.mxu1 %v7671_v2  ;;  %6433 = vmatmul.mubr.bf16.gmra.mxu0 %v1161_v10  ;;  %v1164_v2 = vrot.slane %v7742_v43, 1 }
  0xad   : > { %6340 = vmatprep.mubr.msk.bf16.mxu1 %vm7490_vm0, %v9697_v1  ;;  %6436 = vmatprep.mubr.msk.bf16.mxu0 %vm7490_vm0, %v9697_v1 }
  0xae   : > { %v1165_v13 = vsel %vm1148_vm2, %v1162_v49, %v1164_v2  ;;  %v1185_v49 = vsel %vm1148_vm2, %v1182_v59, %v1184_v47 }
  0xb4   : > { %6341 = vmatmul.mubr.bf16.gmra.mxu1 %v7703_v22  ;;  %6437 = vmatmul.mubr.bf16.gmra.mxu0 %v1163_v12  ;;  %v1166_v22 = vrot.slane %v7804_v8, 1 }
  0xb5   : > { %6344 = vmatprep.mubr.msk.bf16.mxu1 %vm7490_vm0, %v9697_v1  ;;  %6440 = vmatprep.mubr.msk.bf16.mxu0 %vm7490_vm0, %v9697_v1 }
  0xb6   : > { %v1167_v15 = vsel %vm1148_vm2, %v1164_v2, %v1166_v22 }
  0xbc   : > { %6345 = vmatmul.mubr.bf16.gmra.mxu1 %v7742_v43  ;;  %6441 = vmatmul.mubr.bf16.gmra.mxu0 %v1165_v13  ;;  %v1168_v43 = vrot.slane %v7712_v27, 1 }
  0xbd   : > { %6348 = vmatprep.mubr.msk.bf16.mxu1 %vm7490_vm0, %v9697_v1  ;;  %6444 = vmatprep.mubr.msk.bf16.mxu0 %vm7490_vm0, %v9697_v1 }
  0xbe   : > { %v1169_v14 = vsel %vm1148_vm2, %v1166_v22, %v1168_v43 }
  0xc4   : > { %6349 = vmatmul.mubr.bf16.gmra.mxu1 %v7804_v8  ;;  %6445 = vmatmul.mubr.bf16.gmra.mxu0 %v1167_v15  ;;  %v7452_v8 = vld [vmem:[%s7555_s29 + $0x58] sm:$0xff]   ;;  %v1186_v15 = vrot.slane %v7765_v57, 1 }
  0xc5   : > { %6352 = vmatprep.mubr.msk.bf16.mxu1 %vm7490_vm0, %v9697_v1  ;;  %6448 = vmatprep.mubr.msk.bf16.mxu0 %vm7490_vm0, %v9697_v1  ;;  %v1170_v17 = vrot.slane %v7452_v8, 1 }
  0xc7   : > { %v1171_v18 = vsel %vm1148_vm2, %v1168_v43, %v1170_v17 }
  0xcc   : > { %6353 = vmatmul.mubr.bf16.gmra.mxu1 %v7712_v27  ;;  %6449 = vmatmul.mubr.bf16.gmra.mxu0 %v1169_v14  ;;  %v7453_v27 = vld [vmem:[%s7555_s29 + $0x60] sm:$0xff]  }
  0xcd   : > { %6356 = vmatprep.mubr.msk.bf16.mxu1 %vm7490_vm0, %v9697_v1  ;;  %6452 = vmatprep.mubr.msk.bf16.mxu0 %vm7490_vm0, %v9697_v1  ;;  %v1172_v20 = vrot.slane %v7453_v27, 1 }
  0xcf   : > { %v1173_v21 = vsel %vm1148_vm2, %v1170_v17, %v1172_v20  ;;  %v1175_v26 = vsel %vm1148_vm2, %v1172_v20, %v1174_v25  ;;  %v1188_v25 = vrot.slane %v7813_v16, 1 }
  0xd4   : > { %6357 = vmatmul.mubr.bf16.gmra.mxu1 %v7452_v8  ;;  %6453 = vmatmul.mubr.bf16.gmra.mxu0 %v1171_v18  ;;  %v1187_v18 = vsel %vm1148_vm2, %v1184_v47, %v1186_v15 }
  0xd5   : > { %6360 = vmatprep.mubr.msk.bf16.mxu1 %vm7490_vm0, %v9697_v1  ;;  %6456 = vmatprep.mubr.msk.bf16.mxu0 %vm7490_vm0, %v9697_v1 }
  0xdc   : > { %6361 = vmatmul.mubr.bf16.gmra.mxu1 %v7453_v27  ;;  %6457 = vmatmul.mubr.bf16.gmra.mxu0 %v1173_v21 }
  0xdd   : > { %6364 = vmatprep.mubr.msk.bf16.mxu1 %vm7490_vm0, %v9697_v1  ;;  %6460 = vmatprep.mubr.msk.bf16.mxu0 %vm7490_vm0, %v9697_v1 }
  0xe4   : > { %6365 = vmatmul.mubr.bf16.gmra.mxu1 %v7454_v23  ;;  %6461 = vmatmul.mubr.bf16.gmra.mxu0 %v1175_v26  ;;  %v1500_v26 = vld [vmem:[%s7555_s29 + $0x8] sm:$0xe] }
  0xe5   : > { %6368 = vmatprep.mubr.msk.bf16.mxu1 %vm7490_vm0, %v9697_v1  ;;  %6464 = vmatprep.mubr.msk.bf16.mxu0 %vm7490_vm0, %v9697_v1 }
  0xec   : > { %v8011_v31 = vpop.f32.mrf.mxu0  ;;  %v8013_v32 = vpop.f32.mrf.mxu1  ;;  %6369 = vmatmul.mubr.bf16.gmra.mxu1 %v7455_v28  ;;  %6465 = vmatmul.mubr.bf16.gmra.mxu0 %v1177_v30  ;;  %v1501_v28 = vld [vmem:[%s7555_s29 + $0xc] sm:$0xf] }
  0xed   : > { %6372 = vmatprep.mubr.msk.bf16.mxu1 %vm7490_vm0, %v9697_v1  ;;  %6468 = vmatprep.mubr.msk.bf16.mxu0 %vm7490_vm0, %v9697_v1 }
  0xee   : > { %v6214_v35 = vpop.f32.mrf.mxu0  ;;  %v6258_v36 = vpop.f32.mrf.mxu1 }
  0xef   : > { %v7189_v35 = vld [vmem:[%s7555_s29 + $0xa0] ss:$0 sps:$4 sm:$0x33]   ;;  %v5495_v36 = vcombine.low %v1500_v26, %v1501_v28 }
  0xf0   : > { %v8020_v38 = vpop.f32.mrf.mxu0  ;;  %v8022_v39 = vpop.f32.mrf.mxu1 }
  0xf1   : > { %v1661_v16 = vrot.slane %v5495_v36, 1 }
  0xf2   : > { %v6215_v44 = vpop.f32.mrf.mxu0  ;;  %v6259_v45 = vpop.f32.mrf.mxu1 }
  0xf4   : > { %v8025_v46 = vpop.f32.mrf.mxu0  ;;  %v8027_v48 = vpop.f32.mrf.mxu1  ;;  %6373 = vmatmul.mubr.bf16.gmra.mxu1 %v7456_v33  ;;  %6469 = vmatmul.mubr.bf16.gmra.mxu0 %v1179_v42  ;;  %v1189_v42 = vsel %vm1148_vm2, %v1186_v15, %v1188_v25 }
  0xf5   : > { %6376 = vmatprep.mubr.msk.bf16.mxu1 %vm7490_vm0, %v9697_v1  ;;  %6472 = vmatprep.mubr.msk.bf16.mxu0 %vm7490_vm0, %v9697_v1 }
  0xf6   : > { %v6218_v40 = vpop.f32.mrf.mxu0  ;;  %v6262_v6 = vpop.f32.mrf.mxu1 }
  0xf7   : > { %v2035_v6 = vshrl.u32 %v5495_v36, 16 }
  0xf8   : > { %v8034_v52 = vpop.f32.mrf.mxu0  ;;  %v8036_v7 = vpop.f32.mrf.mxu1 }
  0xfa   : > { %v6219_v54 = vpop.f32.mrf.mxu0  ;;  %v6263_v55 = vpop.f32.mrf.mxu1 }
  0xfc   : > { %v8039_v56 = vpop.f32.mrf.mxu0  ;;  %v8041_v11 = vpop.f32.mrf.mxu1  ;;  %6377 = vmatmul.mubr.bf16.gmra.mxu1 %v7457_v50  ;;  %6473 = vmatmul.mubr.bf16.gmra.mxu0 %v1181_v53  ;;  %v2038_v53 = vshll.u32 %v5495_v36, 16 }
  0xfd   : > { %6380 = vmatprep.mubr.msk.bf16.mxu1 %vm7490_vm0, %v9697_v1  ;;  %6476 = vmatprep.mubr.msk.bf16.mxu0 %vm7490_vm0, %v9697_v1 }
  0xfe   : > { %v6222_v60 = vpop.f32.mrf.mxu0  ;;  %v6266_v24 = vpop.f32.mrf.mxu1 }
 0x100   : > { %v8048_v19 = vpop.f32.mrf.mxu0  ;;  %v8050_v61 = vpop.f32.mrf.mxu1 }
 0x102   : > { %v6223_v63 = vpop.f32.mrf.mxu0  ;;  %v6267_v3 = vpop.f32.mrf.mxu1 }
 0x103   : > { %v7193_v63 = vld [vmem:[%s7555_s29 + $0x18] sm:$0xff]   ;;  %v2037_v3 = vrot.slane %v2035_v6, 1 }
 0x104   : > { %v8053_v37 = vpop.f32.mrf.mxu0  ;;  %v8055_v4 = vpop.f32.mrf.mxu1  ;;  %6381 = vmatmul.mubr.bf16.gmra.mxu1 %v7458_v58  ;;  %6477 = vmatmul.mubr.bf16.gmra.mxu0 %v1183_v62 }
 0x105   : > { %6384 = vmatprep.mubr.msk.bf16.mxu1 %vm7490_vm0, %v9697_v1  ;;  %6480 = vmatprep.mubr.msk.bf16.mxu0 %vm7490_vm0, %v9697_v1 }
 0x106   : > { %v6226_v5 = vpop.f32.mrf.mxu0  ;;  %v6270_v41 = vpop.f32.mrf.mxu1 }
 0x108   : > { %v8062_v9 = vpop.f32.mrf.mxu0  ;;  %v8064_v10 = vpop.f32.mrf.mxu1 }
 0x10a   : > { %v6227_v12 = vpop.f32.mrf.mxu0  ;;  %v6271_v2 = vpop.f32.mrf.mxu1 }
 0x10b   : > { %v7192_v12 = vld [vmem:[%s9692_s1 + $0x178] sm:$0xff]  }
 0x10c   : > { %v8067_v13 = vpop.f32.mrf.mxu0  ;;  %v8069_v22 = vpop.f32.mrf.mxu1  ;;  %6385 = vmatmul.mubr.bf16.gmra.mxu1 %v7459_v0  ;;  %6481 = vmatmul.mubr.bf16.gmra.mxu0 %v1185_v49  ;;  %v2040_v0 = vrot.slane %v2038_v53, 2  ;;  %v7202_v53 = vld [vmem:[%s9692_s1 + $0x168] sm:$0xff]  }
 0x10d   : > { %6388 = vmatprep.mubr.msk.bf16.mxu1 %vm7490_vm0, %v9697_v1  ;;  %6484 = vmatprep.mubr.msk.bf16.mxu0 %vm7490_vm0, %v9697_v1 }
 0x10e   : > { %v6230_v43 = vpop.f32.mrf.mxu0  ;;  %v6274_v14 = vpop.f32.mrf.mxu1 }
 0x10f   : > { %v1664_v43 = vrot.slane %v7193_v63, 1  ;;  %v2041_v14 = vor.u32 %v2040_v0, %v2037_v3 }
 0x110   : > { %v8076_v8 = vpop.f32.mrf.mxu0  ;;  %v8078_v17 = vpop.f32.mrf.mxu1 }
 0x112   : > { %v6231_v27 = vpop.f32.mrf.mxu0  ;;  %v6275_v20 = vpop.f32.mrf.mxu1 }
 0x113   : > { %v2052_v27 = vshrl.u32 %v7193_v63, 16  ;;  %v2055_v20 = vshll.u32 %v7193_v63, 16  ;;  %v7198_v63 = vld [vmem:[%s9692_s1 + $0x1b0] sm:$0xff]  }
 0x114   : > { %v8081_v21 = vpop.f32.mrf.mxu0  ;;  %v8083_v23 = vpop.f32.mrf.mxu1  ;;  %6389 = vmatmul.mubr.bf16.gmra.mxu1 %v7765_v57  ;;  %6485 = vmatmul.mubr.bf16.gmra.mxu0 %v1187_v18  ;;  %v7191_v57 = vld [vmem:[%s7555_s29 + $0x10] sm:$0xff]  }
 0x115   : > { %6392 = vmatprep.mubr.msk.bf16.mxu1 %vm7490_vm0, %v9697_v1  ;;  %6488 = vmatprep.mubr.msk.bf16.mxu0 %vm7490_vm0, %v9697_v1  ;;  %v1662_v40 = vrot.slane %v7191_v57, 1  ;;  %v2043_v54 = vshrl.u32 %v7191_v57, 16  ;;  %v2046_v55 = vshll.u32 %v7191_v57, 16  ;;  %v7194_v57 = vld [vmem:[%s9692_s1 + $0x1b8] sm:$0xff]  }
 0x116   : > { %v6234_v29 = vpop.f32.mrf.mxu0  ;;  %v6278_v30 = vpop.f32.mrf.mxu1 }
 0x117   : > { %v1663_v62 = vsel %vm1148_vm2, %v1661_v16, %v1662_v40  ;;  %v2045_v47 = vrot.slane %v2043_v54, 1  ;;  %v2048_v5 = vrot.slane %v2046_v55, 2 }
 0x118   : > { %v8093_v33 = vpop.f32.mrf.mxu0  ;;  %v8095_v34 = vpop.f32.mrf.mxu1 }
 0x119   : > { %v2049_v18 = vor.u32 %v2048_v5, %v2045_v47  ;;  %v7206_v47 = vld [vmem:[%s9692_s1 + $0x160] sm:$0xff]  }
 0x11a   : > { %v6235_v44 = vpop.f32.mrf.mxu0  ;;  %v6279_v45 = vpop.f32.mrf.mxu1 }
 0x11b   : > { %v2050_v36 = vsel %vm2033_vm3, %v2041_v14, %v2049_v18  ;;  %v2054_v44 = vrot.slane %v2052_v27, 1  ;;  %v2057_v45 = vrot.slane %v2055_v20, 2  ;;  %v8171_v14 = vld [vmem:[%s7555_s29 + $0x28] sm:$0xff]  }
 0x11c   : > { %v8100_v50 = vpop.f32.mrf.mxu0  ;;  %v8102_v51 = vpop.f32.mrf.mxu1  ;;  %6393 = vmatmul.mubr.bf16.gmra.mxu1 %v7189_v35  ;;  %6489 = vmatmul.mubr.bf16.gmra.mxu0 %v1189_v42  ;;  %v1665_v35 = vsel %vm1148_vm2, %v1662_v40, %v1664_v43  ;;  %v8139_v42 = vld [vmem:[%s7555_s29 + $0x20] sm:$0xff]  }
 0x11d   : > { %6492 = vmatprep.mubr.msk.bf16.mxu0 %vm7490_vm0, %v9697_v1  ;;  %6512 = vmatprep.mubr.msk.bf16.mxu1 %vm7490_vm0, %v9697_v1  ;;  %v1666_v55 = vrot.slane %v8139_v42, 1 }
 0x11e   : > { %v6238_v58 = vpop.f32.mrf.mxu0  ;;  %v6282_v59 = vpop.f32.mrf.mxu1 }
 0x11f   : > { %v2058_v58 = vor.u32 %v2057_v45, %v2054_v44  ;;  %v2061_v59 = vshrl.u32 %v8139_v42, 16  ;;  %v2073_v44 = vshll.u32 %v8171_v14, 16 }
 0x120   : > { %v8108_v60 = vpop.f32.mrf.mxu0  ;;  %v8110_v24 = vpop.f32.mrf.mxu1 }
 0x121   : > { %v2063_v27 = vrot.slane %v2061_v59, 1 }
 0x122   : > { %v6239_v41 = vpop.f32.mrf.mxu0  ;;  %v6283_v49 = vpop.f32.mrf.mxu1 }
 0x123   : > { %v1667_v49 = vsel %vm1148_vm2, %v1664_v43, %v1666_v55  ;;  %v7211_v43 = vld [vmem:[%s9692_s1 + $0x158] sm:$0xff]  }
 0x124   : > { %v8117_v2 = vpop.f32.mrf.mxu0  ;;  %v8119_v15 = vpop.f32.mrf.mxu1  ;;  %6493 = vmatmul.mubr.bf16.gmra.mxu0 %v1188_v25  ;;  %6513 = vmatmul.mubr.bf16.vlgmr.msra.gmra.mxu1 %v1663_v62  ;;  %v7197_v25 = vld [vmem:[%s9692_s1 + $0x170] sm:$0xff]   ;;  %v2064_v62 = vshll.u32 %v8139_v42, 16  ;;  %v2070_v42 = vshrl.u32 %v8171_v14, 16 }
 0x125   : > { %6516 = vmatprep.mubr.msk.bf16.mxu1 %vm7490_vm0, %v9697_v1  ;;  %6612 = vmatprep.mubr.msk.bf16.mxu0 %vm7490_vm0, %v9697_v1 }
 0x126   : > { %v6242_v26 = vpop.f32.mrf.mxu0  ;;  %v6286_v28 = vpop.f32.mrf.mxu1  ;;  %6697 = vmatpush3.bf16.msra.mxu1 %v7192_v12  ;;  %v2059_v12 = vsel %vm2033_vm3, %v2049_v18, %v2058_v58  ;;  %v2066_v20 = vrot.slane %v2064_v62, 2 }
 0x127   : > { %6698 = vmatprep.subr.bf16.mxu1 %v9697_v1 }
 0x128   : > { %v8129_v29 = vpop.f32.mrf.mxu0  ;;  %v8131_v30 = vpop.f32.mrf.mxu1 }
 0x12a   : > { %v6243_v16 = vpop.f32.mrf.mxu0  ;;  %v6287_v6 = vpop.f32.mrf.mxu1  ;;  %6699 = vmatpush3.bf16.msra.mxu1 %v7197_v25  ;;  %v7203_v25 = vld [vmem:[%s9692_s1 + $0x1a8] sm:$0xff]  }
 0x12b   : > { %6700 = vmatprep.subr.bf16.mxu1 %v9697_v1  ;;  %v7208_v6 = vld [vmem:[%s9692_s1 + $0x1a0] sm:$0xff]  }
 0x12c   : > { %v8145_v40 = vpop.f32.mrf.mxu0  ;;  %v8147_v54 = vpop.f32.mrf.mxu1  ;;  %6517 = vmatmul.mubr.bf16.gmra.mxu1 %v1665_v35  ;;  %6613 = vmatmul.mubr.bf16.vlgmr.msra.gmra.mxu0 %v2050_v36  ;;  %v1668_v36 = vrot.slane %v8171_v14, 1 }
 0x12d   : > { %6797 = vmatpush3.bf16.msra.mxu0 %v7194_v57  ;;  %6520 = vmatprep.mubr.msk.bf16.mxu1 %vm7490_vm0, %v9697_v1  ;;  %v2067_v57 = vor.u32 %v2066_v20, %v2063_v27  ;;  %v7212_v27 = vld [vmem:[%s9692_s1 + $0x198] sm:$0xff]  }
 0x12e   : > { %v6246_v3 = vpop.f32.mrf.mxu0  ;;  %v6290_v0 = vpop.f32.mrf.mxu1  ;;  %6616 = vmatprep.mubr.msk.bf16.mxu0 %vm7490_vm0, %v9697_v1  ;;  %6798 = vmatprep.subr.bf16.mxu0 %v9697_v1 }
 0x12f   : > { %6701 = vmatpush3.bf16.msra.mxu1 %v7202_v53  ;;  %v7216_v53 = vld [vmem:[%s9692_s1 + $0x150] sm:$0xff]   ;;  %v2068_v3 = vsel %vm2033_vm3, %v2058_v58, %v2067_v57 }
 0x130   : > { %v8163_v5 = vpop.f32.mrf.mxu0  ;;  %v8165_v41 = vpop.f32.mrf.mxu1  ;;  %6702 = vmatprep.subr.bf16.mxu1 %v9697_v1  ;;  %v8205_v0 = vld [vmem:[%s7555_s29 + $0x30] sm:$0xff]  }
 0x131   : > { %6799 = vmatpush3.bf16.msra.mxu0 %v7198_v63  ;;  %v1669_v63 = vsel %vm1148_vm2, %v1666_v55, %v1668_v36  ;;  %v7220_v55 = vld [vmem:[%s9692_s1 + $0x148] sm:$0xff]  }
 0x132   : > { %v6247_v26 = vpop.f32.mrf.mxu0  ;;  %v6291_v28 = vpop.f32.mrf.mxu1  ;;  %6800 = vmatprep.subr.bf16.mxu0 %v9697_v1 }
 0x133   : > { %6703 = vmatpush3.bf16.msra.mxu1 %v7206_v47  ;;  %v2072_v47 = vrot.slane %v2070_v42, 1  ;;  %v1670_v26 = vrot.slane %v8205_v0, 1 }
 0x134   : > { %v8180_v35 = vpop.f32.mrf.mxu0  ;;  %v8182_v18 = vpop.f32.mrf.mxu1  ;;  %6521 = vmatmul.mubr.bf16.gmra.mxu1 %v1667_v49  ;;  %6617 = vmatmul.mubr.bf16.gmra.mxu0 %v2059_v12  ;;  %v2075_v49 = vrot.slane %v2073_v44, 2 }
 0x135   : > { %6524 = vmatprep.mubr.msk.bf16.mxu1 %vm7490_vm0, %v9697_v1  ;;  %6620 = vmatprep.mubr.msk.bf16.mxu0 %vm7490_vm0, %v9697_v1 }
 0x136   : > { %v6250_v45 = vpop.f32.mrf.mxu0  ;;  %v6294_v16 = vpop.f32.mrf.mxu1  ;;  %6801 = vmatpush3.bf16.msra.mxu0 %v7203_v25  ;;  %6704 = vmatprep.subr.bf16.mxu1 %v9697_v1  ;;  %v2076_v28 = vor.u32 %v2075_v49, %v2072_v47  ;;  %v2079_v25 = vshrl.u32 %v8205_v0, 16 }
 0x137   : > { %6802 = vmatprep.subr.bf16.mxu0 %v9697_v1  ;;  %6705 = vmatpush3.bf16.msra.mxu1 %v7211_v43  ;;  %v2082_v43 = vshll.u32 %v8205_v0, 16  ;;  %v7217_v45 = vld [vmem:[%s9692_s1 + $0x190] sm:$0xff]   ;;  %v7225_v16 = vld [vmem:[%s9692_s1 + $0x140] sm:$0xff]  }
 0x138   : > { %v8199_v59 = vpop.f32.mrf.mxu0  ;;  %v852_v62 = vpop.f32.mrf.mxu1  ;;  %6706 = vmatprep.subr.bf16.mxu1 %v9697_v1  ;;  %v2081_v0 = vrot.slane %v2079_v25, 1 }
 0x139   : > { %v7200_v62 = vld [vmem:[%s7555_s29 + $0x38] sm:$0xff]   ;;  %v2084_v47 = vrot.slane %v2082_v43, 2 }
 0x13a   : > { %v6251_v12 = vpop.f32.mrf.mxu0  ;;  %v6295_v14 = vpop.f32.mrf.mxu1  ;;  %6803 = vmatpush3.bf16.msra.mxu0 %v7208_v6  ;;  %v2088_v43 = vshrl.u32 %v7200_v62, 16 }
 0x13b   : > { %6804 = vmatprep.subr.bf16.mxu0 %v9697_v1  ;;  %6707 = vmatpush3.bf16.msra.mxu1 %v7216_v53  ;;  %v7221_v14 = vld [vmem:[%s9692_s1 + $0x188] sm:$0xff]   ;;  %v2085_v25 = vor.u32 %v2084_v47, %v2081_v0  ;;  %v7201_v0 = vld [vmem:[%s7555_s29 + $0x40] sm:$0xff]  }
 0x13c   : > { %v8214_v20 = vpop.f32.mrf.mxu0  ;;  %v961_v58 = vpop.f32.mrf.mxu1  ;;  %6525 = vmatmul.mubr.bf16.gmra.mxu1 %v1669_v63  ;;  %6621 = vmatmul.mubr.bf16.gmra.mxu0 %v2068_v3  ;;  %v1671_v63 = vsel %vm1148_vm2, %v1668_v36, %v1670_v26  ;;  %v2077_v3 = vsel %vm2033_vm3, %v2067_v57, %v2076_v28  ;;  %v1672_v36 = vrot.slane %v7200_v62, 1 }
 0x13d   : > { %6528 = vmatprep.mubr.msk.bf16.mxu1 %vm7490_vm0, %v9697_v1  ;;  %6624 = vmatprep.mubr.msk.bf16.mxu0 %vm7490_vm0, %v9697_v1 }
 0x13e   : > { %v6254_v42 = vpop.f32.mrf.mxu0  ;;  %v6314_v44 = vpop.f32.mrf.mxu1  ;;  %6805 = vmatpush3.bf16.msra.mxu0 %v7212_v27  ;;  %6708 = vmatprep.subr.bf16.mxu1 %v9697_v1  ;;  %v962_v27 = vadd.f32 %v961_v58, %v8011_v31  ;;  %v2091_v31 = vshll.u32 %v7200_v62, 16  ;;  %v2086_v62 = vsel %vm2033_vm3, %v2076_v28, %v2085_v25 }
 0x13f   : > { %6806 = vmatprep.subr.bf16.mxu0 %v9697_v1  ;;  %6709 = vmatpush3.bf16.msra.mxu1 %v7220_v55 }
 0x140   : > { %v8231_v6 = vpop.f32.mrf.mxu0  ;;  %v964_v53 = vpop.f32.mrf.mxu1  ;;  %6710 = vmatprep.subr.bf16.mxu1 %v9697_v1 }
 0x142   : > { %v6255_v49 = vpop.f32.mrf.mxu0  ;;  %v6315_v12 = vpop.f32.mrf.mxu1  ;;  %6807 = vmatpush3.bf16.msra.mxu0 %v7217_v45  ;;  %v7226_v45 = vld [vmem:[%s9692_s1 + $0x180] sm:$0xff]  }
 0x143   : > { %6808 = vmatprep.subr.bf16.mxu0 %v9697_v1  ;;  %6711 = vmatpush3.bf16.msra.mxu1 %v7225_v16  ;;  %v965_v16 = vadd.f32 %v964_v53, %v8020_v38  ;;  %v1673_v49 = vsel %vm1148_vm2, %v1670_v26, %v1672_v36  ;;  %v2090_v12 = vrot.slane %v2088_v43, 1  ;;  %v1674_v26 = vrot.slane %v7201_v0, 1 }
 0x144   : > { %v969_v55 = vpop.f32.mrf.mxu1  ;;  %v1293_v42 = vpop.f32.mrf.mxu0  ;;  %6529 = vmatmul.mubr.bf16.gmra.mxu1 %v1671_v63  ;;  %6625 = vmatmul.mubr.bf16.gmra.mxu0 %v2077_v3  ;;  %v2097_v43 = vshrl.u32 %v7201_v0, 16 }
 0x145   : > { %v8242_v57 = vadd.f32 %v1293_v42, %v962_v27  ;;  %6532 = vmatprep.mubr.msk.bf16.mxu1 %vm7490_vm0, %v9697_v1  ;;  %6628 = vmatprep.mubr.msk.bf16.mxu0 %vm7490_vm0, %v9697_v1 }
 0x146   : > { %v6318_v58 = vpop.f32.mrf.mxu1  ;;  %v6414_v44 = vpop.f32.mrf.mxu0  ;;  %6809 = vmatpush3.bf16.msra.mxu0 %v7221_v14  ;;  %6896 = vmatprep.subr.bf16.mxu1 %v9697_v1  ;;  %v2093_v14 = vrot.slane %v2091_v31, 2  ;;  %v2100_v31 = vshll.u32 %v7201_v0, 16 }
 0x147   : > { %6810 = vmatprep.subr.bf16.mxu0 %v9697_v1  ;;  %v970_v58 = vadd.f32 %v969_v55, %v8025_v46 }
 0x148   : > { %v972_v63 = vpop.f32.mrf.mxu1  ;;  %v1296_v3 = vpop.f32.mrf.mxu0  ;;  %v2094_v28 = vor.u32 %v2093_v14, %v2090_v12 }
 0x149   : > { %v8256_v47 = vadd.f32 %v1296_v3, %v965_v16 }
 0x14a   : > { %v6319_v27 = vpop.f32.mrf.mxu1  ;;  %v6415_v42 = vpop.f32.mrf.mxu0  ;;  %6811 = vmatpush3.bf16.msra.mxu0 %v7226_v45  ;;  %v973_v45 = vadd.f32 %v972_v63, %v8034_v52 }
 0x14b   : > { %6996 = vmatprep.subr.bf16.mxu0 %v9697_v1  ;;  %v2095_v42 = vsel %vm2033_vm3, %v2085_v25, %v2094_v28 }
 0x14c   : > { %v977_v38 = vpop.f32.mrf.mxu1  ;;  %v1301_v53 = vpop.f32.mrf.mxu0  ;;  %6533 = vmatmul.mubr.bf16.gmra.mxu1 %v1673_v49  ;;  %6629 = vmatmul.mubr.bf16.gmra.mxu0 %v2086_v62  ;;  %v1675_v49 = vsel %vm1148_vm2, %v1672_v36, %v1674_v26  ;;  %v7204_v62 = vld [vmem:[%s7555_s29 + $0x48] sm:$0xff]   ;;  %v9701_v36 = vmov 0.0  }
 0x14d   : > { %v8261_v44 = vadd.f32 %v1301_v53, %v970_v58  ;;  %6536 = vmatprep.mubr.msk.bf16.mxu1 %vm7490_vm0, %v9697_v1  ;;  %6632 = vmatprep.mubr.msk.bf16.mxu0 %vm7490_vm0, %v9697_v1  ;;  %v2099_v58 = vrot.slane %v2097_v43, 1  ;;  %v2102_v53 = vrot.slane %v2100_v31, 2  ;;  %v978_v12 = vadd.f32 %v977_v38, %v8039_v56 }
 0x14e   : > { %v6322_v46 = vpop.f32.mrf.mxu1  ;;  %v6418_v55 = vpop.f32.mrf.mxu0  ;;  %v1676_v52 = vrot.slane %v7204_v62, 1  ;;  %v2106_v43 = vshrl.u32 %v7204_v62, 16 }
 0x14f   : > { %9699 = vst [vmem:[#allocation2_spill] sm:$0xff] %v8261_v44  ;;  %v2103_v25 = vor.u32 %v2102_v53, %v2099_v58 }
 0x150   : > { %v980_v16 = vpop.f32.mrf.mxu1  ;;  %v1304_v3 = vpop.f32.mrf.mxu0  ;;  %v1677_v55 = vsel %vm1148_vm2, %v1674_v26, %v1676_v52 }
 0x151   : > { %v8270_v27 = vadd.f32 %v1304_v3, %v973_v45  ;;  %v981_v56 = vadd.f32 %v980_v16, %v8048_v19  ;;  %v7205_v45 = vld [vmem:[%s7555_s29 + $0x50] sm:$0xff]  }
 0x152   : > { %v6323_v44 = vpop.f32.mrf.mxu1  ;;  %v6419_v1 = vpop.f32.mrf.mxu0  ;;  %v1678_v19 = vrot.slane %v7205_v45, 1 }
 0x153   : > { %v2109_v44 = vshll.u32 %v7204_v62, 16 }
 0x154   : > { %v985_v0 = vpop.f32.mrf.mxu1  ;;  %v1309_v14 = vpop.f32.mrf.mxu0  ;;  %6537 = vmatmul.mubr.bf16.gmra.mxu1 %v1675_v49  ;;  %6633 = vmatmul.mubr.bf16.gmra.mxu0 %v2095_v42  ;;  %v2104_v49 = vsel %vm2033_vm3, %v2094_v28, %v2103_v25  ;;  %v2108_v42 = vrot.slane %v2106_v43, 1  ;;  %v2115_v28 = vshrl.u32 %v7205_v45, 16  ;;  %v2118_v43 = vshll.u32 %v7205_v45, 16 }
 0x155   : > { %v8274_v63 = vadd.f32 %v1309_v14, %v978_v12  ;;  %6540 = vmatprep.mubr.msk.bf16.mxu1 %vm7490_vm0, %v9701_v36  ;;  %6636 = vmatprep.mubr.msk.bf16.mxu0 %vm7490_vm0, %v9701_v36  ;;  %v2111_v12 = vrot.slane %v2109_v44, 2  ;;  %v986_v58 = vadd.f32 %v985_v0, %v8053_v37 }
 0x156   : > { %v6326_v1 = vpop.f32.mrf.mxu1  ;;  %v6422_v31 = vpop.f32.mrf.mxu0 }
 0x157   : > { %9700 = vst [vmem:[#allocation3_spill] sm:$0xff] %v8274_v63  ;;  %v2112_v26 = vor.u32 %v2111_v12, %v2108_v42  ;;  %v1679_v31 = vsel %vm1148_vm2, %v1676_v52, %v1678_v19 }
 0x158   : > { %v988_v38 = vpop.f32.mrf.mxu1  ;;  %v1312_v46 = vpop.f32.mrf.mxu0 }
 0x159   : > { %v8283_v3 = vadd.f32 %v1312_v46, %v981_v56  ;;  %v989_v37 = vadd.f32 %v988_v38, %v8062_v9  ;;  %v7207_v56 = vld [vmem:[%s7555_s29 + $0x58] sm:$0xff]  }
 0x15a   : > { %v6327_v14 = vpop.f32.mrf.mxu1  ;;  %v6423_v63 = vpop.f32.mrf.mxu0  ;;  %v1680_v9 = vrot.slane %v7207_v56, 1 }
 0x15b   : > { %v2120_v14 = vrot.slane %v2118_v43, 2 }
 0x15c   : > { %v993_v62 = vpop.f32.mrf.mxu1  ;;  %v1317_v53 = vpop.f32.mrf.mxu0  ;;  %6541 = vmatmul.mubr.bf16.gmra.mxu1 %v1677_v55  ;;  %6637 = vmatmul.mubr.bf16.gmra.mxu0 %v2104_v49  ;;  %v2113_v55 = vsel %vm2033_vm3, %v2103_v25, %v2112_v26  ;;  %v2117_v49 = vrot.slane %v2115_v28, 1  ;;  %v2124_v25 = vshrl.u32 %v7207_v56, 16  ;;  %v2127_v28 = vshll.u32 %v7207_v56, 16 }
 0x15d   : > { %v8287_v16 = vadd.f32 %v1317_v53, %v986_v58  ;;  %6544 = vmatprep.mubr.msk.bf16.mxu1 %vm7490_vm0, %v9701_v36  ;;  %6640 = vmatprep.mubr.msk.bf16.mxu0 %vm7490_vm0, %v9701_v36  ;;  %v994_v42 = vadd.f32 %v993_v62, %v8067_v13 }
 0x15e   : > { %v6330_v63 = vpop.f32.mrf.mxu1  ;;  %v6426_v44 = vpop.f32.mrf.mxu0  ;;  %v2121_v52 = vor.u32 %v2120_v14, %v2117_v49 }
 0x160   : > { %v996_v0 = vpop.f32.mrf.mxu1  ;;  %v1320_v1 = vpop.f32.mrf.mxu0 }
 0x161   : > { %v8296_v46 = vadd.f32 %v1320_v1, %v989_v37  ;;  %v997_v13 = vadd.f32 %v996_v0, %v8076_v8  ;;  %v1681_v37 = vsel %vm1148_vm2, %v1678_v19, %v1680_v9  ;;  %v7209_v1 = vld [vmem:[%s7555_s29 + $0x60] sm:$0xff]  }
 0x162   : > { %v6331_v58 = vpop.f32.mrf.mxu1  ;;  %v6427_v53 = vpop.f32.mrf.mxu0  ;;  %v1682_v8 = vrot.slane %v7209_v1, 1 }
 0x163   : > { %v2126_v58 = vrot.slane %v2124_v25, 1  ;;  %v2129_v53 = vrot.slane %v2127_v28, 2  ;;  %v2136_v25 = vshll.u32 %v7209_v1, 16 }
 0x164   : > { %v1001_v45 = vpop.f32.mrf.mxu1  ;;  %v1325_v12 = vpop.f32.mrf.mxu0  ;;  %6545 = vmatmul.mubr.bf16.gmra.mxu1 %v1679_v31  ;;  %6641 = vmatmul.mubr.bf16.gmra.mxu0 %v2113_v55  ;;  %v2122_v55 = vsel %vm2033_vm3, %v2112_v26, %v2121_v52  ;;  %v2133_v26 = vshrl.u32 %v7209_v1, 16 }
 0x165   : > { %v8300_v38 = vadd.f32 %v1325_v12, %v994_v42  ;;  %6548 = vmatprep.mubr.msk.bf16.mxu1 %vm7490_vm0, %v9701_v36  ;;  %6644 = vmatprep.mubr.msk.bf16.mxu0 %vm7490_vm0, %v9701_v36  ;;  %v1002_v49 = vadd.f32 %v1001_v45, %v8081_v21  ;;  %v2130_v19 = vor.u32 %v2129_v53, %v2126_v58 }
 0x166   : > { %v6334_v43 = vpop.f32.mrf.mxu1  ;;  %v6430_v63 = vpop.f32.mrf.mxu0 }
 0x168   : > { %v1004_v62 = vpop.f32.mrf.mxu1  ;;  %v1328_v44 = vpop.f32.mrf.mxu0 }
 0x169   : > { %v8309_v31 = vadd.f32 %v1328_v44, %v997_v13  ;;  %v1005_v21 = vadd.f32 %v1004_v62, %v8093_v33  ;;  %v1683_v13 = vsel %vm1148_vm2, %v1680_v9, %v1682_v8  ;;  %v7210_v44 = vld [vmem:[%s7555_s29 + $0x68] sm:$0xff]  }
 0x16a   : > { %v6335_v42 = vpop.f32.mrf.mxu1  ;;  %v6431_v12 = vpop.f32.mrf.mxu0  ;;  %v1684_v33 = vrot.slane %v7210_v44, 1 }
 0x16b   : > { %v2135_v42 = vrot.slane %v2133_v26, 1  ;;  %v2138_v12 = vrot.slane %v2136_v25, 2  ;;  %v2145_v26 = vshll.u32 %v7210_v44, 16 }
 0x16c   : > { %v1009_v56 = vpop.f32.mrf.mxu1  ;;  %v1333_v14 = vpop.f32.mrf.mxu0  ;;  %6549 = vmatmul.mubr.bf16.gmra.mxu1 %v1681_v37  ;;  %6645 = vmatmul.mubr.bf16.gmra.mxu0 %v2122_v55  ;;  %v2131_v55 = vsel %vm2033_vm3, %v2121_v52, %v2130_v19  ;;  %v2142_v52 = vshrl.u32 %v7210_v44, 16 }
 0x16d   : > { %v8313_v0 = vadd.f32 %v1333_v14, %v1002_v49  ;;  %6552 = vmatprep.mubr.msk.bf16.mxu1 %vm7490_vm0, %v9701_v36  ;;  %6648 = vmatprep.mubr.msk.bf16.mxu0 %vm7490_vm0, %v9701_v36  ;;  %v1010_v58 = vadd.f32 %v1009_v56, %v8100_v50  ;;  %v2139_v9 = vor.u32 %v2138_v12, %v2135_v42 }
 0x16e   : > { %v6338_v28 = vpop.f32.mrf.mxu1  ;;  %v6434_v43 = vpop.f32.mrf.mxu0 }
 0x170   : > { %v1012_v45 = vpop.f32.mrf.mxu1  ;;  %v1336_v63 = vpop.f32.mrf.mxu0 }
 0x171   : > { %v8322_v37 = vadd.f32 %v1336_v63, %v1005_v21  ;;  %v1013_v50 = vadd.f32 %v1012_v45, %v8108_v60  ;;  %v1685_v21 = vsel %vm1148_vm2, %v1682_v8, %v1684_v33  ;;  %v7213_v63 = vld [vmem:[%s7555_s29 + $0x70] sm:$0xff]  }
 0x172   : > { %v6339_v49 = vpop.f32.mrf.mxu1  ;;  %v6435_v14 = vpop.f32.mrf.mxu0  ;;  %v1686_v60 = vrot.slane %v7213_v63, 1 }
 0x173   : > { %v2144_v49 = vrot.slane %v2142_v52, 1  ;;  %v2147_v14 = vrot.slane %v2145_v26, 2  ;;  %v2154_v52 = vshll.u32 %v7213_v63, 16 }
 0x174   : > { %v1017_v1 = vpop.f32.mrf.mxu1  ;;  %v1341_v53 = vpop.f32.mrf.mxu0  ;;  %6553 = vmatmul.mubr.bf16.gmra.mxu1 %v1683_v13  ;;  %6649 = vmatmul.mubr.bf16.gmra.mxu0 %v2131_v55  ;;  %v2140_v55 = vsel %vm2033_vm3, %v2130_v19, %v2139_v9  ;;  %v2151_v19 = vshrl.u32 %v7213_v63, 16 }
 0x175   : > { %v8326_v62 = vadd.f32 %v1341_v53, %v1010_v58  ;;  %6556 = vmatprep.mubr.msk.bf16.mxu1 %vm7490_vm0, %v9701_v36  ;;  %6652 = vmatprep.mubr.msk.bf16.mxu0 %vm7490_vm0, %v9701_v36  ;;  %v1018_v42 = vadd.f32 %v1017_v1, %v8117_v2  ;;  %v2148_v8 = vor.u32 %v2147_v14, %v2144_v49 }
 0x176   : > { %v6342_v25 = vpop.f32.mrf.mxu1  ;;  %v6438_v28 = vpop.f32.mrf.mxu0 }
 0x178   : > { %v1020_v56 = vpop.f32.mrf.mxu1  ;;  %v1344_v43 = vpop.f32.mrf.mxu0 }
 0x179   : > { %v8335_v13 = vadd.f32 %v1344_v43, %v1013_v50  ;;  %v1021_v2 = vadd.f32 %v1020_v56, %v8129_v29  ;;  %v1687_v50 = vsel %vm1148_vm2, %v1684_v33, %v1686_v60  ;;  %v7214_v43 = vld [vmem:[%s7555_s29 + $0x78] sm:$0xff]  }
 0x17a   : > { %v6343_v58 = vpop.f32.mrf.mxu1  ;;  %v6439_v53 = vpop.f32.mrf.mxu0  ;;  %v1688_v29 = vrot.slane %v7214_v43, 1 }
 0x17b   : > { %v2153_v58 = vrot.slane %v2151_v19, 1  ;;  %v2156_v53 = vrot.slane %v2154_v52, 2  ;;  %v2163_v19 = vshll.u32 %v7214_v43, 16 }
 0x17c   : > { %v1025_v44 = vpop.f32.mrf.mxu1  ;;  %v1349_v12 = vpop.f32.mrf.mxu0  ;;  %6557 = vmatmul.mubr.bf16.gmra.mxu1 %v1685_v21  ;;  %6653 = vmatmul.mubr.bf16.gmra.mxu0 %v2140_v55  ;;  %v2149_v55 = vsel %vm2033_vm3, %v2139_v9, %v2148_v8  ;;  %v2160_v9 = vshrl.u32 %v7214_v43, 16 }
 0x17d   : > { %v8339_v45 = vadd.f32 %v1349_v12, %v1018_v42  ;;  %6560 = vmatprep.mubr.msk.bf16.mxu1 %vm7490_vm0, %v9701_v36  ;;  %6656 = vmatprep.mubr.msk.bf16.mxu0 %vm7490_vm0, %v9701_v36  ;;  %v1026_v49 = vadd.f32 %v1025_v44, %v8145_v40  ;;  %v2157_v33 = vor.u32 %v2156_v53, %v2153_v58 }
 0x17e   : > { %v6346_v26 = vpop.f32.mrf.mxu1  ;;  %v6442_v25 = vpop.f32.mrf.mxu0 }
 0x180   : > { %v1028_v1 = vpop.f32.mrf.mxu1  ;;  %v1352_v28 = vpop.f32.mrf.mxu0 }
 0x181   : > { %v8348_v21 = vadd.f32 %v1352_v28, %v1021_v2  ;;  %v1029_v40 = vadd.f32 %v1028_v1, %v8163_v5  ;;  %v1689_v2 = vsel %vm1148_vm2, %v1686_v60, %v1688_v29  ;;  %v7215_v28 = vld [vmem:[%s7555_s29 + $0x80] sm:$0xff]  }
 0x182   : > { %v6347_v42 = vpop.f32.mrf.mxu1  ;;  %v6443_v12 = vpop.f32.mrf.mxu0  ;;  %v1690_v5 = vrot.slane %v7215_v28, 1 }
 0x183   : > { %v2162_v42 = vrot.slane %v2160_v9, 1  ;;  %v2165_v12 = vrot.slane %v2163_v19, 2  ;;  %v2172_v9 = vshll.u32 %v7215_v28, 16 }
 0x184   : > { %v1033_v63 = vpop.f32.mrf.mxu1  ;;  %v1357_v14 = vpop.f32.mrf.mxu0  ;;  %6561 = vmatmul.mubr.bf16.gmra.mxu1 %v1687_v50  ;;  %6657 = vmatmul.mubr.bf16.gmra.mxu0 %v2149_v55  ;;  %v2158_v55 = vsel %vm2033_vm3, %v2148_v8, %v2157_v33  ;;  %v2169_v8 = vshrl.u32 %v7215_v28, 16 }
 0x185   : > { %v8352_v56 = vadd.f32 %v1357_v14, %v1026_v49  ;;  %6564 = vmatprep.mubr.msk.bf16.mxu1 %vm7490_vm0, %v9701_v36  ;;  %6660 = vmatprep.mubr.msk.bf16.mxu0 %vm7490_vm0, %v9701_v36  ;;  %v1034_v58 = vadd.f32 %v1033_v63, %v8180_v35  ;;  %v2166_v60 = vor.u32 %v2165_v12, %v2162_v42 }
 0x186   : > { %v6350_v52 = vpop.f32.mrf.mxu1  ;;  %v6446_v26 = vpop.f32.mrf.mxu0 }
 0x188   : > { %v1036_v44 = vpop.f32.mrf.mxu1  ;;  %v1360_v25 = vpop.f32.mrf.mxu0 }
 0x189   : > { %v8361_v50 = vadd.f32 %v1360_v25, %v1029_v40  ;;  %v1037_v35 = vadd.f32 %v1036_v44, %v8199_v59  ;;  %v1691_v40 = vsel %vm1148_vm2, %v1688_v29, %v1690_v5  ;;  %v7218_v25 = vld [vmem:[%s7555_s29 + $0x88] sm:$0xff]  }
 0x18a   : > { %v6351_v49 = vpop.f32.mrf.mxu1  ;;  %v6447_v14 = vpop.f32.mrf.mxu0  ;;  %v1692_v59 = vrot.slane %v7218_v25, 1 }
 0x18b   : > { %v2171_v49 = vrot.slane %v2169_v8, 1  ;;  %v2174_v14 = vrot.slane %v2172_v9, 2  ;;  %v2181_v8 = vshll.u32 %v7218_v25, 16 }
 0x18c   : > { %v1041_v43 = vpop.f32.mrf.mxu1  ;;  %v1365_v53 = vpop.f32.mrf.mxu0  ;;  %6565 = vmatmul.mubr.bf16.gmra.mxu1 %v1689_v2  ;;  %6661 = vmatmul.mubr.bf16.gmra.mxu0 %v2158_v55  ;;  %v2167_v55 = vsel %vm2033_vm3, %v2157_v33, %v2166_v60  ;;  %v2178_v33 = vshrl.u32 %v7218_v25, 16 }
 0x18d   : > { %v8365_v1 = vadd.f32 %v1365_v53, %v1034_v58  ;;  %6568 = vmatprep.mubr.msk.bf16.mxu1 %vm7490_vm0, %v9701_v36  ;;  %6664 = vmatprep.mubr.msk.bf16.mxu0 %vm7490_vm0, %v9701_v36  ;;  %v1042_v42 = vadd.f32 %v1041_v43, %v8214_v20  ;;  %v2175_v29 = vor.u32 %v2174_v14, %v2171_v49 }
 0x18e   : > { %v6354_v19 = vpop.f32.mrf.mxu1  ;;  %v6450_v52 = vpop.f32.mrf.mxu0 }
 0x190   : > { %v1044_v63 = vpop.f32.mrf.mxu1  ;;  %v1368_v26 = vpop.f32.mrf.mxu0 }
 0x191   : > { %v8374_v2 = vadd.f32 %v1368_v26, %v1037_v35  ;;  %v1045_v20 = vadd.f32 %v1044_v63, %v8231_v6  ;;  %v1693_v35 = vsel %vm1148_vm2, %v1690_v5, %v1692_v59  ;;  %v7219_v26 = vld [vmem:[%s7555_s29 + $0x90] sm:$0xff]  }
 0x192   : > { %v6355_v58 = vpop.f32.mrf.mxu1  ;;  %v6451_v53 = vpop.f32.mrf.mxu0  ;;  %v1694_v6 = vrot.slane %v7219_v26, 1 }
 0x193   : > { %v2180_v58 = vrot.slane %v2178_v33, 1  ;;  %v2183_v53 = vrot.slane %v2181_v8, 2  ;;  %v2190_v33 = vshll.u32 %v7219_v26, 16 }
 0x194   : > { %v1049_v28 = vpop.f32.mrf.mxu1  ;;  %v1373_v12 = vpop.f32.mrf.mxu0  ;;  %6569 = vmatmul.mubr.bf16.gmra.mxu1 %v1691_v40  ;;  %6665 = vmatmul.mubr.bf16.gmra.mxu0 %v2167_v55  ;;  %v2176_v55 = vsel %vm2033_vm3, %v2166_v60, %v2175_v29  ;;  %v2187_v60 = vshrl.u32 %v7219_v26, 16 }
 0x195   : > { %v8378_v44 = vadd.f32 %v1373_v12, %v1042_v42  ;;  %6572 = vmatprep.mubr.msk.bf16.mxu1 %vm7490_vm0, %v9701_v36  ;;  %6668 = vmatprep.mubr.msk.bf16.mxu0 %vm7490_vm0, %v9701_v36  ;;  %v1050_v49 = vadd.f32 %v1049_v28, %v8013_v32  ;;  %v2184_v5 = vor.u32 %v2183_v53, %v2180_v58 }
 0x196   : > { %v6358_v9 = vpop.f32.mrf.mxu1  ;;  %v6454_v19 = vpop.f32.mrf.mxu0 }
 0x198   : > { %v1052_v43 = vpop.f32.mrf.mxu1  ;;  %v1376_v52 = vpop.f32.mrf.mxu0 }
 0x199   : > { %v8387_v40 = vadd.f32 %v1376_v52, %v1045_v20  ;;  %v1053_v32 = vadd.f32 %v1052_v43, %v8022_v39  ;;  %v1695_v20 = vsel %vm1148_vm2, %v1692_v59, %v1694_v6  ;;  %v7222_v52 = vld [vmem:[%s7555_s29 + $0x98] sm:$0xff]  }
 0x19a   : > { %v6359_v42 = vpop.f32.mrf.mxu1  ;;  %v6455_v12 = vpop.f32.mrf.mxu0  ;;  %v1696_v39 = vrot.slane %v7222_v52, 1 }
 0x19b   : > { %v2189_v42 = vrot.slane %v2187_v60, 1  ;;  %v2192_v12 = vrot.slane %v2190_v33, 2  ;;  %v2199_v60 = vshll.u32 %v7222_v52, 16 }
 0x19c   : > { %v1057_v25 = vpop.f32.mrf.mxu1  ;;  %v1381_v14 = vpop.f32.mrf.mxu0  ;;  %6573 = vmatmul.mubr.bf16.gmra.mxu1 %v1693_v35  ;;  %6669 = vmatmul.mubr.bf16.gmra.mxu0 %v2176_v55  ;;  %v2185_v55 = vsel %vm2033_vm3, %v2175_v29, %v2184_v5  ;;  %v2196_v29 = vshrl.u32 %v7222_v52, 16 }
 0x19d   : > { %v8391_v63 = vadd.f32 %v1381_v14, %v1050_v49  ;;  %6576 = vmatprep.mubr.msk.bf16.mxu1 %vm7490_vm0, %v9701_v36  ;;  %6672 = vmatprep.mubr.msk.bf16.mxu0 %vm7490_vm0, %v9701_v36  ;;  %v1058_v58 = vadd.f32 %v1057_v25, %v8027_v48  ;;  %v2193_v59 = vor.u32 %v2192_v12, %v2189_v42 }
 0x19e   : > { %v6362_v8 = vpop.f32.mrf.mxu1  ;;  %v6458_v9 = vpop.f32.mrf.mxu0 }
 0x1a0   : > { %v1060_v28 = vpop.f32.mrf.mxu1  ;;  %v1384_v19 = vpop.f32.mrf.mxu0 }
 0x1a1   : > { %v8400_v35 = vadd.f32 %v1384_v19, %v1053_v32  ;;  %v1061_v48 = vadd.f32 %v1060_v28, %v8036_v7  ;;  %v1697_v32 = vsel %vm1148_vm2, %v1694_v6, %v1696_v39  ;;  %v8413_v19 = vld [vmem:[%s7555_s29 + $0xa0] sm:$0xff]  }
 0x1a2   : > { %v6363_v49 = vpop.f32.mrf.mxu1  ;;  %v6459_v14 = vpop.f32.mrf.mxu0  ;;  %v1698_v7 = vrot.slane %v8413_v19, 1  ;;  %v2205_v28 = vshrl.u32 %v8413_v19, 16 }
 0x1a3   : > { %v2198_v49 = vrot.slane %v2196_v29, 1  ;;  %v2201_v14 = vrot.slane %v2199_v60, 2 }
 0x1a4   : > { %v1065_v26 = vpop.f32.mrf.mxu1  ;;  %v1389_v53 = vpop.f32.mrf.mxu0  ;;  %6577 = vmatmul.mubr.bf16.gmra.mxu1 %v1695_v20  ;;  %6673 = vmatmul.mubr.bf16.gmra.mxu0 %v2185_v55  ;;  %v2194_v55 = vsel %vm2033_vm3, %v2184_v5, %v2193_v59 }
 0x1a5   : > { %v8404_v43 = vadd.f32 %v1389_v53, %v1058_v58  ;;  %6580 = vmatprep.mubr.msk.bf16.mxu1 %vm7490_vm0, %v9701_v36  ;;  %6676 = vmatprep.mubr.msk.bf16.mxu0 %vm7490_vm0, %v9701_v36  ;;  %v1066_v52 = vadd.f32 %v1065_v26, %v8041_v11  ;;  %v2202_v5 = vor.u32 %v2201_v14, %v2198_v49  ;;  %v2208_v11 = vshll.u32 %v8413_v19, 16  ;;  %v8435_v49 = vld [vmem:[%s7555_s29 + $0xa8] ss:$0 sps:$4 sm:$0xff]  }
 0x1a6   : > { %v6366_v33 = vpop.f32.mrf.mxu1  ;;  %v6462_v8 = vpop.f32.mrf.mxu0 }
 0x1a8   : > { %v1068_v25 = vpop.f32.mrf.mxu1  ;;  %v1392_v9 = vpop.f32.mrf.mxu0 }
 0x1a9   : > { %v8415_v20 = vadd.f32 %v1392_v9, %v1061_v48  ;;  %v1069_v60 = vadd.f32 %v1068_v25, %v8050_v61  ;;  %v1699_v48 = vsel %vm1148_vm2, %v1696_v39, %v1698_v7  ;;  %v7224_v9 = vld [vmem:[%s7555_s29 + $0xa8] ss:$0 sps:$4 sm:$0x77]  }
 0x1aa   : > { %v6367_v58 = vpop.f32.mrf.mxu1  ;;  %v6463_v42 = vpop.f32.mrf.mxu0  ;;  %v1700_v61 = vrot.slane %v7224_v9, 1 }
 0x1ab   : > { %v2207_v58 = vrot.slane %v2205_v28, 1  ;;  %v2210_v42 = vrot.slane %v2208_v11, 2  ;;  %v2217_v28 = vshll.u32 %v8435_v49, 16 }
 0x1ac   : > { %v1073_v12 = vpop.f32.mrf.mxu1  ;;  %v1397_v53 = vpop.f32.mrf.mxu0  ;;  %6581 = vmatmul.mubr.bf16.gmra.mxu1 %v1697_v32  ;;  %6677 = vmatmul.mubr.bf16.gmra.mxu0 %v2194_v55  ;;  %v2203_v55 = vsel %vm2033_vm3, %v2193_v59, %v2202_v5  ;;  %v2214_v59 = vshrl.u32 %v8435_v49, 16 }
 0x1ad   : > { %v8420_v6 = vadd.f32 %v1397_v53, %v1066_v52  ;;  %6584 = vmatprep.mubr.msk.bf16.mxu1 %vm7490_vm0, %v9701_v36  ;;  %6680 = vmatprep.mubr.msk.bf16.mxu0 %vm7490_vm0, %v9701_v36  ;;  %v1074_v53 = vadd.f32 %v1073_v12, %v8055_v4  ;;  %v2211_v39 = vor.u32 %v2210_v42, %v2207_v58 }
 0x1ae   : > { %v6370_v26 = vpop.f32.mrf.mxu1  ;;  %v6466_v29 = vpop.f32.mrf.mxu0 }
 0x1b0   : > { %v1076_v33 = vpop.f32.mrf.mxu1  ;;  %v1400_v8 = vpop.f32.mrf.mxu0 }
 0x1b1   : > { %v8431_v32 = vadd.f32 %v1400_v8, %v1069_v60  ;;  %v1077_v12 = vadd.f32 %v1076_v33, %v8064_v10 }
 0x1b2   : > { %v6371_v14 = vpop.f32.mrf.mxu1  ;;  %v6467_v52 = vpop.f32.mrf.mxu0 }
 0x1b3   : > { %v2216_v14 = vrot.slane %v2214_v59, 1  ;;  %v2219_v52 = vrot.slane %v2217_v28, 2  ;;  %v2532_v59 = vld [vmem:[%s7555_s29 + $0x8] sm:$0xc] }
 0x1b4   : > { %v1081_v26 = vpop.f32.mrf.mxu1  ;;  %v1405_v29 = vpop.f32.mrf.mxu0  ;;  %6585 = vmatmul.mubr.bf16.gmra.mxu1 %v1699_v48  ;;  %6681 = vmatmul.mubr.bf16.gmra.mxu0 %v2203_v55  ;;  %v1701_v48 = vsel %vm1148_vm2, %v1698_v7, %v1700_v61  ;;  %v2212_v55 = vsel %vm2033_vm3, %v2202_v5, %v2211_v39 }
 0x1b5   : > { %v8438_v25 = vadd.f32 %v1405_v29, %v1074_v53  ;;  %6588 = vmatprep.mubr.msk.bf16.mxu1 %vm7490_vm0, %v9701_v36  ;;  %6684 = vmatprep.mubr.msk.bf16.mxu0 %vm7490_vm0, %v9701_v36  ;;  %v1082_v53 = vadd.f32 %v1081_v26, %v8069_v22  ;;  %v2220_v7 = vor.u32 %v2219_v52, %v2216_v14 }
 0x1b6   : > { %v6374_v11 = vpop.f32.mrf.mxu1  ;;  %v6470_v4 = vpop.f32.mrf.mxu0 }
 0x1b8   : > { %v1084_v60 = vpop.f32.mrf.mxu1  ;;  %v1408_v8 = vpop.f32.mrf.mxu0 }
 0x1b9   : > { %v8448_v9 = vadd.f32 %v1408_v8, %v1077_v12  ;;  %v1085_v28 = vadd.f32 %v1084_v60, %v8078_v17  ;;  %v2221_v12 = vsel %vm2033_vm3, %v2211_v39, %v2220_v7  ;;  %v7460_v8 = vld [vmem:[%s7555_s29 + $0xc] sm:$0xf]  ;;  %v7461_v60 = vld [vmem:[%s7555_s29 + $0x10] sm:$0xff]  }
 0x1ba   : > { %v6375_v58 = vpop.f32.mrf.mxu1  ;;  %v6471_v42 = vpop.f32.mrf.mxu0  ;;  %v2555_v52 = vrot.slane %v7461_v60, 2 }
 0x1bc   : > { %v1089_v29 = vpop.f32.mrf.mxu1  ;;  %v1413_v11 = vpop.f32.mrf.mxu0  ;;  %6589 = vmatmul.mubr.bf16.gmra.mxu1 %v1701_v48  ;;  %6685 = vmatmul.mubr.bf16.gmra.mxu0 %v2212_v55  ;;  %v5565_v48 = vcombine.low %v2532_v59, %v7460_v8 }
 0x1bd   : > { %v8452_v10 = vadd.f32 %v1413_v11, %v1082_v53  ;;  %6592 = vmatprep.mubr.msk.bf16.mxu1 %vm7490_vm0, %v9701_v36  ;;  %6688 = vmatprep.mubr.msk.bf16.mxu0 %vm7490_vm0, %v9701_v36  ;;  %v1090_v42 = vadd.f32 %v1089_v29, %v8083_v23 }
 0x1be   : > { %v6378_v5 = vpop.f32.mrf.mxu1  ;;  %v6474_v33 = vpop.f32.mrf.mxu0  ;;  %v2554_v39 = vrot.slane %v5565_v48, 2  ;;  %v7229_v48 = vld [vmem:[%s9692_s1 + $0x1f8] sm:$0xff]  }
 0x1c0   : > { %v1092_v22 = vpop.f32.mrf.mxu1  ;;  %v1416_v26 = vpop.f32.mrf.mxu0  ;;  %v2556_v59 = vsel %vm2553_vm4, %v2554_v39, %v2555_v52 }
 0x1c1   : > { %v8460_v4 = vadd.f32 %v1416_v26, %v1085_v28  ;;  %v1093_v23 = vadd.f32 %v1092_v22, %v8095_v34  ;;  %v7230_v28 = vld [vmem:[%s7555_s29 + $0x10] sm:$0xfc]   ;;  %v7231_v26 = vld [vmem:[%s7555_s29 + $0x18] sm:$0xff]  }
 0x1c2   : > { %v6379_v55 = vpop.f32.mrf.mxu1  ;;  %v6475_v58 = vpop.f32.mrf.mxu0  ;;  %v7462_v22 = vld [vmem:[%s7555_s29 + $0x18] sm:$0xff]   ;;  %v3066_v39 = vrot.slane %v7230_v28, 2  ;;  %v3067_v60 = vrot.slane %v7231_v26, 2 }
 0x1c3   : > { %v7232_v26 = vld [vmem:[%s9692_s1 + $0x238] sm:$0xff]  }
 0x1c4   : > { %v1097_v53 = vpop.f32.mrf.mxu1  ;;  %v1421_v14 = vpop.f32.mrf.mxu0  ;;  %6593 = vmatmul.mubr.bf16.gmra.mxu1 %v1700_v61  ;;  %6689 = vmatmul.mubr.bf16.gmra.mxu0 %v2221_v12  ;;  %v3068_v28 = vsel %vm2553_vm4, %v3066_v39, %v3067_v60 }
 0x1c5   : > { %v8465_v17 = vadd.f32 %v1421_v14, %v1090_v42  ;;  %6692 = vmatprep.mubr.msk.bf16.mxu0 %vm7490_vm0, %v9701_v36  ;;  %6712 = vmatprep.mubr.msk.bf16.mxu1 %vm7490_vm0, %v9701_v36  ;;  %v1098_v55 = vadd.f32 %v1097_v53, %v8102_v51  ;;  %v2557_v14 = vrot.slane %v7462_v22, 2  ;;  %v7235_v51 = vld [vmem:[%s9692_s1 + $0x1f0] sm:$0xff]   ;;  %v7463_v22 = vld [vmem:[%s7555_s29 + $0x20] sm:$0xff]  }
 0x1c6   : > { %v6382_v11 = vpop.f32.mrf.mxu1  ;;  %v6478_v5 = vpop.f32.mrf.mxu0  ;;  %v2559_v39 = vrot.slane %v7463_v22, 2  ;;  %v7464_v22 = vld [vmem:[%s7555_s29 + $0x28] sm:$0xff]  }
 0x1c8   : > { %v1100_v61 = vpop.f32.mrf.mxu1  ;;  %v1424_v29 = vpop.f32.mrf.mxu0 }
 0x1c9   : > { %v8473_v33 = vadd.f32 %v1424_v29, %v1093_v23 }
 0x1ca   : > { %v6383_v12 = vpop.f32.mrf.mxu1  ;;  %v6479_v8 = vpop.f32.mrf.mxu0 }
 0x1cb   : > { %v8502_v12 = vld [vmem:[%s7555_s29 + $0x20] sm:$0xff]  }
 0x1cc   : > { %v1105_v58 = vpop.f32.mrf.mxu1  ;;  %v1429_v42 = vpop.f32.mrf.mxu0  ;;  %6693 = vmatmul.mubr.bf16.gmra.mxu0 %v2220_v7  ;;  %6713 = vmatmul.mubr.bf16.vlgmr.msra.gmra.mxu1 %v2556_v59  ;;  %v1101_v7 = vadd.f32 %v1100_v61, %v8110_v24  ;;  %v2558_v59 = vsel %vm2553_vm4, %v2555_v52, %v2557_v14  ;;  %v7240_v52 = vld [vmem:[%s9692_s1 + $0x1e8] sm:$0xff]  }
 0x1cd   : > { %v8482_v34 = vadd.f32 %v1429_v42, %v1098_v55  ;;  %6716 = vmatprep.mubr.msk.bf16.mxu1 %vm7490_vm0, %v9701_v36  ;;  %6812 = vmatprep.mubr.msk.bf16.mxu0 %vm7490_vm0, %v9701_v36  ;;  %v1106_v24 = vadd.f32 %v1105_v58, %v8119_v15  ;;  %v3069_v15 = vrot.slane %v8502_v12, 2  ;;  %v7236_v58 = vld [vmem:[%s9692_s1 + $0x230] sm:$0xff]  }
 0x1ce   : > { %v6386_v11 = vpop.f32.mrf.mxu1  ;;  %v6482_v5 = vpop.f32.mrf.mxu0  ;;  %6897 = vmatpush3.bf16.msra.mxu1 %v7229_v48 }
 0x1cf   : > { %6898 = vmatprep.subr.bf16.mxu1 %v9701_v36  ;;  %v3070_v12 = vsel %vm2553_vm4, %v3067_v60, %v3069_v15 }
 0x1d0   : > { %v1108_v53 = vpop.f32.mrf.mxu1  ;;  %v1432_v23 = vpop.f32.mrf.mxu0 }
 0x1d1   : > { %v8494_v29 = vadd.f32 %v1432_v23, %v1101_v7  ;;  %v7244_v7 = vld [vmem:[%s9692_s1 + $0x1e0] sm:$0xff]  }
 0x1d2   : > { %v6387_v8 = vpop.f32.mrf.mxu1  ;;  %v6483_v48 = vpop.f32.mrf.mxu0  ;;  %6899 = vmatpush3.bf16.msra.mxu1 %v7235_v51  ;;  %v1109_v51 = vadd.f32 %v1108_v53, %v8131_v30 }
 0x1d3   : > { %6900 = vmatprep.subr.bf16.mxu1 %v9701_v36  ;;  %v8531_v8 = vld [vmem:[%s7555_s29 + $0x28] sm:$0xff]  }
 0x1d4   : > { %v1113_v61 = vpop.f32.mrf.mxu1  ;;  %v1437_v55 = vpop.f32.mrf.mxu0  ;;  %6717 = vmatmul.mubr.bf16.gmra.mxu1 %v2558_v59  ;;  %6813 = vmatmul.mubr.bf16.vlgmr.msra.gmra.mxu0 %v3068_v28  ;;  %v7241_v48 = vld [vmem:[%s9692_s1 + $0x228] sm:$0xff]  }
 0x1d5   : > { %v8509_v42 = vadd.f32 %v1437_v55, %v1106_v24  ;;  %6997 = vmatpush3.bf16.msra.mxu0 %v7232_v26  ;;  %6720 = vmatprep.mubr.msk.bf16.mxu1 %vm7490_vm0, %v9701_v36  ;;  %v2560_v26 = vsel %vm2553_vm4, %v2557_v14, %v2559_v39  ;;  %v1114_v24 = vadd.f32 %v1113_v61, %v8147_v54  ;;  %v7249_v14 = vld [vmem:[%s9692_s1 + $0x1d8] sm:$0xff]   ;;  %v3071_v54 = vrot.slane %v8531_v8, 2 }
 0x1d6   : > { %v6390_v11 = vpop.f32.mrf.mxu1  ;;  %v6486_v5 = vpop.f32.mrf.mxu0  ;;  %6816 = vmatprep.mubr.msk.bf16.mxu0 %vm7490_vm0, %v9701_v36  ;;  %6998 = vmatprep.subr.bf16.mxu0 %v9701_v36 }
 0x1d7   : > { %6901 = vmatpush3.bf16.msra.mxu1 %v7240_v52  ;;  %v7246_v5 = vld [vmem:[%s9692_s1 + $0x220] sm:$0xff]  }
 0x1d8   : > { %v1116_v23 = vpop.f32.mrf.mxu1  ;;  %v1440_v59 = vpop.f32.mrf.mxu0  ;;  %6902 = vmatprep.subr.bf16.mxu1 %v9701_v36 }
 0x1d9   : > { %v8526_v28 = vadd.f32 %v1440_v59, %v1109_v51  ;;  %6999 = vmatpush3.bf16.msra.mxu0 %v7236_v58  ;;  %v2561_v58 = vrot.slane %v7464_v22, 2  ;;  %v1117_v51 = vadd.f32 %v1116_v23, %v8165_v41 }
 0x1da   : > { %v6391_v30 = vpop.f32.mrf.mxu1  ;;  %v6487_v53 = vpop.f32.mrf.mxu0  ;;  %7000 = vmatprep.subr.bf16.mxu0 %v9701_v36 }
 0x1db   : > { %6903 = vmatpush3.bf16.msra.mxu1 %v7244_v7  ;;  %v7254_v7 = vld [vmem:[%s9692_s1 + $0x1d0] sm:$0xff]   ;;  %v2562_v8 = vsel %vm2553_vm4, %v2559_v39, %v2561_v58  ;;  %v3072_v30 = vsel %vm2553_vm4, %v3069_v15, %v3071_v54  ;;  %v7258_v39 = vld [vmem:[%s9692_s1 + $0x1c8] sm:$0xff]  }
 0x1dc   : > { %v1121_v60 = vpop.f32.mrf.mxu1  ;;  %v1445_v52 = vpop.f32.mrf.mxu0  ;;  %6721 = vmatmul.mubr.bf16.gmra.mxu1 %v2560_v26  ;;  %6817 = vmatmul.mubr.bf16.gmra.mxu0 %v3070_v12  ;;  %v8564_v53 = vld [vmem:[%s7555_s29 + $0x30] sm:$0xff]  }
 0x1dd   : > { %v8541_v55 = vadd.f32 %v1445_v52, %v1114_v24  ;;  %6724 = vmatprep.mubr.msk.bf16.mxu1 %vm7490_vm0, %v9701_v36  ;;  %6820 = vmatprep.mubr.msk.bf16.mxu0 %vm7490_vm0, %v9701_v36  ;;  %v1122_v24 = vadd.f32 %v1121_v60, %v8182_v18  ;;  %v7465_v18 = vld [vmem:[%s7555_s29 + $0x30] sm:$0xff]  }
 0x1de   : > { %v6394_v61 = vpop.f32.mrf.mxu1  ;;  %v6490_v11 = vpop.f32.mrf.mxu0  ;;  %7001 = vmatpush3.bf16.msra.mxu0 %v7241_v48  ;;  %6904 = vmatprep.subr.bf16.mxu1 %v9701_v36  ;;  %v7250_v48 = vld [vmem:[%s9692_s1 + $0x218] sm:$0xff]   ;;  %v2563_v60 = vrot.slane %v7465_v18, 2 }
 0x1df   : > { %7002 = vmatprep.subr.bf16.mxu0 %v9701_v36  ;;  %6905 = vmatpush3.bf16.msra.mxu1 %v7249_v14  ;;  %v3073_v61 = vrot.slane %v8564_v53, 2  ;;  %v7238_v53 = vld [vmem:[%s7555_s29 + $0x38] sm:$0xff]  }
 0x1e0   : > { %v1124_v59 = vpop.f32.mrf.mxu1  ;;  %v1448_v26 = vpop.f32.mrf.mxu0  ;;  %6906 = vmatprep.subr.bf16.mxu1 %v9701_v36  ;;  %v3075_v18 = vrot.slane %v7238_v53, 2  ;;  %v7239_v53 = vld [vmem:[%s7555_s29 + $0x40] sm:$0xff]  }
 0x1e1   : > { %v8559_v12 = vadd.f32 %v1448_v26, %v1117_v51  ;;  %v7255_v51 = vld [vmem:[%s9692_s1 + $0x210] sm:$0xff]  }
 0x1e2   : > { %v6395_v41 = vpop.f32.mrf.mxu1  ;;  %v6491_v23 = vpop.f32.mrf.mxu0  ;;  %7003 = vmatpush3.bf16.msra.mxu0 %v7246_v5 }
 0x1e3   : > { %7004 = vmatprep.subr.bf16.mxu0 %v9701_v36  ;;  %6907 = vmatpush3.bf16.msra.mxu1 %v7254_v7 }
 0x1e4   : > { %v1453_v15 = vpop.f32.mrf.mxu0  ;;  %v1805_v14 = vpop.f32.mrf.mxu1  ;;  %6725 = vmatmul.mubr.bf16.gmra.mxu1 %v2562_v8  ;;  %6821 = vmatmul.mubr.bf16.gmra.mxu0 %v3072_v30  ;;  %v2564_v8 = vsel %vm2553_vm4, %v2561_v58, %v2563_v60  ;;  %v3074_v30 = vsel %vm2553_vm4, %v3071_v54, %v3073_v61  ;;  %v7466_v54 = vld [vmem:[%s7555_s29 + $0x38] sm:$0xff]  }
 0x1e5   : > { %v8574_v52 = vadd.f32 %v1453_v15, %v1122_v24  ;;  %v1971_v22 = vadd.f32 %v1805_v14, %v8242_v57  ;;  %6728 = vmatprep.mubr.msk.bf16.mxu1 %vm7490_vm0, %v9701_v36  ;;  %6824 = vmatprep.mubr.msk.bf16.mxu0 %vm7490_vm0, %v9701_v36  ;;  %v7263_v57 = vld [vmem:[%s9692_s1 + $0x1c0] sm:$0xff]   ;;  %v2565_v14 = vrot.slane %v7466_v54, 2 }
 0x1e6   : > { %v6494_v11 = vpop.f32.mrf.mxu0  ;;  %v6514_v5 = vpop.f32.mrf.mxu1  ;;  %7005 = vmatpush3.bf16.msra.mxu0 %v7250_v48  ;;  %6908 = vmatprep.subr.bf16.mxu1 %v9701_v36  ;;  %v7259_v48 = vld [vmem:[%s9692_s1 + $0x208] sm:$0xff]  }
 0x1e7   : > { %7006 = vmatprep.subr.bf16.mxu0 %v9701_v36  ;;  %6909 = vmatpush3.bf16.msra.mxu1 %v7258_v39 }
 0x1e8   : > { %v1456_v7 = vpop.f32.mrf.mxu0  ;;  %v1808_v59 = vpop.f32.mrf.mxu1  ;;  %6910 = vmatprep.subr.bf16.mxu1 %v9701_v36 }
 0x1e9   : > { %v1972_v26 = vadd.f32 %v1808_v59, %v8256_v47  ;;  %v9702_v47 = vld [vmem:[#allocation2_spill] sm:$0xff] }
 0x1ea   : > { %v6495_v41 = vpop.f32.mrf.mxu0  ;;  %v6515_v23 = vpop.f32.mrf.mxu1  ;;  %7007 = vmatpush3.bf16.msra.mxu0 %v7255_v51  ;;  %v7264_v51 = vld [vmem:[%s9692_s1 + $0x200] sm:$0xff]  }
 0x1eb   : > { %7008 = vmatprep.subr.bf16.mxu0 %v9701_v36  ;;  %6911 = vmatpush3.bf16.msra.mxu1 %v7263_v57 }
 0x1ec   : > { %v1813_v24 = vpop.f32.mrf.mxu1  ;;  %v2325_v39 = vpop.f32.mrf.mxu0  ;;  %6729 = vmatmul.mubr.bf16.gmra.mxu1 %v2564_v8  ;;  %6825 = vmatmul.mubr.bf16.gmra.mxu0 %v3074_v30  ;;  %v2566_v8 = vsel %vm2553_vm4, %v2563_v60, %v2565_v14  ;;  %v3076_v30 = vsel %vm2553_vm4, %v3073_v61, %v3075_v18  ;;  %v3077_v61 = vrot.slane %v7239_v53, 2 }
 0x1ed   : > { %v1973_v58 = vadd.f32 %v1813_v24, %v9702_v47  ;;  %v8601_v15 = vadd.f32 %v2325_v39, %v1971_v22  ;;  %6732 = vmatprep.mubr.msk.bf16.mxu1 %vm7490_vm0, %v9701_v36  ;;  %6828 = vmatprep.mubr.msk.bf16.mxu0 %vm7490_vm0, %v9701_v36  ;;  %v9703_v39 = vld [vmem:[#allocation3_spill] sm:$0xff] }
 0x1ee   : > { %v6518_v11 = vpop.f32.mrf.mxu1  ;;  %v6614_v5 = vpop.f32.mrf.mxu0  ;;  %7009 = vmatpush3.bf16.msra.mxu0 %v7259_v48 }
 0x1ef   : > { %7010 = vmatprep.subr.bf16.mxu0 %v9701_v36 }
 0x1f0   : > { %v1816_v22 = vpop.f32.mrf.mxu1  ;;  %v2328_v57 = vpop.f32.mrf.mxu0 }
 0x1f1   : > { %v1974_v7 = vadd.f32 %v1816_v22, %v8270_v27  ;;  %v8613_v59 = vadd.f32 %v2328_v57, %v1972_v26  ;;  %v7467_v27 = vld [vmem:[%s7555_s29 + $0x40] sm:$0xff]  }
 0x1f2   : > { %v6519_v41 = vpop.f32.mrf.mxu1  ;;  %v6615_v23 = vpop.f32.mrf.mxu0  ;;  %7011 = vmatpush3.bf16.msra.mxu0 %v7264_v51  ;;  %v2567_v60 = vrot.slane %v7467_v27, 2 }
 0x1f4   : > { %v1821_v48 = vpop.f32.mrf.mxu1  ;;  %v2333_v24 = vpop.f32.mrf.mxu0  ;;  %6733 = vmatmul.mubr.bf16.gmra.mxu1 %v2566_v8  ;;  %6829 = vmatmul.mubr.bf16.gmra.mxu0 %v3076_v30  ;;  %v3078_v8 = vsel %vm2553_vm4, %v3075_v18, %v3077_v61  ;;  %v7242_v30 = vld [vmem:[%s7555_s29 + $0x48] sm:$0xff]  }
 0x1f5   : > { %v1975_v47 = vadd.f32 %v1821_v48, %v9703_v39  ;;  %v8619_v54 = vadd.f32 %v2333_v24, %v1973_v58  ;;  %6736 = vmatprep.mubr.msk.bf16.mxu1 %vm7490_vm0, %v9701_v36  ;;  %6832 = vmatprep.mubr.msk.bf16.mxu0 %vm7490_vm0, %v9701_v36  ;;  %v2568_v58 = vsel %vm2553_vm4, %v2565_v14, %v2567_v60  ;;  %v3079_v18 = vrot.slane %v7242_v30, 2 }
 0x1f6   : > { %v6522_v26 = vpop.f32.mrf.mxu1  ;;  %v6618_v11 = vpop.f32.mrf.mxu0 }
 0x1f8   : > { %v1824_v5 = vpop.f32.mrf.mxu1  ;;  %v2336_v51 = vpop.f32.mrf.mxu0 }
 0x1f9   : > { %v1976_v22 = vadd.f32 %v1824_v5, %v8283_v3  ;;  %v8627_v57 = vadd.f32 %v2336_v51, %v1974_v7  ;;  %v7468_v3 = vld [vmem:[%s7555_s29 + $0x48] sm:$0xff]  }
 0x1fa   : > { %v6523_v41 = vpop.f32.mrf.mxu1  ;;  %v6619_v23 = vpop.f32.mrf.mxu0  ;;  %v2569_v14 = vrot.slane %v7468_v3, 2 }
 0x1fc   : > { %v1829_v48 = vpop.f32.mrf.mxu1  ;;  %v2341_v24 = vpop.f32.mrf.mxu0  ;;  %6737 = vmatmul.mubr.bf16.gmra.mxu1 %v2568_v58  ;;  %6833 = vmatmul.mubr.bf16.gmra.mxu0 %v3078_v8  ;;  %v7243_v58 = vld [vmem:[%s7555_s29 + $0x50] sm:$0xff]  }
 0x1fd   : > { %v1977_v53 = vadd.f32 %v1829_v48, %v8287_v16  ;;  %v8633_v39 = vadd.f32 %v2341_v24, %v1975_v47  ;;  %6740 = vmatprep.mubr.msk.bf16.mxu1 %vm7490_vm0, %v9701_v36  ;;  %6836 = vmatprep.mubr.msk.bf16.mxu0 %vm7490_vm0, %v9701_v36  ;;  %v2570_v16 = vsel %vm2553_vm4, %v2567_v60, %v2569_v14 }
 0x1fe   : > { %v6526_v7 = vpop.f32.mrf.mxu1  ;;  %v6622_v27 = vpop.f32.mrf.mxu0  ;;  %v3080_v47 = vsel %vm2553_vm4, %v3077_v61, %v3079_v18  ;;  %v3081_v61 = vrot.slane %v7243_v58, 2 }
 0x200   : > { %v1832_v26 = vpop.f32.mrf.mxu1  ;;  %v2344_v11 = vpop.f32.mrf.mxu0 }
 0x201   : > { %v1978_v5 = vadd.f32 %v1832_v26, %v8296_v46  ;;  %v8641_v51 = vadd.f32 %v2344_v11, %v1976_v22  ;;  %v7469_v46 = vld [vmem:[%s7555_s29 + $0x50] sm:$0xff]  }
 0x202   : > { %v6527_v8 = vpop.f32.mrf.mxu1  ;;  %v6623_v41 = vpop.f32.mrf.mxu0  ;;  %v2571_v60 = vrot.slane %v7469_v46, 2 }
 0x204   : > { %v1837_v23 = vpop.f32.mrf.mxu1  ;;  %v2349_v48 = vpop.f32.mrf.mxu0  ;;  %6741 = vmatmul.mubr.bf16.gmra.mxu1 %v2570_v16  ;;  %6837 = vmatmul.mubr.bf16.gmra.mxu0 %v3080_v47  ;;  %v7245_v16 = vld [vmem:[%s7555_s29 + $0x58] sm:$0xff]  }
 0x205   : > { %v1979_v30 = vadd.f32 %v1837_v23, %v8300_v38  ;;  %v8647_v24 = vadd.f32 %v2349_v48, %v1977_v53  ;;  %6744 = vmatprep.mubr.msk.bf16.mxu1 %vm7490_vm0, %v9701_v36  ;;  %6840 = vmatprep.mubr.msk.bf16.mxu0 %vm7490_vm0, %v9701_v36  ;;  %v2572_v38 = vsel %vm2553_vm4, %v2569_v14, %v2571_v60 }
 0x206   : > { %v6530_v22 = vpop.f32.mrf.mxu1  ;;  %v6626_v3 = vpop.f32.mrf.mxu0  ;;  %v3082_v53 = vsel %vm2553_vm4, %v3079_v18, %v3081_v61  ;;  %v3083_v18 = vrot.slane %v7245_v16, 2 }
 0x208   : > { %v1840_v7 = vpop.f32.mrf.mxu1  ;;  %v2352_v27 = vpop.f32.mrf.mxu0 }
 0x209   : > { %v1980_v26 = vadd.f32 %v1840_v7, %v8309_v31  ;;  %v8655_v11 = vadd.f32 %v2352_v27, %v1978_v5  ;;  %v7470_v31 = vld [vmem:[%s7555_s29 + $0x58] sm:$0xff]  }
 0x20a   : > { %v6531_v47 = vpop.f32.mrf.mxu1  ;;  %v6627_v8 = vpop.f32.mrf.mxu0  ;;  %v2573_v14 = vrot.slane %v7470_v31, 2 }
 0x20c   : > { %v1845_v41 = vpop.f32.mrf.mxu1  ;;  %v2357_v23 = vpop.f32.mrf.mxu0  ;;  %6745 = vmatmul.mubr.bf16.gmra.mxu1 %v2572_v38  ;;  %6841 = vmatmul.mubr.bf16.gmra.mxu0 %v3082_v53  ;;  %v7247_v38 = vld [vmem:[%s7555_s29 + $0x60] sm:$0xff]  }
 0x20d   : > { %v1981_v58 = vadd.f32 %v1845_v41, %v8313_v0  ;;  %v8661_v48 = vadd.f32 %v2357_v23, %v1979_v30  ;;  %6748 = vmatprep.mubr.msk.bf16.mxu1 %vm7490_vm0, %v9701_v36  ;;  %6844 = vmatprep.mubr.msk.bf16.mxu0 %vm7490_vm0, %v9701_v36  ;;  %v2574_v0 = vsel %vm2553_vm4, %v2571_v60, %v2573_v14 }
 0x20e   : > { %v6534_v5 = vpop.f32.mrf.mxu1  ;;  %v6630_v46 = vpop.f32.mrf.mxu0  ;;  %v3084_v30 = vsel %vm2553_vm4, %v3081_v61, %v3083_v18  ;;  %v3085_v61 = vrot.slane %v7247_v38, 2 }
 0x210   : > { %v1848_v22 = vpop.f32.mrf.mxu1  ;;  %v2360_v3 = vpop.f32.mrf.mxu0 }
 0x211   : > { %v1982_v7 = vadd.f32 %v1848_v22, %v8322_v37  ;;  %v8669_v27 = vadd.f32 %v2360_v3, %v1980_v26  ;;  %v7471_v37 = vld [vmem:[%s7555_s29 + $0x60] sm:$0xff]  }
 0x212   : > { %v6535_v53 = vpop.f32.mrf.mxu1  ;;  %v6631_v47 = vpop.f32.mrf.mxu0  ;;  %v2575_v60 = vrot.slane %v7471_v37, 2 }
 0x214   : > { %v1853_v8 = vpop.f32.mrf.mxu1  ;;  %v2365_v41 = vpop.f32.mrf.mxu0  ;;  %6749 = vmatmul.mubr.bf16.gmra.mxu1 %v2574_v0  ;;  %6845 = vmatmul.mubr.bf16.gmra.mxu0 %v3084_v30  ;;  %v7248_v0 = vld [vmem:[%s7555_s29 + $0x68] sm:$0xff]  }
 0x215   : > { %v1983_v16 = vadd.f32 %v1853_v8, %v8326_v62  ;;  %v8675_v23 = vadd.f32 %v2365_v41, %v1981_v58  ;;  %6752 = vmatprep.mubr.msk.bf16.mxu1 %vm7490_vm0, %v9701_v36  ;;  %6848 = vmatprep.mubr.msk.bf16.mxu0 %vm7490_vm0, %v9701_v36  ;;  %v2576_v62 = vsel %vm2553_vm4, %v2573_v14, %v2575_v60 }
 0x216   : > { %v6538_v26 = vpop.f32.mrf.mxu1  ;;  %v6634_v31 = vpop.f32.mrf.mxu0  ;;  %v3086_v58 = vsel %vm2553_vm4, %v3083_v18, %v3085_v61  ;;  %v3087_v18 = vrot.slane %v7248_v0, 2 }
 0x218   : > { %v1856_v5 = vpop.f32.mrf.mxu1  ;;  %v2368_v46 = vpop.f32.mrf.mxu0 }
 0x219   : > { %v1984_v22 = vadd.f32 %v1856_v5, %v8335_v13  ;;  %v8683_v3 = vadd.f32 %v2368_v46, %v1982_v7  ;;  %v7472_v13 = vld [vmem:[%s7555_s29 + $0x68] sm:$0xff]  }
 0x21a   : > { %v6539_v30 = vpop.f32.mrf.mxu1  ;;  %v6635_v53 = vpop.f32.mrf.mxu0  ;;  %v2577_v14 = vrot.slane %v7472_v13, 2 }
 0x21c   : > { %v1861_v47 = vpop.f32.mrf.mxu1  ;;  %v2373_v8 = vpop.f32.mrf.mxu0  ;;  %6753 = vmatmul.mubr.bf16.gmra.mxu1 %v2576_v62  ;;  %6849 = vmatmul.mubr.bf16.gmra.mxu0 %v3086_v58  ;;  %v7251_v62 = vld [vmem:[%s7555_s29 + $0x70] sm:$0xff]  }
 0x21d   : > { %v1985_v38 = vadd.f32 %v1861_v47, %v8339_v45  ;;  %v8689_v41 = vadd.f32 %v2373_v8, %v1983_v16  ;;  %6756 = vmatprep.mubr.msk.bf16.mxu1 %vm7490_vm0, %v9701_v36  ;;  %6852 = vmatprep.mubr.msk.bf16.mxu0 %vm7490_vm0, %v9701_v36  ;;  %v2578_v45 = vsel %vm2553_vm4, %v2575_v60, %v2577_v14 }
 0x21e   : > { %v6542_v7 = vpop.f32.mrf.mxu1  ;;  %v6638_v37 = vpop.f32.mrf.mxu0  ;;  %v3088_v16 = vsel %vm2553_vm4, %v3085_v61, %v3087_v18  ;;  %v3089_v61 = vrot.slane %v7251_v62, 2 }
 0x220   : > { %v1864_v26 = vpop.f32.mrf.mxu1  ;;  %v2376_v31 = vpop.f32.mrf.mxu0 }
 0x221   : > { %v1986_v5 = vadd.f32 %v1864_v26, %v8348_v21  ;;  %v8697_v46 = vadd.f32 %v2376_v31, %v1984_v22  ;;  %v7473_v21 = vld [vmem:[%s7555_s29 + $0x70] sm:$0xff]  }
 0x222   : > { %v6543_v58 = vpop.f32.mrf.mxu1  ;;  %v6639_v30 = vpop.f32.mrf.mxu0  ;;  %v2579_v60 = vrot.slane %v7473_v21, 2 }
 0x224   : > { %v1869_v53 = vpop.f32.mrf.mxu1  ;;  %v2381_v47 = vpop.f32.mrf.mxu0  ;;  %6757 = vmatmul.mubr.bf16.gmra.mxu1 %v2578_v45  ;;  %6853 = vmatmul.mubr.bf16.gmra.mxu0 %v3088_v16  ;;  %v7252_v45 = vld [vmem:[%s7555_s29 + $0x78] sm:$0xff]  }
 0x225   : > { %v1987_v0 = vadd.f32 %v1869_v53, %v8352_v56  ;;  %v8703_v8 = vadd.f32 %v2381_v47, %v1985_v38  ;;  %6760 = vmatprep.mubr.msk.bf16.mxu1 %vm7490_vm0, %v9701_v36  ;;  %6856 = vmatprep.mubr.msk.bf16.mxu0 %vm7490_vm0, %v9701_v36  ;;  %v2580_v56 = vsel %vm2553_vm4, %v2577_v14, %v2579_v60 }
 0x226   : > { %v6546_v22 = vpop.f32.mrf.mxu1  ;;  %v6642_v13 = vpop.f32.mrf.mxu0  ;;  %v3090_v38 = vsel %vm2553_vm4, %v3087_v18, %v3089_v61  ;;  %v3091_v18 = vrot.slane %v7252_v45, 2 }
 0x228   : > { %v1872_v7 = vpop.f32.mrf.mxu1  ;;  %v2384_v37 = vpop.f32.mrf.mxu0 }
 0x229   : > { %v1988_v26 = vadd.f32 %v1872_v7, %v8361_v50  ;;  %v8711_v31 = vadd.f32 %v2384_v37, %v1986_v5  ;;  %v7474_v50 = vld [vmem:[%s7555_s29 + $0x78] sm:$0xff]  }
 0x22a   : > { %v6547_v16 = vpop.f32.mrf.mxu1  ;;  %v6643_v58 = vpop.f32.mrf.mxu0  ;;  %v2581_v14 = vrot.slane %v7474_v50, 2 }
 0x22c   : > { %v1877_v30 = vpop.f32.mrf.mxu1  ;;  %v2389_v53 = vpop.f32.mrf.mxu0  ;;  %6761 = vmatmul.mubr.bf16.gmra.mxu1 %v2580_v56  ;;  %6857 = vmatmul.mubr.bf16.gmra.mxu0 %v3090_v38  ;;  %v7253_v56 = vld [vmem:[%s7555_s29 + $0x80] sm:$0xff]  }
 0x22d   : > { %v1989_v62 = vadd.f32 %v1877_v30, %v8365_v1  ;;  %v8717_v47 = vadd.f32 %v2389_v53, %v1987_v0  ;;  %6764 = vmatprep.mubr.msk.bf16.mxu1 %vm7490_vm0, %v9701_v36  ;;  %6860 = vmatprep.mubr.msk.bf16.mxu0 %vm7490_vm0, %v9701_v36  ;;  %v2582_v1 = vsel %vm2553_vm4, %v2579_v60, %v2581_v14 }
 0x22e   : > { %v6550_v5 = vpop.f32.mrf.mxu1  ;;  %v6646_v21 = vpop.f32.mrf.mxu0  ;;  %v3092_v0 = vsel %vm2553_vm4, %v3089_v61, %v3091_v18  ;;  %v3093_v61 = vrot.slane %v7253_v56, 2 }
 0x230   : > { %v1880_v22 = vpop.f32.mrf.mxu1  ;;  %v2392_v13 = vpop.f32.mrf.mxu0 }
 0x231   : > { %v1990_v7 = vadd.f32 %v1880_v22, %v8374_v2  ;;  %v8725_v37 = vadd.f32 %v2392_v13, %v1988_v26  ;;  %v7475_v2 = vld [vmem:[%s7555_s29 + $0x80] sm:$0xff]  }
 0x232   : > { %v6551_v38 = vpop.f32.mrf.mxu1  ;;  %v6647_v16 = vpop.f32.mrf.mxu0  ;;  %v2583_v60 = vrot.slane %v7475_v2, 2 }
 0x234   : > { %v1885_v58 = vpop.f32.mrf.mxu1  ;;  %v2397_v30 = vpop.f32.mrf.mxu0  ;;  %6765 = vmatmul.mubr.bf16.gmra.mxu1 %v2582_v1  ;;  %6861 = vmatmul.mubr.bf16.gmra.mxu0 %v3092_v0  ;;  %v7256_v1 = vld [vmem:[%s7555_s29 + $0x88] sm:$0xff]  }
 0x235   : > { %v1991_v45 = vadd.f32 %v1885_v58, %v8378_v44  ;;  %v8731_v53 = vadd.f32 %v2397_v30, %v1989_v62  ;;  %6768 = vmatprep.mubr.msk.bf16.mxu1 %vm7490_vm0, %v9701_v36  ;;  %6864 = vmatprep.mubr.msk.bf16.mxu0 %vm7490_vm0, %v9701_v36  ;;  %v2584_v44 = vsel %vm2553_vm4, %v2581_v14, %v2583_v60 }
 0x236   : > { %v6554_v26 = vpop.f32.mrf.mxu1  ;;  %v6650_v50 = vpop.f32.mrf.mxu0  ;;  %v3094_v62 = vsel %vm2553_vm4, %v3091_v18, %v3093_v61  ;;  %v3095_v18 = vrot.slane %v7256_v1, 2 }
 0x238   : > { %v1888_v5 = vpop.f32.mrf.mxu1  ;;  %v2400_v21 = vpop.f32.mrf.mxu0 }
 0x239   : > { %v1992_v22 = vadd.f32 %v1888_v5, %v8387_v40  ;;  %v8739_v13 = vadd.f32 %v2400_v21, %v1990_v7  ;;  %v7476_v40 = vld [vmem:[%s7555_s29 + $0x88] sm:$0xff]  }
 0x23a   : > { %v6555_v0 = vpop.f32.mrf.mxu1  ;;  %v6651_v38 = vpop.f32.mrf.mxu0  ;;  %v2585_v14 = vrot.slane %v7476_v40, 2 }
 0x23c   : > { %v1893_v16 = vpop.f32.mrf.mxu1  ;;  %v2405_v58 = vpop.f32.mrf.mxu0  ;;  %6769 = vmatmul.mubr.bf16.gmra.mxu1 %v2584_v44  ;;  %6865 = vmatmul.mubr.bf16.gmra.mxu0 %v3094_v62  ;;  %v7257_v44 = vld [vmem:[%s7555_s29 + $0x90] sm:$0xff]  }
 0x23d   : > { %v1993_v56 = vadd.f32 %v1893_v16, %v8391_v63  ;;  %v8745_v30 = vadd.f32 %v2405_v58, %v1991_v45  ;;  %6772 = vmatprep.mubr.msk.bf16.mxu1 %vm7490_vm0, %v9701_v36  ;;  %6868 = vmatprep.mubr.msk.bf16.mxu0 %vm7490_vm0, %v9701_v36  ;;  %v2586_v63 = vsel %vm2553_vm4, %v2583_v60, %v2585_v14 }
 0x23e   : > { %v6558_v7 = vpop.f32.mrf.mxu1  ;;  %v6654_v2 = vpop.f32.mrf.mxu0  ;;  %v3096_v45 = vsel %vm2553_vm4, %v3093_v61, %v3095_v18  ;;  %v3097_v61 = vrot.slane %v7257_v44, 2 }
 0x240   : > { %v1896_v26 = vpop.f32.mrf.mxu1  ;;  %v2408_v50 = vpop.f32.mrf.mxu0 }
 0x241   : > { %v1994_v5 = vadd.f32 %v1896_v26, %v8400_v35  ;;  %v8753_v21 = vadd.f32 %v2408_v50, %v1992_v22  ;;  %v7477_v35 = vld [vmem:[%s7555_s29 + $0x90] sm:$0xff]  }
 0x242   : > { %v6559_v62 = vpop.f32.mrf.mxu1  ;;  %v6655_v0 = vpop.f32.mrf.mxu0  ;;  %v2587_v60 = vrot.slane %v7477_v35, 2 }
 0x244   : > { %v1901_v38 = vpop.f32.mrf.mxu1  ;;  %v2413_v16 = vpop.f32.mrf.mxu0  ;;  %6773 = vmatmul.mubr.bf16.gmra.mxu1 %v2586_v63  ;;  %6869 = vmatmul.mubr.bf16.gmra.mxu0 %v3096_v45  ;;  %v7260_v63 = vld [vmem:[%s7555_s29 + $0x98] sm:$0xff]  }
 0x245   : > { %v1995_v1 = vadd.f32 %v1901_v38, %v8404_v43  ;;  %v8759_v58 = vadd.f32 %v2413_v16, %v1993_v56  ;;  %6776 = vmatprep.mubr.msk.bf16.mxu1 %vm7490_vm0, %v9701_v36  ;;  %6872 = vmatprep.mubr.msk.bf16.mxu0 %vm7490_vm0, %v9701_v36  ;;  %v2588_v43 = vsel %vm2553_vm4, %v2585_v14, %v2587_v60 }
 0x246   : > { %v6562_v22 = vpop.f32.mrf.mxu1  ;;  %v6658_v40 = vpop.f32.mrf.mxu0  ;;  %v3098_v56 = vsel %vm2553_vm4, %v3095_v18, %v3097_v61  ;;  %v3099_v18 = vrot.slane %v7260_v63, 2 }
 0x248   : > { %v1904_v7 = vpop.f32.mrf.mxu1  ;;  %v2416_v2 = vpop.f32.mrf.mxu0 }
 0x249   : > { %v1996_v26 = vadd.f32 %v1904_v7, %v8415_v20  ;;  %v8767_v50 = vadd.f32 %v2416_v2, %v1994_v5  ;;  %v7478_v20 = vld [vmem:[%s7555_s29 + $0x98] sm:$0xff]  }
 0x24a   : > { %v6563_v45 = vpop.f32.mrf.mxu1  ;;  %v6659_v62 = vpop.f32.mrf.mxu0  ;;  %v2589_v14 = vrot.slane %v7478_v20, 2 }
 0x24c   : > { %v1909_v0 = vpop.f32.mrf.mxu1  ;;  %v2421_v38 = vpop.f32.mrf.mxu0  ;;  %6777 = vmatmul.mubr.bf16.gmra.mxu1 %v2588_v43  ;;  %6873 = vmatmul.mubr.bf16.gmra.mxu0 %v3098_v56  ;;  %v7261_v43 = vld [vmem:[%s7555_s29 + $0xa0] sm:$0xff]  }
 0x24d   : > { %v1997_v44 = vadd.f32 %v1909_v0, %v8420_v6  ;;  %v8773_v16 = vadd.f32 %v2421_v38, %v1995_v1  ;;  %6780 = vmatprep.mubr.msk.bf16.mxu1 %vm7490_vm0, %v9701_v36  ;;  %6876 = vmatprep.mubr.msk.bf16.mxu0 %vm7490_vm0, %v9701_v36  ;;  %v2590_v6 = vsel %vm2553_vm4, %v2587_v60, %v2589_v14  ;;  %v3101_v60 = vrot.slane %v7261_v43, 2 }
 0x24e   : > { %v6566_v5 = vpop.f32.mrf.mxu1  ;;  %v6662_v35 = vpop.f32.mrf.mxu0  ;;  %v3100_v1 = vsel %vm2553_vm4, %v3097_v61, %v3099_v18 }
 0x250   : > { %v1912_v22 = vpop.f32.mrf.mxu1  ;;  %v2424_v40 = vpop.f32.mrf.mxu0 }
 0x251   : > { %v1998_v7 = vadd.f32 %v1912_v22, %v8431_v32  ;;  %v8781_v2 = vadd.f32 %v2424_v40, %v1996_v26  ;;  %v2591_v32 = vrot.slane %v8413_v19, 2  ;;  %v7262_v40 = vld [vmem:[%s7555_s29 + $0xa8] sm:$0xff]  }
 0x252   : > { %v6567_v56 = vpop.f32.mrf.mxu1  ;;  %v6663_v45 = vpop.f32.mrf.mxu0 }
 0x254   : > { %v1917_v62 = vpop.f32.mrf.mxu1  ;;  %v2429_v0 = vpop.f32.mrf.mxu0  ;;  %6781 = vmatmul.mubr.bf16.gmra.mxu1 %v2590_v6  ;;  %6877 = vmatmul.mubr.bf16.gmra.mxu0 %v3100_v1 }
 0x255   : > { %v1999_v63 = vadd.f32 %v1917_v62, %v8438_v25  ;;  %v8787_v38 = vadd.f32 %v2429_v0, %v1997_v44  ;;  %6784 = vmatprep.mubr.msk.bf16.mxu1 %vm7490_vm0, %v9701_v36  ;;  %6880 = vmatprep.mubr.msk.bf16.mxu0 %vm7490_vm0, %v9701_v36  ;;  %v2592_v25 = vsel %vm2553_vm4, %v2589_v14, %v2591_v32  ;;  %v3103_v14 = vrot.slane %v7262_v40, 2 }
 0x256   : > { %v6570_v61 = vpop.f32.mrf.mxu1  ;;  %v6666_v26 = vpop.f32.mrf.mxu0  ;;  %v3102_v44 = vsel %vm2553_vm4, %v3099_v18, %v3101_v60  ;;  %v3417_v18 = vld [vmem:[%s7555_s29 + $0x10] sm:$0xc] }
 0x258   : > { %v1920_v20 = vpop.f32.mrf.mxu1  ;;  %v2432_v5 = vpop.f32.mrf.mxu0 }
 0x259   : > { %v2000_v35 = vadd.f32 %v1920_v20, %v8448_v9  ;;  %v8795_v22 = vadd.f32 %v2432_v5, %v1998_v7  ;;  %v2593_v9 = vrot.slane %v8435_v49, 2  ;;  %v8810_v7 = vld [vmem:[%s7555_s29 + $0x14] sm:$0xf]  ;;  %v3104_v49 = vsel %vm2553_vm4, %v3101_v60, %v3103_v14 }
 0x25a   : > { %v6571_v6 = vpop.f32.mrf.mxu1  ;;  %v6667_v1 = vpop.f32.mrf.mxu0 }
 0x25c   : > { %v1925_v56 = vpop.f32.mrf.mxu1  ;;  %v2437_v19 = vpop.f32.mrf.mxu0  ;;  %6785 = vmatmul.mubr.bf16.gmra.mxu1 %v2592_v25  ;;  %6881 = vmatmul.mubr.bf16.gmra.mxu0 %v3102_v44  ;;  %v2594_v25 = vsel %vm2553_vm4, %v2591_v32, %v2593_v9  ;;  %v8822_v44 = vld [vmem:[%s7555_s29 + $0x18] sm:$0xff]  }
 0x25d   : > { %v2001_v43 = vadd.f32 %v1925_v56, %v8452_v10  ;;  %v8801_v45 = vadd.f32 %v2437_v19, %v1999_v63  ;;  %6788 = vmatprep.mubr.msk.bf16.mxu1 %vm7490_vm0, %v9701_v36  ;;  %6884 = vmatprep.mubr.msk.bf16.mxu0 %vm7490_vm0, %v9701_v36  ;;  %v8813_v10 = vld [vmem:[%s7555_s29 + $0xb0] ss:$0 sps:$4 sm:$0xff]   ;;  %v5635_v63 = vcombine.low %v3417_v18, %v8810_v7  ;;  %v3591_v32 = vshrl.u32 %v8822_v44, 16 }
 0x25e   : > { %v6574_v62 = vpop.f32.mrf.mxu1  ;;  %v6670_v0 = vpop.f32.mrf.mxu0  ;;  %v3105_v19 = vrot.slane %v8813_v10, 2  ;;  %v3594_v60 = vshll.u32 %v8822_v44, 16 }
 0x25f   : > { %v3583_v62 = vshrl.u32 %v5635_v63, 16  ;;  %v3586_v18 = vshll.u32 %v5635_v63, 16 }
 0x260   : > { %v1928_v61 = vpop.f32.mrf.mxu1  ;;  %v2440_v26 = vpop.f32.mrf.mxu0 }
 0x261   : > { %v2002_v20 = vadd.f32 %v1928_v61, %v8460_v4  ;;  %v8817_v5 = vadd.f32 %v2440_v26, %v2000_v35  ;;  %v7491_v26 = vmov 0   ;;  %v3585_v63 = vrot.slane %v3583_v62, 2 }
 0x262   : > { %v6575_v40 = vpop.f32.mrf.mxu1  ;;  %v6671_v6 = vpop.f32.mrf.mxu0  ;;  %7125 = vset.pattern.permute.xlu0 %v7491_v26  ;;  %7126 = vset.pattern.permute.xlu1 %v7491_v26 }
 0x263   : > { %9704 = vst [vmem:[#allocation2_spill] sm:$0xff] %v8817_v5  ;;  %v4836_v40 = vld [vmem:[%s9695_s4] sm:$0xff] }
 0x264   : > { %v1933_v1 = vpop.f32.mrf.mxu1  ;;  %v2445_v56 = vpop.f32.mrf.mxu0  ;;  %6789 = vmatmul.mubr.bf16.gmra.mxu1 %v2594_v25  ;;  %6885 = vmatmul.mubr.bf16.gmra.mxu0 %v3104_v49  ;;  %v3588_v25 = vrot.slane %v3586_v18, 3  ;;  %v8836_v49 = vld [vmem:[%s7555_s29 + $0x20] sm:$0xff]  }
 0x265   : > { %v2003_v4 = vadd.f32 %v1933_v1, %v8465_v17  ;;  %v8826_v35 = vadd.f32 %v2445_v56, %v2001_v43  ;;  %6792 = vmatprep.mubr.msk.bf16.mxu1 %vm7490_vm0, %v9701_v36  ;;  %6888 = vmatprep.mubr.msk.bf16.mxu0 %vm7490_vm0, %v9701_v36  ;;  %v3106_v43 = vsel %vm2553_vm4, %v3103_v14, %v3105_v19  ;;  %v3593_v56 = vrot.slane %v3591_v32, 2 }
 0x266   : > { %v6578_v0 = vpop.f32.mrf.mxu1  ;;  %v6674_v61 = vpop.f32.mrf.mxu0  ;;  %4879 = vperm.xlu0 %7125, %v4836_v40   ;;  %v3589_v62 = vor.u32 %v3588_v25, %v3585_v63  ;;  %v3600_v18 = vshrl.u32 %v8836_v49, 16  ;;  %v3603_v5 = vshll.u32 %v8836_v49, 16 }
 0x267   : > { %9705 = vst [vmem:[#allocation3_spill] sm:$0xff] %v8826_v35  ;;  %v3596_v0 = vrot.slane %v3594_v60, 3 }
 0x268   : > { %v1936_v10 = vpop.f32.mrf.mxu1  ;;  %v2448_v17 = vpop.f32.mrf.mxu0  ;;  %v3602_v25 = vrot.slane %v3600_v18, 2  ;;  %v3605_v40 = vrot.slane %v3603_v5, 3 }
 0x269   : > { %v2004_v6 = vadd.f32 %v1936_v10, %v8473_v33  ;;  %v8842_v1 = vadd.f32 %v2448_v17, %v2002_v20  ;;  %v4837_v33 = vld [vmem:[%s9695_s4 + $0x8] sm:$0xff]  ;;  %v4080_v17 = vld [vmem:[%s7555_s29 + $0x10] sm:$0x8] }
 0x26a   : > { %v6579_v61 = vpop.f32.mrf.mxu1  ;;  %v6675_v26 = vpop.f32.mrf.mxu0  ;;  %4884 = vperm.xlu0 %7125, %v4837_v33  }
 0x26b   : > { %v8858_v61 = vld [vmem:[%s7555_s29 + $0x28] sm:$0xff]   ;;  %v5680_v26 = vcombine.low %v4080_v17, %v8810_v7  ;;  %v4842_v7 = vld [vmem:[%s9695_s4 + $0x30] sm:$0xff]  ;;  %v4103_v17 = vrot.slane %v8822_v44, 3 }
 0x26c   : > { %v1941_v35 = vpop.f32.mrf.mxu1  ;;  %v2453_v14 = vpop.f32.mrf.mxu0  ;;  %6793 = vmatmul.mubr.bf16.gmra.mxu1 %v2593_v9  ;;  %6889 = vmatmul.mubr.bf16.gmra.mxu0 %v3106_v43  ;;  %v3597_v9 = vor.u32 %v3596_v0, %v3593_v56 }
 0x26d   : > { %v2005_v20 = vadd.f32 %v1941_v35, %v8482_v34  ;;  %v8850_v32 = vadd.f32 %v2453_v14, %v2003_v4  ;;  %6892 = vmatprep.mubr.msk.bf16.mxu0 %vm7490_vm0, %v9701_v36  ;;  %6912 = vmatprep.mubr.msk.bf16.mxu1 %vm7490_vm0, %v9701_v36  ;;  %v4838_v34 = vld [vmem:[%s9695_s4 + $0x10] sm:$0xff]  ;;  %v4840_v4 = vld [vmem:[%s9695_s4 + $0x20] sm:$0xff] }
 0x26e   : > { %v6582_v60 = vpop.f32.mrf.mxu1  ;;  %v6678_v10 = vpop.f32.mrf.mxu0  ;;  %v3598_v0 = vsel %vm3581_vm5, %v3589_v62, %v3597_v9  ;;  %4889 = vperm.xlu1 %7126, %v4838_v34   ;;  %4899 = vperm.xlu0 %7125, %v4840_v4   ;;  %v4841_v34 = vld [vmem:[%s9695_s4 + $0x28] sm:$0xff]  ;;  %v4844_v4 = vld [vmem:[%s9695_s4 + $0x40] sm:$0xff] }
 0x26f   : > { %9706 = vst [vmem:[#allocation4_spill] sm:$0xff] %v8850_v32  ;;  %v3606_v60 = vor.u32 %v3605_v40, %v3602_v25  ;;  %v3609_v10 = vshrl.u32 %v8858_v61, 16  ;;  %v3612_v32 = vshll.u32 %v8858_v61, 16 }
 0x270   : > { %v1944_v43 = vpop.f32.mrf.mxu1  ;;  %v2456_v63 = vpop.f32.mrf.mxu0 }
 0x271   : > { %v2006_v35 = vadd.f32 %v1944_v43, %v8494_v29  ;;  %v8867_v56 = vadd.f32 %v2456_v63, %v2004_v6  ;;  %v4839_v29 = vld [vmem:[%s9695_s4 + $0x18] sm:$0xff] }
 0x272   : > { %v6583_v5 = vpop.f32.mrf.mxu1  ;;  %v6679_v14 = vpop.f32.mrf.mxu0  ;;  %4894 = vperm.xlu1 %7126, %v4839_v29   ;;  %4909 = vperm.xlu0 %7125, %v4842_v7   ;;  %v4105_v7 = vrot.slane %v8836_v49, 3 }
 0x273   : > { %v8899_v14 = vld [vmem:[%s7555_s29 + $0x30] sm:$0xff]  }
 0x274   : > { %v1949_v18 = vpop.f32.mrf.mxu1  ;;  %v2461_v33 = vpop.f32.mrf.mxu0  ;;  %6893 = vmatmul.mubr.bf16.gmra.mxu0 %v3105_v19  ;;  %6913 = vmatmul.mubr.bf16.vlgmr.msra.gmra.mxu1 %v3598_v0  ;;  %v4102_v19 = vrot.slane %v5680_v26, 3  ;;  %v3607_v26 = vsel %vm3581_vm5, %v3597_v9, %v3606_v60  ;;  %v4846_v9 = vld [vmem:[%s9695_s4 + $0x50] sm:$0xff]  ;;  %v3618_v49 = vshrl.u32 %v8899_v14, 16 }
 0x275   : > { %v2007_v6 = vadd.f32 %v1949_v18, %v8509_v42  ;;  %v8880_v62 = vadd.f32 %v2461_v33, %v2005_v20  ;;  %6916 = vmatprep.mubr.msk.bf16.mxu1 %vm7490_vm0, %v9701_v36  ;;  %7012 = vmatprep.mubr.msk.bf16.mxu0 %vm7490_vm0, %v9701_v36  ;;  %v3611_v42 = vrot.slane %v3609_v10, 2  ;;  %v3614_v20 = vrot.slane %v3612_v32, 3 }
 0x276   : > { %v6586_v43 = vpop.f32.mrf.mxu1  ;;  %v6682_v63 = vpop.f32.mrf.mxu0  ;;  %v4104_v5 = vsel %vm4101_vm6, %v4102_v19, %v4103_v17  ;;  %4904 = vperm.xlu1 %7126, %v4841_v34   ;;  %4919 = vperm.xlu0 %7125, %v4844_v4   ;;  %v4845_v34 = vld [vmem:[%s9695_s4 + $0x48] sm:$0xff]  ;;  %v4848_v4 = vld [vmem:[%s9695_s4 + $0x60] sm:$0xff] }
 0x277   : > { %v3615_v29 = vor.u32 %v3614_v20, %v3611_v42  ;;  %v3621_v43 = vshll.u32 %v8899_v14, 16  ;;  %v8920_v20 = vld [vmem:[%s7555_s29 + $0x38] sm:$0xff]  }
 0x278   : > { %v1952_v25 = vpop.f32.mrf.mxu1  ;;  %v2464_v40 = vpop.f32.mrf.mxu0 }
 0x279   : > { %v2008_v44 = vadd.f32 %v1952_v25, %v8526_v28  ;;  %v8894_v0 = vadd.f32 %v2464_v40, %v2006_v35  ;;  %v4843_v28 = vld [vmem:[%s9695_s4 + $0x38] sm:$0xff] }
 0x27a   : > { %v6587_v18 = vpop.f32.mrf.mxu1  ;;  %v6683_v32 = vpop.f32.mrf.mxu0  ;;  %4914 = vperm.xlu1 %7126, %v4843_v28   ;;  %4929 = vperm.xlu0 %7125, %v4846_v9   ;;  %v3627_v28 = vshrl.u32 %v8920_v20, 16  ;;  %v3630_v9 = vshll.u32 %v8920_v20, 16 }
 0x27b   : > { %v3620_v18 = vrot.slane %v3618_v49, 2  ;;  %v3623_v32 = vrot.slane %v3621_v43, 3 }
 0x27c   : > { %v1957_v33 = vpop.f32.mrf.mxu1  ;;  %v2469_v10 = vpop.f32.mrf.mxu0  ;;  %6917 = vmatmul.mubr.bf16.gmra.mxu1 %v3607_v26  ;;  %7013 = vmatmul.mubr.bf16.vlgmr.msra.gmra.mxu0 %v4104_v5 }
 0x27d   : > { %v2009_v35 = vadd.f32 %v1957_v33, %v8541_v55  ;;  %v8909_v19 = vadd.f32 %v2469_v10, %v2007_v6  ;;  %6920 = vmatprep.mubr.msk.bf16.mxu1 %vm7490_vm0, %v9701_v36  ;;  %7016 = vmatprep.mubr.msk.bf16.mxu0 %vm7490_vm0, %v9701_v36  ;;  %v3616_v55 = vsel %vm3581_vm5, %v3606_v60, %v3615_v29 }
 0x27e   : > { %v6590_v63 = vpop.f32.mrf.mxu1  ;;  %v6686_v25 = vpop.f32.mrf.mxu0  ;;  %v4106_v6 = vsel %vm4101_vm6, %v4103_v17, %v4105_v7  ;;  %4924 = vperm.xlu1 %7126, %v4845_v34   ;;  %4939 = vperm.xlu0 %7125, %v4848_v4   ;;  %v3629_v34 = vrot.slane %v3627_v28, 2  ;;  %v4852_v4 = vld [vmem:[%s9695_s4 + $0x80] sm:$0xff] }
 0x27f   : > { %v3624_v63 = vor.u32 %v3623_v32, %v3620_v18  ;;  %v4107_v25 = vrot.slane %v8858_v61, 3  ;;  %v8958_v32 = vld [vmem:[%s7555_s29 + $0x40] sm:$0xff]  }
 0x280   : > { %v1960_v40 = vpop.f32.mrf.mxu1  ;;  %v2472_v42 = vpop.f32.mrf.mxu0 }
 0x281   : > { %v2010_v26 = vadd.f32 %v1960_v40, %v8559_v12  ;;  %v8929_v5 = vadd.f32 %v2472_v42, %v2008_v44  ;;  %v4847_v12 = vld [vmem:[%s9695_s4 + $0x58] sm:$0xff]  ;;  %v4850_v44 = vld [vmem:[%s9695_s4 + $0x70] sm:$0xff]  ;;  %v3625_v61 = vsel %vm3581_vm5, %v3615_v29, %v3624_v63  ;;  %v4108_v18 = vsel %vm4101_vm6, %v4105_v7, %v4107_v25 }
 0x282   : > { %v6591_v33 = vpop.f32.mrf.mxu1  ;;  %v6687_v60 = vpop.f32.mrf.mxu0  ;;  %4934 = vperm.xlu1 %7126, %v4847_v12   ;;  %4949 = vperm.xlu0 %7125, %v4850_v44   ;;  %v4109_v12 = vrot.slane %v8899_v14, 3  ;;  %v4851_v29 = vld [vmem:[%s9695_s4 + $0x78] sm:$0xff]  ;;  %v4854_v7 = vld [vmem:[%s9695_s4 + $0x90] sm:$0xff]  ;;  %v3636_v14 = vshrl.u32 %v8958_v32, 16 }
 0x284   : > { %v1965_v17 = vpop.f32.mrf.mxu1  ;;  %v2477_v10 = vpop.f32.mrf.mxu0  ;;  %6921 = vmatmul.mubr.bf16.gmra.mxu1 %v3616_v55  ;;  %7017 = vmatmul.mubr.bf16.gmra.mxu0 %v4106_v6 }
 0x285   : > { %v2011_v49 = vadd.f32 %v1965_v17, %v8574_v52  ;;  %v8940_v43 = vadd.f32 %v2477_v10, %v2009_v35  ;;  %6924 = vmatprep.mubr.msk.bf16.mxu1 %vm7490_vm0, %v9701_v36  ;;  %7020 = vmatprep.mubr.msk.bf16.mxu0 %vm7490_vm0, %v9701_v36  ;;  %v3632_v52 = vrot.slane %v3630_v9, 3  ;;  %v4849_v35 = vld [vmem:[%s9695_s4 + $0x68] sm:$0xff] }
 0x286   : > { %v6594_v40 = vpop.f32.mrf.mxu1  ;;  %v6690_v42 = vpop.f32.mrf.mxu0  ;;  %4944 = vperm.xlu1 %7126, %v4849_v35   ;;  %4959 = vperm.xlu0 %7125, %v4852_v4   ;;  %v4856_v35 = vld [vmem:[%s9695_s4 + $0xa0] sm:$0xff] }
 0x287   : > { %v3633_v9 = vor.u32 %v3632_v52, %v3629_v34  ;;  %v3639_v40 = vshll.u32 %v8958_v32, 16  ;;  %v8978_v52 = vld [vmem:[%s7555_s29 + $0x48] sm:$0xff]  }
 0x288   : > { %v1968_v55 = vpop.f32.mrf.mxu1  ;;  %v2480_v6 = vpop.f32.mrf.mxu0 }
 0x289   : > { %v8953_v33 = vadd.f32 %v2480_v6, %v2010_v26 }
 0x28a   : > { %v6595_v60 = vpop.f32.mrf.mxu1  ;;  %v6691_v17 = vpop.f32.mrf.mxu0  ;;  %4954 = vperm.xlu1 %7126, %v4851_v29   ;;  %4969 = vperm.xlu0 %7125, %v4854_v7   ;;  %v3645_v29 = vshrl.u32 %v8978_v52, 16  ;;  %v3648_v7 = vshll.u32 %v8978_v52, 16 }
 0x28b   : > { %v3641_v60 = vrot.slane %v3639_v40, 3 }
 0x28c   : > { %v2485_v10 = vpop.f32.mrf.mxu0  ;;  %v2698_v28 = vpop.f32.mrf.mxu1  ;;  %6925 = vmatmul.mubr.bf16.gmra.mxu1 %v3625_v61  ;;  %7021 = vmatmul.mubr.bf16.gmra.mxu0 %v4108_v18  ;;  %v4110_v61 = vsel %vm4101_vm6, %v4107_v25, %v4109_v12  ;;  %v3638_v18 = vrot.slane %v3636_v14, 2  ;;  %v4858_v25 = vld [vmem:[%s9695_s4 + $0xb0] sm:$0xff] }
 0x28d   : > { %v8967_v26 = vadd.f32 %v2485_v10, %v2011_v49  ;;  %v2864_v44 = vadd.f32 %v2698_v28, %v8601_v15  ;;  %6928 = vmatprep.mubr.msk.bf16.mxu1 %vm7490_vm0, %v9701_v36  ;;  %7024 = vmatprep.mubr.msk.bf16.mxu0 %vm7490_vm0, %v9701_v36  ;;  %v3634_v49 = vsel %vm3581_vm5, %v3624_v63, %v3633_v9  ;;  %v4853_v15 = vld [vmem:[%s9695_s4 + $0x88] sm:$0xff] }
 0x28e   : > { %v6694_v42 = vpop.f32.mrf.mxu0  ;;  %v6714_v55 = vpop.f32.mrf.mxu1  ;;  %4964 = vperm.xlu1 %7126, %v4853_v15   ;;  %4979 = vperm.xlu0 %7125, %v4856_v35   ;;  %v3647_v35 = vrot.slane %v3645_v29, 2 }
 0x28f   : > { %v3642_v42 = vor.u32 %v3641_v60, %v3638_v18  ;;  %v4111_v55 = vrot.slane %v8920_v20, 3 }
 0x290   : > { %v2488_v6 = vpop.f32.mrf.mxu0  ;;  %v2701_v34 = vpop.f32.mrf.mxu1 }
 0x291   : > { %v2865_v4 = vadd.f32 %v2701_v34, %v8613_v59  ;;  %v4855_v59 = vld [vmem:[%s9695_s4 + $0x98] sm:$0xff]  ;;  %v3643_v20 = vsel %vm3581_vm5, %v3633_v9, %v3642_v42  ;;  %v4862_v9 = vld [vmem:[%s9695_s4 + $0xd0] sm:$0xff] }
 0x292   : > { %v6695_v17 = vpop.f32.mrf.mxu0  ;;  %v6715_v10 = vpop.f32.mrf.mxu1  ;;  %4974 = vperm.xlu1 %7126, %v4855_v59   ;;  %4989 = vperm.xlu0 %7125, %v4858_v25   ;;  %v4113_v25 = vrot.slane %v8958_v32, 3 }
 0x293   : > { %v4112_v17 = vsel %vm4101_vm6, %v4109_v12, %v4111_v55  ;;  %v9016_v10 = vld [vmem:[%s7555_s29 + $0x50] sm:$0xff]  }
 0x294   : > { %v2706_v63 = vpop.f32.mrf.mxu1  ;;  %v3210_v28 = vpop.f32.mrf.mxu0  ;;  %6929 = vmatmul.mubr.bf16.gmra.mxu1 %v3634_v49  ;;  %7025 = vmatmul.mubr.bf16.gmra.mxu0 %v4110_v61  ;;  %v4860_v61 = vld [vmem:[%s9695_s4 + $0xc0] sm:$0xff]  ;;  %v3654_v32 = vshrl.u32 %v9016_v10, 16 }
 0x295   : > { %v2866_v14 = vadd.f32 %v2706_v63, %v8619_v54  ;;  %v8997_v40 = vadd.f32 %v3210_v28, %v2864_v44  ;;  %6932 = vmatprep.mubr.msk.bf16.mxu1 %vm7490_vm0, %v9701_v36  ;;  %7028 = vmatprep.mubr.msk.bf16.mxu0 %vm7490_vm0, %v9701_v36  ;;  %v3650_v54 = vrot.slane %v3648_v7, 3  ;;  %v4857_v44 = vld [vmem:[%s9695_s4 + $0xa8] sm:$0xff] }
 0x296   : > { %v6718_v6 = vpop.f32.mrf.mxu1  ;;  %v6814_v34 = vpop.f32.mrf.mxu0  ;;  %4984 = vperm.xlu1 %7126, %v4857_v44   ;;  %4999 = vperm.xlu0 %7125, %v4860_v61   ;;  %v4861_v44 = vld [vmem:[%s9695_s4 + $0xc8] sm:$0xff]  ;;  %v4864_v61 = vld [vmem:[%s9695_s4 + $0xe0] sm:$0xff] }
 0x297   : > { %v3651_v59 = vor.u32 %v3650_v54, %v3647_v35  ;;  %v3657_v6 = vshll.u32 %v9016_v10, 16  ;;  %v9037_v54 = vld [vmem:[%s7555_s29 + $0x58] sm:$0xff]  }
 0x298   : > { %v2709_v49 = vpop.f32.mrf.mxu1  ;;  %v3213_v15 = vpop.f32.mrf.mxu0 }
 0x299   : > { %v2867_v18 = vadd.f32 %v2709_v49, %v8627_v57  ;;  %v9011_v60 = vadd.f32 %v3213_v15, %v2865_v4  ;;  %v4859_v57 = vld [vmem:[%s9695_s4 + $0xb8] sm:$0xff] }
 0x29a   : > { %v6719_v63 = vpop.f32.mrf.mxu1  ;;  %v6815_v28 = vpop.f32.mrf.mxu0  ;;  %4994 = vperm.xlu1 %7126, %v4859_v57   ;;  %5009 = vperm.xlu0 %7125, %v4862_v9   ;;  %v3663_v57 = vshrl.u32 %v9037_v54, 16  ;;  %v3666_v9 = vshll.u32 %v9037_v54, 16 }
 0x29b   : > { %v3656_v63 = vrot.slane %v3654_v32, 2  ;;  %v3659_v28 = vrot.slane %v3657_v6, 3 }
 0x29c   : > { %v2714_v29 = vpop.f32.mrf.mxu1  ;;  %v3218_v7 = vpop.f32.mrf.mxu0  ;;  %6933 = vmatmul.mubr.bf16.gmra.mxu1 %v3643_v20  ;;  %7029 = vmatmul.mubr.bf16.gmra.mxu0 %v4112_v17 }
 0x29d   : > { %v2868_v12 = vadd.f32 %v2714_v29, %v8633_v39  ;;  %v9026_v4 = vadd.f32 %v3218_v7, %v2866_v14  ;;  %6936 = vmatprep.mubr.msk.bf16.mxu1 %vm7490_vm0, %v9701_v36  ;;  %7032 = vmatprep.mubr.msk.bf16.mxu0 %vm7490_vm0, %v9701_v36  ;;  %v3652_v39 = vsel %vm3581_vm5, %v3642_v42, %v3651_v59 }
 0x29e   : > { %v6722_v34 = vpop.f32.mrf.mxu1  ;;  %v6818_v49 = vpop.f32.mrf.mxu0  ;;  %v4114_v14 = vsel %vm4101_vm6, %v4111_v55, %v4113_v25  ;;  %5004 = vperm.xlu1 %7126, %v4861_v44   ;;  %5019 = vperm.xlu0 %7125, %v4864_v61   ;;  %v3665_v44 = vrot.slane %v3663_v57, 2  ;;  %v4868_v61 = vld [vmem:[%s9695_s4 + $0x100] sm:$0xff] }
 0x29f   : > { %v3660_v34 = vor.u32 %v3659_v28, %v3656_v63  ;;  %v4115_v49 = vrot.slane %v8978_v52, 3 }
 0x2a0   : > { %v2717_v15 = vpop.f32.mrf.mxu1  ;;  %v3221_v35 = vpop.f32.mrf.mxu0 }
 0x2a1   : > { %v2869_v20 = vadd.f32 %v2717_v15, %v8641_v51  ;;  %v9046_v17 = vadd.f32 %v3221_v35, %v2867_v18  ;;  %v4863_v51 = vld [vmem:[%s9695_s4 + $0xd8] sm:$0xff]  ;;  %v4866_v18 = vld [vmem:[%s9695_s4 + $0xf0] sm:$0xff]  ;;  %v3661_v52 = vsel %vm3581_vm5, %v3651_v59, %v3660_v34 }
 0x2a2   : > { %v6723_v29 = vpop.f32.mrf.mxu1  ;;  %v6819_v42 = vpop.f32.mrf.mxu0  ;;  %5014 = vperm.xlu1 %7126, %v4863_v51   ;;  %5029 = vperm.xlu0 %7125, %v4866_v18   ;;  %v4117_v18 = vrot.slane %v9016_v10, 3  ;;  %v4870_v59 = vld [vmem:[%s9695_s4 + $0x110] sm:$0xff] }
 0x2a3   : > { %v4116_v29 = vsel %vm4101_vm6, %v4113_v25, %v4115_v49  ;;  %v9076_v42 = vld [vmem:[%s7555_s29 + $0x60] sm:$0xff]  }
 0x2a4   : > { %v2722_v55 = vpop.f32.mrf.mxu1  ;;  %v3226_v7 = vpop.f32.mrf.mxu0  ;;  %6937 = vmatmul.mubr.bf16.gmra.mxu1 %v3652_v39  ;;  %7033 = vmatmul.mubr.bf16.gmra.mxu0 %v4114_v14  ;;  %v3672_v10 = vshrl.u32 %v9076_v42, 16 }
 0x2a5   : > { %v2870_v32 = vadd.f32 %v2722_v55, %v8647_v24  ;;  %v9057_v6 = vadd.f32 %v3226_v7, %v2868_v12  ;;  %6940 = vmatprep.mubr.msk.bf16.mxu1 %vm7490_vm0, %v9701_v36  ;;  %7036 = vmatprep.mubr.msk.bf16.mxu0 %vm7490_vm0, %v9701_v36  ;;  %v3668_v24 = vrot.slane %v3666_v9, 3  ;;  %v4865_v12 = vld [vmem:[%s9695_s4 + $0xe8] sm:$0xff] }
 0x2a6   : > { %v6726_v15 = vpop.f32.mrf.mxu1  ;;  %v6822_v35 = vpop.f32.mrf.mxu0  ;;  %5024 = vperm.xlu1 %7126, %v4865_v12   ;;  %5039 = vperm.xlu0 %7125, %v4868_v61   ;;  %v4869_v12 = vld [vmem:[%s9695_s4 + $0x108] sm:$0xff]  ;;  %v4872_v61 = vld [vmem:[%s9695_s4 + $0x120] sm:$0xff] }
 0x2a7   : > { %v3669_v51 = vor.u32 %v3668_v24, %v3665_v44  ;;  %v3675_v15 = vshll.u32 %v9076_v42, 16  ;;  %v9097_v24 = vld [vmem:[%s7555_s29 + $0x68] sm:$0xff]  }
 0x2a8   : > { %v2725_v39 = vpop.f32.mrf.mxu1  ;;  %v3229_v14 = vpop.f32.mrf.mxu0 }
 0x2a9   : > { %v2871_v63 = vadd.f32 %v2725_v39, %v8655_v11  ;;  %v9071_v28 = vadd.f32 %v3229_v14, %v2869_v20  ;;  %v4867_v11 = vld [vmem:[%s9695_s4 + $0xf8] sm:$0xff] }
 0x2aa   : > { %v6727_v55 = vpop.f32.mrf.mxu1  ;;  %v6823_v7 = vpop.f32.mrf.mxu0  ;;  %5034 = vperm.xlu1 %7126, %v4867_v11   ;;  %5049 = vperm.xlu0 %7125, %v4870_v59   ;;  %v3681_v11 = vshrl.u32 %v9097_v24, 16  ;;  %v3684_v59 = vshll.u32 %v9097_v24, 16 }
 0x2ab   : > { %v3674_v55 = vrot.slane %v3672_v10, 2  ;;  %v3677_v7 = vrot.slane %v3675_v15, 3 }
 0x2ac   : > { %v2730_v57 = vpop.f32.mrf.mxu1  ;;  %v3234_v9 = vpop.f32.mrf.mxu0  ;;  %6941 = vmatmul.mubr.bf16.gmra.mxu1 %v3661_v52  ;;  %7037 = vmatmul.mubr.bf16.gmra.mxu0 %v4116_v29 }
 0x2ad   : > { %v2872_v25 = vadd.f32 %v2730_v57, %v8661_v48  ;;  %v9086_v20 = vadd.f32 %v3234_v9, %v2870_v32  ;;  %6944 = vmatprep.mubr.msk.bf16.mxu1 %vm7490_vm0, %v9701_v36  ;;  %7040 = vmatprep.mubr.msk.bf16.mxu0 %vm7490_vm0, %v9701_v36  ;;  %v3670_v48 = vsel %vm3581_vm5, %v3660_v34, %v3669_v51 }
 0x2ae   : > { %v6730_v35 = vpop.f32.mrf.mxu1  ;;  %v6826_v39 = vpop.f32.mrf.mxu0  ;;  %v4118_v32 = vsel %vm4101_vm6, %v4115_v49, %v4117_v18  ;;  %5044 = vperm.xlu1 %7126, %v4869_v12   ;;  %5059 = vperm.xlu0 %7125, %v4872_v61   ;;  %v3683_v12 = vrot.slane %v3681_v11, 2  ;;  %v4876_v61 = vld [vmem:[%s9695_s4 + $0x140] sm:$0xf] }
 0x2af   : > { %v3678_v35 = vor.u32 %v3677_v7, %v3674_v55  ;;  %v4119_v39 = vrot.slane %v9037_v54, 3 }
 0x2b0   : > { %v2733_v14 = vpop.f32.mrf.mxu1  ;;  %v3237_v44 = vpop.f32.mrf.mxu0 }
 0x2b1   : > { %v2873_v52 = vadd.f32 %v2733_v14, %v8669_v27  ;;  %v9106_v29 = vadd.f32 %v3237_v44, %v2871_v63  ;;  %v4871_v27 = vld [vmem:[%s9695_s4 + $0x118] sm:$0xff]  ;;  %v4874_v63 = vld [vmem:[%s9695_s4 + $0x130] sm:$0xff]  ;;  %v3679_v54 = vsel %vm3581_vm5, %v3669_v51, %v3678_v35 }
 0x2b2   : > { %v6731_v57 = vpop.f32.mrf.mxu1  ;;  %v6827_v34 = vpop.f32.mrf.mxu0  ;;  %5054 = vperm.xlu1 %7126, %v4871_v27   ;;  %5069 = vperm.xlu0 %7125, %v4874_v63   ;;  %v4875_v51 = vld [vmem:[%s9695_s4 + $0x138] sm:$0xff] }
 0x2b3   : > { %v4120_v57 = vsel %vm4101_vm6, %v4117_v18, %v4119_v39  ;;  %v9136_v34 = vld [vmem:[%s7555_s29 + $0x70] sm:$0xff]  }
 0x2b4   : > { %v2738_v49 = vpop.f32.mrf.mxu1  ;;  %v3242_v9 = vpop.f32.mrf.mxu0  ;;  %6945 = vmatmul.mubr.bf16.gmra.mxu1 %v3670_v48  ;;  %7041 = vmatmul.mubr.bf16.gmra.mxu0 %v4118_v32  ;;  %v3690_v63 = vshrl.u32 %v9136_v34, 16 }
 0x2b5   : > { %v2874_v10 = vadd.f32 %v2738_v49, %v8675_v23  ;;  %v9117_v15 = vadd.f32 %v3242_v9, %v2872_v25  ;;  %6948 = vmatprep.mubr.msk.bf16.mxu1 %vm7490_vm0, %v9701_v36  ;;  %7044 = vmatprep.mubr.msk.bf16.mxu0 %vm7490_vm0, %v9701_v36  ;;  %v3686_v23 = vrot.slane %v3684_v59, 3  ;;  %v4873_v25 = vld [vmem:[%s9695_s4 + $0x128] sm:$0xff] }
 0x2b6   : > { %v6734_v14 = vpop.f32.mrf.mxu1  ;;  %v6830_v44 = vpop.f32.mrf.mxu0  ;;  %5064 = vperm.xlu1 %7126, %v4873_v25   ;;  %5079 = vperm.xlu0 %7125, %v4876_v61   ;;  %v3692_v61 = vrot.slane %v3690_v63, 2 }
 0x2b7   : > { %v3687_v27 = vor.u32 %v3686_v23, %v3683_v12  ;;  %v3693_v14 = vshll.u32 %v9136_v34, 16 }
 0x2b8   : > { %v2741_v48 = vpop.f32.mrf.mxu1  ;;  %v3245_v32 = vpop.f32.mrf.mxu0 }
 0x2b9   : > { %v2875_v55 = vadd.f32 %v2741_v48, %v8683_v3  ;;  %v9131_v7 = vadd.f32 %v3245_v32, %v2873_v52  ;;  %v4121_v3 = vrot.slane %v9076_v42, 3  ;;  %v3688_v12 = vsel %vm3581_vm5, %v3678_v35, %v3687_v27 }
 0x2ba   : > { %v6735_v49 = vpop.f32.mrf.mxu1  ;;  %v6831_v9 = vpop.f32.mrf.mxu0  ;;  %5074 = vperm.xlu1 %7126, %v4875_v51  }
 0x2bc   : > { %v2746_v11 = vpop.f32.mrf.mxu1  ;;  %v3250_v59 = vpop.f32.mrf.mxu0  ;;  %6949 = vmatmul.mubr.bf16.gmra.mxu1 %v3679_v54  ;;  %7045 = vmatmul.mubr.bf16.gmra.mxu0 %v4120_v57  ;;  %v3695_v54 = vrot.slane %v3693_v14, 3 }
 0x2bd   : > { %v2876_v18 = vadd.f32 %v2746_v11, %v8689_v41  ;;  %v9143_v52 = vadd.f32 %v3250_v59, %v2874_v10  ;;  %6952 = vmatprep.mubr.msk.bf16.mxu1 %vm7490_vm0, %v9701_v36  ;;  %7048 = vmatprep.mubr.msk.bf16.mxu0 %vm7490_vm0, %v9701_v36  ;;  %v4122_v41 = vsel %vm4101_vm6, %v4119_v39, %v4121_v3  ;;  %v9154_v10 = vld [vmem:[%s7555_s29 + $0x78] sm:$0xff]  }
 0x2be   : > { %v6738_v44 = vpop.f32.mrf.mxu1  ;;  %v6834_v42 = vpop.f32.mrf.mxu0  ;;  %v3699_v59 = vshrl.u32 %v9154_v10, 16  ;;  %v3702_v35 = vshll.u32 %v9154_v10, 16 }
 0x2c0   : > { %v2749_v48 = vpop.f32.mrf.mxu1  ;;  %v3253_v32 = vpop.f32.mrf.mxu0 }
 0x2c1   : > { %v2877_v23 = vadd.f32 %v2749_v48, %v8697_v46  ;;  %v9157_v25 = vadd.f32 %v3253_v32, %v2875_v55  ;;  %v3696_v46 = vor.u32 %v3695_v54, %v3692_v61  ;;  %v4123_v55 = vrot.slane %v9097_v24, 3 }
 0x2c2   : > { %v6739_v57 = vpop.f32.mrf.mxu1  ;;  %v6835_v49 = vpop.f32.mrf.mxu0  ;;  %v3701_v48 = vrot.slane %v3699_v59, 2  ;;  %v3704_v32 = vrot.slane %v3702_v35, 3 }
 0x2c3   : > { %v9175_v57 = vld [vmem:[%s7555_s29 + $0x80] sm:$0xff]  }
 0x2c4   : > { %v2754_v9 = vpop.f32.mrf.mxu1  ;;  %v3258_v11 = vpop.f32.mrf.mxu0  ;;  %6953 = vmatmul.mubr.bf16.gmra.mxu1 %v3688_v12  ;;  %7049 = vmatmul.mubr.bf16.gmra.mxu0 %v4122_v41  ;;  %v4124_v41 = vsel %vm4101_vm6, %v4121_v3, %v4123_v55  ;;  %v3711_v3 = vshll.u32 %v9175_v57, 16 }
 0x2c5   : > { %v2878_v39 = vadd.f32 %v2754_v9, %v8703_v8  ;;  %v9162_v51 = vadd.f32 %v3258_v11, %v2876_v18  ;;  %6956 = vmatprep.mubr.msk.bf16.mxu1 %vm7490_vm0, %v9701_v36  ;;  %7052 = vmatprep.mubr.msk.bf16.mxu0 %vm7490_vm0, %v9701_v36  ;;  %v3697_v18 = vsel %vm3581_vm5, %v3687_v27, %v3696_v46  ;;  %v4125_v11 = vrot.slane %v9136_v34, 3 }
 0x2c6   : > { %v6742_v63 = vpop.f32.mrf.mxu1  ;;  %v6838_v14 = vpop.f32.mrf.mxu0  ;;  %v3705_v9 = vor.u32 %v3704_v32, %v3701_v48  ;;  %v3708_v27 = vshrl.u32 %v9175_v57, 16  ;;  %v3713_v32 = vrot.slane %v3711_v3, 3 }
 0x2c8   : > { %v2757_v44 = vpop.f32.mrf.mxu1  ;;  %v3261_v42 = vpop.f32.mrf.mxu0  ;;  %v3706_v34 = vsel %vm3581_vm5, %v3696_v46, %v3705_v9  ;;  %v3710_v48 = vrot.slane %v3708_v27, 2 }
 0x2c9   : > { %v2879_v8 = vadd.f32 %v2757_v44, %v8711_v31  ;;  %v9170_v12 = vadd.f32 %v3261_v42, %v2877_v23 }
 0x2ca   : > { %v6743_v49 = vpop.f32.mrf.mxu1  ;;  %v6839_v61 = vpop.f32.mrf.mxu0 }
 0x2cc   : > { %v2762_v54 = vpop.f32.mrf.mxu1  ;;  %v3266_v24 = vpop.f32.mrf.mxu0  ;;  %6957 = vmatmul.mubr.bf16.gmra.mxu1 %v3697_v18  ;;  %7053 = vmatmul.mubr.bf16.gmra.mxu0 %v4124_v41 }
 0x2cd   : > { %v2880_v31 = vadd.f32 %v2762_v54, %v8717_v47  ;;  %v9179_v23 = vadd.f32 %v3266_v24, %v2878_v39  ;;  %6960 = vmatprep.mubr.msk.bf16.mxu1 %vm7490_vm0, %v9701_v36  ;;  %7056 = vmatprep.mubr.msk.bf16.mxu0 %vm7490_vm0, %v9701_v36  ;;  %v4126_v47 = vsel %vm4101_vm6, %v4123_v55, %v4125_v11  ;;  %v9190_v39 = vld [vmem:[%s7555_s29 + $0x88] sm:$0xff]  }
 0x2ce   : > { %v6746_v59 = vpop.f32.mrf.mxu1  ;;  %v6842_v35 = vpop.f32.mrf.mxu0  ;;  %v3717_v54 = vshrl.u32 %v9190_v39, 16  ;;  %v3720_v46 = vshll.u32 %v9190_v39, 16 }
 0x2d0   : > { %v2765_v63 = vpop.f32.mrf.mxu1  ;;  %v3269_v14 = vpop.f32.mrf.mxu0 }
 0x2d1   : > { %v2881_v44 = vadd.f32 %v2765_v63, %v8725_v37  ;;  %v9193_v42 = vadd.f32 %v3269_v14, %v2879_v8  ;;  %v3714_v37 = vor.u32 %v3713_v32, %v3710_v48  ;;  %v4127_v8 = vrot.slane %v9154_v10, 3 }
 0x2d2   : > { %v6747_v18 = vpop.f32.mrf.mxu1  ;;  %v6843_v41 = vpop.f32.mrf.mxu0  ;;  %v3719_v63 = vrot.slane %v3717_v54, 2  ;;  %v3722_v14 = vrot.slane %v3720_v46, 3 }
 0x2d3   : > { %v9211_v18 = vld [vmem:[%s7555_s29 + $0x90] sm:$0xff]  }
 0x2d4   : > { %v2770_v49 = vpop.f32.mrf.mxu1  ;;  %v3274_v61 = vpop.f32.mrf.mxu0  ;;  %6961 = vmatmul.mubr.bf16.gmra.mxu1 %v3706_v34  ;;  %7057 = vmatmul.mubr.bf16.gmra.mxu0 %v4126_v47  ;;  %v4128_v47 = vsel %vm4101_vm6, %v4125_v11, %v4127_v8  ;;  %v3729_v11 = vshll.u32 %v9211_v18, 16 }
 0x2d5   : > { %v2882_v55 = vadd.f32 %v2770_v49, %v8731_v53  ;;  %v9198_v24 = vadd.f32 %v3274_v61, %v2880_v31  ;;  %6964 = vmatprep.mubr.msk.bf16.mxu1 %vm7490_vm0, %v9701_v36  ;;  %7060 = vmatprep.mubr.msk.bf16.mxu0 %vm7490_vm0, %v9701_v36  ;;  %v3715_v31 = vsel %vm3581_vm5, %v3705_v9, %v3714_v37  ;;  %v4129_v61 = vrot.slane %v9175_v57, 3 }
 0x2d6   : > { %v6750_v27 = vpop.f32.mrf.mxu1  ;;  %v6846_v3 = vpop.f32.mrf.mxu0  ;;  %v3723_v49 = vor.u32 %v3722_v14, %v3719_v63  ;;  %v3726_v9 = vshrl.u32 %v9211_v18, 16  ;;  %v3731_v14 = vrot.slane %v3729_v11, 3 }
 0x2d8   : > { %v2773_v59 = vpop.f32.mrf.mxu1  ;;  %v3277_v35 = vpop.f32.mrf.mxu0  ;;  %v3724_v57 = vsel %vm3581_vm5, %v3714_v37, %v3723_v49  ;;  %v3728_v63 = vrot.slane %v3726_v9, 2 }
 0x2d9   : > { %v2883_v53 = vadd.f32 %v2773_v59, %v8739_v13  ;;  %v9206_v34 = vadd.f32 %v3277_v35, %v2881_v44 }
 0x2da   : > { %v6751_v41 = vpop.f32.mrf.mxu1  ;;  %v6847_v48 = vpop.f32.mrf.mxu0 }
 0x2dc   : > { %v2778_v32 = vpop.f32.mrf.mxu1  ;;  %v3282_v10 = vpop.f32.mrf.mxu0  ;;  %6965 = vmatmul.mubr.bf16.gmra.mxu1 %v3715_v31  ;;  %7061 = vmatmul.mubr.bf16.gmra.mxu0 %v4128_v47 }
 0x2dd   : > { %v2884_v13 = vadd.f32 %v2778_v32, %v8745_v30  ;;  %v9215_v44 = vadd.f32 %v3282_v10, %v2882_v55  ;;  %6968 = vmatprep.mubr.msk.bf16.mxu1 %vm7490_vm0, %v9701_v36  ;;  %7064 = vmatprep.mubr.msk.bf16.mxu0 %vm7490_vm0, %v9701_v36  ;;  %v4130_v30 = vsel %vm4101_vm6, %v4127_v8, %v4129_v61  ;;  %v9226_v55 = vld [vmem:[%s7555_s29 + $0x98] sm:$0xff]  }
 0x2de   : > { %v6754_v54 = vpop.f32.mrf.mxu1  ;;  %v6850_v46 = vpop.f32.mrf.mxu0  ;;  %v3735_v32 = vshrl.u32 %v9226_v55, 16  ;;  %v3738_v37 = vshll.u32 %v9226_v55, 16 }
 0x2e0   : > { %v2781_v27 = vpop.f32.mrf.mxu1  ;;  %v3285_v3 = vpop.f32.mrf.mxu0 }
 0x2e1   : > { %v2885_v59 = vadd.f32 %v2781_v27, %v8753_v21  ;;  %v9229_v35 = vadd.f32 %v3285_v3, %v2883_v53  ;;  %v3732_v21 = vor.u32 %v3731_v14, %v3728_v63  ;;  %v4131_v53 = vrot.slane %v9190_v39, 3 }
 0x2e2   : > { %v6755_v31 = vpop.f32.mrf.mxu1  ;;  %v6851_v47 = vpop.f32.mrf.mxu0  ;;  %v3737_v27 = vrot.slane %v3735_v32, 2  ;;  %v3740_v3 = vrot.slane %v3738_v37, 3 }
 0x2e3   : > { %v9247_v31 = vld [vmem:[%s7555_s29 + $0xa0] sm:$0xff]  }
 0x2e4   : > { %v2786_v41 = vpop.f32.mrf.mxu1  ;;  %v3290_v48 = vpop.f32.mrf.mxu0  ;;  %6969 = vmatmul.mubr.bf16.gmra.mxu1 %v3724_v57  ;;  %7065 = vmatmul.mubr.bf16.gmra.mxu0 %v4130_v30  ;;  %v4132_v30 = vsel %vm4101_vm6, %v4129_v61, %v4131_v53  ;;  %v3747_v61 = vshll.u32 %v9247_v31, 16 }
 0x2e5   : > { %v2886_v8 = vadd.f32 %v2786_v41, %v8759_v58  ;;  %v9234_v10 = vadd.f32 %v3290_v48, %v2884_v13  ;;  %6972 = vmatprep.mubr.msk.bf16.mxu1 %vm7490_vm0, %v9701_v36  ;;  %7068 = vmatprep.mubr.msk.bf16.mxu0 %vm7490_vm0, %v9701_v36  ;;  %v3733_v13 = vsel %vm3581_vm5, %v3723_v49, %v3732_v21  ;;  %v4133_v48 = vrot.slane %v9211_v18, 3 }
 0x2e6   : > { %v6758_v9 = vpop.f32.mrf.mxu1  ;;  %v6854_v11 = vpop.f32.mrf.mxu0  ;;  %v3741_v41 = vor.u32 %v3740_v3, %v3737_v27  ;;  %v3744_v49 = vshrl.u32 %v9247_v31, 16  ;;  %v3749_v3 = vrot.slane %v3747_v61, 3 }
 0x2e8   : > { %v2789_v54 = vpop.f32.mrf.mxu1  ;;  %v3293_v46 = vpop.f32.mrf.mxu0  ;;  %v3742_v18 = vsel %vm3581_vm5, %v3732_v21, %v3741_v41  ;;  %v3746_v27 = vrot.slane %v3744_v49, 2 }
 0x2e9   : > { %v2887_v58 = vadd.f32 %v2789_v54, %v8767_v50  ;;  %v9242_v57 = vadd.f32 %v3293_v46, %v2885_v59 }
 0x2ea   : > { %v6759_v47 = vpop.f32.mrf.mxu1  ;;  %v6855_v63 = vpop.f32.mrf.mxu0 }
 0x2ec   : > { %v2794_v14 = vpop.f32.mrf.mxu1  ;;  %v3298_v39 = vpop.f32.mrf.mxu0  ;;  %6973 = vmatmul.mubr.bf16.gmra.mxu1 %v3733_v13  ;;  %7069 = vmatmul.mubr.bf16.gmra.mxu0 %v4132_v30 }
 0x2ed   : > { %v2888_v50 = vadd.f32 %v2794_v14, %v8773_v16  ;;  %v9251_v59 = vadd.f32 %v3298_v39, %v2886_v8  ;;  %6976 = vmatprep.mubr.msk.bf16.mxu1 %vm7490_vm0, %v9701_v36  ;;  %7072 = vmatprep.mubr.msk.bf16.mxu0 %vm7490_vm0, %v9701_v36  ;;  %v4134_v16 = vsel %vm4101_vm6, %v4131_v53, %v4133_v48  ;;  %v9262_v8 = vld [vmem:[%s7555_s29 + $0xa8] sm:$0xff]  }
 0x2ee   : > { %v6762_v32 = vpop.f32.mrf.mxu1  ;;  %v6858_v37 = vpop.f32.mrf.mxu0  ;;  %v3753_v14 = vshrl.u32 %v9262_v8, 16  ;;  %v3756_v21 = vshll.u32 %v9262_v8, 16 }
 0x2f0   : > { %v2797_v9 = vpop.f32.mrf.mxu1  ;;  %v3301_v11 = vpop.f32.mrf.mxu0 }
 0x2f1   : > { %v2889_v54 = vadd.f32 %v2797_v9, %v8781_v2  ;;  %v9265_v46 = vadd.f32 %v3301_v11, %v2887_v58  ;;  %v3750_v2 = vor.u32 %v3749_v3, %v3746_v27  ;;  %v4135_v58 = vrot.slane %v9226_v55, 3 }
 0x2f2   : > { %v6763_v13 = vpop.f32.mrf.mxu1  ;;  %v6859_v30 = vpop.f32.mrf.mxu0  ;;  %v3755_v9 = vrot.slane %v3753_v14, 2  ;;  %v3758_v11 = vrot.slane %v3756_v21, 3 }
 0x2f3   : > { %v9283_v13 = vld [vmem:[%s7555_s29 + $0xb0] sm:$0x1f]  }
 0x2f4   : > { %v2802_v47 = vpop.f32.mrf.mxu1  ;;  %v3306_v63 = vpop.f32.mrf.mxu0  ;;  %6977 = vmatmul.mubr.bf16.gmra.mxu1 %v3742_v18  ;;  %7073 = vmatmul.mubr.bf16.gmra.mxu0 %v4134_v16  ;;  %v4136_v16 = vsel %vm4101_vm6, %v4133_v48, %v4135_v58  ;;  %v3765_v48 = vshll.u32 %v9283_v13, 16 }
 0x2f5   : > { %v2890_v53 = vadd.f32 %v2802_v47, %v8787_v38  ;;  %v9270_v39 = vadd.f32 %v3306_v63, %v2888_v50  ;;  %6980 = vmatprep.mubr.msk.bf16.mxu1 %vm7490_vm0, %v9701_v36  ;;  %7076 = vmatprep.mubr.msk.bf16.mxu0 %vm7490_vm0, %v9701_v36  ;;  %v3751_v50 = vsel %vm3581_vm5, %v3741_v41, %v3750_v2  ;;  %v4137_v63 = vrot.slane %v9247_v31, 3 }
 0x2f6   : > { %v6766_v49 = vpop.f32.mrf.mxu1  ;;  %v6862_v61 = vpop.f32.mrf.mxu0  ;;  %v3759_v47 = vor.u32 %v3758_v11, %v3755_v9  ;;  %v3762_v41 = vshrl.u32 %v9283_v13, 16  ;;  %v3767_v11 = vrot.slane %v3765_v48, 3 }
 0x2f8   : > { %v2805_v32 = vpop.f32.mrf.mxu1  ;;  %v3309_v37 = vpop.f32.mrf.mxu0  ;;  %v3760_v31 = vsel %vm3581_vm5, %v3750_v2, %v3759_v47  ;;  %v3764_v9 = vrot.slane %v3762_v41, 2 }
 0x2f9   : > { %v2891_v38 = vadd.f32 %v2805_v32, %v8795_v22  ;;  %v9278_v18 = vadd.f32 %v3309_v37, %v2889_v54 }
 0x2fa   : > { %v6767_v30 = vpop.f32.mrf.mxu1  ;;  %v6863_v27 = vpop.f32.mrf.mxu0  ;;  %v3768_v2 = vor.u32 %v3767_v11, %v3764_v9  ;;  %v9709_v9 = vld [vmem:[#allocation4_spill] sm:$0xff] }
 0x2fc   : > { %v2810_v3 = vpop.f32.mrf.mxu1  ;;  %v3314_v55 = vpop.f32.mrf.mxu0  ;;  %6981 = vmatmul.mubr.bf16.gmra.mxu1 %v3751_v50  ;;  %7077 = vmatmul.mubr.bf16.gmra.mxu0 %v4136_v16 }
 0x2fd   : > { %v2892_v14 = vadd.f32 %v2810_v3, %v8801_v45  ;;  %v9287_v22 = vadd.f32 %v3314_v55, %v2890_v53  ;;  %6984 = vmatprep.mubr.msk.bf16.mxu1 %vm7490_vm0, %v9701_v36  ;;  %7080 = vmatprep.mubr.msk.bf16.mxu0 %vm7490_vm0, %v9701_v36  ;;  %v4138_v45 = vsel %vm4101_vm6, %v4135_v58, %v4137_v63  ;;  %v9707_v53 = vld [vmem:[#allocation2_spill] sm:$0xff]  ;;  %v9708_v3 = vld [vmem:[#allocation3_spill] sm:$0xff]  ;;  %v4139_v58 = vrot.slane %v9262_v8, 3 }
 0x2fe   : > { %v6770_v54 = vpop.f32.mrf.mxu1  ;;  %v6866_v21 = vpop.f32.mrf.mxu0 }
 0x300   : > { %v2813_v49 = vpop.f32.mrf.mxu1  ;;  %v3317_v61 = vpop.f32.mrf.mxu0 }
 0x301   : > { %v2893_v32 = vadd.f32 %v2813_v49, %v9707_v53  ;;  %v9298_v37 = vadd.f32 %v3317_v61, %v2891_v38 }
 0x302   : > { %v6771_v50 = vpop.f32.mrf.mxu1  ;;  %v6867_v16 = vpop.f32.mrf.mxu0 }
 0x304   : > { %v2818_v30 = vpop.f32.mrf.mxu1  ;;  %v3322_v27 = vpop.f32.mrf.mxu0  ;;  %6985 = vmatmul.mubr.bf16.gmra.mxu1 %v3760_v31  ;;  %7081 = vmatmul.mubr.bf16.gmra.mxu0 %v4138_v45  ;;  %v4140_v31 = vsel %vm4101_vm6, %v4137_v63, %v4139_v58 }
 0x305   : > { %v2894_v55 = vadd.f32 %v2818_v30, %v9708_v3  ;;  %v9301_v54 = vadd.f32 %v3322_v27, %v2892_v14  ;;  %6988 = vmatprep.mubr.msk.bf16.mxu1 %vm7490_vm0, %v9701_v36  ;;  %7084 = vmatprep.mubr.msk.bf16.mxu0 %vm7490_vm0, %v9701_v36  ;;  %v3769_v14 = vsel %vm3581_vm5, %v3759_v47, %v3768_v2 }
 0x306   : > { %v6774_v38 = vpop.f32.mrf.mxu1  ;;  %v6870_v41 = vpop.f32.mrf.mxu0 }
 0x308   : > { %v2821_v48 = vpop.f32.mrf.mxu1  ;;  %v3325_v21 = vpop.f32.mrf.mxu0 }
 0x309   : > { %v2895_v49 = vadd.f32 %v2821_v48, %v8842_v1  ;;  %v9309_v61 = vadd.f32 %v3325_v21, %v2893_v32  ;;  %v4141_v1 = vrot.slane %v9283_v13, 3 }
 0x30a   : > { %v6775_v45 = vpop.f32.mrf.mxu1  ;;  %v6871_v53 = vpop.f32.mrf.mxu0 }
 0x30b   : > { %v4142_v38 = vsel %vm4101_vm6, %v4139_v58, %v4141_v1 }
 0x30c   : > { %v2826_v50 = vpop.f32.mrf.mxu1  ;;  %v3330_v16 = vpop.f32.mrf.mxu0  ;;  %6989 = vmatmul.mubr.bf16.gmra.mxu1 %v3769_v14  ;;  %7085 = vmatmul.mubr.bf16.gmra.mxu0 %v4140_v31 }
 0x30d   : > { %v2896_v8 = vadd.f32 %v2826_v50, %v9709_v9  ;;  %v9314_v11 = vadd.f32 %v3330_v16, %v2894_v55  ;;  %6992 = vmatprep.mubr.msk.bf16.mxu1 %vm7490_vm0, %v9701_v36  ;;  %7088 = vmatprep.mubr.msk.bf16.mxu0 %vm7490_vm0, %v9701_v36 }
 0x30e   : > { %v6778_v47 = vpop.f32.mrf.mxu1  ;;  %v6874_v63 = vpop.f32.mrf.mxu0 }
 0x310   : > { %v2829_v32 = vpop.f32.mrf.mxu1  ;;  %v3333_v30 = vpop.f32.mrf.mxu0 }
 0x311   : > { %v2897_v27 = vadd.f32 %v2829_v32, %v8867_v56  ;;  %v9322_v3 = vadd.f32 %v3333_v30, %v2895_v49 }
 0x312   : > { %v6779_v55 = vpop.f32.mrf.mxu1  ;;  %v6875_v41 = vpop.f32.mrf.mxu0 }
 0x314   : > { %v2834_v48 = vpop.f32.mrf.mxu1  ;;  %v3338_v21 = vpop.f32.mrf.mxu0  ;;  %6993 = vmatmul.mubr.bf16.gmra.mxu1 %v3768_v2  ;;  %7089 = vmatmul.mubr.bf16.gmra.mxu0 %v4142_v38 }
 0x315   : > { %v2898_v14 = vadd.f32 %v2834_v48, %v8880_v62  ;;  %v9326_v31 = vadd.f32 %v3338_v21, %v2896_v8  ;;  %7092 = vmatprep.mubr.msk.bf16.mxu0 %vm7490_vm0, %v9701_v36 }
 0x316   : > { %v6782_v13 = vpop.f32.mrf.mxu1  ;;  %v6878_v45 = vpop.f32.mrf.mxu0 }
 0x318   : > { %v2837_v56 = vpop.f32.mrf.mxu1  ;;  %v3341_v49 = vpop.f32.mrf.mxu0 }
 0x319   : > { %v2899_v53 = vadd.f32 %v2837_v56, %v8894_v0  ;;  %v9331_v58 = vadd.f32 %v3341_v49, %v2897_v27 }
 0x31a   : > { %v6783_v50 = vpop.f32.mrf.mxu1  ;;  %v6879_v16 = vpop.f32.mrf.mxu0 }
 0x31c   : > { %v2842_v9 = vpop.f32.mrf.mxu1  ;;  %v3346_v2 = vpop.f32.mrf.mxu0  ;;  %7093 = vmatmul.mubr.bf16.gmra.mxu0 %v4141_v1 }
 0x31d   : > { %v2900_v62 = vadd.f32 %v2842_v9, %v8909_v19  ;;  %v9334_v8 = vadd.f32 %v3346_v2, %v2898_v14 }
 0x31e   : > { %v6786_v47 = vpop.f32.mrf.mxu1  ;;  %v6882_v63 = vpop.f32.mrf.mxu0 }
 0x320   : > { %v2845_v36 = vpop.f32.mrf.mxu1  ;;  %v3349_v32 = vpop.f32.mrf.mxu0 }
 0x321   : > { %v2901_v30 = vadd.f32 %v2845_v36, %v8929_v5  ;;  %v9337_v38 = vadd.f32 %v3349_v32, %v2899_v53 }
 0x322   : > { %v6787_v0 = vpop.f32.mrf.mxu1  ;;  %v6883_v27 = vpop.f32.mrf.mxu0 }
 0x324   : > { %v2850_v55 = vpop.f32.mrf.mxu1  ;;  %v3354_v41 = vpop.f32.mrf.mxu0 }
 0x325   : > { %v2902_v48 = vadd.f32 %v2850_v55, %v8940_v43  ;;  %v9340_v21 = vadd.f32 %v3354_v41, %v2900_v62 }
 0x326   : > { %v6790_v1 = vpop.f32.mrf.mxu1  ;;  %v6886_v19 = vpop.f32.mrf.mxu0 }
 0x328   : > { %v2853_v14 = vpop.f32.mrf.mxu1  ;;  %v3357_v13 = vpop.f32.mrf.mxu0 }
 0x329   : > { %v2903_v45 = vadd.f32 %v2853_v14, %v8953_v33  ;;  %v9343_v56 = vadd.f32 %v3357_v13, %v2901_v30 }
 0x32a   : > { %v6791_v49 = vpop.f32.mrf.mxu1  ;;  %v6887_v5 = vpop.f32.mrf.mxu0 }
 0x32c   : > { %v2858_v53 = vpop.f32.mrf.mxu1  ;;  %v3362_v50 = vpop.f32.mrf.mxu0 }
 0x32d   : > { %v2904_v16 = vadd.f32 %v2858_v53, %v8967_v26  ;;  %v9346_v9 = vadd.f32 %v3362_v50, %v2902_v48  ;;  %v9365_v50 = vld [vmem:[%s9357_s6] ss:$0 sm:$0xff] }
 0x32e   : > { %v6794_v2 = vpop.f32.mrf.mxu1  ;;  %v6890_v43 = vpop.f32.mrf.mxu0 }
 0x330   : > { %v2861_v62 = vpop.f32.mrf.mxu1  ;;  %v3365_v47 = vpop.f32.mrf.mxu0 }
 0x331   : > { %v9348_v63 = vadd.f32 %v3365_v47, %v2903_v45  ;;  %v9362_v45 = vld [vmem:[%s9693_s2] ss:$0 sm:$0xff] }
 0x332   : > { %v6795_v36 = vpop.f32.mrf.mxu1  ;;  %v6891_v32 = vpop.f32.mrf.mxu0 }
 0x334   : > { %v3370_v33 = vpop.f32.mrf.mxu0  ;;  %v3873_v30 = vpop.f32.mrf.mxu1 }
 0x335   : > { %v9350_v0 = vadd.f32 %v3370_v33, %v2904_v16  ;;  %v4039_v19 = vadd.f32 %v3873_v30, %v8997_v40 }
 0x336   : > { %v6894_v27 = vpop.f32.mrf.mxu0  ;;  %v6914_v55 = vpop.f32.mrf.mxu1 }
 0x338   : > { %v3373_v41 = vpop.f32.mrf.mxu0  ;;  %v3876_v1 = vpop.f32.mrf.mxu1 }
 0x339   : > { %v4040_v40 = vadd.f32 %v3876_v1, %v9011_v60 }
 0x33a   : > { %v6895_v26 = vpop.f32.mrf.mxu0  ;;  %v6915_v48 = vpop.f32.mrf.mxu1 }
 0x33c   : > { %v3881_v14 = vpop.f32.mrf.mxu1  ;;  %v4246_v13 = vpop.f32.mrf.mxu0 }
 0x33d   : > { %v4412_v49 = vadd.f32 %v4246_v13, %v4039_v19  ;;  %v4041_v33 = vadd.f32 %v3881_v14, %v9026_v4 }
 0x33e   : > { %v6918_v5 = vpop.f32.mrf.mxu1  ;;  %v7014_v53 = vpop.f32.mrf.mxu0 }
 0x33f   : > { %v4460_v16 = vadd.f32 %v9362_v45, %v4412_v49 }
 0x340   : > { %v3884_v2 = vpop.f32.mrf.mxu1  ;;  %v4249_v43 = vpop.f32.mrf.mxu0 }
 0x341   : > { %v4413_v62 = vadd.f32 %v4249_v43, %v4040_v40  ;;  %v9370_v47 = vadd.f32 %v9365_v50, %v4460_v16  ;;  %v4042_v19 = vadd.f32 %v3884_v2, %v9046_v17 }
 0x342   : > { %v6919_v36 = vpop.f32.mrf.mxu1  ;;  %v7015_v32 = vpop.f32.mrf.mxu0 }
 0x343   : > { %v4461_v30 = vadd.f32 %v9362_v45, %v4413_v62  ;;  %v5691_v27 = vmul.f32 -1.442695, %v9370_v47 }
 0x344   : > { %v3889_v55 = vpop.f32.mrf.mxu1  ;;  %v4254_v41 = vpop.f32.mrf.mxu0 }
 0x345   : > { %v4414_v26 = vadd.f32 %v4254_v41, %v4041_v33  ;;  %7288 = vpow2.f32 %v5691_v27  ;;  %v9376_v60 = vadd.f32 %v9365_v50, %v4461_v30  ;;  %v4043_v43 = vadd.f32 %v3889_v55, %v9057_v6 }
 0x346   : > { %v6922_v1 = vpop.f32.mrf.mxu1  ;;  %v7018_v48 = vpop.f32.mrf.mxu0 }
 0x347   : > { %v4462_v13 = vadd.f32 %v9362_v45, %v4414_v26  ;;  %v5692_v49 = vmul.f32 -1.442695, %v9376_v60 }
 0x348   : > { %v3892_v4 = vpop.f32.mrf.mxu1  ;;  %v4257_v14 = vpop.f32.mrf.mxu0 }
 0x349   : > { %v4415_v5 = vadd.f32 %v4257_v14, %v4042_v19  ;;  %7290 = vpow2.f32 %v5692_v49  ;;  %v9382_v53 = vadd.f32 %v9365_v50, %v4462_v13  ;;  %v4044_v41 = vadd.f32 %v3892_v4, %v9071_v28 }
 0x34a   : > { %v6923_v40 = vpop.f32.mrf.mxu1  ;;  %v7019_v16 = vpop.f32.mrf.mxu0 }
 0x34b   : > { %v4463_v62 = vadd.f32 %v9362_v45, %v4415_v5  ;;  %v5693_v36 = vmul.f32 -1.442695, %v9382_v53 }
 0x34c   : > { %v3897_v17 = vpop.f32.mrf.mxu1  ;;  %v4262_v2 = vpop.f32.mrf.mxu0 }
 0x34d   : > { %v4416_v32 = vadd.f32 %v4262_v2, %v4043_v43  ;;  %7292 = vpow2.f32 %v5693_v36  ;;  %v9388_v33 = vadd.f32 %v9365_v50, %v4463_v62  ;;  %v4045_v5 = vadd.f32 %v3897_v17, %v9086_v20 }
 0x34e   : > { %v6926_v30 = vpop.f32.mrf.mxu1  ;;  %v7022_v27 = vpop.f32.mrf.mxu0 }
 0x34f   : > { %v4464_v26 = vadd.f32 %v9362_v45, %v4416_v32  ;;  %v5694_v1 = vmul.f32 -1.442695, %v9388_v33 }
 0x350   : > { %v3900_v6 = vpop.f32.mrf.mxu1  ;;  %v4265_v55 = vpop.f32.mrf.mxu0 }
 0x351   : > { %v4417_v48 = vadd.f32 %v4265_v55, %v4044_v41  ;;  %v9394_v19 = vadd.f32 %v9365_v50, %v4464_v26  ;;  %7294 = vpow2.f32 %v5694_v1  ;;  %v4046_v27 = vadd.f32 %v3900_v6, %v9106_v29 }
 0x352   : > { %v7289_v13 = vpop.eup %7288  ;;  %v6927_v49 = vpop.f32.mrf.mxu1 }
 0x353   : > { %v7023_v14 = vpop.f32.mrf.mxu0  ;;  %v4465_v40 = vadd.f32 %v9362_v45, %v4417_v48  ;;  %v4672_v16 = vadd.f32 1.0, %v7289_v13  ;;  %v5695_v28 = vmul.f32 -1.442695, %v9394_v19 }
 0x354   : > { %v3905_v4 = vpop.f32.mrf.mxu1 }
 0x355   : > { %v4270_v43 = vpop.f32.mrf.mxu0  ;;  %7296 = vrcp.f32 %v4672_v16  ;;  %v9400_v36 = vadd.f32 %v9365_v50, %v4465_v40 }
 0x356   : > { %v4418_v62 = vadd.f32 %v4270_v43, %v4045_v5  ;;  %v7291_v2 = vpop.eup %7290  ;;  %v6930_v32 = vpop.f32.mrf.mxu1  ;;  %7298 = vpow2.f32 %v5695_v28  ;;  %v4047_v5 = vadd.f32 %v3905_v4, %v9117_v15 }
 0x357   : > { %v7026_v30 = vpop.f32.mrf.mxu0  ;;  %v4673_v17 = vadd.f32 1.0, %v7291_v2  ;;  %v5696_v41 = vmul.f32 -1.442695, %v9400_v36  ;;  %v4880_v4 = vpop.permute.xlu0 %4879 }
 0x358   : > { %v4466_v20 = vadd.f32 %v9362_v45, %v4418_v62  ;;  %v3908_v26 = vpop.f32.mrf.mxu1 }
 0x359   : > { %v4273_v1 = vpop.f32.mrf.mxu0  ;;  %7300 = vrcp.f32 %v4673_v17 }
 0x35a   : > { %v4419_v55 = vadd.f32 %v4273_v1, %v4046_v27  ;;  %v9406_v48 = vadd.f32 %v9365_v50, %v4466_v20  ;;  %v7293_v13 = vpop.eup %7292  ;;  %v6931_v49 = vpop.f32.mrf.mxu1  ;;  %7302 = vpow2.f32 %v5696_v41  ;;  %v4048_v27 = vadd.f32 %v3908_v26, %v9131_v7 }
 0x35b   : > { %v7027_v14 = vpop.f32.mrf.mxu0  ;;  %v4674_v6 = vadd.f32 1.0, %v7293_v13 }
 0x35c   : > { %v4467_v29 = vadd.f32 %v9362_v45, %v4419_v55  ;;  %v5697_v40 = vmul.f32 -1.442695, %v9406_v48  ;;  %v3913_v16 = vpop.f32.mrf.mxu1 }
 0x35d   : > { %v4278_v28 = vpop.f32.mrf.mxu0  ;;  %7304 = vrcp.f32 %v4674_v6  ;;  %v4049_v7 = vadd.f32 %v3913_v16, %v9143_v52 }
 0x35e   : > { %v4420_v43 = vadd.f32 %v4278_v28, %v4047_v5  ;;  %v9412_v62 = vadd.f32 %v9365_v50, %v4467_v29  ;;  %v7295_v2 = vpop.eup %7294  ;;  %v6934_v32 = vpop.f32.mrf.mxu1  ;;  %7306 = vpow2.f32 %v5697_v40 }
 0x35f   : > { %v7030_v30 = vpop.f32.mrf.mxu0  ;;  %v4675_v20 = vadd.f32 1.0, %v7295_v2 }
 0x360   : > { %v4468_v15 = vadd.f32 %v9362_v45, %v4420_v43  ;;  %v5698_v17 = vmul.f32 -1.442695, %v9412_v62  ;;  %v3916_v41 = vpop.f32.mrf.mxu1  ;;  %v4885_v30 = vpop.permute.xlu0 %4884 }
 0x361   : > { %v4281_v1 = vpop.f32.mrf.mxu0  ;;  %7308 = vrcp.f32 %v4675_v20  ;;  %v4050_v16 = vadd.f32 %v3916_v41, %v9157_v25 }
 0x362   : > { %v4421_v55 = vadd.f32 %v4281_v1, %v4048_v27  ;;  %v9418_v13 = vadd.f32 %v9365_v50, %v4468_v15  ;;  %v7297_v49 = vpop.eup %7296  ;;  %v6935_v14 = vpop.f32.mrf.mxu1  ;;  %7310 = vpow2.f32 %v5698_v17 }
 0x363   : > { %v7031_v5 = vpop.f32.mrf.mxu0  ;;  %v7299_v29 = vpop.eup %7298  ;;  %v4795_v2 = vmul.f32 %v7297_v49, %v9370_v47 }
 0x364   : > { %v4469_v26 = vadd.f32 %v9362_v45, %v4421_v55  ;;  %v5699_v6 = vmul.f32 -1.442695, %v9418_v13  ;;  %v3921_v40 = vpop.f32.mrf.mxu1  ;;  %v4676_v43 = vadd.f32 1.0, %v7299_v29  ;;  %v4890_v14 = vpop.permute.xlu1 %4889 }
 0x365   : > { %v4286_v28 = vpop.f32.mrf.mxu0 }
 0x366   : > { %v4422_v32 = vadd.f32 %v4286_v28, %v4049_v7  ;;  %7312 = vpow2.f32 %v5699_v6  ;;  %v7301_v27 = vpop.eup %7300  ;;  %v6938_v15 = vpop.f32.mrf.mxu1  ;;  %v9426_v17 = vadd.f32 %v9365_v50, %v4469_v26  ;;  %v5082_v7 = vmul.f32 %v4880_v4, %v4795_v2 }
 0x367   : > { %v7034_v20 = vpop.f32.mrf.mxu0  ;;  %7314 = vrcp.f32 %v4676_v43  ;;  %v7303_v52 = vpop.eup %7302  ;;  %v4796_v55 = vmul.f32 %v7301_v27, %v9376_v60 }
 0x368   : > { %v4470_v1 = vadd.f32 %v9362_v45, %v4422_v32  ;;  %v3924_v47 = vpop.f32.mrf.mxu1  ;;  %v4677_v5 = vadd.f32 1.0, %v7303_v52  ;;  %v5700_v29 = vmul.f32 -1.442695, %v9426_v17  ;;  %v4051_v32 = vadd.f32 %v3921_v40, %v9162_v51 }
 0x369   : > { %v4289_v49 = vpop.f32.mrf.mxu0  ;;  %v5083_v6 = vmul.f32 %v4885_v30, %v4796_v55 }
 0x36a   : > { %v4423_v28 = vadd.f32 %v4289_v49, %v4050_v16  ;;  %v9433_v43 = vadd.f32 %v9365_v50, %v4470_v1  ;;  %v7305_v26 = vpop.eup %7304  ;;  %v6939_v25 = vpop.f32.mrf.mxu1  ;;  %7316 = vrcp.f32 %v4677_v5 }
 0x36b   : > { %v7035_v60 = vpop.f32.mrf.mxu0  ;;  %v7307_v41 = vpop.eup %7306  ;;  %v5819_v27 = vpack.c.bf16 %v5083_v6, %v5082_v7  ;;  %7318 = vpow2.f32 %v5700_v29  ;;  %v4797_v52 = vmul.f32 %v7305_v26, %v9382_v53  ;;  %v4052_v7 = vadd.f32 %v3924_v47, %v9170_v12 }
 0x36c   : > { %v4471_v4 = vadd.f32 %v9362_v45, %v4423_v28  ;;  %v5701_v2 = vmul.f32 -1.442695, %v9433_v43  ;;  %v3929_v30 = vpop.f32.mrf.mxu1  ;;  %v4678_v20 = vadd.f32 1.0, %v7307_v41  ;;  %v4895_v1 = vpop.permute.xlu1 %4894 }
 0x36d   : > { %v4294_v15 = vpop.f32.mrf.mxu0  ;;  %5820 = vst [vmem:[%s9438_s11] sm:$0xff] %v5819_v27   ;;  %v5084_v60 = vmul.f32 %v4890_v14, %v4797_v52  ;;  %v4053_v47 = vadd.f32 %v3929_v30, %v9179_v23 }
 0x36e   : > { %v4424_v16 = vadd.f32 %v4294_v15, %v4051_v32  ;;  %7320 = vpow2.f32 %v5701_v2  ;;  %v7309_v55 = vpop.eup %7308  ;;  %v6942_v49 = vpop.f32.mrf.mxu1  ;;  %v9446_v51 = vadd.f32 %v9365_v50, %v4471_v4 }
 0x36f   : > { %v7038_v5 = vpop.f32.mrf.mxu0  ;;  %7322 = vrcp.f32 %v4678_v20  ;;  %v7311_v40 = vpop.eup %7310  ;;  %v4798_v29 = vmul.f32 %v7309_v55, %v9388_v33 }
 0x370   : > { %v4472_v6 = vadd.f32 %v9362_v45, %v4424_v16  ;;  %v3932_v28 = vpop.f32.mrf.mxu1  ;;  %v4679_v53 = vadd.f32 1.0, %v7311_v40  ;;  %v5702_v26 = vmul.f32 -1.442695, %v9446_v51 }
 0x371   : > { %v4297_v25 = vpop.f32.mrf.mxu0  ;;  %v5085_v41 = vmul.f32 %v4895_v1, %v4798_v29  ;;  %v4054_v30 = vadd.f32 %v3932_v28, %v9193_v42 }
 0x372   : > { %v4425_v32 = vadd.f32 %v4297_v25, %v4052_v7  ;;  %v9453_v27 = vadd.f32 %v9365_v50, %v4472_v6  ;;  %v6943_v2 = vpop.f32.mrf.mxu1  ;;  %7324 = vrcp.f32 %v4679_v53 }
 0x373   : > { %v7313_v4 = vpop.eup %7312  ;;  %v7039_v15 = vpop.f32.mrf.mxu0  ;;  %v5824_v33 = vpack.c.bf16 %v5085_v41, %v5084_v60  ;;  %7326 = vpow2.f32 %v5702_v26 }
 0x374   : > { %v7315_v12 = vpop.eup %7314  ;;  %v4473_v20 = vadd.f32 %v9362_v45, %v4425_v32  ;;  %v5703_v16 = vmul.f32 -1.442695, %v9453_v27  ;;  %v3937_v55 = vpop.f32.mrf.mxu1  ;;  %v4680_v52 = vadd.f32 1.0, %v7313_v4 }
 0x375   : > { %v4302_v14 = vpop.f32.mrf.mxu0  ;;  %5916 = vst [vmem:[%s9438_s11 + $0x8] sm:$0xff] %v5824_v33   ;;  %v4799_v5 = vmul.f32 %v7315_v12, %v9394_v19  ;;  %v4900_v41 = vpop.permute.xlu0 %4899 }
 0x376   : > { %v4426_v1 = vadd.f32 %v4302_v14, %v4053_v47  ;;  %v9460_v49 = vadd.f32 %v9365_v50, %v4473_v20  ;;  %v6946_v40 = vpop.f32.mrf.mxu1  ;;  %7328 = vpow2.f32 %v5703_v16  ;;  %v4905_v32 = vpop.permute.xlu1 %4904 }
 0x377   : > { %v7042_v7 = vpop.f32.mrf.mxu0  ;;  %v7317_v23 = vpop.eup %7316  ;;  %7330 = vrcp.f32 %v4680_v52  ;;  %v5086_v15 = vmul.f32 %v4900_v41, %v4799_v5 }
 0x378   : > { %v4474_v6 = vadd.f32 %v9362_v45, %v4426_v1  ;;  %v5704_v29 = vmul.f32 -1.442695, %v9460_v49  ;;  %v4800_v25 = vmul.f32 %v7317_v23, %v9400_v36  ;;  %v3940_v53 = vpop.f32.mrf.mxu1  ;;  %v7319_v60 = vpop.eup %7318  ;;  %v4055_v36 = vadd.f32 %v3937_v55, %v9198_v24 }
 0x379   : > { %v4305_v26 = vpop.f32.mrf.mxu0  ;;  %v4681_v47 = vadd.f32 1.0, %v7319_v60  ;;  %v4056_v55 = vadd.f32 %v3940_v53, %v9206_v34 }
 0x37a   : > { %v4427_v4 = vadd.f32 %v4305_v26, %v4054_v30  ;;  %v9468_v19 = vadd.f32 %v9365_v50, %v4474_v6  ;;  %7332 = vpow2.f32 %v5704_v29  ;;  %v5087_v42 = vmul.f32 %v4905_v32, %v4800_v25  ;;  %v6947_v28 = vpop.f32.mrf.mxu1 }
 0x37b   : > { %v7321_v2 = vpop.eup %7320  ;;  %v7043_v12 = vpop.f32.mrf.mxu0  ;;  %7334 = vrcp.f32 %v4681_v47 }
 0x37c   : > { %v7323_v33 = vpop.eup %7322  ;;  %v4475_v20 = vadd.f32 %v9362_v45, %v4427_v4  ;;  %v5705_v16 = vmul.f32 -1.442695, %v9468_v19  ;;  %v5829_v14 = vpack.c.bf16 %v5087_v42, %v5086_v15  ;;  %v4682_v52 = vadd.f32 1.0, %v7321_v2  ;;  %v3945_v1 = vpop.f32.mrf.mxu1 }
 0x37d   : > { %v4310_v40 = vpop.f32.mrf.mxu0  ;;  %v4801_v23 = vmul.f32 %v7323_v33, %v9406_v48  ;;  %v4910_v4 = vpop.permute.xlu0 %4909 }
 0x37e   : > { %v4428_v7 = vadd.f32 %v4310_v40, %v4055_v36  ;;  %v9474_v5 = vadd.f32 %v9365_v50, %v4475_v20  ;;  %5917 = vst [vmem:[%s9438_s11 + $0x10] sm:$0xff] %v5829_v14   ;;  %v6950_v30 = vpop.f32.mrf.mxu1  ;;  %7336 = vpow2.f32 %v5705_v16  ;;  %v4915_v2 = vpop.permute.xlu1 %4914 }
 0x37f   : > { %v7046_v6 = vpop.f32.mrf.mxu0  ;;  %v7325_v24 = vpop.eup %7324  ;;  %7338 = vrcp.f32 %v4682_v52  ;;  %v5088_v42 = vmul.f32 %v4910_v4, %v4801_v23 }
 0x380   : > { %v4476_v29 = vadd.f32 %v9362_v45, %v4428_v7  ;;  %v5706_v25 = vmul.f32 -1.442695, %v9474_v5  ;;  %v4802_v26 = vmul.f32 %v7325_v24, %v9412_v62  ;;  %v3948_v60 = vpop.f32.mrf.mxu1  ;;  %v7327_v32 = vpop.eup %7326  ;;  %v4057_v62 = vadd.f32 %v3945_v1, %v9215_v44 }
 0x381   : > { %v4313_v41 = vpop.f32.mrf.mxu0  ;;  %v4683_v34 = vadd.f32 1.0, %v7327_v32  ;;  %v4058_v44 = vadd.f32 %v3948_v60, %v9229_v35  ;;  %v4920_v60 = vpop.permute.xlu0 %4919 }
 0x382   : > { %v4429_v48 = vadd.f32 %v4313_v41, %v4056_v55  ;;  %v9483_v15 = vadd.f32 %v9365_v50, %v4476_v29  ;;  %7340 = vpow2.f32 %v5706_v25  ;;  %v5089_v28 = vmul.f32 %v4915_v2, %v4802_v26  ;;  %v6951_v53 = vpop.f32.mrf.mxu1 }
 0x383   : > { %v7047_v12 = vpop.f32.mrf.mxu0  ;;  %v7329_v47 = vpop.eup %7328  ;;  %7342 = vrcp.f32 %v4683_v34 }
 0x384   : > { %v4477_v33 = vadd.f32 %v9362_v45, %v4429_v48  ;;  %v5707_v36 = vmul.f32 -1.442695, %v9483_v15  ;;  %v5834_v20 = vpack.c.bf16 %v5089_v28, %v5088_v42  ;;  %v4684_v16 = vadd.f32 1.0, %v7329_v47  ;;  %v3953_v14 = vpop.f32.mrf.mxu1  ;;  %v7331_v40 = vpop.eup %7330 }
 0x385   : > { %v4318_v52 = vpop.f32.mrf.mxu0  ;;  %v4803_v29 = vmul.f32 %v7331_v40, %v9418_v13  ;;  %v4925_v34 = vpop.permute.xlu1 %4924  ;;  %v4059_v13 = vadd.f32 %v3953_v14, %v9234_v10 }
 0x386   : > { %v4430_v7 = vadd.f32 %v4318_v52, %v4057_v62  ;;  %7344 = vpow2.f32 %v5707_v36  ;;  %5918 = vst [vmem:[%s9438_s11 + $0x18] sm:$0xff] %v5834_v20   ;;  %v6954_v30 = vpop.f32.mrf.mxu1  ;;  %v9490_v24 = vadd.f32 %v9365_v50, %v4477_v33 }
 0x387   : > { %v7333_v23 = vpop.eup %7332  ;;  %7346 = vrcp.f32 %v4684_v16  ;;  %v7050_v6 = vpop.f32.mrf.mxu0  ;;  %v5090_v47 = vmul.f32 %v4920_v60, %v4803_v29 }
 0x388   : > { %v4478_v1 = vadd.f32 %v9362_v45, %v4430_v7  ;;  %v4685_v55 = vadd.f32 1.0, %v7333_v23  ;;  %v3956_v25 = vpop.f32.mrf.mxu1  ;;  %v5708_v41 = vmul.f32 -1.442695, %v9490_v24  ;;  %v7335_v32 = vpop.eup %7334 }
 0x389   : > { %v4321_v26 = vpop.f32.mrf.mxu0  ;;  %v4804_v48 = vmul.f32 %v7335_v32, %v9426_v17  ;;  %v4060_v14 = vadd.f32 %v3956_v25, %v9242_v57  ;;  %v4935_v32 = vpop.permute.xlu1 %4934 }
 0x38a   : > { %7348 = vrcp.f32 %v4685_v55  ;;  %v4431_v4 = vadd.f32 %v4321_v26, %v4058_v44  ;;  %v9497_v2 = vadd.f32 %v9365_v50, %v4478_v1  ;;  %v6955_v42 = vpop.f32.mrf.mxu1 }
 0x38b   : > { %v7051_v28 = vpop.f32.mrf.mxu0  ;;  %7350 = vpow2.f32 %v5708_v41  ;;  %v7337_v35 = vpop.eup %7336  ;;  %v5091_v62 = vmul.f32 %v4925_v34, %v4804_v48 }
 0x38c   : > { %v4479_v53 = vadd.f32 %v9362_v45, %v4431_v4  ;;  %v5709_v12 = vmul.f32 -1.442695, %v9497_v2  ;;  %v4686_v33 = vadd.f32 1.0, %v7337_v35  ;;  %v3961_v36 = vpop.f32.mrf.mxu1  ;;  %v7339_v16 = vpop.eup %7338 }
 0x38d   : > { %v4326_v20 = vpop.f32.mrf.mxu0  ;;  %v5839_v40 = vpack.c.bf16 %v5091_v62, %v5090_v47  ;;  %v4805_v44 = vmul.f32 %v7339_v16, %v9433_v43  ;;  %v4930_v41 = vpop.permute.xlu0 %4929  ;;  %v4061_v60 = vadd.f32 %v3961_v36, %v9251_v59 }
 0x38e   : > { %7352 = vpow2.f32 %v5709_v12  ;;  %v4432_v17 = vadd.f32 %v4326_v20, %v4059_v13  ;;  %v6958_v7 = vpop.f32.mrf.mxu1  ;;  %v9504_v10 = vadd.f32 %v9365_v50, %v4479_v53 }
 0x38f   : > { %v7341_v52 = vpop.eup %7340  ;;  %7354 = vrcp.f32 %v4686_v33  ;;  %v7054_v23 = vpop.f32.mrf.mxu0  ;;  %5919 = vst [vmem:[%s9438_s11 + $0x20] sm:$0xff] %v5839_v40   ;;  %v5092_v53 = vmul.f32 %v4930_v41, %v4805_v44 }
 0x390   : > { %v4687_v30 = vadd.f32 1.0, %v7341_v52  ;;  %v4480_v6 = vadd.f32 %v9362_v45, %v4432_v17  ;;  %v3964_v1 = vpop.f32.mrf.mxu1  ;;  %v5710_v29 = vmul.f32 -1.442695, %v9504_v10  ;;  %v7343_v26 = vpop.eup %7342 }
 0x391   : > { %v4329_v55 = vpop.f32.mrf.mxu0  ;;  %v4806_v57 = vmul.f32 %v7343_v26, %v9446_v51  ;;  %v4940_v40 = vpop.permute.xlu0 %4939 }
 0x392   : > { %7356 = vrcp.f32 %v4687_v30  ;;  %v9512_v4 = vadd.f32 %v9365_v50, %v4480_v6  ;;  %v4433_v48 = vadd.f32 %v4329_v55, %v4060_v14  ;;  %v6959_v25 = vpop.f32.mrf.mxu1  ;;  %v4945_v7 = vpop.permute.xlu1 %4944  ;;  %v4062_v6 = vadd.f32 %v3964_v1, %v9265_v46 }
 0x393   : > { %v7345_v42 = vpop.eup %7344  ;;  %7358 = vpow2.f32 %v5710_v29  ;;  %v7055_v28 = vpop.f32.mrf.mxu0  ;;  %v5093_v12 = vmul.f32 %v4935_v32, %v4806_v57 }
 0x394   : > { %v7347_v43 = vpop.eup %7346  ;;  %v4688_v35 = vadd.f32 1.0, %v7345_v42  ;;  %v5711_v34 = vmul.f32 -1.442695, %v9512_v4  ;;  %v4481_v13 = vadd.f32 %v9362_v45, %v4433_v48  ;;  %v3969_v47 = vpop.f32.mrf.mxu1 }
 0x395   : > { %v4334_v62 = vpop.f32.mrf.mxu0  ;;  %v4807_v33 = vmul.f32 %v7347_v43, %v9453_v27  ;;  %v5844_v17 = vpack.c.bf16 %v5093_v12, %v5092_v53  ;;  %v4063_v43 = vadd.f32 %v3969_v47, %v9270_v39  ;;  %v4950_v39 = vpop.permute.xlu0 %4949 }
 0x396   : > { %7360 = vrcp.f32 %v4688_v35  ;;  %v4434_v51 = vadd.f32 %v4334_v62, %v4061_v60  ;;  %v9520_v20 = vadd.f32 %v9365_v50, %v4481_v13  ;;  %v6962_v59 = vpop.f32.mrf.mxu1  ;;  %v4955_v47 = vpop.permute.xlu1 %4954 }
 0x397   : > { %v7349_v16 = vpop.eup %7348  ;;  %7362 = vpow2.f32 %v5711_v34  ;;  %v7058_v36 = vpop.f32.mrf.mxu0  ;;  %5920 = vst [vmem:[%s9438_s11 + $0x28] sm:$0xff] %v5844_v17   ;;  %v5094_v29 = vmul.f32 %v4940_v40, %v4807_v33 }
 0x398   : > { %v7351_v52 = vpop.eup %7350  ;;  %v4808_v23 = vmul.f32 %v7349_v16, %v9460_v49  ;;  %v4482_v14 = vadd.f32 %v9362_v45, %v4434_v51  ;;  %v5712_v30 = vmul.f32 -1.442695, %v9520_v20  ;;  %v3972_v44 = vpop.f32.mrf.mxu1 }
 0x399   : > { %v4689_v27 = vadd.f32 1.0, %v7351_v52  ;;  %v4337_v55 = vpop.f32.mrf.mxu0  ;;  %v4064_v17 = vadd.f32 %v3972_v44, %v9278_v18 }
 0x39a   : > { %v5095_v26 = vmul.f32 %v4945_v7, %v4808_v23  ;;  %v9528_v41 = vadd.f32 %v9365_v50, %v4482_v14  ;;  %7364 = vpow2.f32 %v5712_v30  ;;  %v4435_v49 = vadd.f32 %v4337_v55, %v4062_v6  ;;  %v6963_v48 = vpop.f32.mrf.mxu1 }
 0x39b   : > { %v7353_v32 = vpop.eup %7352  ;;  %7366 = vrcp.f32 %v4689_v27  ;;  %v7059_v42 = vpop.f32.mrf.mxu0 }
 0x39c   : > { %v7355_v57 = vpop.eup %7354  ;;  %v5849_v25 = vpack.c.bf16 %v5095_v26, %v5094_v29  ;;  %v4690_v28 = vadd.f32 1.0, %v7353_v32  ;;  %v5713_v46 = vmul.f32 -1.442695, %v9528_v41  ;;  %v4483_v1 = vadd.f32 %v9362_v45, %v4435_v49  ;;  %v3977_v35 = vpop.f32.mrf.mxu1 }
 0x39d   : > { %v4342_v60 = vpop.f32.mrf.mxu0  ;;  %v4809_v34 = vmul.f32 %v7355_v57, %v9468_v19  ;;  %v4065_v44 = vadd.f32 %v3977_v35, %v9287_v22 }
 0x39e   : > { %5921 = vst [vmem:[%s9438_s11 + $0x30] sm:$0xff] %v5849_v25   ;;  %7368 = vrcp.f32 %v4690_v28  ;;  %v4436_v13 = vadd.f32 %v4342_v60, %v4063_v43  ;;  %v9536_v12 = vadd.f32 %v9365_v50, %v4483_v1  ;;  %v6966_v62 = vpop.f32.mrf.mxu1 }
 0x39f   : > { %v7357_v53 = vpop.eup %7356  ;;  %7370 = vpow2.f32 %v5713_v46  ;;  %v7062_v33 = vpop.f32.mrf.mxu0  ;;  %v5096_v7 = vmul.f32 %v4950_v39, %v4809_v34 }
 0x3a0   : > { %v7359_v51 = vpop.eup %7358  ;;  %v4810_v16 = vmul.f32 %v7357_v53, %v9474_v5  ;;  %v4484_v59 = vadd.f32 %v9362_v45, %v4436_v13  ;;  %v5714_v36 = vmul.f32 -1.442695, %v9536_v12  ;;  %v3980_v52 = vpop.f32.mrf.mxu1 }
 0x3a1   : > { %v4691_v19 = vadd.f32 1.0, %v7359_v51  ;;  %v4345_v40 = vpop.f32.mrf.mxu0  ;;  %v4066_v35 = vadd.f32 %v3980_v52, %v9298_v37  ;;  %v4960_v33 = vpop.permute.xlu0 %4959 }
 0x3a2   : > { %v5097_v23 = vmul.f32 %v4955_v47, %v4810_v16  ;;  %v9543_v14 = vadd.f32 %v9365_v50, %v4484_v59  ;;  %v4437_v30 = vadd.f32 %v4345_v40, %v4064_v17  ;;  %v6967_v6 = vpop.f32.mrf.mxu1 }
 0x3a3   : > { %v7361_v27 = vpop.eup %7360  ;;  %7372 = vrcp.f32 %v4691_v19  ;;  %v7063_v5 = vpop.f32.mrf.mxu0 }
 0x3a4   : > { %v7363_v55 = vpop.eup %7362  ;;  %v5854_v18 = vpack.c.bf16 %v5097_v23, %v5096_v7  ;;  %7374 = vpow2.f32 %v5714_v36  ;;  %v5715_v29 = vmul.f32 -1.442695, %v9543_v14  ;;  %v4485_v32 = vadd.f32 %v9362_v45, %v4437_v30  ;;  %v3985_v49 = vpop.f32.mrf.mxu1 }
 0x3a5   : > { %v4692_v26 = vadd.f32 1.0, %v7363_v55  ;;  %v4350_v48 = vpop.f32.mrf.mxu0  ;;  %v4811_v25 = vmul.f32 %v7361_v27, %v9483_v15  ;;  %v4965_v15 = vpop.permute.xlu1 %4964  ;;  %v4067_v7 = vadd.f32 %v3985_v49, %v9301_v54 }
 0x3a6   : > { %5922 = vst [vmem:[%s9438_s11 + $0x38] sm:$0xff] %v5854_v18   ;;  %7376 = vpow2.f32 %v5715_v29  ;;  %v4438_v42 = vadd.f32 %v4350_v48, %v4065_v44  ;;  %v9551_v28 = vadd.f32 %v9365_v50, %v4485_v32  ;;  %v6970_v43 = vpop.f32.mrf.mxu1 }
 0x3a7   : > { %v7365_v57 = vpop.eup %7364  ;;  %7378 = vrcp.f32 %v4692_v26  ;;  %v7066_v46 = vpop.f32.mrf.mxu0  ;;  %v5098_v16 = vmul.f32 %v4960_v33, %v4811_v25 }
 0x3a8   : > { %v7367_v22 = vpop.eup %7366  ;;  %v4693_v1 = vadd.f32 1.0, %v7365_v57  ;;  %v4486_v60 = vadd.f32 %v9362_v45, %v4438_v42  ;;  %v5716_v13 = vmul.f32 -1.442695, %v9551_v28  ;;  %v3988_v53 = vpop.f32.mrf.mxu1 }
 0x3a9   : > { %v4812_v34 = vmul.f32 %v7367_v22, %v9490_v24  ;;  %v4353_v62 = vpop.f32.mrf.mxu0  ;;  %v4068_v29 = vadd.f32 %v3988_v53, %v9309_v61  ;;  %v4970_v57 = vpop.permute.xlu0 %4969 }
 0x3aa   : > { %7380 = vrcp.f32 %v4693_v1  ;;  %v9558_v51 = vadd.f32 %v9365_v50, %v4486_v60  ;;  %v4439_v39 = vadd.f32 %v4353_v62, %v4066_v35  ;;  %v6971_v37 = vpop.f32.mrf.mxu1  ;;  %v4975_v25 = vpop.permute.xlu1 %4974 }
 0x3ab   : > { %v7369_v47 = vpop.eup %7368  ;;  %v5099_v17 = vmul.f32 %v4965_v15, %v4812_v34  ;;  %7382 = vpow2.f32 %v5716_v13  ;;  %v7067_v59 = vpop.f32.mrf.mxu0 }
 0x3ac   : > { %v7371_v19 = vpop.eup %7370  ;;  %v5717_v24 = vmul.f32 -1.442695, %v9558_v51  ;;  %v4487_v36 = vadd.f32 %v9362_v45, %v4439_v39  ;;  %v3993_v23 = vpop.f32.mrf.mxu1  ;;  %v4813_v6 = vmul.f32 %v7369_v47, %v9497_v2 }
 0x3ad   : > { %v5859_v52 = vpack.c.bf16 %v5099_v17, %v5098_v16  ;;  %v4694_v40 = vadd.f32 1.0, %v7371_v19  ;;  %v4358_v30 = vpop.f32.mrf.mxu0  ;;  %v4069_v13 = vadd.f32 %v3993_v23, %v9314_v11 }
 0x3ae   : > { %7384 = vpow2.f32 %v5717_v24  ;;  %v9564_v27 = vadd.f32 %v9365_v50, %v4487_v36  ;;  %v4440_v5 = vadd.f32 %v4358_v30, %v4067_v7  ;;  %v6974_v55 = vpop.f32.mrf.mxu1  ;;  %v5100_v22 = vmul.f32 %v4970_v57, %v4813_v6  ;;  %v4980_v24 = vpop.permute.xlu0 %4979 }
 0x3af   : > { %5923 = vst [vmem:[%s9438_s11 + $0x40] sm:$0xff] %v5859_v52   ;;  %v7070_v18 = vpop.f32.mrf.mxu0  ;;  %7386 = vrcp.f32 %v4694_v40  ;;  %v4985_v36 = vpop.permute.xlu1 %4984 }
 0x3b0   : > { %v7373_v44 = vpop.eup %7372  ;;  %v5718_v26 = vmul.f32 -1.442695, %v9564_v27  ;;  %v4488_v49 = vadd.f32 %v9362_v45, %v4440_v5  ;;  %v3996_v48 = vpop.f32.mrf.mxu1 }
 0x3b1   : > { %v7375_v32 = vpop.eup %7374  ;;  %v4814_v54 = vmul.f32 %v7373_v44, %v9504_v10  ;;  %v4361_v42 = vpop.f32.mrf.mxu0  ;;  %v4070_v23 = vadd.f32 %v3996_v48, %v9322_v3 }
 0x3b2   : > { %v4695_v2 = vadd.f32 1.0, %v7375_v32  ;;  %7388 = vpow2.f32 %v5718_v26  ;;  %v4441_v43 = vadd.f32 %v4361_v42, %v4068_v29  ;;  %v9573_v35 = vadd.f32 %v9365_v50, %v4488_v49  ;;  %v6975_v61 = vpop.f32.mrf.mxu1 }
 0x3b3   : > { %v7377_v46 = vpop.eup %7376  ;;  %v5101_v1 = vmul.f32 %v4975_v25, %v4814_v54  ;;  %v7071_v60 = vpop.f32.mrf.mxu0 }
 0x3b4   : > { %v7379_v34 = vpop.eup %7378  ;;  %7390 = vrcp.f32 %v4695_v2  ;;  %v4696_v10 = vadd.f32 1.0, %v7377_v46  ;;  %v4489_v53 = vadd.f32 %v9362_v45, %v4441_v43  ;;  %v5719_v33 = vmul.f32 -1.442695, %v9573_v35  ;;  %v4001_v15 = vpop.f32.mrf.mxu1 }
 0x3b5   : > { %v5864_v62 = vpack.c.bf16 %v5101_v1, %v5100_v22  ;;  %v4366_v39 = vpop.f32.mrf.mxu0  ;;  %v4815_v47 = vmul.f32 %v7379_v34, %v9512_v4  ;;  %v4071_v49 = vadd.f32 %v4001_v15, %v9326_v31 }
 0x3b6   : > { %7392 = vrcp.f32 %v4696_v10  ;;  %v9580_v16 = vadd.f32 %v9365_v50, %v4489_v53  ;;  %v4442_v17 = vadd.f32 %v4366_v39, %v4069_v13  ;;  %v6978_v59 = vpop.f32.mrf.mxu1 }
 0x3b7   : > { %v7381_v37 = vpop.eup %7380  ;;  %5924 = vst [vmem:[%s9438_s11 + $0x48] sm:$0xff] %v5864_v62   ;;  %7394 = vpow2.f32 %v5719_v33  ;;  %v7074_v19 = vpop.f32.mrf.mxu0  ;;  %v5102_v5 = vmul.f32 %v4980_v24, %v4815_v47 }
 0x3b8   : > { %v7383_v11 = vpop.eup %7382  ;;  %v4816_v52 = vmul.f32 %v7381_v37, %v9520_v20  ;;  %v5720_v40 = vmul.f32 -1.442695, %v9580_v16  ;;  %v4490_v7 = vadd.f32 %v9362_v45, %v4442_v17  ;;  %v4004_v30 = vpop.f32.mrf.mxu1 }
 0x3b9   : > { %v4697_v4 = vadd.f32 1.0, %v7383_v11  ;;  %v4369_v6 = vpop.f32.mrf.mxu0  ;;  %v4072_v10 = vadd.f32 %v4004_v30, %v9331_v58  ;;  %v4990_v62 = vpop.permute.xlu0 %4989 }
 0x3ba   : > { %v5103_v55 = vmul.f32 %v4985_v36, %v4816_v52  ;;  %7396 = vpow2.f32 %v5720_v40  ;;  %v9588_v18 = vadd.f32 %v9365_v50, %v4490_v7  ;;  %v4443_v29 = vadd.f32 %v4369_v6, %v4070_v23  ;;  %v6979_v20 = vpop.f32.mrf.mxu1  ;;  %v4995_v33 = vpop.permute.xlu1 %4994 }
 0x3bb   : > { %v7385_v44 = vpop.eup %7384  ;;  %7398 = vrcp.f32 %v4697_v4  ;;  %v7075_v26 = vpop.f32.mrf.mxu0 }
 0x3bc   : > { %v5869_v32 = vpack.c.bf16 %v5103_v55, %v5102_v5  ;;  %v4698_v54 = vadd.f32 1.0, %v7385_v44  ;;  %v5721_v3 = vmul.f32 -1.442695, %v9588_v18  ;;  %v7387_v48 = vpop.eup %7386  ;;  %v4491_v42 = vadd.f32 %v9362_v45, %v4443_v29  ;;  %v4009_v57 = vpop.f32.mrf.mxu1  ;;  %v9601_v45 = vld [vmem:[%s9693_s2] ss:$0 sm:$0xff] }
 0x3bd   : > { %v4374_v25 = vpop.f32.mrf.mxu0  ;;  %v4817_v31 = vmul.f32 %v7387_v48, %v9528_v41  ;;  %v9608_v41 = vld [vmem:[%s9357_s6] ss:$0 sm:$0xff] }
 0x3be   : > { %5925 = vst [vmem:[%s9438_s11 + $0x50] sm:$0xff] %v5869_v32   ;;  %7400 = vrcp.f32 %v4698_v54  ;;  %v4444_v2 = vadd.f32 %v4374_v25, %v4071_v49  ;;  %v9595_v46 = vadd.f32 %v9365_v50, %v4491_v42  ;;  %v6982_v22 = vpop.f32.mrf.mxu1  ;;  %v5005_v48 = vpop.permute.xlu1 %5004 }
 0x3bf   : > { %v7389_v43 = vpop.eup %7388  ;;  %7402 = vpow2.f32 %v5721_v3  ;;  %v7078_v1 = vpop.f32.mrf.mxu0  ;;  %v5104_v19 = vmul.f32 %v4990_v62, %v4817_v31 }
 0x3c0   : > { %v4699_v61 = vadd.f32 1.0, %v7389_v43  ;;  %v4492_v60 = vadd.f32 %v9601_v45, %v4444_v2  ;;  %v5722_v13 = vmul.f32 -1.442695, %v9595_v46  ;;  %v4012_v50 = vpop.f32.mrf.mxu1  ;;  %v5000_v3 = vpop.permute.xlu0 %4999 }
 0x3c1   : > { %v7391_v34 = vpop.eup %7390  ;;  %v4377_v53 = vpop.f32.mrf.mxu0 }
 0x3c2   : > { %v4818_v15 = vmul.f32 %v7391_v34, %v9536_v12  ;;  %7404 = vrcp.f32 %v4699_v61  ;;  %v9611_v39 = vadd.f32 %v9608_v41, %v4492_v60  ;;  %v4445_v17 = vadd.f32 %v4377_v53, %v4072_v10  ;;  %v6983_v37 = vpop.f32.mrf.mxu1 }
 0x3c3   : > { %v7393_v47 = vpop.eup %7392  ;;  %7406 = vpow2.f32 %v5722_v13  ;;  %v7079_v59 = vpop.f32.mrf.mxu0  ;;  %v4073_v12 = vadd.f32 %v4009_v57, %v9334_v8  ;;  %v4074_v8 = vadd.f32 %v4012_v50, %v9337_v38 }
 0x3c4   : > { %v7395_v58 = vpop.eup %7394  ;;  %v5105_v11 = vmul.f32 %v4995_v33, %v4818_v15  ;;  %v5723_v24 = vmul.f32 -1.442695, %v9611_v39  ;;  %v4493_v52 = vadd.f32 %v9601_v45, %v4445_v17  ;;  %v4017_v40 = vpop.f32.mrf.mxu1  ;;  %v4819_v30 = vmul.f32 %v7393_v47, %v9543_v14 }
 0x3c5   : > { %v4700_v36 = vadd.f32 1.0, %v7395_v58  ;;  %v4382_v7 = vpop.f32.mrf.mxu0  ;;  %v4075_v1 = vadd.f32 %v4017_v40, %v9340_v21  ;;  %v5010_v17 = vpop.permute.xlu0 %5009 }
 0x3c6   : > { %v5874_v4 = vpack.c.bf16 %v5105_v11, %v5104_v19  ;;  %7408 = vpow2.f32 %v5723_v24  ;;  %v9618_v6 = vadd.f32 %v9608_v41, %v4493_v52  ;;  %v4446_v5 = vadd.f32 %v4382_v7, %v4073_v12  ;;  %v6986_v55 = vpop.f32.mrf.mxu1  ;;  %v5015_v37 = vpop.permute.xlu1 %5014 }
 0x3c7   : > { %v7397_v23 = vpop.eup %7396  ;;  %7410 = vrcp.f32 %v4700_v36  ;;  %v7082_v44 = vpop.f32.mrf.mxu0  ;;  %v5106_v25 = vmul.f32 %v5000_v3, %v4819_v30 }
 0x3c8   : > { %v7399_v29 = vpop.eup %7398  ;;  %5926 = vst [vmem:[%s9438_s11 + $0x58] sm:$0xff] %v5874_v4   ;;  %v4701_v20 = vadd.f32 1.0, %v7397_v23  ;;  %v5724_v32 = vmul.f32 -1.442695, %v9618_v6  ;;  %v4494_v54 = vadd.f32 %v9601_v45, %v4446_v5  ;;  %v4020_v49 = vpop.f32.mrf.mxu1 }
 0x3c9   : > { %v4820_v26 = vmul.f32 %v7399_v29, %v9551_v28  ;;  %v4385_v14 = vpop.f32.mrf.mxu0  ;;  %v4076_v11 = vadd.f32 %v4020_v49, %v9343_v56 }
 0x3ca   : > { %7412 = vrcp.f32 %v4701_v20  ;;  %v4447_v42 = vadd.f32 %v4385_v14, %v4074_v8  ;;  %v9626_v43 = vadd.f32 %v9608_v41, %v4494_v54  ;;  %v6987_v38 = vpop.f32.mrf.mxu1 }
 0x3cb   : > { %v7401_v57 = vpop.eup %7400  ;;  %v5107_v2 = vmul.f32 %v5005_v48, %v4820_v26  ;;  %7414 = vpow2.f32 %v5724_v32  ;;  %v7083_v28 = vpop.f32.mrf.mxu0 }
 0x3cc   : > { %v7403_v22 = vpop.eup %7402  ;;  %v4495_v31 = vadd.f32 %v9601_v45, %v4447_v42  ;;  %v5725_v34 = vmul.f32 -1.442695, %v9626_v43  ;;  %v4025_v10 = vpop.f32.mrf.mxu1  ;;  %v4821_v50 = vmul.f32 %v7401_v57, %v9558_v51 }
 0x3cd   : > { %v5879_v61 = vpack.c.bf16 %v5107_v2, %v5106_v25  ;;  %v4702_v60 = vadd.f32 1.0, %v7403_v22  ;;  %v4390_v13 = vpop.f32.mrf.mxu0  ;;  %v4077_v44 = vadd.f32 %v4025_v10, %v9346_v9  ;;  %v5020_v9 = vpop.permute.xlu0 %5019 }
 0x3ce   : > { %v9633_v53 = vadd.f32 %v9608_v41, %v4495_v31  ;;  %v4448_v62 = vadd.f32 %v4390_v13, %v4075_v1  ;;  %v6990_v15 = vpop.f32.mrf.mxu1  ;;  %v5108_v12 = vmul.f32 %v5010_v17, %v4821_v50  ;;  %v5025_v42 = vpop.permute.xlu1 %5024 }
 0x3cf   : > { %v7405_v33 = vpop.eup %7404  ;;  %5927 = vst [vmem:[%s9438_s11 + $0x60] sm:$0xff] %v5879_v61   ;;  %7416 = vrcp.f32 %v4702_v60  ;;  %v7086_v47 = vpop.f32.mrf.mxu0 }
 0x3d0   : > { %v7407_v21 = vpop.eup %7406  ;;  %v4822_v59 = vmul.f32 %v7405_v33, %v9564_v27  ;;  %7418 = vpow2.f32 %v5725_v34  ;;  %v5726_v58 = vmul.f32 -1.442695, %v9633_v53  ;;  %v4496_v19 = vadd.f32 %v9601_v45, %v4448_v62  ;;  %v4028_v24 = vpop.f32.mrf.mxu1 }
 0x3d1   : > { %v4703_v51 = vadd.f32 1.0, %v7407_v21  ;;  %v4393_v36 = vpop.f32.mrf.mxu0  ;;  %v4078_v25 = vadd.f32 %v4028_v24, %v9348_v63 }
 0x3d2   : > { %v5109_v52 = vmul.f32 %v5015_v37, %v4822_v59  ;;  %7420 = vpow2.f32 %v5726_v58  ;;  %v9641_v40 = vadd.f32 %v9608_v41, %v4496_v19  ;;  %v4449_v27 = vadd.f32 %v4393_v36, %v4076_v11  ;;  %v6991_v4 = vpop.f32.mrf.mxu1 }
 0x3d3   : > { %v7409_v7 = vpop.eup %7408  ;;  %7422 = vrcp.f32 %v4703_v51  ;;  %v7087_v23 = vpop.f32.mrf.mxu0 }
 0x3d4   : > { %v7411_v30 = vpop.eup %7410  ;;  %v5884_v5 = vpack.c.bf16 %v5109_v52, %v5108_v12  ;;  %v4704_v55 = vadd.f32 1.0, %v7409_v7  ;;  %v5727_v56 = vmul.f32 -1.442695, %v9641_v40  ;;  %v4497_v29 = vadd.f32 %v9601_v45, %v4449_v27  ;;  %v4033_v20 = vpop.f32.mrf.mxu1 }
 0x3d5   : > { %v4398_v8 = vpop.f32.mrf.mxu0  ;;  %v4823_v26 = vmul.f32 %v7411_v30, %v9573_v35  ;;  %v4079_v34 = vadd.f32 %v4033_v20, %v9350_v0  ;;  %v5030_v12 = vpop.permute.xlu0 %5029 }
 0x3d6   : > { %5928 = vst [vmem:[%s9438_s11 + $0x68] sm:$0xff] %v5884_v5   ;;  %7424 = vrcp.f32 %v4704_v55  ;;  %v4450_v32 = vadd.f32 %v4398_v8, %v4077_v44  ;;  %v9649_v49 = vadd.f32 %v9608_v41, %v4497_v29  ;;  %v6994_v3 = vpop.f32.mrf.mxu1  ;;  %v5035_v52 = vpop.permute.xlu1 %5034 }
 0x3d7   : > { %v7413_v54 = vpop.eup %7412  ;;  %7426 = vpow2.f32 %v5727_v56  ;;  %v7090_v14 = vpop.f32.mrf.mxu0  ;;  %v5110_v1 = vmul.f32 %v5020_v9, %v4823_v26 }
 0x3d8   : > { %v7415_v48 = vpop.eup %7414  ;;  %v4824_v57 = vmul.f32 %v7413_v54, %v9580_v16  ;;  %v4498_v2 = vadd.f32 %v9601_v45, %v4450_v32  ;;  %v5728_v35 = vmul.f32 -1.442695, %v9649_v49  ;;  %v4036_v22 = vpop.f32.mrf.mxu1 }
 0x3d9   : > { %v4705_v38 = vadd.f32 1.0, %v7415_v48  ;;  %v4401_v28 = vpop.f32.mrf.mxu0  ;;  %v5040_v29 = vpop.permute.xlu0 %5039 }
 0x3da   : > { %v5111_v31 = vmul.f32 %v5025_v42, %v4824_v57  ;;  %v9656_v61 = vadd.f32 %v9608_v41, %v4498_v2  ;;  %v4451_v60 = vadd.f32 %v4401_v28, %v4078_v25  ;;  %v6995_v10 = vpop.f32.mrf.mxu1  ;;  %v5045_v20 = vpop.permute.xlu1 %5044 }
 0x3db   : > { %7428 = vrcp.f32 %v4705_v38  ;;  %v7091_v16 = vpop.f32.mrf.mxu0 }
 0x3dc   : > { %v7417_v63 = vpop.eup %7416  ;;  %v5889_v13 = vpack.c.bf16 %v5111_v31, %v5110_v1  ;;  %7430 = vpow2.f32 %v5728_v35  ;;  %v5729_v50 = vmul.f32 -1.442695, %v9656_v61  ;;  %v4499_v62 = vadd.f32 %v9601_v45, %v4451_v60 }
 0x3dd   : > { %v7419_v33 = vpop.eup %7418  ;;  %v4406_v15 = vpop.f32.mrf.mxu0  ;;  %v4825_v0 = vmul.f32 %v7417_v63, %v9588_v18 }
 0x3de   : > { %5929 = vst [vmem:[%s9438_s11 + $0x70] sm:$0xff] %v5889_v13   ;;  %v4706_v47 = vadd.f32 1.0, %v7419_v33  ;;  %7432 = vpow2.f32 %v5729_v50  ;;  %v9663_v21 = vadd.f32 %v9608_v41, %v4499_v62  ;;  %v4452_v17 = vadd.f32 %v4406_v15, %v4079_v34  ;;  %v5055_v25 = vpop.permute.xlu1 %5054 }
 0x3df   : > { %v7421_v37 = vpop.eup %7420  ;;  %v7094_v59 = vpop.f32.mrf.mxu0  ;;  %v5112_v18 = vmul.f32 %v5030_v12, %v4825_v0 }
 0x3e0   : > { %v7423_v58 = vpop.eup %7422  ;;  %7434 = vrcp.f32 %v4706_v47  ;;  %v4707_v19 = vadd.f32 1.0, %v7421_v37  ;;  %v5730_v51 = vmul.f32 -1.442695, %v9663_v21  ;;  %v4500_v11 = vadd.f32 %v9601_v45, %v4452_v17 }
 0x3e1   : > { %v4826_v24 = vmul.f32 %v7423_v58, %v9595_v46  ;;  %v4409_v36 = vpop.f32.mrf.mxu0 }
 0x3e2   : > { %7436 = vrcp.f32 %v4707_v19  ;;  %v9670_v7 = vadd.f32 %v9608_v41, %v4500_v11 }
 0x3e3   : > { %v7425_v27 = vpop.eup %7424  ;;  %v5113_v4 = vmul.f32 %v5035_v52, %v4826_v24  ;;  %7438 = vpow2.f32 %v5730_v51  ;;  %v7095_v23 = vpop.f32.mrf.mxu0 }
 0x3e4   : > { %v7427_v30 = vpop.eup %7426  ;;  %v5731_v5 = vmul.f32 -1.442695, %v9670_v7  ;;  %v4827_v46 = vmul.f32 %v7425_v27, %v9611_v39 }
 0x3e5   : > { %v5894_v55 = vpack.c.bf16 %v5113_v4, %v5112_v18  ;;  %v4708_v45 = vadd.f32 1.0, %v7427_v30 }
 0x3e6   : > { %7440 = vpow2.f32 %v5731_v5  ;;  %v5114_v32 = vmul.f32 %v5040_v29, %v4827_v46 }
 0x3e7   : > { %5930 = vst [vmem:[%s9438_s11 + $0x78] sm:$0xff] %v5894_v55   ;;  %7442 = vrcp.f32 %v4708_v45 }
 0x3e8   : > { %v7429_v44 = vpop.eup %7428 }
 0x3e9   : > { %v7431_v56 = vpop.eup %7430  ;;  %v4828_v41 = vmul.f32 %v7429_v44, %v9618_v6  ;;  %v5050_v6 = vpop.permute.xlu0 %5049 }
 0x3ea   : > { %v4709_v8 = vadd.f32 1.0, %v7431_v56 }
 0x3eb   : > { %v7433_v26 = vpop.eup %7432  ;;  %v5115_v54 = vmul.f32 %v5045_v20, %v4828_v41 }
 0x3ec   : > { %7444 = vrcp.f32 %v4709_v8  ;;  %v4710_v14 = vadd.f32 1.0, %v7433_v26 }
 0x3ed   : > { %v7435_v3 = vpop.eup %7434  ;;  %v5899_v48 = vpack.c.bf16 %v5115_v54, %v5114_v32  ;;  %v5060_v34 = vpop.permute.xlu0 %5059 }
 0x3ee   : > { %v4829_v9 = vmul.f32 %v7435_v3, %v9626_v43  ;;  %7446 = vrcp.f32 %v4710_v14 }
 0x3ef   : > { %v7437_v39 = vpop.eup %7436  ;;  %5931 = vst [vmem:[%s9438_s11 + $0x80] sm:$0xff] %v5899_v48  }
 0x3f0   : > { %v7439_v42 = vpop.eup %7438  ;;  %v4830_v57 = vmul.f32 %v7437_v39, %v9633_v53  ;;  %v5116_v38 = vmul.f32 %v5050_v6, %v4829_v9  ;;  %v5065_v53 = vpop.permute.xlu1 %5064 }
 0x3f1   : > { %v4711_v2 = vadd.f32 1.0, %v7439_v42  ;;  %v5070_v62 = vpop.permute.xlu0 %5069 }
 0x3f2   : > { %v5117_v35 = vmul.f32 %v5055_v25, %v4830_v57 }
 0x3f3   : > { %v7441_v28 = vpop.eup %7440  ;;  %7448 = vrcp.f32 %v4711_v2 }
 0x3f4   : > { %v5904_v22 = vpack.c.bf16 %v5117_v35, %v5116_v38  ;;  %v4712_v1 = vadd.f32 1.0, %v7441_v28  ;;  %v7443_v31 = vpop.eup %7442  ;;  %v5075_v17 = vpop.permute.xlu1 %5074 }
 0x3f5   : > { %v4831_v43 = vmul.f32 %v7443_v31, %v9641_v40  ;;  %v5080_v59 = vpop.permute.xlu0 %5079 }
 0x3f6   : > { %5932 = vst [vmem:[%s9438_s11 + $0x88] sm:$0xff] %v5904_v22   ;;  %7450 = vrcp.f32 %v4712_v1 }
 0x3f7   : > { %v5118_v63 = vmul.f32 %v5060_v34, %v4831_v43 }
 0x3f9   : > { %v7445_v60 = vpop.eup %7444 }
 0x3fa   : > { %v4832_v16 = vmul.f32 %v7445_v60, %v9649_v49 }
 0x3fb   : > { %v7447_v10 = vpop.eup %7446 }
 0x3fc   : > { %v5119_v13 = vmul.f32 %v5065_v53, %v4832_v16  ;;  %v4833_v33 = vmul.f32 %v7447_v10, %v9656_v61 }
 0x3fe   : > { %v5909_v50 = vpack.c.bf16 %v5119_v13, %v5118_v63  ;;  %v5120_v37 = vmul.f32 %v5070_v62, %v4833_v33 }
 0x400   : > { %v7449_v15 = vpop.eup %7448  ;;  %5933 = vst [vmem:[%s9438_s11 + $0x90] sm:$0xff] %v5909_v50  }
 0x401   : > { %v4834_v47 = vmul.f32 %v7449_v15, %v9663_v21 }
 0x403   : > { %v7451_v40 = vpop.eup %7450  ;;  %v5121_v0 = vmul.f32 %v5075_v17, %v4834_v47 }
 0x404   : > { %v4835_v49 = vmul.f32 %v7451_v40, %v9670_v7 }
 0x405   : > { %v5914_v58 = vpack.c.bf16 %v5121_v0, %v5120_v37 }
 0x406   : > { %v5122_v19 = vmul.f32 %v5080_v59, %v4835_v49 }
 0x407   : > { %5934 = vst [vmem:[%s9438_s11 + $0x98] sm:$0xff] %v5914_v58  }
 0x408   : > { %v5815_v51 = vpack.c.bf16 %v5122_v19, %v5122_v19 }
 0x40a   : > { %5328 = vst [vmem:[%s9438_s11 + $0xa0] sm:$0x3] %v5815_v51 }
 0x40b PF: > { %s15_s18 = sadd.s32 1, %s7487_s18  }
 0x40c   : > { %p12_p4 = scmp.ge.s32.totalorder %s15_s18, 4  }
 0x40e   :  { %14 = sbr.rel (!%p12_p4) target bundleno = 1 (0x1), region = 81 }

</bundles_post_ra>
